<compile_context>
chip_gen: v7x
topology: tpu7x:2x2x1
jax: 0.10.0
libtpu: 0.0.40
codegen_flags: <defaults>
</compile_context>

<pallas_src>
import math
from functools import partial

import jax
import jax.numpy as jnp
from jax import lax
from jax.experimental import pallas as pl
from jax.experimental.pallas import tpu as pltpu

_BN_EPS = 1e-5


def _round_up(x, m):
    return ((x + m - 1) // m) * m


def _next_pow2(x):
    return 1 << (x - 1).bit_length()


# --------------------------- Pallas kernel ----------------------------------

def _basic_block_kernel(a_ref, w1_ref, w2_ref, o_ref,
                        a16_ref, lhs_ref, mid_ref,
                        *, wp, pg8, base, h, w, log2_wp):
    """One PAIR of lane-packed images per grid step.

    a_ref   : (MA, 2C)       f32  spatially padded pair, flattened rows + zero tail
    w1_ref  : (9*2C, 2C)     bf16 conv1 weights, tap-major, block-diagonal, BN folded
    w2_ref  : (9*2C, 2C)     bf16 conv2 weights, same layout
    o_ref   : (pg8, 2C)      f32  block output on the padded grid (wrapper crops)
    a16_ref : (MA, 2C)       bf16 scratch: one-shot bf16 cast of a_ref
    lhs_ref : (pg8, 9*2C)    bf16 scratch: im2col operand (reused by both convs)
    mid_ref : (mid_rows, 2C) bf16 scratch: conv1 output staged as conv2's padded grid
    """
    c2 = o_ref.shape[-1]
    mid_rows = mid_ref.shape[0]
    offsets = [dy * wp + dx for dy in range(3) for dx in range(3)]

    # Zero only the halo ring of the conv2 staging buffer; the [base, base+pg8)
    # band is fully overwritten below.  (Re-zeroed each step -> safe under
    # megacore "parallel" sharding where program_id 0 may not run on a core.)
    tail = mid_rows - (base + pg8)
    mid_ref[pl.ds(0, base), :] = jnp.zeros((base, c2), jnp.bfloat16)
    mid_ref[pl.ds(base + pg8, tail), :] = jnp.zeros((tail, c2), jnp.bfloat16)

    # Single bf16 cast of the activation (zero tail rows carry over).
    a16_ref[...] = a_ref[...].astype(jnp.bfloat16)

    # Valid-output mask built in-kernel: row r -> (y, x) = (r >> log2_wp, r & (wp-1)).
    r = lax.broadcasted_iota(jnp.int32, (pg8, 1), 0)
    yy = jnp.right_shift(r, log2_wp)
    xx = jnp.bitwise_and(r, wp - 1)
    maskf = jnp.where((yy < h) & (xx < w), jnp.float32(1.0), jnp.float32(0.0))

    # ---- conv1 (+BN scale folded): in-VMEM im2col, ONE K=9*2C matmul.
    for t, off in enumerate(offsets):
        lhs_ref[:, t * c2:(t + 1) * c2] = a16_ref[pl.ds(off, pg8), :]
    out1 = jnp.dot(lhs_ref[...], w1_ref[...], preferred_element_type=jnp.float32)
    # ReLU, zero the conv-padding ring, stage conv2's padded input in bf16.
    mid_ref[pl.ds(base, pg8), :] = (jnp.maximum(out1, 0.0) * maskf).astype(jnp.bfloat16)

    # ---- conv2 (+BN scale folded): same im2col against the staged grid,
    # shifted by (wp + 1) rows.
    rebase = base - (wp + 1)
    for t, off in enumerate(offsets):
        lhs_ref[:, t * c2:(t + 1) * c2] = mid_ref[pl.ds(rebase + off, pg8), :]
    out2 = jnp.dot(lhs_ref[...], w2_ref[...], preferred_element_type=jnp.float32)

    # ---- identity shortcut (exact f32) + final ReLU.  Original x at output
    # position q lives at padded row q + (wp + 1).  Invalid rows are cropped
    # by the wrapper, so no output mask is needed.
    o_ref[...] = jnp.maximum(out2 + a_ref[pl.ds(wp + 1, pg8), :], 0.0)


# --------------------------- wrapper ------------------------------------------

def basic_block_forward(x_nchw, w1_hwio, w2_hwio):
    """BasicBlock forward (stride=1, downsample=None), eval-mode BatchNorm."""
    n, c, h, w = x_nchw.shape
    kh, kw, cin, cout = w1_hwio.shape
    assert (kh, kw) == (3, 3) and cin == c and cout == c, \
        "identity shortcut requires Cin == Cout and 3x3 kernels"

    n2 = _round_up(n, 2)                 # pack two images per grid step on lanes
    g = n2 // 2
    c2 = 2 * c                           # 128 lanes for C=64 -> lane-dense
    hp = h + 2
    wp = max(8, _next_pow2(w + 2))       # power-of-two padded row width (>= w+2)
    log2_wp = wp.bit_length() - 1
    pg = hp * wp                         # padded-grid rows per pair
    pg8 = _round_up(pg, 16)
    max_off = 2 * wp + 2                 # largest tap offset (dy=dx=2)
    ma = _round_up(pg8 + max_off, 16)    # activation rows (zero tail)
    base = _round_up(wp + 1, 16)         # aligned store base inside mid scratch
    mid_rows = _round_up(base + pg8 + wp + 1, 16)

    # Activation: NHWC, pairs packed on channels, spatially padded, flattened.
    x32 = x_nchw.astype(jnp.float32)
    if n2 != n:
        x32 = jnp.pad(x32, ((0, n2 - n), (0, 0), (0, 0), (0, 0)))
    x_nhwc = jnp.transpose(x32, (0, 2, 3, 1))                          # (n2,h,w,c)
    x_pair = x_nhwc.reshape(g, 2, h, w, c).transpose(0, 2, 3, 1, 4)    # (g,h,w,2,c)
    x_pair = x_pair.reshape(g, h, w, c2)
    xp = jnp.pad(x_pair, ((0, 0), (1, hp - h - 1), (1, wp - w - 1), (0, 0)))
    a = xp.reshape(g, pg, c2)
    a = jnp.pad(a, ((0, 0), (0, ma - pg), (0, 0)))                     # (g, ma, 2c)

    # Fold eval-mode BN scale (gamma=1, beta=0, mean=0, var=1) into the weights,
    # and build tap-major block-diagonal bf16 weights for the 2-image lane packing.
    bn_scale = 1.0 / math.sqrt(1.0 + _BN_EPS)

    def block_diag_weights(w_hwio):
        wt = (w_hwio.astype(jnp.float32) * bn_scale).reshape(9, c, c)
        z = jnp.zeros((9, c, c), jnp.float32)
        top = jnp.concatenate([wt, z], axis=2)        # image-0 in-ch -> out [0:c]
        bot = jnp.concatenate([z, wt], axis=2)        # image-1 in-ch -> out [c:2c]
        return jnp.concatenate([top, bot], axis=1).reshape(9 * c2, c2).astype(jnp.bfloat16)

    w1 = block_diag_weights(w1_hwio)
    w2 = block_diag_weights(w2_hwio)

    kernel = partial(_basic_block_kernel, wp=wp, pg8=pg8, base=base,
                     h=h, w=w, log2_wp=log2_wp)

    out = pl.pallas_call(
        kernel,
        out_shape=jax.ShapeDtypeStruct((g, pg8, c2), jnp.float32),
        grid=(g,),
        in_specs=[
            pl.BlockSpec((None, ma, c2), lambda i: (i, 0, 0)),     # activation pair
            pl.BlockSpec((9 * c2, c2), lambda i: (0, 0)),          # conv1 weights
            pl.BlockSpec((9 * c2, c2), lambda i: (0, 0)),          # conv2 weights
        ],
        out_specs=pl.BlockSpec((None, pg8, c2), lambda i: (i, 0, 0)),
        scratch_shapes=[
            pltpu.VMEM((ma, c2), jnp.bfloat16),          # one-shot bf16 activation
            pltpu.VMEM((pg8, 9 * c2), jnp.bfloat16),     # im2col lhs (both convs)
            pltpu.VMEM((mid_rows, c2), jnp.bfloat16),    # conv2 padded input grid
        ],
        compiler_params=pltpu.CompilerParams(
            dimension_semantics=("parallel",)),          # pairs across v7x's 2 TCs
    )(a, w1, w2)

    out = out[:, :pg, :].reshape(g, hp, wp, 2, c)[:, :h, :w, :, :]
    out = out.transpose(0, 3, 1, 2, 4).reshape(n2, h, w, c)[:n]
    return jnp.transpose(out, (0, 3, 1, 2))              # back to NCHW


# --------------------------- pure-JAX reference -------------------------------

def basic_block_reference(x, w1_hwio, w2_hwio):
    s = 1.0 / math.sqrt(1.0 + _BN_EPS)
    dn = ("NCHW", "HWIO", "NCHW")
    y = lax.conv_general_dilated(x, w1_hwio, (1, 1), ((1, 1), (1, 1)),
                                 dimension_numbers=dn,
                                 precision=lax.Precision.HIGHEST) * s
    y = jnp.maximum(y, 0.0)
    y = lax.conv_general_dilated(y, w2_hwio, (1, 1), ((1, 1), (1, 1)),
                                 dimension_numbers=dn,
                                 precision=lax.Precision.HIGHEST) * s
    return jnp.maximum(y + x, 0.0)


# --------------------------- main ---------------------------------------------

if __name__ == "__main__":
    key = jax.random.PRNGKey(0)
    kx, k1, k2 = jax.random.split(key, 3)
    n, c, h, w = 4, 64, 16, 16                      # BasicBlock(64, 64), stride=1
    x = jax.random.normal(kx, (n, c, h, w), jnp.float32)
    std = math.sqrt(2.0 / (c * 9))                  # kaiming_normal_, fan_out, relu
    w1 = std * jax.random.normal(k1, (3, 3, c, c), jnp.float32)   # HWIO layout
    w2 = std * jax.random.normal(k2, (3, 3, c, c), jnp.float32)

    fwd = jax.jit(basic_block_forward)
    y = fwd(x, w1, w2)
    jax.block_until_ready(y)

    y_ref = basic_block_reference(x, w1, w2)
    assert y.shape == (n, c, h, w), y.shape
    assert bool(jnp.all(jnp.isfinite(y)))
    max_err = float(jnp.max(jnp.abs(y - y_ref)))
    assert max_err < 1e-1, f"max abs err vs reference: {max_err}"
    print("KERNEL_OK")
</pallas_src>

<mosaic_0001>
module attributes {stable_mosaic.version = 11 : i64} {
  func.func @_basic_block_kernel(%arg0: i32, %arg1: memref<1x656x128xf32, #tpu.memory_space<vmem>>, %arg2: memref<1152x128xbf16, #tpu.memory_space<vmem>>, %arg3: memref<1152x128xbf16, #tpu.memory_space<vmem>>, %arg4: memref<1x576x128xf32, #tpu.memory_space<vmem>>, %arg5: memref<656x128xbf16, #tpu.memory_space<vmem>>, %arg6: memref<576x1152xbf16, #tpu.memory_space<vmem>>, %arg7: memref<672x128xbf16, #tpu.memory_space<vmem>>) attributes {dimension_semantics = [#tpu.dimension_semantics<parallel>], iteration_bounds = array<i64: 2>, scalar_prefetch = 0 : i64, scratch_operands = 3 : i64, tpu.core_type = #tpu.core_type<tc>, window_params = [{transform_indices = @transform_0, window_bounds = array<i64: 1, 656, 128>}, {pipeline_mode = #tpu.pipeline_mode<synchronous>, transform_indices = @transform_1, window_bounds = array<i64: 1152, 128>}, {pipeline_mode = #tpu.pipeline_mode<synchronous>, transform_indices = @transform_2, window_bounds = array<i64: 1152, 128>}, {transform_indices = @transform_3, window_bounds = array<i64: 1, 576, 128>}]} {
    %cst = arith.constant 0.000000e+00 : bf16
    %0 = vector.broadcast %cst : bf16 to vector<48x128xbf16>
    %c0 = arith.constant 0 : index
    %c0_0 = arith.constant 0 : index
    %1 = vector.load %arg7[%c0, %c0_0] : memref<672x128xbf16, #tpu.memory_space<vmem>>, vector<48x128xbf16>
    tpu.vector_store %arg7[%c0, %c0_0], %0 {strides = array<i32>} : memref<672x128xbf16, #tpu.memory_space<vmem>>, vector<48x128xbf16>,
    %cst_1 = arith.constant 0.000000e+00 : bf16
    %2 = vector.broadcast %cst_1 : bf16 to vector<48x128xbf16>
    %c624 = arith.constant 624 : index
    %c0_2 = arith.constant 0 : index
    %3 = vector.load %arg7[%c624, %c0_2] : memref<672x128xbf16, #tpu.memory_space<vmem>>, vector<48x128xbf16>
    tpu.vector_store %arg7[%c624, %c0_2], %2 {strides = array<i32>} : memref<672x128xbf16, #tpu.memory_space<vmem>>, vector<48x128xbf16>,
    %c0_3 = arith.constant 0 : index
    %c0_4 = arith.constant 0 : index
    %c0_5 = arith.constant 0 : index
    %4 = vector.load %arg1[%c0_3, %c0_4, %c0_5] : memref<1x656x128xf32, #tpu.memory_space<vmem>>, vector<1x656x128xf32>
    %5 = vector.shape_cast %4 : vector<1x656x128xf32> to vector<656x128xf32>
    %6 = arith.truncf %5 : vector<656x128xf32> to vector<656x128xbf16>
    %c0_6 = arith.constant 0 : index
    %c0_7 = arith.constant 0 : index
    %7 = vector.load %arg5[%c0_6, %c0_7] : memref<656x128xbf16, #tpu.memory_space<vmem>>, vector<656x128xbf16>
    tpu.vector_store %arg5[%c0_6, %c0_7], %6 {strides = array<i32>} : memref<656x128xbf16, #tpu.memory_space<vmem>>, vector<656x128xbf16>,
    %8 = tpu.iota {dimensions = array<i32: 0>} : vector<576x1xi32>
    %c5_i32 = arith.constant 5 : i32
    %9 = vector.broadcast %c5_i32 : i32 to vector<576x1xi32>
    %10 = arith.shrsi %8, %9 : vector<576x1xi32>
    %c31_i32 = arith.constant 31 : i32
    %11 = vector.broadcast %c31_i32 : i32 to vector<576x1xi32>
    %12 = arith.andi %8, %11 : vector<576x1xi32>
    %c16_i32 = arith.constant 16 : i32
    %13 = vector.broadcast %c16_i32 : i32 to vector<576x1xi32>
    %14 = arith.cmpi slt, %10, %13 : vector<576x1xi32>
    %c16_i32_8 = arith.constant 16 : i32
    %15 = vector.broadcast %c16_i32_8 : i32 to vector<576x1xi32>
    %16 = arith.cmpi slt, %12, %15 : vector<576x1xi32>
    %17 = arith.andi %14, %16 : vector<576x1xi1>
    %cst_9 = arith.constant 1.000000e+00 : f32
    %cst_10 = arith.constant 0.000000e+00 : f32
    %18 = vector.broadcast %cst_9 : f32 to vector<576x1xf32>
    %19 = vector.broadcast %cst_10 : f32 to vector<576x1xf32>
    %20 = arith.select %17, %18, %19 : vector<576x1xi1>, vector<576x1xf32>
    %c0_11 = arith.constant 0 : index
    %c0_12 = arith.constant 0 : index
    %21 = vector.load %arg5[%c0_11, %c0_12] : memref<656x128xbf16, #tpu.memory_space<vmem>>, vector<576x128xbf16>
    %c0_13 = arith.constant 0 : index
    %c0_14 = arith.constant 0 : index
    %22 = vector.load %arg6[%c0_13, %c0_14] : memref<576x1152xbf16, #tpu.memory_space<vmem>>, vector<576x128xbf16>
    tpu.vector_store %arg6[%c0_13, %c0_14], %21 {strides = array<i32>} : memref<576x1152xbf16, #tpu.memory_space<vmem>>, vector<576x128xbf16>,
    %c1 = arith.constant 1 : index
    %c0_15 = arith.constant 0 : index
    %23 = vector.load %arg5[%c1, %c0_15] : memref<656x128xbf16, #tpu.memory_space<vmem>>, vector<576x128xbf16>
    %c0_16 = arith.constant 0 : index
    %c128 = arith.constant 128 : index
    %24 = vector.load %arg6[%c0_16, %c128] : memref<576x1152xbf16, #tpu.memory_space<vmem>>, vector<576x128xbf16>
    tpu.vector_store %arg6[%c0_16, %c128], %23 {strides = array<i32>} : memref<576x1152xbf16, #tpu.memory_space<vmem>>, vector<576x128xbf16>,
    %c2 = arith.constant 2 : index
    %c0_17 = arith.constant 0 : index
    %25 = vector.load %arg5[%c2, %c0_17] : memref<656x128xbf16, #tpu.memory_space<vmem>>, vector<576x128xbf16>
    %c0_18 = arith.constant 0 : index
    %c256 = arith.constant 256 : index
    %26 = vector.load %arg6[%c0_18, %c256] : memref<576x1152xbf16, #tpu.memory_space<vmem>>, vector<576x128xbf16>
    tpu.vector_store %arg6[%c0_18, %c256], %25 {strides = array<i32>} : memref<576x1152xbf16, #tpu.memory_space<vmem>>, vector<576x128xbf16>,
    %c32 = arith.constant 32 : index
    %c0_19 = arith.constant 0 : index
    %27 = vector.load %arg5[%c32, %c0_19] : memref<656x128xbf16, #tpu.memory_space<vmem>>, vector<576x128xbf16>
    %c0_20 = arith.constant 0 : index
    %c384 = arith.constant 384 : index
    %28 = vector.load %arg6[%c0_20, %c384] : memref<576x1152xbf16, #tpu.memory_space<vmem>>, vector<576x128xbf16>
    tpu.vector_store %arg6[%c0_20, %c384], %27 {strides = array<i32>} : memref<576x1152xbf16, #tpu.memory_space<vmem>>, vector<576x128xbf16>,
    %c33 = arith.constant 33 : index
    %c0_21 = arith.constant 0 : index
    %29 = vector.load %arg5[%c33, %c0_21] : memref<656x128xbf16, #tpu.memory_space<vmem>>, vector<576x128xbf16>
    %c0_22 = arith.constant 0 : index
    %c512 = arith.constant 512 : index
    %30 = vector.load %arg6[%c0_22, %c512] : memref<576x1152xbf16, #tpu.memory_space<vmem>>, vector<576x128xbf16>
    tpu.vector_store %arg6[%c0_22, %c512], %29 {strides = array<i32>} : memref<576x1152xbf16, #tpu.memory_space<vmem>>, vector<576x128xbf16>,
    %c34 = arith.constant 34 : index
    %c0_23 = arith.constant 0 : index
    %31 = vector.load %arg5[%c34, %c0_23] : memref<656x128xbf16, #tpu.memory_space<vmem>>, vector<576x128xbf16>
    %c0_24 = arith.constant 0 : index
    %c640 = arith.constant 640 : index
    %32 = vector.load %arg6[%c0_24, %c640] : memref<576x1152xbf16, #tpu.memory_space<vmem>>, vector<576x128xbf16>
    tpu.vector_store %arg6[%c0_24, %c640], %31 {strides = array<i32>} : memref<576x1152xbf16, #tpu.memory_space<vmem>>, vector<576x128xbf16>,
    %c64 = arith.constant 64 : index
    %c0_25 = arith.constant 0 : index
    %33 = vector.load %arg5[%c64, %c0_25] : memref<656x128xbf16, #tpu.memory_space<vmem>>, vector<576x128xbf16>
    %c0_26 = arith.constant 0 : index
    %c768 = arith.constant 768 : index
    %34 = vector.load %arg6[%c0_26, %c768] : memref<576x1152xbf16, #tpu.memory_space<vmem>>, vector<576x128xbf16>
    tpu.vector_store %arg6[%c0_26, %c768], %33 {strides = array<i32>} : memref<576x1152xbf16, #tpu.memory_space<vmem>>, vector<576x128xbf16>,
    %c65 = arith.constant 65 : index
    %c0_27 = arith.constant 0 : index
    %35 = vector.load %arg5[%c65, %c0_27] : memref<656x128xbf16, #tpu.memory_space<vmem>>, vector<576x128xbf16>
    %c0_28 = arith.constant 0 : index
    %c896 = arith.constant 896 : index
    %36 = vector.load %arg6[%c0_28, %c896] : memref<576x1152xbf16, #tpu.memory_space<vmem>>, vector<576x128xbf16>
    tpu.vector_store %arg6[%c0_28, %c896], %35 {strides = array<i32>} : memref<576x1152xbf16, #tpu.memory_space<vmem>>, vector<576x128xbf16>,
    %c66 = arith.constant 66 : index
    %c0_29 = arith.constant 0 : index
    %37 = vector.load %arg5[%c66, %c0_29] : memref<656x128xbf16, #tpu.memory_space<vmem>>, vector<576x128xbf16>
    %c0_30 = arith.constant 0 : index
    %c1024 = arith.constant 1024 : index
    %38 = vector.load %arg6[%c0_30, %c1024] : memref<576x1152xbf16, #tpu.memory_space<vmem>>, vector<576x128xbf16>
    tpu.vector_store %arg6[%c0_30, %c1024], %37 {strides = array<i32>} : memref<576x1152xbf16, #tpu.memory_space<vmem>>, vector<576x128xbf16>,
    %c0_31 = arith.constant 0 : index
    %c0_32 = arith.constant 0 : index
    %39 = vector.load %arg6[%c0_31, %c0_32] : memref<576x1152xbf16, #tpu.memory_space<vmem>>, vector<576x1152xbf16>
    %c0_33 = arith.constant 0 : index
    %c0_34 = arith.constant 0 : index
    %40 = vector.load %arg2[%c0_33, %c0_34] : memref<1152x128xbf16, #tpu.memory_space<vmem>>, vector<1152x128xbf16>
    %cst_35 = arith.constant dense<0.000000e+00> : vector<576x128xf32>
    %41 = tpu.matmul %39, %40, %cst_35 {dimension_numbers = #tpu.dot_dimension_numbers<[1], [0], [0], [1], [0, 0, 1, 1], [], []>} : vector<576x1152xbf16>, vector<1152x128xbf16>, vector<576x128xf32> -> vector<576x128xf32>
    %cst_36 = arith.constant 0.000000e+00 : f32
    %42 = vector.broadcast %cst_36 : f32 to vector<576x128xf32>
    %43 = arith.maximumf %41, %42 : vector<576x128xf32>
    %44 = vector.broadcast %20 : vector<576x1xf32> to vector<576x128xf32>
    %45 = arith.mulf %43, %44 : vector<576x128xf32>
    %46 = arith.truncf %45 : vector<576x128xf32> to vector<576x128xbf16>
    %c48 = arith.constant 48 : index
    %c0_37 = arith.constant 0 : index
    %47 = vector.load %arg7[%c48, %c0_37] : memref<672x128xbf16, #tpu.memory_space<vmem>>, vector<576x128xbf16>
    tpu.vector_store %arg7[%c48, %c0_37], %46 {strides = array<i32>} : memref<672x128xbf16, #tpu.memory_space<vmem>>, vector<576x128xbf16>,
    %c15 = arith.constant 15 : index
    %c0_38 = arith.constant 0 : index
    %48 = vector.load %arg7[%c15, %c0_38] : memref<672x128xbf16, #tpu.memory_space<vmem>>, vector<576x128xbf16>
    %c0_39 = arith.constant 0 : index
    %c0_40 = arith.constant 0 : index
    %49 = vector.load %arg6[%c0_39, %c0_40] : memref<576x1152xbf16, #tpu.memory_space<vmem>>, vector<576x128xbf16>
    tpu.vector_store %arg6[%c0_39, %c0_40], %48 {strides = array<i32>} : memref<576x1152xbf16, #tpu.memory_space<vmem>>, vector<576x128xbf16>,
    %c16 = arith.constant 16 : index
    %c0_41 = arith.constant 0 : index
    %50 = vector.load %arg7[%c16, %c0_41] : memref<672x128xbf16, #tpu.memory_space<vmem>>, vector<576x128xbf16>
    %c0_42 = arith.constant 0 : index
    %c128_43 = arith.constant 128 : index
    %51 = vector.load %arg6[%c0_42, %c128_43] : memref<576x1152xbf16, #tpu.memory_space<vmem>>, vector<576x128xbf16>
    tpu.vector_store %arg6[%c0_42, %c128_43], %50 {strides = array<i32>} : memref<576x1152xbf16, #tpu.memory_space<vmem>>, vector<576x128xbf16>,
    %c17 = arith.constant 17 : index
    %c0_44 = arith.constant 0 : index
    %52 = vector.load %arg7[%c17, %c0_44] : memref<672x128xbf16, #tpu.memory_space<vmem>>, vector<576x128xbf16>
    %c0_45 = arith.constant 0 : index
    %c256_46 = arith.constant 256 : index
    %53 = vector.load %arg6[%c0_45, %c256_46] : memref<576x1152xbf16, #tpu.memory_space<vmem>>, vector<576x128xbf16>
    tpu.vector_store %arg6[%c0_45, %c256_46], %52 {strides = array<i32>} : memref<576x1152xbf16, #tpu.memory_space<vmem>>, vector<576x128xbf16>,
    %c47 = arith.constant 47 : index
    %c0_47 = arith.constant 0 : index
    %54 = vector.load %arg7[%c47, %c0_47] : memref<672x128xbf16, #tpu.memory_space<vmem>>, vector<576x128xbf16>
    %c0_48 = arith.constant 0 : index
    %c384_49 = arith.constant 384 : index
    %55 = vector.load %arg6[%c0_48, %c384_49] : memref<576x1152xbf16, #tpu.memory_space<vmem>>, vector<576x128xbf16>
    tpu.vector_store %arg6[%c0_48, %c384_49], %54 {strides = array<i32>} : memref<576x1152xbf16, #tpu.memory_space<vmem>>, vector<576x128xbf16>,
    %c48_50 = arith.constant 48 : index
    %c0_51 = arith.constant 0 : index
    %56 = vector.load %arg7[%c48_50, %c0_51] : memref<672x128xbf16, #tpu.memory_space<vmem>>, vector<576x128xbf16>
    %c0_52 = arith.constant 0 : index
    %c512_53 = arith.constant 512 : index
    %57 = vector.load %arg6[%c0_52, %c512_53] : memref<576x1152xbf16, #tpu.memory_space<vmem>>, vector<576x128xbf16>
    tpu.vector_store %arg6[%c0_52, %c512_53], %56 {strides = array<i32>} : memref<576x1152xbf16, #tpu.memory_space<vmem>>, vector<576x128xbf16>,
    %c49 = arith.constant 49 : index
    %c0_54 = arith.constant 0 : index
    %58 = vector.load %arg7[%c49, %c0_54] : memref<672x128xbf16, #tpu.memory_space<vmem>>, vector<576x128xbf16>
    %c0_55 = arith.constant 0 : index
    %c640_56 = arith.constant 640 : index
    %59 = vector.load %arg6[%c0_55, %c640_56] : memref<576x1152xbf16, #tpu.memory_space<vmem>>, vector<576x128xbf16>
    tpu.vector_store %arg6[%c0_55, %c640_56], %58 {strides = array<i32>} : memref<576x1152xbf16, #tpu.memory_space<vmem>>, vector<576x128xbf16>,
    %c79 = arith.constant 79 : index
    %c0_57 = arith.constant 0 : index
    %60 = vector.load %arg7[%c79, %c0_57] : memref<672x128xbf16, #tpu.memory_space<vmem>>, vector<576x128xbf16>
    %c0_58 = arith.constant 0 : index
    %c768_59 = arith.constant 768 : index
    %61 = vector.load %arg6[%c0_58, %c768_59] : memref<576x1152xbf16, #tpu.memory_space<vmem>>, vector<576x128xbf16>
    tpu.vector_store %arg6[%c0_58, %c768_59], %60 {strides = array<i32>} : memref<576x1152xbf16, #tpu.memory_space<vmem>>, vector<576x128xbf16>,
    %c80 = arith.constant 80 : index
    %c0_60 = arith.constant 0 : index
    %62 = vector.load %arg7[%c80, %c0_60] : memref<672x128xbf16, #tpu.memory_space<vmem>>, vector<576x128xbf16>
    %c0_61 = arith.constant 0 : index
    %c896_62 = arith.constant 896 : index
    %63 = vector.load %arg6[%c0_61, %c896_62] : memref<576x1152xbf16, #tpu.memory_space<vmem>>, vector<576x128xbf16>
    tpu.vector_store %arg6[%c0_61, %c896_62], %62 {strides = array<i32>} : memref<576x1152xbf16, #tpu.memory_space<vmem>>, vector<576x128xbf16>,
    %c81 = arith.constant 81 : index
    %c0_63 = arith.constant 0 : index
    %64 = vector.load %arg7[%c81, %c0_63] : memref<672x128xbf16, #tpu.memory_space<vmem>>, vector<576x128xbf16>
    %c0_64 = arith.constant 0 : index
    %c1024_65 = arith.constant 1024 : index
    %65 = vector.load %arg6[%c0_64, %c1024_65] : memref<576x1152xbf16, #tpu.memory_space<vmem>>, vector<576x128xbf16>
    tpu.vector_store %arg6[%c0_64, %c1024_65], %64 {strides = array<i32>} : memref<576x1152xbf16, #tpu.memory_space<vmem>>, vector<576x128xbf16>,
    %c0_66 = arith.constant 0 : index
    %c0_67 = arith.constant 0 : index
    %66 = vector.load %arg6[%c0_66, %c0_67] : memref<576x1152xbf16, #tpu.memory_space<vmem>>, vector<576x1152xbf16>
    %c0_68 = arith.constant 0 : index
    %c0_69 = arith.constant 0 : index
    %67 = vector.load %arg3[%c0_68, %c0_69] : memref<1152x128xbf16, #tpu.memory_space<vmem>>, vector<1152x128xbf16>
    %cst_70 = arith.constant dense<0.000000e+00> : vector<576x128xf32>
    %68 = tpu.matmul %66, %67, %cst_70 {dimension_numbers = #tpu.dot_dimension_numbers<[1], [0], [0], [1], [0, 0, 1, 1], [], []>} : vector<576x1152xbf16>, vector<1152x128xbf16>, vector<576x128xf32> -> vector<576x128xf32>
    %c0_71 = arith.constant 0 : index
    %c33_72 = arith.constant 33 : index
    %c0_73 = arith.constant 0 : index
    %69 = vector.load %arg1[%c0_71, %c33_72, %c0_73] : memref<1x656x128xf32, #tpu.memory_space<vmem>>, vector<1x576x128xf32>
    %70 = vector.shape_cast %69 : vector<1x576x128xf32> to vector<576x128xf32>
    %71 = arith.addf %68, %70 : vector<576x128xf32>
    %cst_74 = arith.constant 0.000000e+00 : f32
    %72 = vector.broadcast %cst_74 : f32 to vector<576x128xf32>
    %73 = arith.maximumf %71, %72 : vector<576x128xf32>
    %c0_75 = arith.constant 0 : index
    %c0_76 = arith.constant 0 : index
    %c0_77 = arith.constant 0 : index
    %74 = vector.load %arg4[%c0_75, %c0_76, %c0_77] : memref<1x576x128xf32, #tpu.memory_space<vmem>>, vector<1x576x128xf32>
    %75 = vector.shape_cast %74 : vector<1x576x128xf32> to vector<576x128xf32>
    %76 = vector.shape_cast %73 : vector<576x128xf32> to vector<1x576x128xf32>
    tpu.vector_store %arg4[%c0_75, %c0_76, %c0_77], %76 {strides = array<i32>} : memref<1x576x128xf32, #tpu.memory_space<vmem>>, vector<1x576x128xf32>,
    return
  }
  func.func @transform_0(%arg0: i32) -> (i32, i32, i32) {
    %c0_i32 = arith.constant 0 : i32
    %c0_i32_0 = arith.constant 0 : i32
    %c0_i32_1 = arith.constant 0 : i32
    return %arg0, %c0_i32, %c0_i32_0 : i32, i32, i32
  }
  func.func @transform_1(%arg0: i32) -> (i32, i32) {
    %c0_i32 = arith.constant 0 : i32
    %c0_i32_0 = arith.constant 0 : i32
    %c0_i32_1 = arith.constant 0 : i32
    return %c0_i32, %c0_i32_0 : i32, i32
  }
  func.func @transform_2(%arg0: i32) -> (i32, i32) {
    %c0_i32 = arith.constant 0 : i32
    %c0_i32_0 = arith.constant 0 : i32
    %c0_i32_1 = arith.constant 0 : i32
    return %c0_i32, %c0_i32_0 : i32, i32
  }
  func.func @transform_3(%arg0: i32) -> (i32, i32, i32) {
    %c0_i32 = arith.constant 0 : i32
    %c0_i32_0 = arith.constant 0 : i32
    %c0_i32_1 = arith.constant 0 : i32
    return %arg0, %c0_i32, %c0_i32_0 : i32, i32, i32
  }
}

</mosaic_0001>

<bundles_post_ra>
// kernel: basic_block_forward.1
= control target key start
LH: loop header
LB: loop body
LE: loop exit
PB: predicated region body
PF: predicated region fallthrough
CT: control target
= control target key end

     0   :  { %s12652_s12 = smov 0   ;;  %s15805_s0 = inlined_call_operand.vmem [shape: f32[2,656,128], index: 0, kind: input, shape index: {}]   ;;  %s15806_s1 = inlined_call_operand.vmem [shape: bf16[1152,128], index: 1, kind: input, shape index: {}]   ;;  %s15807_s2 = inlined_call_operand.vmem [shape: bf16[1152,128], index: 2, kind: input, shape index: {}]   ;;  %s15808_s3 = inlined_call_operand.vmem [shape: f32[2,576,128], index: 3, kind: output, shape index: {}]  }
   0x1 LB: > { %s11045_s13 = sadd.s32 4294967295, %s12628_s12   ;;  %p11049_p0 = scmp.ge.s32.totalorder %s12628_s12, 1  ;;  %s12628_s12 = sphi %s12652_s12, %s13_s12  }
   0x2   : > { %p137_p1 = scmp.lt.s32.totalorder %s12628_s12, 3 }
   0x4   : > { %p138_p2 = pnand %p11049_p0, %p137_p1 }
   0x6   : > { %141 = sbr.rel (%p138_p2) target bundleno = 2535 (0x9e7), region = 32 }
   0xd   : > { %v12426_v0 = vld [vmem:[%s15806_s1] sm:$0xff]   ;;  %v12630_v1 = vmov 0   ;;  %p161_p3 = scmp.lt.s32.totalorder %s11045_s13, 1  ;;  %v12427_v2 = vld [vmem:[%s15806_s1 + $0x8] sm:$0xff]   ;;  %v12428_v3 = vld [vmem:[%s15806_s1 + $0x10] sm:$0xff]   ;;  %vm1395_vm1 = vcmask 1046528  }
   0xe   : > { %3825 = vmatprep.subr.bf16.mxu0 %v12630_v1  ;;  %172 = vst [vmem:[#allocation4] sm:$0xff] %v12630_v1  ;;  %174 = vst [vmem:[#allocation4 + $0x10] sm:$0xff] %v12630_v1  ;;  %v12429_v4 = vld [vmem:[%s15806_s1 + $0x18] sm:$0xff]   ;;  %v12430_v5 = vld [vmem:[%s15806_s1 + $0x20] sm:$0xff]   ;;  %vm956_vm0 = vsmask.f32 7424 }
   0xf   : > { %175 = vst [vmem:[#allocation4 + $0x138] sm:$0xff] %v12630_v1  ;;  %177 = vst [vmem:[#allocation4 + $0x148] sm:$0xff] %v12630_v1  ;;  %3826 = vmatpush1.bf16.msra.mxu0 %v12426_v0  ;;  %s16131_s13 = smov (!%p161_p3, %s11045_s13), 1  ;;  %v12431_v11 = vld [vmem:[%s15806_s1 + $0x28] sm:$0xff]   ;;  %v12432_v27 = vld [vmem:[%s15806_s1 + $0x30] sm:$0xff]  }
  0x10   : > { %3827 = vmatprep.subr.bf16.mxu0 %v12630_v1  ;;  %s12414_s20 = smul.u32 656, %s16131_s13  ;;  %v12433_v40 = vld [vmem:[%s15806_s1 + $0x38] sm:$0xff]   ;;  %v12434_v49 = vld [vmem:[%s15806_s1 + $0x40] sm:$0xff]   ;;  %v12435_v54 = vld [vmem:[%s15806_s1 + $0x48] sm:$0xff]   ;;  %vm5683_vm2 = vsmask.f32 256 }
  0x11   : > { %v12436_v63 = vld [vmem:[%s15806_s1 + $0x50] sm:$0xff]   ;;  %s12415_s7 = smul.u32 576, %s16131_s13 }
  0x12   : > { %s12686_s25 = scalar_lea.vmem %s15805_s0, %s12414_s20 }
  0x13   : > { %3828 = vmatpush1.bf16.msra.mxu0 %v12427_v2  ;;  %v178_v6 = vld [vmem:[%s12686_s25] sm:$0xff]  ;;  %v179_v7 = vld [vmem:[%s12686_s25 + $0x8] sm:$0xff]  ;;  %v180_v8 = vld [vmem:[%s12686_s25 + $0x10] sm:$0xff]  ;;  %s15572_s10 = scalar_lea.vmem %s15808_s3, %s12415_s7 }
  0x14   : > { %3829 = vmatprep.subr.bf16.mxu0 %v12630_v1  ;;  %v181_v9 = vld [vmem:[%s12686_s25 + $0x18] sm:$0xff]  ;;  %v12696_v10 = vpack.c.bf16 %v179_v7, %v178_v6  ;;  %v182_v13 = vld [vmem:[%s12686_s25 + $0x20] sm:$0xff]  ;;  %v183_v14 = vld [vmem:[%s12686_s25 + $0x28] sm:$0xff] }
  0x15   : > { %v12701_v12 = vpack.c.bf16 %v181_v9, %v180_v8  ;;  %v12709_v17 = vpack.c.bf16 %v183_v14, %v182_v13  ;;  %v184_v18 = vld [vmem:[%s12686_s25 + $0x30] sm:$0xff]  ;;  %v185_v19 = vld [vmem:[%s12686_s25 + $0x38] sm:$0xff]  ;;  %v186_v22 = vld [vmem:[%s12686_s25 + $0x40] sm:$0xff] }
  0x16   : > { %301 = vst [vmem:[#allocation2] sm:$0xff] %v12696_v10  ;;  %v958_v15 = vshrl.u32 %v12696_v10, 16  ;;  %v960_v16 = vshll.u32 %v12696_v10, 16  ;;  %v12715_v21 = vpack.c.bf16 %v185_v19, %v184_v18  ;;  %v187_v24 = vld [vmem:[%s12686_s25 + $0x48] sm:$0xff]  ;;  %v188_v25 = vld [vmem:[%s12686_s25 + $0x50] sm:$0xff]  ;;  %v189_v26 = vld [vmem:[%s12686_s25 + $0x58] sm:$0xff] }
  0x17   : > { %3830 = vmatpush1.bf16.msra.mxu0 %v12428_v3  ;;  %302 = vst [vmem:[#allocation2 + $0x8] sm:$0xff] %v12701_v12  ;;  %v965_v20 = vshll.u32 %v12701_v12, 16  ;;  %303 = vst [vmem:[#allocation2 + $0x10] sm:$0xff] %v12709_v17  ;;  %v12728_v29 = vpack.c.bf16 %v187_v24, %v186_v22  ;;  %v12731_v31 = vpack.c.bf16 %v189_v26, %v188_v25  ;;  %v190_v32 = vld [vmem:[%s12686_s25 + $0x60] sm:$0xff]  ;;  %v191_v33 = vld [vmem:[%s12686_s25 + $0x68] sm:$0xff]  ;;  %v969_v13 = vshrl.u32 %v12701_v12, 16 }
  0x18   : > { %3831 = vmatprep.subr.bf16.mxu0 %v12630_v1  ;;  %v962_v23 = vrot.slane %v960_v16, 1  ;;  %304 = vst [vmem:[#allocation2 + $0x18] sm:$0xff] %v12715_v21  ;;  %v192_v34 = vld [vmem:[%s12686_s25 + $0x70] sm:$0xff]  ;;  %v193_v35 = vld [vmem:[%s12686_s25 + $0x78] sm:$0xff]  ;;  %v194_v36 = vld [vmem:[%s12686_s25 + $0x80] sm:$0xff]  ;;  %v12742_v38 = vpack.c.bf16 %v191_v33, %v190_v32  ;;  %v973_v14 = vshll.u32 %v12709_v17, 16 }
  0x19   : > { %v12725_v28 = vrot.slane %v965_v20, 1  ;;  %305 = vst [vmem:[#allocation2 + $0x20] sm:$0xff] %v12728_v29  ;;  %306 = vst [vmem:[#allocation2 + $0x28] sm:$0xff] %v12731_v31  ;;  %v195_v39 = vld [vmem:[%s12686_s25 + $0x88] sm:$0xff]  ;;  %v12750_v41 = vpack.c.bf16 %v193_v35, %v192_v34  ;;  %v196_v42 = vld [vmem:[%s12686_s25 + $0x90] sm:$0xff]  ;;  %v977_v24 = vshrl.u32 %v12709_v17, 16 }
  0x1a   : > { %v963_v30 = vor.u32 %v962_v23, %v958_v15  ;;  %307 = vst [vmem:[#allocation2 + $0x30] sm:$0xff] %v12742_v38  ;;  %v197_v43 = vld [vmem:[%s12686_s25 + $0x98] sm:$0xff]  ;;  %v12754_v44 = vpack.c.bf16 %v195_v39, %v194_v36  ;;  %v198_v45 = vld [vmem:[%s12686_s25 + $0xa0] sm:$0xff]  ;;  %v199_v46 = vld [vmem:[%s12686_s25 + $0xa8] sm:$0xff]  ;;  %v975_v22 = vrot.slane %v973_v14, 1  ;;  %v981_v25 = vshll.u32 %v12715_v21, 16 }
  0x1b   : > { %3832 = vmatpush1.bf16.msra.mxu0 %v12429_v4  ;;  %308 = vst [vmem:[#allocation2 + $0x38] sm:$0xff] %v12750_v41  ;;  %v200_v47 = vld [vmem:[%s12686_s25 + $0xb0] sm:$0xff]  ;;  %v201_v48 = vld [vmem:[%s12686_s25 + $0xb8] sm:$0xff]  ;;  %v12765_v50 = vpack.c.bf16 %v197_v43, %v196_v42  ;;  %v12768_v51 = vpack.c.bf16 %v199_v46, %v198_v45  ;;  %v202_v52 = vld [vmem:[%s12686_s25 + $0xc0] sm:$0xff]  ;;  %v971_v20 = vor.u32 %v969_v13, %v12725_v28  ;;  %v985_v35 = vshrl.u32 %v12715_v21, 16 }
  0x1c   : > { %3833 = vmatprep.subr.bf16.mxu0 %v12630_v1  ;;  %v968_v37 = vsel %vm956_vm0, %v963_v30, %v12725_v28  ;;  %309 = vst [vmem:[#allocation2 + $0x40] sm:$0xff] %v12754_v44  ;;  %v203_v53 = vld [vmem:[%s12686_s25 + $0xc8] sm:$0xff]  ;;  %v12776_v55 = vpack.c.bf16 %v201_v48, %v200_v47  ;;  %v204_v56 = vld [vmem:[%s12686_s25 + $0xd0] sm:$0xff]  ;;  %v205_v57 = vld [vmem:[%s12686_s25 + $0xd8] sm:$0xff]  ;;  %v979_v33 = vor.u32 %v977_v24, %v975_v22  ;;  %v983_v34 = vrot.slane %v981_v25, 1 }
  0x1d   : > { %3857 = vmatprep.mubr.bf16.mxu0 %v968_v37  ;;  %310 = vst [vmem:[#allocation2 + $0x48] sm:$0xff] %v12765_v50  ;;  %311 = vst [vmem:[#allocation2 + $0x50] sm:$0xff] %v12768_v51  ;;  %v206_v58 = vld [vmem:[%s12686_s25 + $0xe0] sm:$0xff]  ;;  %v12783_v59 = vpack.c.bf16 %v203_v53, %v202_v52  ;;  %v207_v60 = vld [vmem:[%s12686_s25 + $0xe8] sm:$0xff]  ;;  %v12787_v61 = vpack.c.bf16 %v205_v57, %v204_v56  ;;  %v976_v26 = vsel %vm956_vm0, %v971_v20, %v975_v22 }
  0x1e   : > { %312 = vst [vmem:[#allocation2 + $0x58] sm:$0xff] %v12776_v55  ;;  %v12791_v62 = vpack.c.bf16 %v207_v60, %v206_v58  ;;  %v208_v0 = vld [vmem:[%s12686_s25 + $0xf0] sm:$0xff]  ;;  %v209_v2 = vld [vmem:[%s12686_s25 + $0xf8] sm:$0xff]  ;;  %v210_v6 = vld [vmem:[%s12686_s25 + $0x100] sm:$0xff]  ;;  %v989_v36 = vshll.u32 %v12728_v29, 16  ;;  %v984_v37 = vsel %vm956_vm0, %v979_v33, %v983_v34  ;;  %v987_v45 = vor.u32 %v985_v35, %v983_v34 }
  0x1f   : > { %3834 = vmatpush1.bf16.msra.mxu0 %v12430_v5  ;;  %313 = vst [vmem:[#allocation2 + $0x60] sm:$0xff] %v12783_v59  ;;  %314 = vst [vmem:[#allocation2 + $0x68] sm:$0xff] %v12787_v61  ;;  %v12437_v3 = vld [vmem:[%s15806_s1 + $0x58] sm:$0xff]   ;;  %v12803_v4 = vpack.c.bf16 %v209_v2, %v208_v0  ;;  %v12438_v5 = vld [vmem:[%s15806_s1 + $0x60] sm:$0xff]   ;;  %v993_v47 = vshrl.u32 %v12728_v29, 16  ;;  %v997_v48 = vshll.u32 %v12731_v31, 16 }
  0x20   : > { %3835 = vmatprep.subr.bf16.mxu0 %v12630_v1  ;;  %315 = vst [vmem:[#allocation2 + $0x70] sm:$0xff] %v12791_v62  ;;  %v211_v7 = vld [vmem:[%s12686_s25 + $0x108] sm:$0xff]  ;;  %v212_v15 = vld [vmem:[%s12686_s25 + $0x110] sm:$0xff]  ;;  %v213_v16 = vld [vmem:[%s12686_s25 + $0x118] sm:$0xff]  ;;  %v991_v46 = vrot.slane %v989_v36, 1  ;;  %v1001_v60 = vshrl.u32 %v12731_v31, 16 }
  0x21   : > { %316 = vst [vmem:[#allocation2 + $0x78] sm:$0xff] %v12803_v4  ;;  %v12439_v8 = vld [vmem:[%s15806_s1 + $0x68] sm:$0xff]   ;;  %v12816_v9 = vpack.c.bf16 %v211_v7, %v210_v6  ;;  %v12828_v18 = vpack.c.bf16 %v213_v16, %v212_v15  ;;  %v12441_v19 = vld [vmem:[%s15806_s1 + $0x78] sm:$0xff]   ;;  %v12442_v23 = vld [vmem:[%s15806_s1 + $0x80] sm:$0xff]   ;;  %v999_v58 = vrot.slane %v997_v48, 1  ;;  %v1013_v13 = vshll.u32 %v12750_v41, 16 }
  0x22   : > { %v215_v30 = vld [vmem:[%s12686_s25 + $0x128] sm:$0xff]  ;;  %v216_v39 = vld [vmem:[%s12686_s25 + $0x130] sm:$0xff]  ;;  %v12445_v42 = vld [vmem:[%s15806_s1 + $0x98] sm:$0xff]   ;;  %v995_v57 = vor.u32 %v993_v47, %v991_v46  ;;  %v1017_v24 = vshrl.u32 %v12750_v41, 16  ;;  %v1021_v25 = vshll.u32 %v12754_v44, 16  ;;  %v1025_v34 = vshrl.u32 %v12754_v44, 16 }
  0x23   : > { %3836 = vmatpush1.bf16.msra.mxu0 %v12431_v11  ;;  %317 = vst [vmem:[#allocation2 + $0x80] sm:$0xff] %v12816_v9  ;;  %v12440_v11 = vld [vmem:[%s15806_s1 + $0x70] sm:$0xff]   ;;  %318 = vst [vmem:[#allocation2 + $0x88] sm:$0xff] %v12828_v18  ;;  %v12443_v28 = vld [vmem:[%s15806_s1 + $0x88] sm:$0xff]   ;;  %v1003_v7 = vor.u32 %v1001_v60, %v999_v58  ;;  %v1029_v35 = vshll.u32 %v12765_v50, 16 }
  0x24   : > { %3837 = vmatprep.subr.bf16.mxu0 %v12630_v1  ;;  %v218_v52 = vld [vmem:[%s12686_s25 + $0x140] sm:$0xff]  ;;  %v219_v53 = vld [vmem:[%s12686_s25 + $0x148] sm:$0xff]  ;;  %v1000_v0 = vsel %vm956_vm0, %v995_v57, %v999_v58  ;;  %v220_v2 = vld [vmem:[%s12686_s25 + $0x150] sm:$0xff]  ;;  %v1023_v33 = vrot.slane %v1021_v25, 1  ;;  %v1065_v25 = vshrl.u32 %v12787_v61, 16 }
  0x25   : > { %v12883_v56 = vpack.c.bf16 %v219_v53, %v218_v52  ;;  %v222_v15 = vld [vmem:[%s12686_s25 + $0x160] sm:$0xff]  ;;  %v223_v16 = vld [vmem:[%s12686_s25 + $0x168] sm:$0xff]  ;;  %v228_v47 = vld [vmem:[%s12686_s25 + $0x190] sm:$0xff]  ;;  %v1045_v53 = vshll.u32 %v12776_v55, 16 }
  0x26   : > { %v12917_v20 = vpack.c.bf16 %v223_v16, %v222_v15  ;;  %v229_v48 = vld [vmem:[%s12686_s25 + $0x198] sm:$0xff]  ;;  %v230_v57 = vld [vmem:[%s12686_s25 + $0x1a0] sm:$0xff]  ;;  %v231_v58 = vld [vmem:[%s12686_s25 + $0x1a8] sm:$0xff]  ;;  %v1061_v15 = vshll.u32 %v12787_v61, 16 }
  0x27   : > { %3838 = vmatpush1.bf16.msra.mxu0 %v12432_v27  ;;  %v214_v27 = vld [vmem:[%s12686_s25 + $0x120] sm:$0xff]  ;;  %321 = vst [vmem:[#allocation2 + $0xa0] sm:$0xff] %v12883_v56  ;;  %v12453_v60 = vld [vmem:[%s15806_s1 + $0xd8] sm:$0xff]  }
  0x28   : > { %3839 = vmatprep.subr.bf16.mxu0 %v12630_v1  ;;  %v12849_v32 = vpack.c.bf16 %v215_v30, %v214_v27  ;;  %323 = vst [vmem:[#allocation2 + $0xb0] sm:$0xff] %v12917_v20  ;;  %v225_v27 = vld [vmem:[%s12686_s25 + $0x178] sm:$0xff]  ;;  %v234_v16 = vld [vmem:[%s12686_s25 + $0x1c0] sm:$0xff] }
  0x2a   : > { %319 = vst [vmem:[#allocation2 + $0x90] sm:$0xff] %v12849_v32 }
  0x2b   : > { %3840 = vmatpush1.bf16.msra.mxu0 %v12433_v40  ;;  %v217_v40 = vld [vmem:[%s12686_s25 + $0x138] sm:$0xff] }
  0x2c   : > { %3841 = vmatprep.subr.bf16.mxu0 %v12630_v1  ;;  %v12866_v43 = vpack.c.bf16 %v217_v40, %v216_v39  ;;  %v1027_v40 = vor.u32 %v1025_v34, %v1023_v33 }
  0x2e   : > { %320 = vst [vmem:[#allocation2 + $0x98] sm:$0xff] %v12866_v43 }
  0x2f   : > { %3842 = vmatpush1.bf16.msra.mxu0 %v12434_v49  ;;  %v992_v49 = vsel %vm956_vm0, %v987_v45, %v991_v46  ;;  %v1033_v45 = vshrl.u32 %v12765_v50, 16 }
  0x30   : > { %3843 = vmatprep.subr.bf16.mxu0 %v12630_v1 }
  0x33   : > { %3844 = vmatpush1.bf16.msra.mxu0 %v12435_v54  ;;  %v12447_v54 = vld [vmem:[%s15806_s1 + $0xa8] sm:$0xff]  }
  0x34   : > { %3845 = vmatprep.subr.bf16.mxu0 %v12630_v1 }
  0x37   : > { %3846 = vmatpush1.bf16.msra.mxu0 %v12436_v63  ;;  %v1005_v63 = vshll.u32 %v12742_v38, 16 }
  0x38   : > { %3847 = vmatprep.subr.bf16.mxu0 %v12630_v1 }
  0x3b   : > { %3848 = vmatpush1.bf16.msra.mxu0 %v12437_v3  ;;  %v221_v3 = vld [vmem:[%s12686_s25 + $0x158] sm:$0xff] }
  0x3c   : > { %3849 = vmatprep.subr.bf16.mxu0 %v12630_v1  ;;  %v12900_v6 = vpack.c.bf16 %v221_v3, %v220_v2  ;;  %v1053_v2 = vshll.u32 %v12783_v59, 16  ;;  %v12967_v3 = vld [vmem:[#allocation4] sm:$0xff] }
  0x3e   : > { %322 = vst [vmem:[#allocation2 + $0xa8] sm:$0xff] %v12900_v6 }
  0x3f   : > { %3850 = vmatpush1.bf16.msra.mxu0 %v12438_v5  ;;  %v12449_v5 = vld [vmem:[%s15806_s1 + $0xb8] sm:$0xff]  }
  0x40   : > { %3851 = vmatprep.subr.bf16.mxu0 %v12630_v1 }
  0x43   : > { %3852 = vmatpush1.bf16.msra.mxu0 %v12439_v8  ;;  %v1007_v8 = vrot.slane %v1005_v63, 1 }
  0x44   : > { %3853 = vmatprep.subr.bf16.mxu0 %v12630_v1 }
  0x45   : > { %v1008_v14 = vsel %vm956_vm0, %v1003_v7, %v1007_v8  ;;  %v233_v7 = vld [vmem:[%s12686_s25 + $0x1b8] sm:$0xff] }
  0x47   : > { %3854 = vmatpush1.bf16.msra.mxu0 %v12440_v11  ;;  %v1009_v11 = vshrl.u32 %v12742_v38, 16 }
  0x48   : > { %3855 = vmatprep.subr.bf16.mxu0 %v12630_v1 }
  0x49   : > { %v1011_v22 = vor.u32 %v1009_v11, %v1007_v8 }
  0x4b   : > { %3856 = vmatpush1.bf16.msra.mxu0 %v12441_v19  ;;  %v12451_v19 = vld [vmem:[%s15806_s1 + $0xc8] sm:$0xff]  }
  0x4c   : > { %4146 = vmatprep.subr.bf16.mxu0 %v12630_v1 }
  0x4e   : > { %3858 = vmatmul.mubr.bf16.vlgmr.msra.gmra.mrb[0].mxu0 %v12696_v10  ;;  %v12444_v10 = vld [vmem:[%s15806_s1 + $0x90] sm:$0xff]  }
  0x4f   : > { %4147 = vmatpush1.bf16.msra.mxu0 %v12442_v23  ;;  %3865 = vmatprep.mubr.bf16.mxu0 %v976_v26  ;;  %v1015_v23 = vrot.slane %v1013_v13, 1  ;;  %v224_v26 = vld [vmem:[%s12686_s25 + $0x170] sm:$0xff]  ;;  %v1055_v13 = vrot.slane %v1053_v2, 1  ;;  %v1097_v2 = vshrl.u32 %v12828_v18, 16 }
  0x50   : > { %4148 = vmatprep.subr.bf16.mxu0 %v12630_v1  ;;  %v12928_v30 = vpack.c.bf16 %v225_v27, %v224_v26  ;;  %v236_v26 = vld [vmem:[%s12686_s25 + $0x1d0] sm:$0xff]  ;;  %v237_v27 = vld [vmem:[%s12686_s25 + $0x1d8] sm:$0xff] }
  0x52   : > { %324 = vst [vmem:[#allocation2 + $0xb8] sm:$0xff] %v12928_v30 }
  0x53   : > { %4149 = vmatpush1.bf16.msra.mxu0 %v12443_v28  ;;  %v1019_v28 = vor.u32 %v1017_v24, %v1015_v23 }
  0x54   : > { %4150 = vmatprep.subr.bf16.mxu0 %v12630_v1 }
  0x55   : > { %v1024_v36 = vsel %vm956_vm0, %v1019_v28, %v1023_v33  ;;  %v12995_v28 = vpack.c.bf16 %v237_v27, %v236_v26  ;;  %v1117_v26 = vshll.u32 %v12883_v56, 16  ;;  %v248_v27 = vld [vmem:[%s12686_s25 + $0x230] sm:$0xff] }
  0x56   : > { %3866 = vmatmul.mubr.bf16.gmra.mrb[4].mxu0 %v12701_v12  ;;  %v12446_v12 = vld [vmem:[%s15806_s1 + $0xa0] sm:$0xff]  }
  0x57   : > { %3873 = vmatprep.mubr.bf16.mxu0 %v984_v37  ;;  %4151 = vmatpush1.bf16.msra.mxu0 %v12444_v10  ;;  %v226_v10 = vld [vmem:[%s12686_s25 + $0x180] sm:$0xff]  ;;  %v227_v37 = vld [vmem:[%s12686_s25 + $0x188] sm:$0xff]  ;;  %330 = vst [vmem:[#allocation2 + $0xe8] sm:$0xff] %v12995_v28 }
  0x58   : > { %4152 = vmatprep.subr.bf16.mxu0 %v12630_v1  ;;  %v12940_v39 = vpack.c.bf16 %v227_v37, %v226_v10  ;;  %v238_v10 = vld [vmem:[%s12686_s25 + $0x1e0] sm:$0xff]  ;;  %v239_v37 = vld [vmem:[%s12686_s25 + $0x1e8] sm:$0xff] }
  0x5a   : > { %325 = vst [vmem:[#allocation2 + $0xc0] sm:$0xff] %v12940_v39 }
  0x5b   : > { %4153 = vmatpush1.bf16.msra.mxu0 %v12445_v42  ;;  %v1031_v42 = vrot.slane %v1029_v35, 1 }
  0x5c   : > { %4154 = vmatprep.subr.bf16.mxu0 %v12630_v1 }
  0x5d   : > { %v1032_v46 = vsel %vm956_vm0, %v1027_v40, %v1031_v42 }
  0x5e   : > { %3874 = vmatmul.mubr.bf16.gmra.mrb[8].mxu0 %v12709_v17  ;;  %v12448_v17 = vld [vmem:[%s15806_s1 + $0xb0] sm:$0xff]  }
  0x5f   : > { %3881 = vmatprep.mubr.bf16.mxu0 %v992_v49  ;;  %4155 = vmatpush1.bf16.msra.mxu0 %v12446_v12  ;;  %v12950_v12 = vpack.c.bf16 %v229_v48, %v228_v47  ;;  %v1035_v49 = vor.u32 %v1033_v45, %v1031_v42  ;;  %v240_v47 = vld [vmem:[%s12686_s25 + $0x1f0] sm:$0xff]  ;;  %v241_v48 = vld [vmem:[%s12686_s25 + $0x1f8] sm:$0xff] }
  0x60   : > { %4156 = vmatprep.subr.bf16.mxu0 %v12630_v1 }
  0x61   : > { %326 = vst [vmem:[#allocation2 + $0xc8] sm:$0xff] %v12950_v12 }
  0x63   : > { %4157 = vmatpush1.bf16.msra.mxu0 %v12447_v54 }
  0x64   : > { %4158 = vmatprep.subr.bf16.mxu0 %v12630_v1 }
  0x66   : > { %3882 = vmatmul.mubr.bf16.gmra.mrb[12].mxu0 %v12715_v21  ;;  %v12450_v21 = vld [vmem:[%s15806_s1 + $0xc0] sm:$0xff]  }
  0x67   : > { %3889 = vmatprep.mubr.bf16.mxu0 %v1000_v0  ;;  %4159 = vmatpush1.bf16.msra.mxu0 %v12448_v17  ;;  %v1047_v17 = vrot.slane %v1045_v53, 1  ;;  %v1049_v0 = vshrl.u32 %v12776_v55, 16 }
  0x68   : > { %4160 = vmatprep.subr.bf16.mxu0 %v12630_v1 }
  0x69   : > { %v1051_v11 = vor.u32 %v1049_v0, %v1047_v17 }
  0x6b   : > { %4161 = vmatpush1.bf16.msra.mxu0 %v12449_v5  ;;  %v232_v5 = vld [vmem:[%s12686_s25 + $0x1b0] sm:$0xff] }
  0x6c   : > { %4162 = vmatprep.subr.bf16.mxu0 %v12630_v1  ;;  %v12974_v8 = vpack.c.bf16 %v233_v7, %v232_v5  ;;  %v244_v5 = vld [vmem:[%s12686_s25 + $0x210] sm:$0xff]  ;;  %v245_v7 = vld [vmem:[%s12686_s25 + $0x218] sm:$0xff] }
  0x6e   : > { %3890 = vmatmul.mubr.bf16.gmra.mrb[16].mxu0 %v12728_v29  ;;  %v1016_v29 = vsel %vm956_vm0, %v1011_v22, %v1015_v23  ;;  %328 = vst [vmem:[#allocation2 + $0xd8] sm:$0xff] %v12974_v8  ;;  %v1063_v23 = vrot.slane %v1061_v15, 1  ;;  %v1109_v15 = vshll.u32 %v12866_v43, 16 }
  0x6f   : > { %3897 = vmatprep.mubr.bf16.mxu0 %v1008_v14  ;;  %4163 = vmatpush1.bf16.msra.mxu0 %v12450_v21  ;;  %v1056_v21 = vsel %vm956_vm0, %v1051_v11, %v1055_v13  ;;  %v1057_v14 = vshrl.u32 %v12783_v59, 16  ;;  %v13039_v11 = vpack.c.bf16 %v245_v7, %v244_v5  ;;  %v1161_v7 = vshrl.u32 %v12950_v12, 16 }
  0x70   : > { %4164 = vmatprep.subr.bf16.mxu0 %v12630_v1  ;;  %v1067_v33 = vor.u32 %v1065_v25, %v1063_v23 }
  0x71   : > { %v1059_v22 = vor.u32 %v1057_v14, %v1055_v13  ;;  %334 = vst [vmem:[#allocation2 + $0x108] sm:$0xff] %v13039_v11 }
  0x73   : > { %4165 = vmatpush1.bf16.msra.mxu0 %v12451_v19  ;;  %v235_v19 = vld [vmem:[%s12686_s25 + $0x1c8] sm:$0xff]  ;;  %v1064_v24 = vsel %vm956_vm0, %v1059_v22, %v1063_v23 }
  0x74   : > { %4166 = vmatprep.subr.bf16.mxu0 %v12630_v1 }
  0x76   : > { %3898 = vmatmul.mubr.bf16.gmra.mrb[20].mxu0 %v12731_v31  ;;  %v12452_v31 = vld [vmem:[%s15806_s1 + $0xd0] sm:$0xff]  }
  0x77   : > { %3905 = vmatprep.mubr.bf16.mxu0 %v1016_v29  ;;  %4167 = vmatpush1.bf16.msra.mxu0 %v12452_v31  ;;  %v1069_v29 = vshll.u32 %v12791_v62, 16  ;;  %v13005_v31 = vpack.c.bf16 %v239_v37, %v238_v10  ;;  %v1119_v10 = vrot.slane %v1117_v26, 1  ;;  %v1121_v37 = vshrl.u32 %v12883_v56, 16 }
  0x78   : > { %4168 = vmatprep.subr.bf16.mxu0 %v12630_v1  ;;  %v1041_v1 = vshrl.u32 %v12768_v51, 16 }
  0x79   : > { %v1071_v34 = vrot.slane %v1069_v29, 1  ;;  %331 = vst [vmem:[#allocation2 + $0xf0] sm:$0xff] %v13005_v31  ;;  %v1113_v29 = vshrl.u32 %v12866_v43, 16 }
  0x7b   : > { %4169 = vmatpush1.bf16.msra.mxu0 %v12453_v60  ;;  %v1072_v35 = vsel %vm956_vm0, %v1067_v33, %v1071_v34  ;;  %v250_v33 = vld [vmem:[%s12686_s25 + $0x240] sm:$0xff] }
  0x7c   : > { %4170 = vmatprep.subr.bf16.mxu0 %v12967_v3 }
  0x7e   : > { %3906 = vmatmul.mubr.bf16.gmra.mrb[24].mxu0 %v12742_v38  ;;  %v1037_v38 = vshll.u32 %v12768_v51, 16 }
  0x7f   : > { %3913 = vmatprep.mubr.bf16.mxu0 %v1024_v36  ;;  %v1077_v36 = vshll.u32 %v12803_v4, 16 }
  0x80   : > { %v1039_v52 = vrot.slane %v1037_v38, 1  ;;  %v1081_v38 = vshrl.u32 %v12803_v4, 16 }
  0x81   : > { %v1079_v42 = vrot.slane %v1077_v36, 1 }
  0x82   : > { %v1040_v54 = vsel %vm956_vm0, %v1035_v49, %v1039_v52  ;;  %v1043_v63 = vor.u32 %v1041_v1, %v1039_v52  ;;  %v13017_v49 = vpack.c.bf16 %v241_v48, %v240_v47  ;;  %v1133_v47 = vshll.u32 %v12917_v20, 16 }
  0x83   : > { %v1083_v52 = vor.u32 %v1081_v38, %v1079_v42 }
  0x84   : > { %332 = vst [vmem:[#allocation2 + $0xf8] sm:$0xff] %v13017_v49 }
  0x86   : > { %3914 = vmatmul.mubr.bf16.gmra.mrb[28].mxu0 %v12750_v41  ;;  %v12959_v41 = vpack.c.bf16 %v231_v58, %v230_v57  ;;  %v242_v57 = vld [vmem:[%s12686_s25 + $0x200] sm:$0xff]  ;;  %v243_v58 = vld [vmem:[%s12686_s25 + $0x208] sm:$0xff] }
  0x87   : > { %3921 = vmatprep.mubr.bf16.mxu0 %v1032_v46  ;;  %v1085_v46 = vshll.u32 %v12816_v9, 16  ;;  %v13027_v60 = vpack.c.bf16 %v243_v58, %v242_v57  ;;  %v1145_v57 = vshrl.u32 %v12928_v30, 16 }
  0x88   : > { %327 = vst [vmem:[#allocation2 + $0xd0] sm:$0xff] %v12959_v41 }
  0x89   : > { %v1087_v1 = vrot.slane %v1085_v46, 1  ;;  %333 = vst [vmem:[#allocation2 + $0x100] sm:$0xff] %v13027_v60  ;;  %v1129_v46 = vshrl.u32 %v12900_v6, 16 }
  0x8b   : > { %v1088_v53 = vsel %vm956_vm0, %v1083_v52, %v1087_v1 }
  0x8e   : > { %3922 = vmatmul.mubr.bf16.gmra.mrb[32].mxu0 %v12754_v44  ;;  %v1048_v44 = vsel %vm956_vm0, %v1043_v63, %v1047_v17 }
  0x8f   : > { %3929 = vmatprep.mubr.bf16.mxu0 %v1040_v54  ;;  %v1093_v54 = vshll.u32 %v12828_v18, 16 }
  0x91   : > { %v1095_v17 = vrot.slane %v1093_v54, 1 }
  0x93   : > { %v1099_v13 = vor.u32 %v1097_v2, %v1095_v17 }
  0x96   : > { %3930 = vmatmul.mubr.bf16.gmra.mrb[36].mxu0 %v12765_v50  ;;  %v12983_v50 = vpack.c.bf16 %v235_v19, %v234_v16  ;;  %v246_v16 = vld [vmem:[%s12686_s25 + $0x220] sm:$0xff]  ;;  %v247_v19 = vld [vmem:[%s12686_s25 + $0x228] sm:$0xff] }
  0x97   : > { %3937 = vmatprep.mubr.bf16.mxu0 %v1048_v44  ;;  %v1101_v44 = vshll.u32 %v12849_v32, 16  ;;  %v13049_v22 = vpack.c.bf16 %v247_v19, %v246_v16  ;;  %v1177_v19 = vshrl.u32 %v12974_v8, 16 }
  0x98   : > { %329 = vst [vmem:[#allocation2 + $0xe0] sm:$0xff] %v12983_v50  ;;  %v1185_v26 = vshrl.u32 %v12983_v50, 16 }
  0x99   : > { %335 = vst [vmem:[#allocation2 + $0x110] sm:$0xff] %v13049_v22 }
  0x9e   : > { %3938 = vmatmul.mubr.bf16.gmra.mrb[40].mxu0 %v12768_v51  ;;  %v12454_v51 = vld [vmem:[%s15806_s1 + $0xe0] sm:$0xff]  }
  0x9f   : > { %3945 = vmatprep.mubr.bf16.mxu0 %v1056_v21  ;;  %4171 = vmatpush1.bf16.msra.mxu0 %v12454_v51  ;;  %v1103_v21 = vrot.slane %v1101_v44, 1  ;;  %v249_v51 = vld [vmem:[%s12686_s25 + $0x238] sm:$0xff] }
  0xa0   : > { %4172 = vmatprep.subr.bf16.mxu0 %v12967_v3 }
  0xa1   : > { %v1104_v14 = vsel %vm956_vm0, %v1099_v13, %v1103_v21 }
  0xa6   : > { %3946 = vmatmul.mubr.bf16.gmra.mrb[44].mxu0 %v12776_v55  ;;  %v1073_v55 = vshrl.u32 %v12791_v62, 16 }
  0xa7   : > { %3953 = vmatprep.mubr.bf16.mxu0 %v1064_v24  ;;  %v1111_v24 = vrot.slane %v1109_v15, 1 }
  0xa8   : > { %v1075_v40 = vor.u32 %v1073_v55, %v1071_v34  ;;  %v13059_v34 = vpack.c.bf16 %v249_v51, %v248_v27  ;;  %v1189_v27 = vshll.u32 %v12995_v28, 16 }
  0xa9   : > { %v1115_v36 = vor.u32 %v1113_v29, %v1111_v24 }
  0xaa   : > { %v1080_v45 = vsel %vm956_vm0, %v1075_v40, %v1079_v42  ;;  %336 = vst [vmem:[#allocation2 + $0x118] sm:$0xff] %v13059_v34  ;;  %v1125_v40 = vshll.u32 %v12900_v6, 16  ;;  %v1123_v42 = vor.u32 %v1121_v37, %v1119_v10 }
  0xae   : > { %3954 = vmatmul.mubr.bf16.gmra.mrb[48].mxu0 %v12783_v59  ;;  %v12455_v59 = vld [vmem:[%s15806_s1 + $0xe8] sm:$0xff]  }
  0xaf   : > { %3961 = vmatprep.mubr.bf16.mxu0 %v1072_v35  ;;  %4173 = vmatpush1.bf16.msra.mxu0 %v12455_v59  ;;  %v12457_v35 = vld [vmem:[%s15806_s1 + $0xf8] sm:$0xff]   ;;  %v1135_v59 = vrot.slane %v1133_v47, 1  ;;  %v1209_v47 = vshrl.u32 %v13017_v49, 16 }
  0xb0   : > { %4174 = vmatprep.subr.bf16.mxu0 %v12967_v3 }
  0xb6   : > { %3962 = vmatmul.mubr.bf16.gmra.mrb[52].mxu0 %v12787_v61  ;;  %v1089_v61 = vshrl.u32 %v12816_v9, 16 }
  0xb7   : > { %3969 = vmatprep.mubr.bf16.mxu0 %v1080_v45  ;;  %v1127_v45 = vrot.slane %v1125_v40, 1  ;;  %v1201_v40 = vshrl.u32 %v13005_v31, 16 }
  0xb8   : > { %v1091_v63 = vor.u32 %v1089_v61, %v1087_v1  ;;  %v1137_v1 = vshrl.u32 %v12917_v20, 16 }
  0xb9   : > { %v1128_v38 = vsel %vm956_vm0, %v1123_v42, %v1127_v45  ;;  %v1131_v48 = vor.u32 %v1129_v46, %v1127_v45  ;;  %v1205_v42 = vshll.u32 %v13017_v49, 16 }
  0xba   : > { %v1096_v0 = vsel %vm956_vm0, %v1091_v63, %v1095_v17 }
  0xbb   : > { %v1136_v52 = vsel %vm956_vm0, %v1131_v48, %v1135_v59  ;;  %v1213_v48 = vshll.u32 %v13027_v60, 16 }
  0xbe   : > { %3970 = vmatmul.mubr.bf16.gmra.mrb[56].mxu0 %v12791_v62  ;;  %v12456_v62 = vld [vmem:[%s15806_s1 + $0xf0] sm:$0xff]  }
  0xbf   : > { %3977 = vmatprep.mubr.bf16.mxu0 %v1088_v53  ;;  %4175 = vmatpush1.bf16.msra.mxu0 %v12456_v62  ;;  %v1139_v53 = vor.u32 %v1137_v1, %v1135_v59 }
  0xc0   : > { %4176 = vmatprep.subr.bf16.mxu0 %v12967_v3 }
  0xc3   : > { %4177 = vmatpush1.bf16.msra.mxu0 %v12457_v35  ;;  %v1193_v35 = vshrl.u32 %v12995_v28, 16 }
  0xc4   : > { %4467 = vmatprep.subr.bf16.mxu0 %v12967_v3 }
  0xc6   : > { %3978 = vmatmul.mubr.bf16.gmra.mrb[60].mxu0 %v12803_v4  ;;  %v1105_v4 = vshrl.u32 %v12849_v32, 16 }
  0xc7   : > { %3985 = vmatprep.mubr.bf16.mxu0 %v1096_v0  ;;  %v1153_v0 = vshrl.u32 %v12940_v39, 16 }
  0xc8   : > { %v1107_v23 = vor.u32 %v1105_v4, %v1103_v21 }
  0xca   : > { %v1112_v25 = vsel %vm956_vm0, %v1107_v23, %v1111_v24  ;;  %v1181_v23 = vshll.u32 %v12983_v50, 16 }
  0xce   : > { %3986 = vmatmul.mubr.bf16.gmra.mrb[64].mxu0 %v12816_v9  ;;  %v251_v9 = vld [vmem:[%s12686_s25 + $0x248] sm:$0xff] }
  0xcf   : > { %3993 = vmatprep.mubr.bf16.mxu0 %v1104_v14  ;;  %v13065_v55 = vpack.c.bf16 %v251_v9, %v250_v33  ;;  %v1169_v14 = vshrl.u32 %v12959_v41, 16  ;;  %v1191_v33 = vrot.slane %v1189_v27, 1  ;;  %v12459_v27 = vld [vmem:[%s15806_s1 + $0x108] sm:$0xff]  }
  0xd1   : > { %337 = vst [vmem:[#allocation2 + $0x120] sm:$0xff] %v13065_v55 }
  0xd6   : > { %3994 = vmatmul.mubr.bf16.gmra.mrb[68].mxu0 %v12828_v18  ;;  %v1120_v18 = vsel %vm956_vm0, %v1115_v36, %v1119_v10  ;;  %v1197_v36 = vshll.u32 %v13005_v31, 16  ;;  %v1195_v10 = vor.u32 %v1193_v35, %v1191_v33 }
  0xd7   : > { %4001 = vmatprep.mubr.bf16.mxu0 %v1112_v25  ;;  %v1183_v25 = vrot.slane %v1181_v23, 1 }
  0xd9   : > { %v1187_v51 = vor.u32 %v1185_v26, %v1183_v25 }
  0xdb   : > { %v1192_v9 = vsel %vm956_vm0, %v1187_v51, %v1191_v33  ;;  %v12460_v33 = vld [vmem:[%s15806_s1 + $0x110] sm:$0xff]  }
  0xde   : > { %4002 = vmatmul.mubr.bf16.gmra.mrb[72].mxu0 %v12849_v32  ;;  %v1141_v32 = vshll.u32 %v12928_v30, 16 }
  0xdf   : > { %4009 = vmatprep.mubr.bf16.mxu0 %v1120_v18  ;;  %v1199_v18 = vrot.slane %v1197_v36, 1  ;;  %v12461_v36 = vld [vmem:[%s15806_s1 + $0x118] sm:$0xff]  }
  0xe0   : > { %v1143_v61 = vrot.slane %v1141_v32, 1  ;;  %v1217_v32 = vshrl.u32 %v13027_v60, 16 }
  0xe1   : > { %v1200_v37 = vsel %vm956_vm0, %v1195_v10, %v1199_v18  ;;  %v1203_v45 = vor.u32 %v1201_v40, %v1199_v18  ;;  %v12462_v18 = vld [vmem:[%s15806_s1 + $0x120] sm:$0xff]  }
  0xe2   : > { %v1144_v54 = vsel %vm956_vm0, %v1139_v53, %v1143_v61  ;;  %v1147_v58 = vor.u32 %v1145_v57, %v1143_v61  ;;  %v1221_v53 = vshll.u32 %v13039_v11, 16 }
  0xe6   : > { %4010 = vmatmul.mubr.bf16.gmra.mrb[76].mxu0 %v12866_v43  ;;  %v1149_v43 = vshll.u32 %v12940_v39, 16 }
  0xe7   : > { %4017 = vmatprep.mubr.bf16.mxu0 %v1128_v38  ;;  %v1207_v38 = vrot.slane %v1205_v42, 1  ;;  %v12463_v42 = vld [vmem:[%s15806_s1 + $0x128] sm:$0xff]  }
  0xe8   : > { %v1151_v63 = vrot.slane %v1149_v43, 1  ;;  %v1225_v43 = vshrl.u32 %v13039_v11, 16 }
  0xe9   : > { %v1208_v46 = vsel %vm956_vm0, %v1203_v45, %v1207_v38  ;;  %v1211_v59 = vor.u32 %v1209_v47, %v1207_v38  ;;  %v12464_v38 = vld [vmem:[%s15806_s1 + $0x130] sm:$0xff]  }
  0xea   : > { %v1152_v17 = vsel %vm956_vm0, %v1147_v58, %v1151_v63  ;;  %v1155_v2 = vor.u32 %v1153_v0, %v1151_v63  ;;  %v1229_v58 = vshll.u32 %v13049_v22, 16 }
  0xee   : > { %4018 = vmatmul.mubr.bf16.gmra.mrb[80].mxu0 %v12883_v56  ;;  %v1157_v56 = vshll.u32 %v12950_v12, 16 }
  0xef   : > { %4025 = vmatprep.mubr.bf16.mxu0 %v1136_v52  ;;  %v1215_v52 = vrot.slane %v1213_v48, 1  ;;  %v12465_v48 = vld [vmem:[%s15806_s1 + $0x138] sm:$0xff]  }
  0xf0   : > { %v1159_v44 = vrot.slane %v1157_v56, 1  ;;  %v1233_v56 = vshrl.u32 %v13049_v22, 16 }
  0xf1   : > { %v1216_v1 = vsel %vm956_vm0, %v1211_v59, %v1215_v52  ;;  %v1219_v61 = vor.u32 %v1217_v32, %v1215_v52  ;;  %v12466_v52 = vld [vmem:[%s15806_s1 + $0x140] sm:$0xff]   ;;  %v12572_v32 = vld [vmem:[#allocation2 + $0x38] sm:$0xff] }
  0xf2   : > { %v1160_v5 = vsel %vm956_vm0, %v1155_v2, %v1159_v44  ;;  %v1163_v62 = vor.u32 %v1161_v7, %v1159_v44  ;;  %v1237_v2 = vshll.u32 %v13059_v34, 16  ;;  %v955_v7 = vld [vmem:[#allocation2 + $0x120] sm:$0x1] }
  0xf6   : > { %4026 = vmatmul.mubr.bf16.gmra.mrb[84].mxu0 %v12900_v6  ;;  %v1165_v6 = vshll.u32 %v12959_v41, 16 }
  0xf7   : > { %4033 = vmatprep.mubr.bf16.mxu0 %v1144_v54  ;;  %v1223_v54 = vrot.slane %v1221_v53, 1 }
  0xf8   : > { %v1167_v13 = vrot.slane %v1165_v6, 1 }
  0xf9   : > { %v1224_v57 = vsel %vm956_vm0, %v1219_v61, %v1223_v54  ;;  %v1227_v63 = vor.u32 %v1225_v43, %v1223_v54  ;;  %v12467_v61 = vld [vmem:[%s15806_s1 + $0x148] sm:$0xff]   ;;  %v1409_v43 = vrot.slane %v12572_v32, 1 }
  0xfa   : > { %v1168_v21 = vsel %vm956_vm0, %v1163_v62, %v1167_v13  ;;  %v1171_v4 = vor.u32 %v1169_v14, %v1167_v13  ;;  %v1241_v62 = vshrl.u32 %v13059_v34, 16  ;;  %v1245_v13 = vshll.u32 %v955_v7, 16  ;;  %v12576_v7 = vld [vmem:[#allocation2 + $0x58] sm:$0xff] }
  0xfc   : > { %v1247_v14 = vrot.slane %v1245_v13, 1 }
  0xfe   : > { %4034 = vmatmul.mubr.bf16.gmra.mrb[88].mxu0 %v12917_v20  ;;  %v1173_v20 = vshll.u32 %v12974_v8, 16 }
  0xff   : > { %4041 = vmatprep.mubr.bf16.mxu0 %v1152_v17  ;;  %v1231_v17 = vrot.slane %v1229_v58, 1 }
 0x100   : > { %v1175_v15 = vrot.slane %v1173_v20, 1 }
 0x101   : > { %v1232_v0 = vsel %vm956_vm0, %v1227_v63, %v1231_v17  ;;  %v1235_v44 = vor.u32 %v1233_v56, %v1231_v17  ;;  %v12468_v63 = vld [vmem:[%s15806_s1 + $0x150] sm:$0xff]   ;;  %v12574_v17 = vld [vmem:[#allocation2 + $0x48] sm:$0xff] }
 0x102   : > { %v1176_v16 = vsel %vm956_vm0, %v1171_v4, %v1175_v15  ;;  %v1179_v24 = vor.u32 %v1177_v19, %v1175_v15  ;;  %v13135_v4 = vld [vmem:[#allocation2 + $0x10] sm:$0xff]  ;;  %v1321_v15 = vld [vmem:[#allocation2] sm:$0xfe] }
 0x103   : > { %v1396_v19 = vrot.slane %v1321_v15, 1  ;;  %v1399_v26 = vrot.slane %v13135_v4, 1  ;;  %v12578_v15 = vld [vmem:[#allocation2 + $0x68] sm:$0xff] }
 0x104   : > { %v1184_v29 = vsel %vm956_vm0, %v1179_v24, %v1183_v25  ;;  %v12458_v25 = vld [vmem:[%s15806_s1 + $0x100] sm:$0xff]  }
 0x106   : > { %4042 = vmatmul.mubr.bf16.gmra.mrb[92].mxu0 %v12928_v30 }
 0x107   : > { %4049 = vmatprep.mubr.bf16.mxu0 %v1160_v5  ;;  %v1239_v5 = vrot.slane %v1237_v2, 1  ;;  %v12575_v2 = vld [vmem:[#allocation2 + $0x50] sm:$0xff] }
 0x109   : > { %v1240_v6 = vsel %vm956_vm0, %v1235_v44, %v1239_v5  ;;  %v1413_v44 = vrot.slane %v12574_v17, 1 }
 0x10e   : > { %4050 = vmatmul.mubr.bf16.gmra.mrb[96].mxu0 %v12940_v39 }
 0x10f   : > { %4057 = vmatprep.mubr.bf16.mxu0 %v1168_v21  ;;  %v1243_v21 = vor.u32 %v1241_v62, %v1239_v5  ;;  %v12469_v62 = vld [vmem:[%s15806_s1 + $0x158] sm:$0xff]  }
 0x111   : > { %v1248_v20 = vsel %vm956_vm0, %v1243_v21, %v1247_v14  ;;  %v12577_v21 = vld [vmem:[#allocation2 + $0x60] sm:$0xff]  ;;  %v1417_v14 = vrot.slane %v12576_v7, 1 }
 0x116   : > { %4058 = vmatmul.mubr.bf16.gmra.mrb[100].mxu0 %v12950_v12 }
 0x117   : > { %4065 = vmatprep.mubr.bf16.mxu0 %v1176_v16  ;;  %v1322_v16 = vld [vmem:[#allocation2 + $0x8] sm:$0xff] }
 0x118   : > { %v1397_v23 = vrot.slane %v1322_v16, 1  ;;  %v1419_v16 = vrot.slane %v12577_v21, 1 }
 0x11a   : > { %v1398_v24 = vsel %vm1395_vm1, %v1396_v19, %v1397_v23  ;;  %v1400_v51 = vsel %vm1395_vm1, %v1397_v23, %v1399_v26  ;;  %v1420_v19 = vsel %vm1395_vm1, %v1417_v14, %v1419_v16  ;;  %v12470_v23 = vld [vmem:[%s15806_s1 + $0x160] sm:$0xff]  }
 0x11e   : > { %4066 = vmatmul.mubr.bf16.gmra.mrb[104].mxu0 %v12959_v41 }
 0x11f   : > { %4073 = vmatprep.mubr.bf16.mxu0 %v1184_v29  ;;  %v13143_v29 = vld [vmem:[#allocation2 + $0x18] sm:$0xff] }
 0x120   : > { %v13160_v35 = vrot.slane %v13143_v29, 1 }
 0x122   : > { %v1402_v10 = vsel %vm1395_vm1, %v1399_v26, %v13160_v35 }
 0x126   : > { %4074 = vmatmul.mubr.bf16.gmra.mrb[108].mxu0 %v12974_v8 }
 0x127   : > { %4081 = vmatprep.mubr.bf16.mxu0 %v1192_v9  ;;  %v13155_v9 = vld [vmem:[#allocation2 + $0x20] sm:$0xff] }
 0x128   : > { %v1403_v40 = vrot.slane %v13155_v9, 1 }
 0x12a   : > { %v13182_v45 = vsel %vm1395_vm1, %v13160_v35, %v1403_v40 }
 0x12e   : > { %4082 = vmatmul.mubr.bf16.gmra.mrb[112].mxu0 %v12983_v50 }
 0x12f   : > { %4089 = vmatprep.mubr.bf16.mxu0 %v1200_v37  ;;  %v13171_v37 = vld [vmem:[#allocation2 + $0x28] sm:$0xff] }
 0x130   : > { %v1405_v47 = vrot.slane %v13171_v37, 1 }
 0x132   : > { %v13195_v59 = vsel %vm1395_vm1, %v1403_v40, %v1405_v47 }
 0x136   : > { %4090 = vmatmul.mubr.bf16.gmra.mrb[116].mxu0 %v12995_v28 }
 0x137   : > { %4097 = vmatprep.mubr.bf16.mxu0 %v1208_v46  ;;  %v12571_v46 = vld [vmem:[#allocation2 + $0x30] sm:$0xff] }
 0x13e   : > { %4098 = vmatmul.mubr.bf16.gmra.mrb[120].mxu0 %v13005_v31 }
 0x13f   : > { %4105 = vmatprep.mubr.bf16.mxu0 %v1216_v1  ;;  %v13200_v1 = vld [vmem:[#allocation2 + $0x30] sm:$0xff] }
 0x140   : > { %v13205_v53 = vrot.slane %v13200_v1, 1 }
 0x142   : > { %v13213_v54 = vsel %vm1395_vm1, %v1405_v47, %v13205_v53  ;;  %v1410_v58 = vsel %vm1395_vm1, %v13205_v53, %v1409_v43  ;;  %v12472_v47 = vld [vmem:[%s15806_s1 + $0x170] sm:$0xff]  }
 0x146   : > { %4106 = vmatmul.mubr.bf16.gmra.mrb[124].mxu0 %v13017_v49 }
 0x147   : > { %4113 = vmatprep.mubr.bf16.mxu0 %v1224_v57  ;;  %v12573_v57 = vld [vmem:[#allocation2 + $0x40] sm:$0xff] }
 0x14e   : > { %4114 = vmatmul.mubr.bf16.gmra.mrb[128].mxu0 %v13027_v60 }
 0x14f   : > { %4121 = vmatprep.mubr.bf16.mxu0 %v1232_v0  ;;  %v1411_v0 = vrot.slane %v12573_v57, 1 }
 0x151   : > { %v1412_v56 = vsel %vm1395_vm1, %v1409_v43, %v1411_v0  ;;  %v1414_v5 = vsel %vm1395_vm1, %v1411_v0, %v1413_v44 }
 0x156   : > { %4122 = vmatmul.mubr.bf16.gmra.mrb[132].mxu0 %v13039_v11 }
 0x157   : > { %4129 = vmatprep.mubr.bf16.mxu0 %v1240_v6  ;;  %v1415_v6 = vrot.slane %v12575_v2, 1 }
 0x159   : > { %v1416_v13 = vsel %vm1395_vm1, %v1413_v44, %v1415_v6  ;;  %v12586_v44 = vld [vmem:[#allocation2 + $0xa8] sm:$0xff] }
 0x15e   : > { %4130 = vmatmul.mubr.bf16.gmra.mrb[136].mxu0 %v13049_v22 }
 0x15f   : > { %4137 = vmatprep.mubr.bf16.mxu0 %v1248_v20  ;;  %v1418_v20 = vsel %vm1395_vm1, %v1415_v6, %v1417_v14 }
 0x166   : > { %4138 = vmatmul.mubr.bf16.gmra.mrb[140].mxu0 %v13059_v34 }
 0x167   : > { %4178 = vmatprep.mubr.bf16.mxu0 %v13135_v4 }
 0x16e   : > { %4179 = vmatmul.mubr.bf16.vlgmr.msra.gmra.mrb[0].mxu0 %v1398_v24  ;;  %v12579_v24 = vld [vmem:[#allocation2 + $0x70] sm:$0xff] }
 0x16f   : > { %4468 = vmatpush1.bf16.msra.mxu0 %v12458_v25  ;;  %4186 = vmatprep.mubr.bf16.mxu0 %v13143_v29  ;;  %v1421_v25 = vrot.slane %v12578_v15, 1 }
 0x170   : > { %4469 = vmatprep.subr.bf16.mxu0 %v12967_v3 }
 0x171   : > { %v1422_v26 = vsel %vm1395_vm1, %v1419_v16, %v1421_v25 }
 0x173   : > { %4470 = vmatpush1.bf16.msra.mxu0 %v12459_v27  ;;  %v12580_v27 = vld [vmem:[#allocation2 + $0x78] sm:$0xff] }
 0x174   : > { %4471 = vmatprep.subr.bf16.mxu0 %v12967_v3 }
 0x176   : > { %4187 = vmatmul.mubr.bf16.gmra.mrb[4].mxu0 %v1400_v51  ;;  %v1423_v51 = vrot.slane %v12579_v24, 1 }
 0x177   : > { %4194 = vmatprep.mubr.bf16.mxu0 %v13155_v9  ;;  %4472 = vmatpush1.bf16.msra.mxu0 %v12460_v33 }
 0x178   : > { %4473 = vmatprep.subr.bf16.mxu0 %v12967_v3  ;;  %v1424_v33 = vsel %vm1395_vm1, %v1421_v25, %v1423_v51 }
 0x17b   : > { %4474 = vmatpush1.bf16.msra.mxu0 %v12461_v36  ;;  %v12471_v36 = vld [vmem:[%s15806_s1 + $0x168] sm:$0xff]  }
 0x17c   : > { %4475 = vmatprep.subr.bf16.mxu0 %v12967_v3 }
 0x17e   : > { %4195 = vmatmul.mubr.bf16.gmra.mrb[8].mxu0 %v1402_v10  ;;  %v12581_v10 = vld [vmem:[#allocation2 + $0x80] sm:$0xff] }
 0x17f   : > { %4202 = vmatprep.mubr.bf16.mxu0 %v13171_v37  ;;  %4476 = vmatpush1.bf16.msra.mxu0 %v12462_v18  ;;  %v1425_v18 = vrot.slane %v12580_v27, 1 }
 0x180   : > { %4477 = vmatprep.subr.bf16.mxu0 %v12967_v3 }
 0x181   : > { %v1426_v40 = vsel %vm1395_vm1, %v1423_v51, %v1425_v18 }
 0x183   : > { %4478 = vmatpush1.bf16.msra.mxu0 %v12463_v42  ;;  %v12582_v42 = vld [vmem:[#allocation2 + $0x88] sm:$0xff] }
 0x184   : > { %4479 = vmatprep.subr.bf16.mxu0 %v12967_v3 }
 0x186   : > { %4203 = vmatmul.mubr.bf16.gmra.mrb[12].mxu0 %v13182_v45 }
 0x187   : > { %4210 = vmatprep.mubr.bf16.mxu0 %v12571_v46  ;;  %4480 = vmatpush1.bf16.msra.mxu0 %v12464_v38  ;;  %v1427_v38 = vrot.slane %v12581_v10, 1 }
 0x188   : > { %4481 = vmatprep.subr.bf16.mxu0 %v12967_v3 }
 0x189   : > { %v1428_v46 = vsel %vm1395_vm1, %v1425_v18, %v1427_v38 }
 0x18b   : > { %4482 = vmatpush1.bf16.msra.mxu0 %v12465_v48  ;;  %v12583_v48 = vld [vmem:[#allocation2 + $0x90] sm:$0xff] }
 0x18c   : > { %4483 = vmatprep.subr.bf16.mxu0 %v12967_v3 }
 0x18e   : > { %4211 = vmatmul.mubr.bf16.gmra.mrb[16].mxu0 %v13195_v59 }
 0x18f   : > { %4218 = vmatprep.mubr.bf16.mxu0 %v12572_v32  ;;  %4484 = vmatpush1.bf16.msra.mxu0 %v12466_v52  ;;  %v1429_v52 = vrot.slane %v12582_v42, 1 }
 0x190   : > { %4485 = vmatprep.subr.bf16.mxu0 %v12967_v3 }
 0x191   : > { %v1430_v32 = vsel %vm1395_vm1, %v1427_v38, %v1429_v52 }
 0x193   : > { %4486 = vmatpush1.bf16.msra.mxu0 %v12467_v61  ;;  %v12584_v61 = vld [vmem:[#allocation2 + $0x98] sm:$0xff] }
 0x194   : > { %4487 = vmatprep.subr.bf16.mxu0 %v12967_v3 }
 0x196   : > { %4219 = vmatmul.mubr.bf16.gmra.mrb[20].mxu0 %v13213_v54 }
 0x197   : > { %4226 = vmatprep.mubr.bf16.mxu0 %v12573_v57  ;;  %4488 = vmatpush1.bf16.msra.mxu0 %v12468_v63  ;;  %v1431_v57 = vrot.slane %v12583_v48, 1  ;;  %v1433_v63 = vrot.slane %v12584_v61, 1 }
 0x198   : > { %4489 = vmatprep.subr.bf16.mxu0 %v12967_v3 }
 0x199   : > { %v1432_v43 = vsel %vm1395_vm1, %v1429_v52, %v1431_v57  ;;  %v1434_v0 = vsel %vm1395_vm1, %v1431_v57, %v1433_v63 }
 0x19b   : > { %4490 = vmatpush1.bf16.msra.mxu0 %v12469_v62  ;;  %v12587_v62 = vld [vmem:[#allocation2 + $0xb0] sm:$0xff] }
 0x19c   : > { %4491 = vmatprep.subr.bf16.mxu0 %v12967_v3  ;;  %v1439_v14 = vrot.slane %v12587_v62, 1 }
 0x19e   : > { %4227 = vmatmul.mubr.bf16.gmra.mrb[24].mxu0 %v1410_v58  ;;  %v12585_v58 = vld [vmem:[#allocation2 + $0xa0] sm:$0xff] }
 0x19f   : > { %4234 = vmatprep.mubr.bf16.mxu0 %v12574_v17  ;;  %4492 = vmatpush1.bf16.msra.mxu0 %v12470_v23  ;;  %v12473_v17 = vld [vmem:[%s15806_s1 + $0x178] sm:$0xff]  }
 0x1a0   : > { %4493 = vmatprep.subr.bf16.mxu0 %v12967_v3 }
 0x1a3   : > { %4494 = vmatpush1.bf16.msra.mxu0 %v12471_v36 }
 0x1a4   : > { %4495 = vmatprep.subr.bf16.mxu0 %v12967_v3 }
 0x1a6   : > { %4235 = vmatmul.mubr.bf16.gmra.mrb[28].mxu0 %v1412_v56  ;;  %v252_v56 = vld [vmem:[%s12686_s25 + $0x250] sm:$0xff] }
 0x1a7   : > { %4242 = vmatprep.mubr.bf16.mxu0 %v12575_v2  ;;  %4496 = vmatpush1.bf16.msra.mxu0 %v12472_v47  ;;  %v253_v2 = vld [vmem:[%s12686_s25 + $0x258] sm:$0xff]  ;;  %v2014_v47 = vld [vmem:[#allocation2 + $0x10] sm:$0xfe] }
 0x1a8   : > { %4497 = vmatprep.subr.bf16.mxu0 %v12967_v3  ;;  %v2088_v52 = vrot.slane %v2014_v47, 1 }
 0x1ab   : > { %4498 = vmatpush1.bf16.msra.mxu0 %v12473_v17  ;;  %v1662_v17 = vshrl.u32 %v13143_v29, 16 }
 0x1ac   : > { %4788 = vmatprep.subr.bf16.mxu0 %v12967_v3 }
 0x1ae   : > { %4243 = vmatmul.mubr.bf16.gmra.mrb[32].mxu0 %v1414_v5  ;;  %v1435_v5 = vrot.slane %v12585_v58, 1 }
 0x1af   : > { %4250 = vmatprep.mubr.bf16.mxu0 %v12576_v7  ;;  %v13257_v7 = vpack.c.bf16 %v253_v2, %v252_v56  ;;  %v12475_v56 = vld [vmem:[%s15806_s1 + $0x188] sm:$0xff]  }
 0x1b0   : > { %v1436_v6 = vsel %vm1395_vm1, %v1433_v63, %v1435_v5  ;;  %v12474_v63 = vld [vmem:[%s15806_s1 + $0x180] sm:$0xff]  }
 0x1b1   : > { %338 = vst [vmem:[#allocation2 + $0x128] sm:$0xff] %v13257_v7 }
 0x1b6   : > { %4251 = vmatmul.mubr.bf16.gmra.mrb[36].mxu0 %v1416_v13  ;;  %v1437_v13 = vrot.slane %v12586_v44, 1 }
 0x1b7   : > { %4258 = vmatprep.mubr.bf16.mxu0 %v12577_v21 }
 0x1b8   : > { %v1438_v21 = vsel %vm1395_vm1, %v1435_v5, %v1437_v13  ;;  %v12476_v5 = vld [vmem:[%s15806_s1 + $0x190] sm:$0xff]  }
 0x1be   : > { %4259 = vmatmul.mubr.bf16.gmra.mrb[40].mxu0 %v1418_v20  ;;  %v1440_v20 = vsel %vm1395_vm1, %v1437_v13, %v1439_v14  ;;  %v1678_v13 = vshrl.u32 %v13171_v37, 16 }
 0x1bf   : > { %4266 = vmatprep.mubr.bf16.mxu0 %v12578_v15  ;;  %v1441_v15 = vrot.slane %v12928_v30, 1 }
 0x1c1   : > { %v1442_v16 = vsel %vm1395_vm1, %v1439_v14, %v1441_v15  ;;  %v2019_v14 = vld [vmem:[#allocation2 + $0x38] sm:$0xff] }
 0x1c6   : > { %4267 = vmatmul.mubr.bf16.gmra.mrb[44].mxu0 %v1420_v19  ;;  %v1443_v19 = vrot.slane %v12940_v39, 1 }
 0x1c7   : > { %4274 = vmatprep.mubr.bf16.mxu0 %v12579_v24  ;;  %v1445_v24 = vrot.slane %v12950_v12, 1 }
 0x1c8   : > { %v1444_v23 = vsel %vm1395_vm1, %v1441_v15, %v1443_v19 }
 0x1c9   : > { %v1446_v25 = vsel %vm1395_vm1, %v1443_v19, %v1445_v24 }
 0x1ce   : > { %4275 = vmatmul.mubr.bf16.gmra.mrb[48].mxu0 %v1422_v26 }
 0x1cf   : > { %4282 = vmatprep.mubr.bf16.mxu0 %v12580_v27 }
 0x1d6   : > { %4283 = vmatmul.mubr.bf16.gmra.mrb[52].mxu0 %v1424_v33 }
 0x1d7   : > { %4290 = vmatprep.mubr.bf16.mxu0 %v12581_v10 }
 0x1de   : > { %4291 = vmatmul.mubr.bf16.gmra.mrb[56].mxu0 %v1426_v40 }
 0x1df   : > { %4298 = vmatprep.mubr.bf16.mxu0 %v12582_v42 }
 0x1e6   : > { %4299 = vmatmul.mubr.bf16.gmra.mrb[60].mxu0 %v1428_v46  ;;  %v1357_v46 = vld [vmem:[#allocation2 + $0x120] sm:$0x1] }
 0x1e7   : > { %4306 = vmatprep.mubr.bf16.mxu0 %v12583_v48  ;;  %v1653_v48 = vshll.u32 %v13135_v4, 16 }
 0x1ee   : > { %4307 = vmatmul.mubr.bf16.gmra.mrb[64].mxu0 %v1430_v32  ;;  %v1651_v32 = vshrl.u32 %v13135_v4, 16  ;;  %v1666_v4 = vshll.u32 %v13155_v9, 16 }
 0x1ef   : > { %4314 = vmatprep.mubr.bf16.mxu0 %v12584_v61  ;;  %v1655_v61 = vrot.slane %v1653_v48, 1 }
 0x1f1   : > { %v1656_v57 = vor.u32 %v1655_v61, %v1651_v32  ;;  %v12484_v32 = vld [vmem:[%s15806_s1 + $0x1d0] sm:$0xff]  }
 0x1f6   : > { %4315 = vmatmul.mubr.bf16.gmra.mrb[68].mxu0 %v1432_v43 }
 0x1f7   : > { %4322 = vmatprep.mubr.bf16.mxu0 %v12585_v58 }
 0x1fe   : > { %4323 = vmatmul.mubr.bf16.gmra.mrb[72].mxu0 %v1434_v0 }
 0x1ff   : > { %4330 = vmatprep.mubr.bf16.mxu0 %v12586_v44  ;;  %v1670_v44 = vshrl.u32 %v13155_v9, 16 }
 0x206   : > { %4331 = vmatmul.mubr.bf16.gmra.mrb[76].mxu0 %v1436_v6 }
 0x207   : > { %4338 = vmatprep.mubr.bf16.mxu0 %v12587_v62  ;;  %v12477_v62 = vld [vmem:[%s15806_s1 + $0x198] sm:$0xff]  }
 0x20e   : > { %4339 = vmatmul.mubr.bf16.gmra.mrb[80].mxu0 %v1438_v21  ;;  %v1682_v21 = vshll.u32 %v13200_v1, 16 }
 0x20f   : > { %4346 = vmatprep.mubr.bf16.mxu0 %v12928_v30  ;;  %v1447_v30 = vrot.slane %v12959_v41, 1 }
 0x210   : > { %v1684_v15 = vrot.slane %v1682_v21, 1 }
 0x211   : > { %v1448_v26 = vsel %vm1395_vm1, %v1445_v24, %v1447_v30  ;;  %v1690_v24 = vshll.u32 %v2019_v14, 16 }
 0x216   : > { %4347 = vmatmul.mubr.bf16.gmra.mrb[84].mxu0 %v1440_v20 }
 0x217   : > { %4354 = vmatprep.mubr.bf16.mxu0 %v12940_v39  ;;  %v1449_v39 = vrot.slane %v12974_v8, 1 }
 0x219   : > { %v1450_v27 = vsel %vm1395_vm1, %v1447_v30, %v1449_v39  ;;  %v2020_v30 = vld [vmem:[#allocation2 + $0x40] sm:$0xff] }
 0x21e   : > { %4355 = vmatmul.mubr.bf16.gmra.mrb[88].mxu0 %v1442_v16  ;;  %v13344_v16 = vrot.slane %v2019_v14, 1 }
 0x21f   : > { %4362 = vmatprep.mubr.bf16.mxu0 %v12950_v12  ;;  %v1451_v12 = vrot.slane %v12983_v50, 1 }
 0x221   : > { %v1452_v51 = vsel %vm1395_vm1, %v1449_v39, %v1451_v12  ;;  %v13356_v39 = vrot.slane %v1690_v24, 1 }
 0x226   : > { %4363 = vmatmul.mubr.bf16.gmra.mrb[92].mxu0 %v1444_v23  ;;  %v1686_v23 = vshrl.u32 %v13200_v1, 16  ;;  %v12481_v1 = vld [vmem:[%s15806_s1 + $0x1b8] sm:$0xff]  }
 0x227   : > { %4370 = vmatprep.mubr.bf16.mxu0 %v12959_v41  ;;  %v1453_v41 = vrot.slane %v12995_v28, 1 }
 0x229   : > { %v1454_v33 = vsel %vm1395_vm1, %v1451_v12, %v1453_v41  ;;  %v13361_v12 = vld [vmem:[#allocation4] sm:$0xff] }
 0x22e   : > { %4371 = vmatmul.mubr.bf16.gmra.mrb[96].mxu0 %v1446_v25  ;;  %v2098_v25 = vsel %vm1395_vm1, %v13205_v53, %v13344_v16 }
 0x22f   : > { %4378 = vmatprep.mubr.bf16.mxu0 %v12974_v8  ;;  %v1455_v8 = vrot.slane %v13005_v31, 1 }
 0x231   : > { %v1456_v36 = vsel %vm1395_vm1, %v1453_v41, %v1455_v8  ;;  %v12482_v41 = vld [vmem:[%s15806_s1 + $0x1c0] sm:$0xff]  }
 0x236   : > { %4379 = vmatmul.mubr.bf16.gmra.mrb[100].mxu0 %v1448_v26  ;;  %v1688_v26 = vor.u32 %v1686_v23, %v1684_v15 }
 0x237   : > { %4386 = vmatprep.mubr.bf16.mxu0 %v12983_v50  ;;  %v1457_v50 = vrot.slane %v13017_v49, 1 }
 0x238   : > { %v1693_v53 = vsel %vm956_vm0, %v1688_v26, %v13356_v39 }
 0x239   : > { %v1458_v10 = vsel %vm1395_vm1, %v1455_v8, %v1457_v50  ;;  %v2021_v8 = vld [vmem:[#allocation2 + $0x48] sm:$0xff] }
 0x23e   : > { %4387 = vmatmul.mubr.bf16.gmra.mrb[104].mxu0 %v1450_v27  ;;  %v2099_v27 = vrot.slane %v2020_v30, 1 }
 0x23f   : > { %4394 = vmatprep.mubr.bf16.mxu0 %v12995_v28  ;;  %v1459_v28 = vrot.slane %v13027_v60, 1 }
 0x241   : > { %v1460_v18 = vsel %vm1395_vm1, %v1457_v50, %v1459_v28 }
 0x246   : > { %4395 = vmatmul.mubr.bf16.gmra.mrb[108].mxu0 %v1452_v51  ;;  %v1698_v51 = vshll.u32 %v2020_v30, 16 }
 0x247   : > { %4402 = vmatprep.mubr.bf16.mxu0 %v13005_v31  ;;  %v1461_v31 = vrot.slane %v13039_v11, 1 }
 0x248   : > { %v1700_v50 = vrot.slane %v1698_v51, 1 }
 0x249   : > { %v1462_v40 = vsel %vm1395_vm1, %v1459_v28, %v1461_v31  ;;  %v2101_v28 = vrot.slane %v2021_v8, 1 }
 0x24e   : > { %4403 = vmatmul.mubr.bf16.gmra.mrb[112].mxu0 %v1454_v33  ;;  %v13371_v33 = vsel %vm1395_vm1, %v13344_v16, %v2099_v27 }
 0x24f   : > { %4410 = vmatprep.mubr.bf16.mxu0 %v13017_v49  ;;  %v1463_v49 = vrot.slane %v13049_v22, 1 }
 0x251   : > { %v1464_v42 = vsel %vm1395_vm1, %v1461_v31, %v1463_v49  ;;  %v1702_v31 = vshrl.u32 %v2020_v30, 16  ;;  %v2027_v30 = vld [vmem:[#allocation2 + $0x78] sm:$0xff] }
 0x252   : > { %v1754_v51 = vshll.u32 %v2027_v30, 16 }
 0x256   : > { %4411 = vmatmul.mubr.bf16.gmra.mrb[116].mxu0 %v1456_v36 }
 0x257   : > { %4418 = vmatprep.mubr.bf16.mxu0 %v13027_v60  ;;  %v1465_v60 = vrot.slane %v13059_v34, 1 }
 0x259   : > { %v1466_v38 = vsel %vm1395_vm1, %v1463_v49, %v1465_v60  ;;  %v13384_v49 = vsel %vm1395_vm1, %v2099_v27, %v2101_v28  ;;  %v2113_v27 = vrot.slane %v2027_v30, 1 }
 0x25e   : > { %4419 = vmatmul.mubr.bf16.gmra.mrb[120].mxu0 %v1458_v10  ;;  %v12483_v10 = vld [vmem:[%s15806_s1 + $0x1c8] sm:$0xff]  }
 0x25f   : > { %4426 = vmatprep.mubr.bf16.mxu0 %v13039_v11  ;;  %v1467_v11 = vrot.slane %v1357_v46, 1 }
 0x266   : > { %4427 = vmatmul.mubr.bf16.gmra.mrb[124].mxu0 %v1460_v18 }
 0x267   : > { %4434 = vmatprep.mubr.bf16.mxu0 %v13049_v22  ;;  %v1468_v22 = vsel %vm1395_vm1, %v1465_v60, %v1467_v11  ;;  %v1704_v60 = vor.u32 %v1702_v31, %v1700_v50  ;;  %v1710_v11 = vshrl.u32 %v2021_v8, 16 }
 0x26e   : > { %4435 = vmatmul.mubr.bf16.gmra.mrb[128].mxu0 %v1462_v40  ;;  %v1706_v40 = vshll.u32 %v2021_v8, 16  ;;  %v2028_v8 = vld [vmem:[#allocation2 + $0x80] sm:$0xff] }
 0x26f   : > { %4442 = vmatprep.mubr.bf16.mxu0 %v13059_v34  ;;  %v2090_v34 = vsel %vm1395_vm1, %v2088_v52, %v13160_v35  ;;  %v1668_v35 = vrot.slane %v1666_v4, 1 }
 0x276   : > { %4443 = vmatmul.mubr.bf16.gmra.mrb[132].mxu0 %v1464_v42  ;;  %v2022_v42 = vld [vmem:[#allocation2 + $0x50] sm:$0xff] }
 0x277   : > { %4450 = vmatprep.mubr.bf16.mxu0 %v13065_v55  ;;  %v1658_v55 = vshll.u32 %v13143_v29, 16  ;;  %v1674_v29 = vshll.u32 %v13171_v37, 16  ;;  %v12479_v37 = vld [vmem:[%s15806_s1 + $0x1a8] sm:$0xff]   ;;  %v2103_v46 = vrot.slane %v2022_v42, 1  ;;  %v1714_v48 = vshll.u32 %v2022_v42, 16 }
 0x279   : > { %v1660_v43 = vrot.slane %v1658_v55, 1  ;;  %v1676_v6 = vrot.slane %v1674_v29, 1  ;;  %v13393_v52 = vsel %vm1395_vm1, %v2101_v28, %v2103_v46  ;;  %v1716_v55 = vrot.slane %v1714_v48, 1 }
 0x27a   : > { %v2115_v28 = vrot.slane %v2028_v8, 1 }
 0x27b   : > { %v1661_v58 = vsel %vm956_vm0, %v1656_v57, %v1660_v43  ;;  %v1664_v0 = vor.u32 %v1662_v17, %v1660_v43  ;;  %v1680_v20 = vor.u32 %v1678_v13, %v1676_v6  ;;  %v1718_v43 = vshrl.u32 %v2022_v42, 16  ;;  %v2024_v17 = vld [vmem:[#allocation2 + $0x60] sm:$0xff] }
 0x27c   : > { %v1734_v21 = vshrl.u32 %v2024_v17, 16  ;;  %v1762_v42 = vshll.u32 %v2028_v8, 16 }
 0x27d   : > { %v1669_v2 = vsel %vm956_vm0, %v1664_v0, %v1668_v35  ;;  %v1685_v19 = vsel %vm956_vm0, %v1680_v20, %v1684_v15  ;;  %v1720_v4 = vor.u32 %v1718_v43, %v1716_v55  ;;  %v2026_v20 = vld [vmem:[#allocation2 + $0x70] sm:$0xff]  ;;  %v12487_v43 = vld [vmem:[%s15806_s1 + $0x1e8] sm:$0xff]  }
 0x27e   : > { %4451 = vmatmul.mubr.bf16.gmra.mrb[136].mxu0 %v1466_v38  ;;  %v1708_v38 = vrot.slane %v1706_v40, 1  ;;  %v1758_v40 = vshrl.u32 %v2027_v30, 16 }
 0x27f   : > { %4458 = vmatprep.mubr.bf16.mxu0 %v13257_v7 }
 0x280   : > { %v13390_v47 = vsel %vm956_vm0, %v1704_v60, %v1708_v38  ;;  %v1712_v61 = vor.u32 %v1710_v11, %v1708_v38  ;;  %v13453_v60 = vsel %vm1395_vm1, %v2113_v27, %v2115_v28  ;;  %v2029_v38 = vld [vmem:[#allocation2 + $0x88] sm:$0xff]  ;;  %v1764_v11 = vrot.slane %v1762_v42, 1 }
 0x281   : > { %v2117_v48 = vrot.slane %v2029_v38, 1 }
 0x282   : > { %v13402_v57 = vsel %vm956_vm0, %v1712_v61, %v1716_v55  ;;  %v1770_v61 = vshll.u32 %v2029_v38, 16 }
 0x283   : > { %v13461_v55 = vsel %vm1395_vm1, %v2115_v28, %v2117_v48 }
 0x286   : > { %4459 = vmatmul.mubr.bf16.gmra.mrb[140].mxu0 %v1468_v22  ;;  %v2023_v22 = vld [vmem:[#allocation2 + $0x58] sm:$0xff] }
 0x287   : > { %4499 = vmatprep.mubr.bf16.mxu0 %v2090_v34  ;;  %v2105_v34 = vrot.slane %v2023_v22, 1 }
 0x28e   : > { %4500 = vmatmul.mubr.bf16.vlgmr.msra.gmra.mrb[0].mxu0 %v1661_v58  ;;  %v1722_v58 = vshll.u32 %v2023_v22, 16 }
 0x28f   : > { %4789 = vmatpush1.bf16.msra.mxu0 %v12474_v63  ;;  %4507 = vmatprep.mubr.bf16.mxu0 %v13182_v45  ;;  %v1672_v45 = vor.u32 %v1670_v44, %v1668_v35  ;;  %v13405_v63 = vsel %vm1395_vm1, %v2103_v46, %v2105_v34  ;;  %v2107_v35 = vrot.slane %v2024_v17, 1  ;;  %v1730_v44 = vshll.u32 %v2024_v17, 16 }
 0x290   : > { %4790 = vmatprep.subr.bf16.mxu0 %v12967_v3  ;;  %v1724_v0 = vrot.slane %v1722_v58, 1  ;;  %v1772_v17 = vrot.slane %v1770_v61, 1  ;;  %v254_v61 = vld [vmem:[%s12686_s25 + $0x260] sm:$0xff] }
 0x291   : > { %v1677_v9 = vsel %vm956_vm0, %v1672_v45, %v1676_v6  ;;  %v13413_v29 = vsel %vm1395_vm1, %v2105_v34, %v2107_v35  ;;  %v1732_v6 = vrot.slane %v1730_v44, 1  ;;  %v2030_v34 = vld [vmem:[#allocation2 + $0x90] sm:$0xff] }
 0x293   : > { %4791 = vmatpush1.bf16.msra.mxu0 %v12475_v56  ;;  %v13410_v56 = vsel %vm956_vm0, %v1720_v4, %v1724_v0  ;;  %v1736_v15 = vor.u32 %v1734_v21, %v1732_v6  ;;  %v13468_v4 = vrot.slane %v2030_v34, 1  ;;  %v1782_v21 = vshrl.u32 %v2030_v34, 16 }
 0x294   : > { %4792 = vmatprep.subr.bf16.mxu0 %v12967_v3 }
 0x295   : > { %v13476_v44 = vsel %vm1395_vm1, %v2117_v48, %v13468_v4  ;;  %v2034_v48 = vld [vmem:[#allocation2 + $0xb0] sm:$0xff] }
 0x296   : > { %4508 = vmatmul.mubr.bf16.gmra.mrb[4].mxu0 %v1669_v2  ;;  %v1726_v2 = vshrl.u32 %v2023_v22, 16 }
 0x297   : > { %4515 = vmatprep.mubr.bf16.mxu0 %v13195_v59  ;;  %4793 = vmatpush1.bf16.msra.mxu0 %v12476_v5  ;;  %v12478_v59 = vld [vmem:[%s15806_s1 + $0x1a0] sm:$0xff]   ;;  %v2025_v5 = vld [vmem:[#allocation2 + $0x68] sm:$0xff] }
 0x298   : > { %4794 = vmatprep.subr.bf16.mxu0 %v12967_v3  ;;  %v1728_v45 = vor.u32 %v1726_v2, %v1724_v0  ;;  %v1742_v24 = vshrl.u32 %v2025_v5, 16  ;;  %v1778_v2 = vshll.u32 %v2030_v34, 16  ;;  %v255_v34 = vld [vmem:[%s12686_s25 + $0x268] sm:$0xff] }
 0x29a   : > { %v13422_v13 = vsel %vm956_vm0, %v1728_v45, %v1732_v6  ;;  %v1780_v6 = vrot.slane %v1778_v2, 1  ;;  %v2127_v2 = vrot.slane %v2034_v48, 1 }
 0x29b   : > { %4795 = vmatpush1.bf16.msra.mxu0 %v12477_v62  ;;  %v12485_v62 = vld [vmem:[%s15806_s1 + $0x1d8] sm:$0xff]  }
 0x29c   : > { %4796 = vmatprep.subr.bf16.mxu0 %v12967_v3 }
 0x29e   : > { %4516 = vmatmul.mubr.bf16.gmra.mrb[8].mxu0 %v1677_v9  ;;  %v2109_v9 = vrot.slane %v2025_v5, 1 }
 0x29f   : > { %4523 = vmatprep.mubr.bf16.mxu0 %v13213_v54  ;;  %4797 = vmatpush1.bf16.msra.mxu0 %v12478_v59  ;;  %v12480_v54 = vld [vmem:[%s15806_s1 + $0x1b0] sm:$0xff]   ;;  %v1738_v59 = vshll.u32 %v2025_v5, 16  ;;  %v2031_v5 = vld [vmem:[#allocation2 + $0x98] sm:$0xff] }
 0x2a0   : > { %4798 = vmatprep.subr.bf16.mxu0 %v12967_v3 }
 0x2a3   : > { %4799 = vmatpush1.bf16.msra.mxu0 %v12479_v37  ;;  %v1740_v37 = vrot.slane %v1738_v59, 1  ;;  %v1786_v59 = vshll.u32 %v2031_v5, 16 }
 0x2a4   : > { %4800 = vmatprep.subr.bf16.mxu0 %v12967_v3  ;;  %v1694_v3 = vshrl.u32 %v2019_v14, 16  ;;  %v13425_v14 = vsel %vm1395_vm1, %v2107_v35, %v2109_v9  ;;  %v1774_v35 = vshrl.u32 %v2029_v38, 16 }
 0x2a5   : > { %v13430_v23 = vsel %vm956_vm0, %v1736_v15, %v1740_v37  ;;  %v1744_v26 = vor.u32 %v1742_v24, %v1740_v37  ;;  %v2032_v15 = vld [vmem:[#allocation2 + $0xa0] sm:$0xff]  ;;  %v12488_v37 = vld [vmem:[%s15806_s1 + $0x1f0] sm:$0xff]   ;;  %v1784_v24 = vor.u32 %v1782_v21, %v1780_v6  ;;  %v12495_v21 = vld [vmem:[%s15806_s1 + $0x228] sm:$0xff]  }
 0x2a6   : > { %4524 = vmatmul.mubr.bf16.gmra.mrb[12].mxu0 %v1685_v19  ;;  %v1696_v36 = vor.u32 %v1694_v3, %v13356_v39  ;;  %v2111_v19 = vrot.slane %v2026_v20, 1  ;;  %v1750_v3 = vshrl.u32 %v2026_v20, 16  ;;  %v13480_v45 = vor.u32 %v1774_v35, %v1772_v17 }
 0x2a7   : > { %4531 = vmatprep.mubr.bf16.mxu0 %v2098_v25  ;;  %4801 = vmatpush1.bf16.msra.mxu0 %v12480_v54  ;;  %v1746_v54 = vshll.u32 %v2026_v20, 16  ;;  %v13492_v30 = vrot.slane %v2032_v15, 1  ;;  %v1798_v42 = vshrl.u32 %v2032_v15, 16  ;;  %v13518_v35 = vpack.c.bf16 %v255_v34, %v254_v61 }
 0x2a8   : > { %4802 = vmatprep.subr.bf16.mxu0 %v13361_v12  ;;  %v13381_v18 = vsel %vm956_vm0, %v1696_v36, %v1700_v50  ;;  %v13433_v25 = vsel %vm1395_vm1, %v2109_v9, %v2111_v19  ;;  %v12486_v36 = vld [vmem:[%s15806_s1 + $0x1e0] sm:$0xff]   ;;  %v1781_v9 = vsel %vm956_vm0, %v13480_v45, %v1780_v6 }
 0x2a9   : > { %339 = vst [vmem:[#allocation2 + $0x130] sm:$0xff] %v13518_v35 }
 0x2ab   : > { %4803 = vmatpush1.bf16.msra.mxu0 %v12481_v1  ;;  %v1748_v1 = vrot.slane %v1746_v54, 1  ;;  %v1788_v54 = vrot.slane %v1786_v59, 1  ;;  %v2035_v59 = vld [vmem:[#allocation2 + $0xb8] sm:$0xff] }
 0x2ac   : > { %4804 = vmatprep.subr.bf16.mxu0 %v13361_v12 }
 0x2ad   : > { %v1752_v50 = vor.u32 %v1750_v3, %v1748_v1 }
 0x2ae   : > { %4532 = vmatmul.mubr.bf16.gmra.mrb[16].mxu0 %v1693_v53  ;;  %v13438_v53 = vsel %vm956_vm0, %v1744_v26, %v1748_v1  ;;  %v1789_v26 = vsel %vm956_vm0, %v1784_v24, %v1788_v54  ;;  %v1790_v1 = vshrl.u32 %v2031_v5, 16 }
 0x2af   : > { %4539 = vmatprep.mubr.bf16.mxu0 %v13371_v33  ;;  %4805 = vmatpush1.bf16.msra.mxu0 %v12482_v41  ;;  %v13441_v41 = vsel %vm1395_vm1, %v2111_v19, %v2113_v27  ;;  %v12489_v19 = vld [vmem:[%s15806_s1 + $0x200] sm:$0xff]   ;;  %v1794_v27 = vshll.u32 %v2032_v15, 16 }
 0x2b0   : > { %4806 = vmatprep.subr.bf16.mxu0 %v13361_v12  ;;  %11286 = vmatprep.subr.bf16.mxu1 %v12489_v19 }
 0x2b1   : > { %11287 = vmatpush3.bf16.msra.mxu1 %v12489_v19  ;;  %v2129_v19 = vrot.slane %v2035_v59, 1 }
 0x2b3   : > { %4807 = vmatpush1.bf16.msra.mxu0 %v12483_v10  ;;  %v1756_v10 = vrot.slane %v1754_v51, 1  ;;  %v12490_v51 = vld [vmem:[%s15806_s1 + $0x208] sm:$0xff]  }
 0x2b4   : > { %4808 = vmatprep.subr.bf16.mxu0 %v13361_v12  ;;  %11288 = vmatprep.subr.bf16.mxu1 %v12490_v51 }
 0x2b5   : > { %v13450_v31 = vsel %vm956_vm0, %v1752_v50, %v1756_v10  ;;  %v1760_v46 = vor.u32 %v1758_v40, %v1756_v10  ;;  %v1792_v50 = vor.u32 %v1790_v1, %v1788_v54  ;;  %v1796_v10 = vrot.slane %v1794_v27, 1  ;;  %11289 = vmatpush3.bf16.msra.mxu1 %v12490_v51  ;;  %v12497_v27 = vld [vmem:[%s15806_s1 + $0x238] sm:$0xff]   ;;  %v2706_v51 = vld [vmem:[#allocation2 + $0x20] sm:$0xfe] }
 0x2b6   : > { %4540 = vmatmul.mubr.bf16.gmra.mrb[20].mxu0 %v13381_v18  ;;  %v1814_v54 = vshrl.u32 %v2034_v48, 16  ;;  %v2130_v1 = vsel %vm1395_vm1, %v2127_v2, %v2129_v19 }
 0x2b7   : > { %4547 = vmatprep.mubr.bf16.mxu0 %v13384_v49  ;;  %4809 = vmatpush1.bf16.msra.mxu0 %v12484_v32  ;;  %v13458_v22 = vsel %vm956_vm0, %v1760_v46, %v1764_v11  ;;  %v1766_v32 = vshrl.u32 %v2028_v8, 16  ;;  %v2033_v8 = vld [vmem:[#allocation2 + $0xa8] sm:$0xff]  ;;  %v1797_v40 = vsel %vm956_vm0, %v1792_v50, %v1796_v10 }
 0x2b8   : > { %4810 = vmatprep.subr.bf16.mxu0 %v13361_v12  ;;  %v2125_v28 = vrot.slane %v2033_v8, 1  ;;  %v1802_v38 = vshll.u32 %v2033_v8, 16  ;;  %v1806_v6 = vshrl.u32 %v2033_v8, 16  ;;  %v13534_v8 = vld [vmem:[#allocation2 + $0x28] sm:$0xff] }
 0x2b9   : > { %v1768_v58 = vor.u32 %v1766_v32, %v1764_v11  ;;  %v12492_v11 = vld [vmem:[%s15806_s1 + $0x218] sm:$0xff]   ;;  %v12493_v32 = vld [vmem:[%s15806_s1 + $0x220] sm:$0xff]   ;;  %v2781_v50 = vrot.slane %v13534_v8, 1 }
 0x2ba   : > { %v2126_v46 = vsel %vm1395_vm1, %v13492_v30, %v2125_v28 }
 0x2bb   : > { %4811 = vmatpush1.bf16.msra.mxu0 %v12485_v62  ;;  %v13472_v0 = vsel %vm956_vm0, %v1768_v58, %v1772_v17  ;;  %v2121_v62 = vrot.slane %v2031_v5, 1  ;;  %v1804_v58 = vrot.slane %v1802_v38, 1  ;;  %v12494_v17 = vld [vmem:[%s15806_s1 + $0x1f8] sm:$0xff]  }
 0x2bc   : > { %4812 = vmatprep.subr.bf16.mxu0 %v13361_v12 }
 0x2bd   : > { %v2122_v20 = vsel %vm1395_vm1, %v13468_v4, %v2121_v62  ;;  %v2124_v3 = vsel %vm1395_vm1, %v2121_v62, %v13492_v30  ;;  %v1810_v62 = vshll.u32 %v2034_v48, 16  ;;  %v1808_v15 = vor.u32 %v1806_v6, %v1804_v58 }
 0x2be   : > { %4548 = vmatmul.mubr.bf16.gmra.mrb[24].mxu0 %v13390_v47 }
 0x2bf   : > { %4555 = vmatprep.mubr.bf16.mxu0 %v13393_v52  ;;  %4813 = vmatpush1.bf16.msra.mxu0 %v12486_v36  ;;  %v12491_v36 = vld [vmem:[%s15806_s1 + $0x210] sm:$0xff]  }
 0x2c0   : > { %4814 = vmatprep.subr.bf16.mxu0 %v13361_v12  ;;  %11290 = vmatprep.subr.bf16.mxu1 %v12491_v36 }
 0x2c1   : > { %11291 = vmatpush3.bf16.msra.mxu1 %v12491_v36  ;;  %v2780_v36 = vrot.slane %v2706_v51, 1 }
 0x2c2   : > { %11292 = vmatprep.subr.bf16.mxu1 %v12492_v11 }
 0x2c3   : > { %4815 = vmatpush1.bf16.msra.mxu0 %v12487_v43  ;;  %v1800_v43 = vor.u32 %v1798_v42, %v1796_v10  ;;  %v13537_v10 = vld [vmem:[#allocation2 + $0x30] sm:$0xff] }
 0x2c4   : > { %4816 = vmatprep.subr.bf16.mxu0 %v13361_v12  ;;  %v2783_v42 = vrot.slane %v13537_v10, 1 }
 0x2c5   : > { %11293 = vmatpush3.bf16.msra.mxu1 %v12492_v11  ;;  %v1805_v5 = vsel %vm956_vm0, %v1800_v43, %v1804_v58  ;;  %v2037_v43 = vld [vmem:[#allocation2 + $0xc8] sm:$0xff] }
 0x2c6   : > { %4556 = vmatmul.mubr.bf16.gmra.mrb[28].mxu0 %v13402_v57  ;;  %11294 = vmatprep.subr.bf16.mxu1 %v12493_v32  ;;  %v2784_v11 = vsel %vm1395_vm1, %v2781_v50, %v2783_v42 }
 0x2c7   : > { %4563 = vmatprep.mubr.bf16.mxu0 %v13405_v63  ;;  %4817 = vmatpush1.bf16.msra.mxu0 %v12488_v37  ;;  %v1812_v37 = vrot.slane %v1810_v62, 1  ;;  %v1834_v62 = vshll.u32 %v2037_v43, 16 }
 0x2c8   : > { %4818 = vmatprep.subr.bf16.mxu0 %v13361_v12 }
 0x2c9   : > { %11295 = vmatpush3.bf16.msra.mxu1 %v12493_v32  ;;  %v1813_v24 = vsel %vm956_vm0, %v1808_v15, %v1812_v37  ;;  %v1822_v32 = vshrl.u32 %v2035_v59, 16  ;;  %v1836_v15 = vrot.slane %v1834_v62, 1 }
 0x2ca   : > { %11296 = vmatprep.subr.bf16.mxu1 %v12495_v21 }
 0x2cb   : > { %4819 = vmatpush1.bf16.msra.mxu0 %v12494_v17 }
 0x2cd   : > { %11297 = vmatpush3.bf16.msra.mxu1 %v12495_v21  ;;  %v2038_v21 = vld [vmem:[#allocation2 + $0xd0] sm:$0xff] }
 0x2ce   : > { %4564 = vmatmul.mubr.bf16.gmra.mrb[32].mxu0 %v13410_v56  ;;  %v1846_v51 = vshrl.u32 %v2038_v21, 16 }
 0x2cf   : > { %4571 = vmatprep.mubr.bf16.mxu0 %v13413_v29 }
 0x2d6   : > { %4572 = vmatmul.mubr.bf16.gmra.mrb[36].mxu0 %v13422_v13 }
 0x2d7   : > { %4579 = vmatprep.mubr.bf16.mxu0 %v13425_v14 }
 0x2de   : > { %4580 = vmatmul.mubr.bf16.gmra.mrb[40].mxu0 %v13430_v23 }
 0x2df   : > { %4587 = vmatprep.mubr.bf16.mxu0 %v13433_v25 }
 0x2e6   : > { %4588 = vmatmul.mubr.bf16.gmra.mrb[44].mxu0 %v13438_v53 }
 0x2e7   : > { %4595 = vmatprep.mubr.bf16.mxu0 %v13441_v41 }
 0x2ee   : > { %4596 = vmatmul.mubr.bf16.gmra.mrb[48].mxu0 %v13450_v31 }
 0x2ef   : > { %4603 = vmatprep.mubr.bf16.mxu0 %v13453_v60 }
 0x2f6   : > { %4604 = vmatmul.mubr.bf16.gmra.mrb[52].mxu0 %v13458_v22 }
 0x2f7   : > { %4611 = vmatprep.mubr.bf16.mxu0 %v13461_v55 }
 0x2fe   : > { %4612 = vmatmul.mubr.bf16.gmra.mrb[56].mxu0 %v13472_v0 }
 0x2ff   : > { %4619 = vmatprep.mubr.bf16.mxu0 %v13476_v44 }
 0x306   : > { %4620 = vmatmul.mubr.bf16.gmra.mrb[60].mxu0 %v1781_v9  ;;  %v2128_v9 = vsel %vm1395_vm1, %v2125_v28, %v2127_v2  ;;  %v1816_v28 = vor.u32 %v1814_v54, %v1812_v37  ;;  %v2133_v2 = vrot.slane %v2037_v43, 1  ;;  %v2135_v37 = vrot.slane %v2038_v21, 1 }
 0x307   : > { %4627 = vmatprep.mubr.bf16.mxu0 %v2122_v20  ;;  %v12496_v20 = vld [vmem:[%s15806_s1 + $0x230] sm:$0xff]   ;;  %v1842_v54 = vshll.u32 %v2038_v21, 16 }
 0x308   : > { %11298 = vmatprep.subr.bf16.mxu1 %v12496_v20 }
 0x309   : > { %11299 = vmatpush3.bf16.msra.mxu1 %v12496_v20 }
 0x30a   : > { %11300 = vmatprep.subr.bf16.mxu1 %v12497_v27 }
 0x30d   : > { %11301 = vmatpush3.bf16.msra.mxu1 %v12497_v27 }
 0x30e   : > { %4628 = vmatmul.mubr.bf16.gmra.mrb[64].mxu0 %v1789_v26  ;;  %v1818_v26 = vshll.u32 %v2035_v59, 16  ;;  %9241 = vmatprep.subr.bf16.mxu1 %v13361_v12  ;;  %v2786_v59 = vsel %vm1395_vm1, %v2783_v42, %v13344_v16  ;;  %v1844_v16 = vrot.slane %v1842_v54, 1 }
 0x30f   : > { %4635 = vmatprep.mubr.bf16.mxu0 %v2124_v3  ;;  %v2036_v3 = vld [vmem:[#allocation2 + $0xc0] sm:$0xff] }
 0x310   : > { %v2131_v38 = vrot.slane %v2036_v3, 1  ;;  %v1826_v61 = vshll.u32 %v2036_v3, 16  ;;  %v1830_v6 = vshrl.u32 %v2036_v3, 16 }
 0x312   : > { %v2132_v34 = vsel %vm1395_vm1, %v2129_v19, %v2131_v38  ;;  %v1828_v17 = vrot.slane %v1826_v61, 1 }
 0x314   : > { %v1832_v20 = vor.u32 %v1830_v6, %v1828_v17 }
 0x316   : > { %4636 = vmatmul.mubr.bf16.gmra.mrb[68].mxu0 %v1797_v40  ;;  %v1820_v40 = vrot.slane %v1818_v26, 1  ;;  %v1837_v19 = vsel %vm956_vm0, %v1832_v20, %v1836_v15  ;;  %v2136_v26 = vsel %vm1395_vm1, %v2133_v2, %v2135_v37 }
 0x317   : > { %4643 = vmatprep.mubr.bf16.mxu0 %v2126_v46  ;;  %v2782_v46 = vsel %vm1395_vm1, %v2780_v36, %v2781_v50  ;;  %v2040_v50 = vld [vmem:[#allocation2 + $0xe0] sm:$0xff] }
 0x318   : > { %11302 = vmatprep.mubr.bf16.mxu1 %v2782_v46  ;;  %v1821_v48 = vsel %vm956_vm0, %v1816_v28, %v1820_v40  ;;  %v1824_v58 = vor.u32 %v1822_v32, %v1820_v40  ;;  %v1848_v28 = vor.u32 %v1846_v51, %v1844_v16  ;;  %v2139_v42 = vrot.slane %v2040_v50, 1 }
 0x319   : > { %11303 = vmatmul.mubr.bf16.vlgmr.msra.gmra.mrb[0].mxu1 %v2784_v11  ;;  %v2041_v11 = vld [vmem:[#allocation2 + $0xe8] sm:$0xff] }
 0x31a   : > { %11306 = vmatprep.mubr.bf16.mxu1 %v2786_v59  ;;  %v2141_v61 = vrot.slane %v2041_v11, 1  ;;  %v1870_v6 = vshrl.u32 %v2041_v11, 16 }
 0x31e   : > { %4644 = vmatmul.mubr.bf16.gmra.mrb[72].mxu0 %v1805_v5  ;;  %v1829_v5 = vsel %vm956_vm0, %v1824_v58, %v1828_v17  ;;  %v2042_v58 = vld [vmem:[#allocation2 + $0xf0] sm:$0xff] }
 0x31f   : > { %4651 = vmatprep.mubr.bf16.mxu0 %v2128_v9  ;;  %v2134_v9 = vsel %vm1395_vm1, %v2131_v38, %v2133_v2 }
 0x321   : > { %11307 = vmatmul.mubr.bf16.gmra.mrb[4].mxu1 %v13371_v33 }
 0x322   : > { %11310 = vmatprep.mubr.bf16.mxu1 %v13384_v49 }
 0x326   : > { %4652 = vmatmul.mubr.bf16.gmra.mrb[76].mxu0 %v1813_v24  ;;  %v1838_v24 = vshrl.u32 %v2037_v43, 16  ;;  %v2142_v43 = vsel %vm1395_vm1, %v2139_v42, %v2141_v61 }
 0x327   : > { %4659 = vmatprep.mubr.bf16.mxu0 %v2130_v1  ;;  %v2039_v1 = vld [vmem:[#allocation2 + $0xd8] sm:$0xff] }
 0x328   : > { %v1840_v27 = vor.u32 %v1838_v24, %v1836_v15  ;;  %v2137_v3 = vrot.slane %v2039_v1, 1  ;;  %v1850_v49 = vshll.u32 %v2039_v1, 16  ;;  %v1854_v38 = vshrl.u32 %v2039_v1, 16 }
 0x329   : > { %11311 = vmatmul.mubr.bf16.gmra.mrb[8].mxu1 %v13393_v52 }
 0x32a   : > { %11314 = vmatprep.mubr.bf16.mxu1 %v13405_v63  ;;  %v1845_v33 = vsel %vm956_vm0, %v1840_v27, %v1844_v16  ;;  %v2138_v36 = vsel %vm1395_vm1, %v2135_v37, %v2137_v3  ;;  %v1852_v40 = vrot.slane %v1850_v49, 1  ;;  %v1858_v63 = vshll.u32 %v2040_v50, 16 }
 0x32b   : > { %v2140_v46 = vsel %vm1395_vm1, %v2137_v3, %v2139_v42  ;;  %v1878_v37 = vshrl.u32 %v2042_v58, 16  ;;  %v2046_v42 = vld [vmem:[#allocation2 + $0x110] sm:$0xff] }
 0x32c   : > { %v1853_v52 = vsel %vm956_vm0, %v1848_v28, %v1852_v40  ;;  %v1860_v32 = vrot.slane %v1858_v63, 1 }
 0x32e   : > { %4660 = vmatmul.mubr.bf16.gmra.mrb[80].mxu0 %v1821_v48  ;;  %v1856_v48 = vor.u32 %v1854_v38, %v1852_v40 }
 0x32f   : > { %4667 = vmatprep.mubr.bf16.mxu0 %v2132_v34  ;;  %v1862_v34 = vshrl.u32 %v2040_v50, 16 }
 0x331   : > { %11315 = vmatmul.mubr.bf16.gmra.mrb[12].mxu1 %v13413_v29  ;;  %v1861_v29 = vsel %vm956_vm0, %v1856_v48, %v1860_v32  ;;  %v1864_v17 = vor.u32 %v1862_v34, %v1860_v32  ;;  %v1906_v32 = vshll.u32 %v2046_v42, 16 }
 0x332   : > { %11318 = vmatprep.mubr.bf16.mxu1 %v13425_v14  ;;  %v1866_v14 = vshll.u32 %v2041_v11, 16 }
 0x334   : > { %v1868_v2 = vrot.slane %v1866_v14, 1  ;;  %v1908_v14 = vrot.slane %v1906_v32, 1 }
 0x336   : > { %4668 = vmatmul.mubr.bf16.gmra.mrb[84].mxu0 %v1829_v5  ;;  %v2143_v5 = vrot.slane %v2042_v58, 1  ;;  %v1872_v21 = vor.u32 %v1870_v6, %v1868_v2  ;;  %v2048_v6 = vld [vmem:[#allocation2 + $0x120] sm:$0xff] }
 0x337   : > { %4675 = vmatprep.mubr.bf16.mxu0 %v2134_v9  ;;  %v2043_v9 = vld [vmem:[#allocation2 + $0xf8] sm:$0xff] }
 0x338   : > { %v2144_v62 = vsel %vm1395_vm1, %v2141_v61, %v2143_v5  ;;  %v2145_v20 = vrot.slane %v2043_v9, 1  ;;  %v1886_v27 = vshrl.u32 %v2043_v9, 16 }
 0x339   : > { %11319 = vmatmul.mubr.bf16.gmra.mrb[16].mxu1 %v13433_v25  ;;  %v1869_v25 = vsel %vm956_vm0, %v1864_v17, %v1868_v2  ;;  %v1910_v2 = vshrl.u32 %v2046_v42, 16 }
 0x33a   : > { %11322 = vmatprep.mubr.bf16.mxu1 %v13441_v41  ;;  %v1874_v41 = vshll.u32 %v2042_v58, 16 }
 0x33c   : > { %v1876_v59 = vrot.slane %v1874_v41, 1  ;;  %v1912_v41 = vor.u32 %v1910_v2, %v1908_v14  ;;  %v2354_v2 = vshrl.u32 %v13534_v8, 16 }
 0x33e   : > { %4676 = vmatmul.mubr.bf16.gmra.mrb[88].mxu0 %v1837_v19  ;;  %v1877_v15 = vsel %vm956_vm0, %v1872_v21, %v1876_v59  ;;  %v2044_v19 = vld [vmem:[#allocation2 + $0x100] sm:$0xff]  ;;  %v1880_v24 = vor.u32 %v1878_v37, %v1876_v59  ;;  %v12500_v37 = vld [vmem:[%s15807_s2 + $0x10] sm:$0xff]  }
 0x33f   : > { %4683 = vmatprep.mubr.bf16.mxu0 %v2136_v26  ;;  %v2147_v26 = vrot.slane %v2044_v19, 1  ;;  %v1890_v16 = vshll.u32 %v2044_v19, 16  ;;  %v1894_v50 = vshrl.u32 %v2044_v19, 16  ;;  %v2157_v19 = vrot.slane %v13257_v7, 1 }
 0x341   : > { %11323 = vmatmul.mubr.bf16.gmra.mrb[20].mxu1 %v13453_v60  ;;  %v1882_v60 = vshll.u32 %v2043_v9, 16  ;;  %v2148_v3 = vsel %vm1395_vm1, %v2145_v20, %v2147_v26  ;;  %v1892_v51 = vrot.slane %v1890_v16, 1  ;;  %v13595_v9 = vrot.slane %v2048_v6, 1  ;;  %v2305_v16 = vld [vmem:[#allocation2 + $0x20] sm:$0xff] }
 0x342   : > { %11326 = vmatprep.mubr.bf16.mxu1 %v13461_v55  ;;  %v2146_v55 = vsel %vm1395_vm1, %v2143_v5, %v2145_v20  ;;  %v1922_v20 = vshll.u32 %v2048_v6, 16 }
 0x343   : > { %v1884_v54 = vrot.slane %v1882_v60, 1  ;;  %v1896_v38 = vor.u32 %v1894_v50, %v1892_v51  ;;  %v1649_v50 = vld [vmem:[#allocation2 + $0x130] sm:$0x1] }
 0x345   : > { %v1885_v1 = vsel %vm956_vm0, %v1880_v24, %v1884_v54 }
 0x346   : > { %4684 = vmatmul.mubr.bf16.gmra.mrb[92].mxu0 %v1845_v33  ;;  %v2045_v33 = vld [vmem:[#allocation2 + $0x108] sm:$0xff] }
 0x347   : > { %4691 = vmatprep.mubr.bf16.mxu0 %v2138_v36  ;;  %v2149_v49 = vrot.slane %v2045_v33, 1  ;;  %v1898_v28 = vshll.u32 %v2045_v33, 16  ;;  %v1902_v48 = vshrl.u32 %v2045_v33, 16  ;;  %v12501_v33 = vld [vmem:[%s15807_s2 + $0x18] sm:$0xff]  }
 0x349   : > { %11327 = vmatmul.mubr.bf16.gmra.mrb[24].mxu1 %v13476_v44  ;;  %v1888_v44 = vor.u32 %v1886_v27, %v1884_v54  ;;  %v2150_v40 = vsel %vm1395_vm1, %v2147_v26, %v2149_v49  ;;  %v1900_v63 = vrot.slane %v1898_v28, 1  ;;  %v1926_v54 = vshrl.u32 %v2048_v6, 16  ;;  %v2050_v27 = vld [vmem:[#allocation2 + $0x130] sm:$0x1]  ;;  %v13634_v6 = vld [vmem:[#allocation2 + $0xa8] sm:$0xff] }
 0x34a   : > { %v1930_v26 = vshll.u32 %v13257_v7, 16  ;;  %v2345_v7 = vshll.u32 %v2305_v16, 16 }
 0x34b   : > { %v1893_v36 = vsel %vm956_vm0, %v1888_v44, %v1892_v51  ;;  %v1901_v11 = vsel %vm956_vm0, %v1896_v38, %v1900_v63  ;;  %v1904_v34 = vor.u32 %v1902_v48, %v1900_v63  ;;  %v1938_v63 = vshll.u32 %v1649_v50, 16  ;;  %v13671_v50 = vld [vmem:[#allocation2 + $0xd0] sm:$0xff] }
 0x34c   : > { %v2343_v48 = vshrl.u32 %v2305_v16, 16  ;;  %v2347_v32 = vrot.slane %v2345_v7, 1  ;;  %v12506_v7 = vld [vmem:[%s15807_s2 + $0x40] sm:$0xff]  }
 0x34d   : > { %v1909_v17 = vsel %vm956_vm0, %v1904_v34, %v1908_v14  ;;  %v1940_v34 = vrot.slane %v1938_v63, 1 }
 0x34e   : > { %4692 = vmatmul.mubr.bf16.gmra.mrb[96].mxu0 %v1853_v52  ;;  %v12498_v52 = vld [vmem:[%s15807_s2] sm:$0xff]   ;;  %v2348_v14 = vor.u32 %v2347_v32, %v2343_v48 }
 0x34f   : > { %4699 = vmatprep.mubr.bf16.mxu0 %v2140_v46  ;;  %v13579_v46 = vrot.slane %v2046_v42, 1  ;;  %9242 = vmatpush1.bf16.msra.mxu1 %v12498_v52  ;;  %v12589_v52 = vld [vmem:[#allocation2 + $0x128] sm:$0xff]  ;;  %v2237_v32 = vld [vmem:[#allocation2 + $0x40] sm:$0xff] }
 0x350   : > { %9243 = vmatprep.subr.bf16.mxu1 %v13361_v12  ;;  %v1934_v38 = vshrl.u32 %v12589_v52, 16  ;;  %v13682_v52 = vld [vmem:[#allocation2 + $0xd8] sm:$0xff] }
 0x351   : > { %v2152_v61 = vsel %vm1395_vm1, %v2149_v49, %v13579_v46  ;;  %v1932_v49 = vrot.slane %v1930_v26, 1 }
 0x356   : > { %4700 = vmatmul.mubr.bf16.gmra.mrb[100].mxu0 %v1861_v29  ;;  %v2047_v29 = vld [vmem:[#allocation2 + $0x118] sm:$0xff] }
 0x357   : > { %4707 = vmatprep.mubr.bf16.mxu0 %v2142_v43  ;;  %v12499_v43 = vld [vmem:[%s15807_s2 + $0x8] sm:$0xff]   ;;  %v2153_v58 = vrot.slane %v2047_v29, 1  ;;  %v1914_v5 = vshll.u32 %v2047_v29, 16  ;;  %v1918_v59 = vshrl.u32 %v2047_v29, 16  ;;  %v1936_v29 = vor.u32 %v1934_v38, %v1932_v49  ;;  %v13685_v38 = vld [vmem:[#allocation2 + $0xe0] sm:$0xff] }
 0x358   : > { %9244 = vmatpush1.bf16.msra.mxu1 %v12499_v43  ;;  %v2827_v63 = vrot.slane %v13685_v38, 1 }
 0x359   : > { %9245 = vmatprep.subr.bf16.mxu1 %v13361_v12 }
 0x35c   : > { %9246 = vmatpush1.bf16.msra.mxu1 %v12500_v37 }
 0x35d   : > { %9247 = vmatprep.subr.bf16.mxu1 %v13361_v12 }
 0x35e   : > { %4708 = vmatmul.mubr.bf16.gmra.mrb[104].mxu0 %v1869_v25  ;;  %v13592_v25 = vsel %vm1395_vm1, %v13579_v46, %v2153_v58 }
 0x35f   : > { %4715 = vmatprep.mubr.bf16.mxu0 %v2144_v62  ;;  %v1916_v62 = vrot.slane %v1914_v5, 1  ;;  %v2358_v5 = vshll.u32 %v13537_v10, 16 }
 0x360   : > { %9248 = vmatpush1.bf16.msra.mxu1 %v12501_v33  ;;  %v13658_v33 = vld [vmem:[#allocation2 + $0xc0] sm:$0xff] }
 0x361   : > { %v1917_v21 = vsel %vm956_vm0, %v1912_v41, %v1916_v62  ;;  %v1920_v60 = vor.u32 %v1918_v59, %v1916_v62  ;;  %9249 = vmatprep.subr.bf16.mxu1 %v13361_v12  ;;  %v12503_v41 = vld [vmem:[%s15807_s2 + $0x28] sm:$0xff]   ;;  %v2813_v62 = vrot.slane %v13634_v6, 1  ;;  %v2360_v37 = vrot.slane %v2358_v5, 1 }
 0x366   : > { %4716 = vmatmul.mubr.bf16.gmra.mrb[108].mxu0 %v1877_v15  ;;  %v13600_v15 = vsel %vm1395_vm1, %v2153_v58, %v13595_v9  ;;  %v1941_v58 = vsel %vm956_vm0, %v1936_v29, %v1940_v34  ;;  %v13698_v29 = vld [vmem:[#allocation2 + $0xf0] sm:$0xff] }
 0x367   : > { %4723 = vmatprep.mubr.bf16.mxu0 %v2146_v55  ;;  %v1924_v55 = vrot.slane %v1922_v20, 1 }
 0x369   : > { %v1925_v24 = vsel %vm956_vm0, %v1920_v60, %v1924_v55  ;;  %v1928_v51 = vor.u32 %v1926_v54, %v1924_v55  ;;  %v2814_v60 = vsel %vm1395_vm1, %v13492_v30, %v2813_v62  ;;  %v12504_v54 = vld [vmem:[%s15807_s2 + $0x30] sm:$0xff]  }
 0x36b   : > { %v1933_v42 = vsel %vm956_vm0, %v1928_v51, %v1932_v49  ;;  %v12505_v51 = vld [vmem:[%s15807_s2 + $0x38] sm:$0xff]  }
 0x36e   : > { %4724 = vmatmul.mubr.bf16.gmra.mrb[112].mxu0 %v1885_v1  ;;  %v2158_v1 = vsel %vm1395_vm1, %v13595_v9, %v2157_v19 }
 0x36f   : > { %4731 = vmatprep.mubr.bf16.mxu0 %v2148_v3  ;;  %v13612_v3 = vld [vmem:[#allocation2 + $0x98] sm:$0xff] }
 0x370   : > { %v2809_v44 = vrot.slane %v13612_v3, 1 }
 0x372   : > { %v2810_v28 = vsel %vm1395_vm1, %v13468_v4, %v2809_v44  ;;  %v12502_v4 = vld [vmem:[%s15807_s2 + $0x20] sm:$0xff]  }
 0x373   : > { %11330 = vmatprep.mubr.bf16.mxu1 %v2810_v28  ;;  %9250 = vmatpush1.bf16.msra.mxu1 %v12502_v4 }
 0x374   : > { %9251 = vmatprep.subr.bf16.mxu1 %v13361_v12 }
 0x376   : > { %4732 = vmatmul.mubr.bf16.gmra.mrb[116].mxu0 %v1893_v36  ;;  %v2159_v36 = vrot.slane %v2050_v27, 1 }
 0x377   : > { %4739 = vmatprep.mubr.bf16.mxu0 %v2150_v40  ;;  %v2812_v40 = vsel %vm1395_vm1, %v2809_v44, %v13492_v30  ;;  %9252 = vmatpush1.bf16.msra.mxu1 %v12503_v41  ;;  %v13653_v30 = vld [vmem:[#allocation2 + $0xb8] sm:$0xff]  ;;  %v12508_v41 = vld [vmem:[%s15807_s2 + $0x50] sm:$0xff]  }
 0x378   : > { %11331 = vmatmul.mubr.bf16.gmra.mrb[28].mxu1 %v2812_v40  ;;  %9253 = vmatprep.subr.bf16.mxu1 %v13361_v12  ;;  %v2817_v27 = vrot.slane %v13653_v30, 1 }
 0x379   : > { %11334 = vmatprep.mubr.bf16.mxu1 %v2814_v60  ;;  %v12509_v60 = vld [vmem:[%s15807_s2 + $0x58] sm:$0xff]  }
 0x37b   : > { %9254 = vmatpush1.bf16.msra.mxu1 %v12504_v54  ;;  %v2241_v54 = vld [vmem:[#allocation2 + $0x60] sm:$0xff] }
 0x37c   : > { %9255 = vmatprep.subr.bf16.mxu1 %v13361_v12 }
 0x37e   : > { %4740 = vmatmul.mubr.bf16.gmra.mrb[120].mxu0 %v1901_v11  ;;  %v2160_v11 = vsel %vm1395_vm1, %v2157_v19, %v2159_v36 }
 0x37f   : > { %4747 = vmatprep.mubr.bf16.mxu0 %v2152_v61  ;;  %v2350_v61 = vshll.u32 %v13534_v8, 16  ;;  %9256 = vmatpush1.bf16.msra.mxu1 %v12505_v51  ;;  %v257_v51 = vld [vmem:[%s12686_s25 + $0x278] sm:$0xff] }
 0x380   : > { %9257 = vmatprep.subr.bf16.mxu1 %v13361_v12 }
 0x381   : > { %v2352_v43 = vrot.slane %v2350_v61, 1  ;;  %v13695_v61 = vld [vmem:[#allocation2 + $0xe8] sm:$0xff] }
 0x382   : > { %v2829_v4 = vrot.slane %v13695_v61, 1 }
 0x383   : > { %v2356_v20 = vor.u32 %v2354_v2, %v2352_v43  ;;  %9258 = vmatpush1.bf16.msra.mxu1 %v12506_v7  ;;  %v13707_v2 = vld [vmem:[#allocation2 + $0x100] sm:$0xff] }
 0x384   : > { %9259 = vmatprep.subr.bf16.mxu1 %v13361_v12  ;;  %v2830_v34 = vsel %vm1395_vm1, %v2827_v63, %v2829_v4  ;;  %v2835_v5 = vrot.slane %v13707_v2, 1 }
 0x385   : > { %v2361_v19 = vsel %vm956_vm0, %v2356_v20, %v2360_v37  ;;  %v13717_v20 = vld [vmem:[#allocation2 + $0x108] sm:$0xff] }
 0x386   : > { %4748 = vmatmul.mubr.bf16.gmra.mrb[124].mxu0 %v1909_v17  ;;  %v2353_v17 = vsel %vm956_vm0, %v2348_v14, %v2352_v43  ;;  %v2238_v43 = vld [vmem:[#allocation2 + $0x48] sm:$0xff] }
 0x387   : > { %4755 = vmatprep.mubr.bf16.mxu0 %v13592_v25 }
 0x38e   : > { %4756 = vmatmul.mubr.bf16.gmra.mrb[128].mxu0 %v1917_v21  ;;  %v13640_v21 = vld [vmem:[#allocation2 + $0xb0] sm:$0xff] }
 0x38f   : > { %4763 = vmatprep.mubr.bf16.mxu0 %v13600_v15  ;;  %v2815_v59 = vrot.slane %v13640_v21, 1 }
 0x391   : > { %v2816_v55 = vsel %vm1395_vm1, %v2813_v62, %v2815_v59  ;;  %v2818_v44 = vsel %vm1395_vm1, %v2815_v59, %v2817_v27  ;;  %v2239_v59 = vld [vmem:[#allocation2 + $0x50] sm:$0xff] }
 0x392   : > { %11335 = vmatmul.mubr.bf16.gmra.mrb[32].mxu1 %v2816_v55 }
 0x393   : > { %11338 = vmatprep.mubr.bf16.mxu1 %v2818_v44  ;;  %v256_v44 = vld [vmem:[%s12686_s25 + $0x270] sm:$0xff] }
 0x396   : > { %4764 = vmatmul.mubr.bf16.gmra.mrb[132].mxu0 %v1925_v24  ;;  %v2362_v24 = vshrl.u32 %v13537_v10, 16 }
 0x397   : > { %4771 = vmatprep.mubr.bf16.mxu0 %v2158_v1 }
 0x398   : > { %v2364_v26 = vor.u32 %v2362_v24, %v2360_v37  ;;  %v2837_v37 = vrot.slane %v13717_v20, 1  ;;  %v12510_v24 = vld [vmem:[%s15807_s2 + $0x60] sm:$0xff]  }
 0x39a   : > { %v2369_v1 = vsel %vm956_vm0, %v2364_v26, %v13356_v39  ;;  %v13668_v39 = vld [vmem:[#allocation2 + $0xc8] sm:$0xff]  ;;  %v2838_v55 = vsel %vm1395_vm1, %v2835_v5, %v2837_v37 }
 0x39b   : > { %v2821_v36 = vrot.slane %v13668_v39, 1  ;;  %v13739_v26 = vld [vmem:[#allocation2 + $0x128] sm:$0xff] }
 0x39e   : > { %4772 = vmatmul.mubr.bf16.gmra.mrb[136].mxu0 %v1933_v42  ;;  %v2236_v42 = vld [vmem:[#allocation2 + $0x38] sm:$0xff] }
 0x39f   : > { %4779 = vmatprep.mubr.bf16.mxu0 %v2160_v11 }
 0x3a6   : > { %4780 = vmatmul.mubr.bf16.gmra.mrb[140].mxu0 %v1941_v58  ;;  %v13704_v58 = vld [vmem:[#allocation2 + $0xf8] sm:$0xff] }
 0x3a7   : > { %4820 = vmatprep.mubr.bf16.mxu0 %v2353_v17  ;;  %v2833_v17 = vrot.slane %v13704_v58, 1 }
 0x3a9   : > { %v2836_v62 = vsel %vm1395_vm1, %v2833_v17, %v2835_v5 }
 0x3ae   : > { %4821 = vmatmul.mubr.bf16.vlgmr.msra.gmra.mrb[0].mxu0 %v2305_v16  ;;  %v2819_v16 = vrot.slane %v13658_v33, 1 }
 0x3af   : > { %4828 = vmatprep.mubr.bf16.mxu0 %v2361_v19  ;;  %v2240_v19 = vld [vmem:[#allocation2 + $0x58] sm:$0xff] }
 0x3b0   : > { %v2820_v49 = vsel %vm1395_vm1, %v2817_v27, %v2819_v16  ;;  %v2822_v28 = vsel %vm1395_vm1, %v2819_v16, %v2821_v36  ;;  %v2847_v27 = vrot.slane %v13518_v35, 1  ;;  %v13753_v35 = vpack.c.bf16 %v257_v51, %v256_v44 }
 0x3b1   : > { %11339 = vmatmul.mubr.bf16.gmra.mrb[36].mxu1 %v2820_v49  ;;  %v2242_v49 = vld [vmem:[#allocation2 + $0x68] sm:$0xff]  ;;  %v2478_v51 = vshll.u32 %v13634_v6, 16 }
 0x3b2   : > { %11342 = vmatprep.mubr.bf16.mxu1 %v2822_v28  ;;  %340 = vst [vmem:[#allocation2 + $0x138] sm:$0xff] %v13753_v35 }
 0x3b6   : > { %4829 = vmatmul.mubr.bf16.gmra.mrb[4].mxu0 %v13534_v8  ;;  %v2823_v8 = vrot.slane %v13671_v50, 1 }
 0x3b7   : > { %4836 = vmatprep.mubr.bf16.mxu0 %v2369_v1  ;;  %v2845_v1 = vrot.slane %v13739_v26, 1 }
 0x3b8   : > { %v2824_v40 = vsel %vm1395_vm1, %v2821_v36, %v2823_v8  ;;  %v2849_v36 = vrot.slane %v13753_v35, 1 }
 0x3b9   : > { %11343 = vmatmul.mubr.bf16.gmra.mrb[40].mxu1 %v2824_v40  ;;  %v2848_v16 = vsel %vm1395_vm1, %v2845_v1, %v2847_v27  ;;  %v2243_v40 = vld [vmem:[#allocation2 + $0x70] sm:$0xff] }
 0x3ba   : > { %v2850_v7 = vsel %vm1395_vm1, %v2847_v27, %v2849_v36  ;;  %v12514_v27 = vld [vmem:[%s15807_s2 + $0x80] sm:$0xff]  }
 0x3be   : > { %4837 = vmatmul.mubr.bf16.gmra.mrb[8].mxu0 %v13537_v10  ;;  %v2825_v10 = vrot.slane %v13682_v52, 1 }
 0x3bf   : > { %4844 = vmatprep.mubr.bf16.mxu0 %v13381_v18  ;;  %v12507_v18 = vld [vmem:[%s15807_s2 + $0x48] sm:$0xff]  }
 0x3c0   : > { %v2826_v11 = vsel %vm1395_vm1, %v2823_v8, %v2825_v10  ;;  %v2828_v48 = vsel %vm1395_vm1, %v2825_v10, %v2827_v63  ;;  %9260 = vmatpush1.bf16.msra.mxu1 %v12507_v18  ;;  %v5646_v63 = vld [vmem:[#allocation4] sm:$0x80] }
 0x3c1   : > { %11346 = vmatprep.mubr.bf16.mxu1 %v2826_v11  ;;  %9261 = vmatprep.subr.bf16.mxu1 %v13361_v12  ;;  %v5685_v18 = vshrl.u32 %v5646_v63, 16  ;;  %v12515_v63 = vld [vmem:[%s15807_s2 + $0x88] sm:$0xff]  }
 0x3c2   : > { %11347 = vmatmul.mubr.bf16.gmra.mrb[44].mxu1 %v2828_v48 }
 0x3c3   : > { %11350 = vmatprep.mubr.bf16.mxu1 %v2830_v34  ;;  %v5687_v34 = vrot.slane %v5685_v18, 7 }
 0x3c4   : > { %9262 = vmatpush1.bf16.msra.mxu1 %v12508_v41 }
 0x3c5   : > { %9263 = vmatprep.subr.bf16.mxu1 %v13361_v12  ;;  %v2840_v12 = vsel %vm1395_vm1, %v2837_v37, %v13579_v46  ;;  %v259_v46 = vld [vmem:[%s12686_s25 + $0x288] sm:$0xff] }
 0x3c6   : > { %4845 = vmatmul.mubr.bf16.gmra.mrb[12].mxu0 %v2236_v42 }
 0x3c7   : > { %4852 = vmatprep.mubr.bf16.mxu0 %v13390_v47  ;;  %v2831_v47 = vrot.slane %v13698_v29, 1 }
 0x3c8   : > { %9264 = vmatpush1.bf16.msra.mxu1 %v12509_v60  ;;  %v2462_v60 = vshll.u32 %v13612_v3, 16 }
 0x3c9   : > { %v2832_v14 = vsel %vm1395_vm1, %v2829_v4, %v2831_v47 }
 0x3ca   : > { %11351 = vmatmul.mubr.bf16.gmra.mrb[48].mxu1 %v2832_v14  ;;  %v2319_v14 = vld [vmem:[#allocation2 + $0x90] sm:$0xff] }
 0x3cb   : > { %v2454_v41 = vshll.u32 %v2319_v14, 16  ;;  %v2458_v37 = vshrl.u32 %v2319_v14, 16 }
 0x3ce   : > { %4853 = vmatmul.mubr.bf16.gmra.mrb[16].mxu0 %v2237_v32 }
 0x3cf   : > { %4860 = vmatprep.mubr.bf16.mxu0 %v13402_v57  ;;  %v2834_v57 = vsel %vm1395_vm1, %v2831_v47, %v2833_v17  ;;  %v2244_v17 = vld [vmem:[#allocation2 + $0x78] sm:$0xff] }
 0x3d0   : > { %11354 = vmatprep.mubr.bf16.mxu1 %v2834_v57 }
 0x3d2   : > { %11355 = vmatmul.mubr.bf16.gmra.mrb[52].mxu1 %v2836_v62  ;;  %v2245_v62 = vld [vmem:[#allocation2 + $0x80] sm:$0xff] }
 0x3d3   : > { %11358 = vmatprep.mubr.bf16.mxu1 %v2838_v55 }
 0x3d6   : > { %4861 = vmatmul.mubr.bf16.gmra.mrb[20].mxu0 %v2238_v43 }
 0x3d7   : > { %4868 = vmatprep.mubr.bf16.mxu0 %v13410_v56  ;;  %v13727_v56 = vld [vmem:[#allocation4] sm:$0xff] }
 0x3d8   : > { %9265 = vmatprep.subr.bf16.mxu1 %v13727_v56  ;;  %v5689_v42 = vshrl.u32 %v13727_v56, 16  ;;  %v5692_v4 = vshll.u32 %v13727_v56, 16 }
 0x3d9   : > { %9266 = vmatpush1.bf16.msra.mxu1 %v12510_v24  ;;  %v2464_v24 = vrot.slane %v2462_v60, 1  ;;  %v2502_v60 = vshll.u32 %v13658_v33, 16 }
 0x3da   : > { %11359 = vmatmul.mubr.bf16.gmra.mrb[56].mxu1 %v2840_v12  ;;  %9267 = vmatprep.subr.bf16.mxu1 %v13727_v56  ;;  %v13773_v48 = vrot.slane %v5689_v42, 7  ;;  %v2486_v42 = vshll.u32 %v13640_v21, 16 }
 0x3db   : > { %11362 = vmatprep.mubr.bf16.mxu1 %v13592_v25 }
 0x3dc   : > { %v5694_v43 = vor.u32 %v5692_v4, %v13773_v48  ;;  %v2488_v18 = vrot.slane %v2486_v42, 1  ;;  %v12524_v42 = vld [vmem:[%s15807_s2 + $0x230] sm:$0xff]  }
 0x3de   : > { %4869 = vmatmul.mubr.bf16.gmra.mrb[24].mxu0 %v2239_v59  ;;  %v5695_v5 = vsel %vm5683_vm2, %v5687_v34, %v5694_v43  ;;  %v5703_v57 = vsel %vm5683_vm2, %v13773_v48, %v5694_v43  ;;  %v2490_v34 = vshrl.u32 %v13640_v21, 16  ;;  %v12516_v43 = vld [vmem:[%s15807_s2 + $0x200] sm:$0xff]  }
 0x3df   : > { %4876 = vmatprep.mubr.bf16.mxu0 %v13422_v13  ;;  %v258_v13 = vld [vmem:[%s12686_s25 + $0x280] sm:$0xff]  ;;  %11374 = vmatprep.subr.bf16.mxu0 %v12516_v43 }
 0x3e0   : > { %v300_v25 = vpack.c.bf16 %v259_v46, %v258_v13  ;;  %v2321_v46 = vld [vmem:[#allocation2 + $0xa0] sm:$0xff]  ;;  %11375 = vmatpush3.bf16.msra.mxu0 %v12516_v43 }
 0x3e1   : > { %v2474_v44 = vshrl.u32 %v2321_v46, 16 }
 0x3e2   : > { %11363 = vmatmul.mubr.bf16.gmra.mrb[60].mxu1 %v13600_v15  ;;  %341 = vst [vmem:[#allocation2 + $0x140] sm:$0xff] %v300_v25  ;;  %v2846_v15 = vsel %vm1395_vm1, %v13595_v9, %v2845_v1  ;;  %v2466_v25 = vshrl.u32 %v13612_v3, 16  ;;  %v2470_v1 = vshll.u32 %v2321_v46, 16 }
 0x3e3   : > { %11366 = vmatprep.mubr.bf16.mxu1 %v2846_v15 }
 0x3e4   : > { %v2472_v15 = vrot.slane %v2470_v1, 1  ;;  %v2506_v1 = vshrl.u32 %v13658_v33, 16 }
 0x3e6   : > { %4877 = vmatmul.mubr.bf16.gmra.mrb[28].mxu0 %v2240_v19 }
 0x3e7   : > { %4884 = vmatprep.mubr.bf16.mxu0 %v13430_v23  ;;  %v12511_v23 = vld [vmem:[%s15807_s2 + $0x68] sm:$0xff]  }
 0x3e8   : > { %9268 = vmatpush1.bf16.msra.mxu1 %v12511_v23  ;;  %v2468_v23 = vor.u32 %v2466_v25, %v2464_v24 }
 0x3e9   : > { %9269 = vmatprep.subr.bf16.mxu1 %v13727_v56  ;;  %v2742_v8 = vld [vmem:[#allocation2 + $0x140] sm:$0x1] }
 0x3ea   : > { %11367 = vmatmul.mubr.bf16.gmra.mrb[64].mxu1 %v2848_v16  ;;  %v2851_v9 = vrot.slane %v2742_v8, 1  ;;  %v2473_v16 = vsel %vm956_vm0, %v2468_v23, %v2472_v15 }
 0x3eb   : > { %11370 = vmatprep.mubr.bf16.mxu1 %v2850_v7 }
 0x3ec   : > { %v2852_v28 = vsel %vm1395_vm1, %v2849_v36, %v2851_v9  ;;  %v13766_v10 = vpop.f32.mrb[0].mxu1  ;;  %v2476_v9 = vor.u32 %v2474_v44, %v2472_v15 }
 0x3ed   : > { %v13768_v11 = vpop.f32.mrb[1].mxu1 }
 0x3ee   : > { %4885 = vmatmul.mubr.bf16.gmra.mrb[32].mxu0 %v2241_v54  ;;  %v13776_v32 = vpop.f32.mrb[2].mxu1  ;;  %v2246_v54 = vld [vmem:[#allocation2 + $0x88] sm:$0xff] }
 0x3ef   : > { %4892 = vmatprep.mubr.bf16.mxu0 %v13438_v53  ;;  %v12512_v53 = vld [vmem:[%s15807_s2 + $0x70] sm:$0xff]   ;;  %v13779_v47 = vpop.f32.mrb[3].mxu1 }
 0x3f0   : > { %9270 = vmatpush1.bf16.msra.mxu1 %v12512_v53  ;;  %v2480_v53 = vrot.slane %v2478_v51, 1 }
 0x3f1   : > { %9271 = vmatprep.subr.bf16.mxu1 %v13727_v56 }
 0x3f2   : > { %11371 = vmatmul.mubr.bf16.gmra.mrb[68].mxu1 %v2852_v28  ;;  %v2481_v28 = vsel %vm956_vm0, %v2476_v9, %v2480_v53 }
 0x3f3   : > { %9273 = vmatprep.mubr.bf16.mxu1 %v13727_v56 }
 0x3f4   : > { %v13791_v55 = vpop.f32.mrb[4].mxu1 }
 0x3f5   : > { %v13793_v12 = vpop.f32.mrb[5].mxu1 }
 0x3f6   : > { %4893 = vmatmul.mubr.bf16.gmra.mrb[36].mxu0 %v2242_v49  ;;  %v13795_v19 = vpop.f32.mrb[6].mxu1 }
 0x3f7   : > { %4900 = vmatprep.mubr.bf16.mxu0 %v13450_v31  ;;  %v12513_v31 = vld [vmem:[%s15807_s2 + $0x78] sm:$0xff]   ;;  %v13797_v13 = vpop.f32.mrb[7].mxu1 }
 0x3f8   : > { %9272 = vmatpush1.bf16.msra.mxu1 %v12513_v31 }
 0x3f9   : > { %9562 = vmatprep.subr.bf16.mxu1 %v13727_v56 }
 0x3fb   : > { %9274 = vmatmul.mubr.bf16.vlgmr.msra.gmra.mrb[72].mxu1 %v5695_v5 }
 0x3fc   : > { %9281 = vmatprep.mubr.bf16.mxu1 %v13727_v56  ;;  %9563 = vmatpush1.bf16.msra.mxu1 %v12514_v27  ;;  %v13807_v49 = vpop.f32.mrb[8].mxu1  ;;  %v2510_v27 = vshll.u32 %v13668_v39, 16 }
 0x3fd   : > { %9564 = vmatprep.subr.bf16.mxu1 %v13727_v56  ;;  %v13809_v36 = vpop.f32.mrb[9].mxu1 }
 0x3fe   : > { %4901 = vmatmul.mubr.bf16.gmra.mrb[40].mxu0 %v2243_v40  ;;  %v13811_v8 = vpop.f32.mrb[10].mxu1  ;;  %v2482_v40 = vshrl.u32 %v13634_v6, 16  ;;  %v2512_v51 = vrot.slane %v2510_v27, 1 }
 0x3ff   : > { %4908 = vmatprep.mubr.bf16.mxu0 %v13458_v22  ;;  %v2456_v22 = vrot.slane %v2454_v41, 1  ;;  %v13813_v7 = vpop.f32.mrb[11].mxu1  ;;  %v2492_v41 = vor.u32 %v2490_v34, %v2488_v18 }
 0x400   : > { %9565 = vmatpush1.bf16.msra.mxu1 %v12515_v63  ;;  %v2484_v31 = vor.u32 %v2482_v40, %v2480_v53  ;;  %v12523_v53 = vld [vmem:[%s15807_s2 + $0x228] sm:$0xff]   ;;  %v2518_v40 = vshll.u32 %v13671_v50, 16  ;;  %v12522_v63 = vld [vmem:[%s15807_s2 + $0x98] sm:$0xff]  }
 0x401   : > { %v2457_v59 = vsel %vm956_vm0, %v13480_v45, %v2456_v22  ;;  %9566 = vmatprep.subr.bf16.mxu1 %v13727_v56 }
 0x402   : > { %v2489_v4 = vsel %vm956_vm0, %v2484_v31, %v2488_v18  ;;  %v2520_v18 = vrot.slane %v2518_v40, 1  ;;  %v2550_v40 = vshll.u32 %v13698_v29, 16 }
 0x403   : > { %9282 = vmatmul.mubr.bf16.gmra.mrb[76].mxu1 %v5703_v57 }
 0x406   : > { %4909 = vmatmul.mubr.bf16.gmra.mrb[44].mxu0 %v2244_v17  ;;  %v13829_v17 = vpop.f32.mrb[12].mxu1 }
 0x407   : > { %4916 = vmatprep.mubr.bf16.mxu0 %v13472_v0  ;;  %v2460_v0 = vor.u32 %v2458_v37, %v2456_v22  ;;  %v2498_v37 = vshrl.u32 %v13653_v30, 16 }
 0x409   : > { %v2465_v45 = vsel %vm956_vm0, %v2460_v0, %v2464_v24  ;;  %v12517_v0 = vld [vmem:[%s15807_s2 + $0x90] sm:$0xff]  }
 0x40a   : > { %v12519_v24 = vld [vmem:[%s15807_s2 + $0x210] sm:$0xff]   ;;  %9567 = vmatpush1.bf16.msra.mxu1 %v12517_v0  ;;  %v2530_v0 = vshrl.u32 %v13682_v52, 16 }
 0x40b   : > { %9568 = vmatprep.subr.bf16.mxu1 %v13727_v56 }
 0x40e   : > { %4917 = vmatmul.mubr.bf16.gmra.mrb[48].mxu0 %v2245_v62  ;;  %v12518_v62 = vld [vmem:[%s15807_s2 + $0x208] sm:$0xff]   ;;  %9569 = vmatpush1.bf16.msra.mxu1 %v12522_v63 }
 0x40f   : > { %4924 = vmatprep.mubr.bf16.mxu0 %v2457_v59  ;;  %11376 = vmatprep.subr.bf16.mxu0 %v12518_v62 }
 0x410   : > { %11377 = vmatpush3.bf16.msra.mxu0 %v12518_v62  ;;  %9570 = vmatprep.subr.bf16.mxu1 %v13727_v56 }
 0x411   : > { %11378 = vmatprep.subr.bf16.mxu0 %v12519_v24 }
 0x414   : > { %11379 = vmatpush3.bf16.msra.mxu0 %v12519_v24  ;;  %v2534_v24 = vshll.u32 %v13685_v38, 16 }
 0x416   : > { %4925 = vmatmul.mubr.bf16.gmra.mrb[52].mxu0 %v2246_v54  ;;  %v2504_v54 = vrot.slane %v2502_v60, 1 }
 0x417   : > { %4932 = vmatprep.mubr.bf16.mxu0 %v2465_v45  ;;  %v12520_v45 = vld [vmem:[%s15807_s2 + $0x218] sm:$0xff]  }
 0x418   : > { %11380 = vmatprep.subr.bf16.mxu0 %v12520_v45  ;;  %v2508_v44 = vor.u32 %v2506_v1, %v2504_v54  ;;  %v12526_v1 = vld [vmem:[%s15807_s2 + $0xa0] sm:$0xff]  }
 0x419   : > { %11381 = vmatpush3.bf16.msra.mxu0 %v12520_v45  ;;  %v2538_v45 = vshrl.u32 %v13685_v38, 16  ;;  %9571 = vmatpush1.bf16.msra.mxu1 %v12526_v1  ;;  %v2574_v1 = vshll.u32 %v13717_v20, 16 }
 0x41a   : > { %9572 = vmatprep.subr.bf16.mxu1 %v13727_v56 }
 0x41e   : > { %4933 = vmatmul.mubr.bf16.gmra.mrb[56].mxu0 %v2319_v14  ;;  %v2494_v14 = vshll.u32 %v13653_v30, 16 }
 0x41f   : > { %4940 = vmatprep.mubr.bf16.mxu0 %v2473_v16 }
 0x420   : > { %v2496_v22 = vrot.slane %v2494_v14, 1  ;;  %v2526_v14 = vshll.u32 %v13682_v52, 16 }
 0x422   : > { %v2497_v59 = vsel %vm956_vm0, %v2492_v41, %v2496_v22 }
 0x426   : > { %4941 = vmatmul.mubr.bf16.gmra.mrb[60].mxu0 %v13612_v3  ;;  %v13831_v3 = vpop.f32.mrb[13].mxu1 }
 0x427   : > { %4948 = vmatprep.mubr.bf16.mxu0 %v2481_v28  ;;  %v13833_v5 = vpop.f32.mrb[14].mxu1  ;;  %v2513_v28 = vsel %vm956_vm0, %v2508_v44, %v2512_v51 }
 0x428   : > { %v13835_v57 = vpop.f32.mrb[15].mxu1 }
 0x429   : > { %v13860_v23 = vpop.f32.mrb[16].mxu1 }
 0x42a   : > { %v13863_v15 = vpop.f32.mrb[17].mxu1 }
 0x42b   : > { %v13865_v16 = vpop.f32.mrb[18].mxu1 }
 0x42c   : > { %v13867_v9 = vpop.f32.mrb[19].mxu1 }
 0x42d   : > { %v13889_v43 = vpop.f32.mrb[20].mxu1 }
 0x42e   : > { %4949 = vmatmul.mubr.bf16.gmra.mrb[64].mxu0 %v2321_v46  ;;  %v2500_v46 = vor.u32 %v2498_v37, %v2496_v22  ;;  %v13892_v41 = vpop.f32.mrb[21].mxu1 }
 0x42f   : > { %4956 = vmatprep.mubr.bf16.mxu0 %v2489_v4  ;;  %v12525_v4 = vld [vmem:[%s15807_s2 + $0x238] sm:$0xff]   ;;  %v13894_v22 = vpop.f32.mrb[22].mxu1 }
 0x430   : > { %v2505_v25 = vsel %vm956_vm0, %v2500_v46, %v2504_v54  ;;  %v13896_v37 = vpop.f32.mrb[23].mxu1 }
 0x431   : > { %v13908_v27 = vpop.f32.mrb[24].mxu1 }
 0x436   : > { %4957 = vmatmul.mubr.bf16.gmra.mrb[68].mxu0 %v13634_v6  ;;  %v12521_v6 = vld [vmem:[%s15807_s2 + $0x220] sm:$0xff]  }
 0x437   : > { %4964 = vmatprep.mubr.bf16.mxu0 %v2497_v59  ;;  %11382 = vmatprep.subr.bf16.mxu0 %v12521_v6  ;;  %v2528_v59 = vrot.slane %v2526_v14, 1 }
 0x438   : > { %11383 = vmatpush3.bf16.msra.mxu0 %v12521_v6  ;;  %v13911_v6 = vpop.f32.mrb[25].mxu1 }
 0x439   : > { %11384 = vmatprep.subr.bf16.mxu0 %v12523_v53  ;;  %v2532_v46 = vor.u32 %v2530_v0, %v2528_v59 }
 0x43c   : > { %11385 = vmatpush3.bf16.msra.mxu0 %v12523_v53 }
 0x43d   : > { %11386 = vmatprep.subr.bf16.mxu0 %v12524_v42 }
 0x43e   : > { %4965 = vmatmul.mubr.bf16.gmra.mrb[72].mxu0 %v13640_v21  ;;  %v2514_v21 = vshrl.u32 %v13668_v39, 16 }
 0x43f   : > { %4972 = vmatprep.mubr.bf16.mxu0 %v2505_v25  ;;  %v2542_v25 = vshll.u32 %v13695_v61, 16 }
 0x440   : > { %v2516_v31 = vor.u32 %v2514_v21, %v2512_v51  ;;  %11387 = vmatpush3.bf16.msra.mxu0 %v12524_v42  ;;  %v2546_v21 = vshrl.u32 %v13695_v61, 16  ;;  %v2552_v42 = vrot.slane %v2550_v40, 1 }
 0x441   : > { %11388 = vmatprep.subr.bf16.mxu0 %v12525_v4  ;;  %v2544_v51 = vrot.slane %v2542_v25, 1  ;;  %v2570_v25 = vshrl.u32 %v13707_v2, 16 }
 0x442   : > { %v2521_v34 = vsel %vm956_vm0, %v2516_v31, %v2520_v18  ;;  %v2554_v31 = vshrl.u32 %v13698_v29, 16 }
 0x444   : > { %11389 = vmatpush3.bf16.msra.mxu0 %v12525_v4  ;;  %v12527_v4 = vld [vmem:[%s15807_s2 + $0xa8] sm:$0xff]   ;;  %v2556_v14 = vor.u32 %v2554_v31, %v2552_v42 }
 0x445   : > { %9573 = vmatpush1.bf16.msra.mxu1 %v12527_v4  ;;  %v13962_v4 = vld [vmem:[#allocation2 + $0x110] sm:$0xff] }
 0x446   : > { %4973 = vmatmul.mubr.bf16.gmra.mrb[76].mxu0 %v13653_v30  ;;  %v2522_v30 = vshrl.u32 %v13671_v50, 16  ;;  %9574 = vmatprep.subr.bf16.mxu1 %v13727_v56 }
 0x447   : > { %4980 = vmatprep.mubr.bf16.mxu0 %v2513_v28 }
 0x448   : > { %v2524_v62 = vor.u32 %v2522_v30, %v2520_v18  ;;  %v2558_v18 = vshll.u32 %v13704_v58, 16 }
 0x44a   : > { %v2529_v60 = vsel %vm956_vm0, %v2524_v62, %v2528_v59  ;;  %v2560_v62 = vrot.slane %v2558_v18, 1 }
 0x44c   : > { %v2561_v0 = vsel %vm956_vm0, %v2556_v14, %v2560_v62 }
 0x44e   : > { %4981 = vmatmul.mubr.bf16.gmra.mrb[80].mxu0 %v13658_v33  ;;  %v2536_v33 = vrot.slane %v2534_v24, 1  ;;  %v2562_v24 = vshrl.u32 %v13704_v58, 16 }
 0x44f   : > { %4988 = vmatprep.mubr.bf16.mxu0 %v2521_v34 }
 0x450   : > { %v2537_v54 = vsel %vm956_vm0, %v2532_v46, %v2536_v33  ;;  %v2540_v44 = vor.u32 %v2538_v45, %v2536_v33  ;;  %v2566_v46 = vshll.u32 %v13707_v2, 16  ;;  %v2564_v33 = vor.u32 %v2562_v24, %v2560_v62 }
 0x452   : > { %v2545_v28 = vsel %vm956_vm0, %v2540_v44, %v2544_v51 }
 0x456   : > { %4989 = vmatmul.mubr.bf16.gmra.mrb[84].mxu0 %v13668_v39  ;;  %v13913_v39 = vpop.f32.mrb[26].mxu1 }
 0x457   : > { %4996 = vmatprep.mubr.bf16.mxu0 %v2529_v60  ;;  %v13916_v53 = vpop.f32.mrb[27].mxu1  ;;  %v342_v60 = vlaneseq }
 0x458   : > { %v13928_v34 = vpop.f32.mrb[28].mxu1 }
 0x459   : > { %v13931_v30 = vpop.f32.mrb[29].mxu1 }
 0x45e   : > { %4997 = vmatmul.mubr.bf16.gmra.mrb[88].mxu0 %v13671_v50  ;;  %v2548_v50 = vor.u32 %v2546_v21, %v2544_v51  ;;  %v12528_v51 = vld [vmem:[%s15807_s2 + $0xb0] sm:$0xff]  }
 0x45f   : > { %5004 = vmatprep.mubr.bf16.mxu0 %v2537_v54  ;;  %v2568_v54 = vrot.slane %v2566_v46, 1  ;;  %9575 = vmatpush1.bf16.msra.mxu1 %v12528_v51 }
 0x460   : > { %v2553_v63 = vsel %vm956_vm0, %v2548_v50, %v2552_v42  ;;  %v2576_v42 = vrot.slane %v2574_v1, 1  ;;  %9576 = vmatprep.subr.bf16.mxu1 %v13727_v56 }
 0x461   : > { %v2569_v44 = vsel %vm956_vm0, %v2564_v33, %v2568_v54  ;;  %v2572_v50 = vor.u32 %v2570_v25, %v2568_v54  ;;  %v2578_v33 = vshrl.u32 %v13717_v20, 16  ;;  %v2582_v54 = vshll.u32 %v13962_v4, 16 }
 0x466   : > { %5005 = vmatmul.mubr.bf16.gmra.mrb[92].mxu0 %v13682_v52  ;;  %v13933_v52 = vpop.f32.mrb[30].mxu1 }
 0x467   : > { %5012 = vmatprep.mubr.bf16.mxu0 %v2545_v28  ;;  %v13936_v59 = vpop.f32.mrb[31].mxu1 }
 0x468   : > { %v13951_v28 = vpop.f32.mrb[32].mxu1 }
 0x469   : > { %v13955_v40 = vpop.f32.mrb[33].mxu1 }
 0x46e   : > { %5013 = vmatmul.mubr.bf16.gmra.mrb[96].mxu0 %v13685_v38  ;;  %v13942_v38 = vshrl.u32 %v342_v60, 7  ;;  %v2577_v60 = vsel %vm956_vm0, %v2572_v50, %v2576_v42  ;;  %v13972_v50 = vld [vmem:[#allocation2 + $0x118] sm:$0xff] }
 0x46f   : > { %5020 = vmatprep.mubr.bf16.mxu0 %v2553_v63  ;;  %v13957_v63 = vpop.f32.mrb[34].mxu1 }
 0x470   : > { %v344_v45 = vadd.s32 8, %v13942_v38  ;;  %v13960_v31 = vpop.f32.mrb[35].mxu1 }
 0x472   : > { %v416_v21 = vshra.s32 %v344_v45, 5  ;;  %v15809_v45 = vmov 0.0  }
 0x474   : > { %vm560_vm4 = vcmp.lt.s32.totalorder %v416_v21, 16  ;;  %v2584_v21 = vrot.slane %v2582_v54, 1 }
 0x475   : > { %v776_v1 = vsel %vm560_vm4, 1.0, %v15809_v45 }
 0x476   : > { %5021 = vmatmul.mubr.bf16.gmra.mrb[100].mxu0 %v13695_v61  ;;  %v415_v61 = vshra.s32 %v13942_v38, 5 }
 0x477   : > { %5028 = vmatprep.mubr.bf16.mxu0 %v2561_v0 }
 0x478   : > { %vm559_vm3 = vcmp.lt.s32.totalorder %v415_v61, 16  ;;  %v2580_v61 = vor.u32 %v2578_v33, %v2576_v42 }
 0x479   : > { %v775_v25 = vsel %vm559_vm3, 1.0, %v15809_v45 }
 0x47a   : > { %v2585_v54 = vsel %vm956_vm0, %v2580_v61, %v2584_v21 }
 0x47e   : > { %5029 = vmatmul.mubr.bf16.gmra.mrb[104].mxu0 %v13698_v29 }
 0x47f   : > { %5036 = vmatprep.mubr.bf16.mxu0 %v2569_v44 }
 0x481   : > { %v4822_v18 = vpop.f32.mrb[0].mxu0 }
 0x482   : > { %v5144_v29 = vadd.f32 %v13768_v11, %v4822_v18  ;;  %v4824_v14 = vpop.f32.mrb[1].mxu0  ;;  %v347_v18 = vadd.s32 32, %v13942_v38 }
 0x483   : > { %v4825_v62 = vpop.f32.mrb[2].mxu0 }
 0x484   : > { %v5430_v0 = vmax.f32 %v5144_v29, 0.0  ;;  %v5147_v24 = vadd.f32 %v13779_v47, %v4825_v62  ;;  %v4827_v46 = vpop.f32.mrb[3].mxu0 }
 0x485   : > { %v348_v46 = vadd.s32 40, %v13942_v38 }
 0x486   : > { %v5431_v44 = vmax.f32 %v5147_v24, 0.0  ;;  %5037 = vmatmul.mubr.bf16.gmra.mrb[108].mxu0 %v13704_v58  ;;  %v5502_v11 = vmul.f32 %v5430_v0, %v775_v25  ;;  %v2586_v24 = vshrl.u32 %v13962_v4, 16  ;;  %v2590_v58 = vshll.u32 %v13972_v50, 16 }
 0x487   : > { %5044 = vmatprep.mubr.bf16.mxu0 %v2577_v60  ;;  %v13979_v60 = vpop.f32.mrb[36].mxu1 }
 0x488   : > { %v5503_v51 = vmul.f32 %v5431_v44, %v776_v1  ;;  %15879 = vst [vmem:[#allocation5_spill] sm:$0xff] %v13979_v60  ;;  %v419_v1 = vshra.s32 %v347_v18, 5  ;;  %v2588_v61 = vor.u32 %v2586_v24, %v2584_v21 }
 0x489   : > { %v4830_v47 = vpop.f32.mrb[4].mxu0 }
 0x48a   : > { %v5574_v29 = vpack.c.bf16 %v5503_v51, %v5502_v11  ;;  %v5152_v14 = vadd.f32 %v13766_v10, %v4830_v47  ;;  %v4832_v62 = vpop.f32.mrb[5].mxu0  ;;  %v13983_v10 = vpop.f32.mrb[37].mxu1  ;;  %v420_v51 = vshra.s32 %v348_v46, 5  ;;  %vm13993_vm5 = vcmp.lt.s32.totalorder %v419_v1, 16  ;;  %v13997_v46 = vld [vmem:[#allocation2 + $0x120] sm:$0xff] }
 0x48b   : > { %v4833_v45 = vpop.f32.mrb[6].mxu0  ;;  %v13985_v44 = vpop.f32.mrb[38].mxu1 }
 0x48c   : > { %5610 = vst [vmem:[#allocation4 + $0x18] sm:$0xff] %v5574_v29  ;;  %v5432_v42 = vmax.f32 %v5152_v14, 0.0  ;;  %v5155_v0 = vadd.f32 %v13776_v32, %v4833_v45  ;;  %v4835_v33 = vpop.f32.mrb[7].mxu0  ;;  %9289 = vmatprep.mubr.bf16.mxu1 %v5574_v29  ;;  %v5705_v25 = vshrl.u32 %v5574_v29, 16  ;;  %15880 = vst [vmem:[#allocation6_spill] sm:$0xff] %v13985_v44  ;;  %v5708_v62 = vshll.u32 %v5574_v29, 16 }
 0x48d   : > { %v12529_v32 = vld [vmem:[%s15807_s2 + $0xb8] sm:$0xff]   ;;  %v13991_v45 = vpop.f32.mrb[39].mxu1  ;;  %v2592_v14 = vrot.slane %v2590_v58, 1  ;;  %vm564_vm6 = vcmp.lt.s32.totalorder %v420_v51, 16  ;;  %v15885_v51 = vmov 0.0  }
 0x48e   : > { %v5433_v11 = vmax.f32 %v5155_v0, 0.0  ;;  %5045 = vmatmul.mubr.bf16.gmra.mrb[112].mxu0 %v13707_v2  ;;  %v5707_v47 = vrot.slane %v5705_v25, 7  ;;  %15881 = vst [vmem:[#allocation7_spill] sm:$0xff] %v13991_v45  ;;  %v5504_v33 = vmul.f32 0.0, %v5432_v42  ;;  %9577 = vmatpush1.bf16.msra.mxu1 %v12529_v32  ;;  %v2594_v42 = vshrl.u32 %v13972_v50, 16 }
 0x48f   : > { %5052 = vmatprep.mubr.bf16.mxu0 %v2585_v54  ;;  %9578 = vmatprep.subr.bf16.mxu1 %v13727_v56  ;;  %v2593_v58 = vsel %vm956_vm0, %v2588_v61, %v2592_v14  ;;  %v351_v45 = vadd.s32 64, %v13942_v38 }
 0x490   : > { %v5505_v60 = vmul.f32 0.0, %v5433_v11  ;;  %v5710_v18 = vor.u32 %v5708_v62, %v5707_v47  ;;  %v780_v62 = vsel %vm564_vm6, 1.0, %v15885_v51 }
 0x491   : > { %v4838_v2 = vpop.f32.mrb[8].mxu0 }
 0x492   : > { %v5575_v29 = vpack.c.bf16 %v5505_v60, %v5504_v33  ;;  %v5160_v25 = vadd.f32 %v13793_v12, %v4838_v2  ;;  %v4840_v44 = vpop.f32.mrb[9].mxu0  ;;  %v5711_v21 = vsel %vm5683_vm2, %v13773_v48, %v5710_v18  ;;  %v2598_v12 = vshll.u32 %v13997_v46, 16 }
 0x493   : > { %v4841_v24 = vpop.f32.mrb[10].mxu0  ;;  %9290 = vmatmul.mubr.bf16.gmra.mrb[80].mxu1 %v5711_v21  ;;  %v14007_v44 = vpop.f32.mrb[40].mxu1  ;;  %v779_v48 = vsel %vm13993_vm5, 1.0, %v15885_v51  ;;  %v2596_v2 = vor.u32 %v2594_v42, %v2592_v14  ;;  %v2602_v14 = vshrl.u32 %v13997_v46, 16 }
 0x494   : > { %5611 = vst [vmem:[#allocation4 + $0x20] sm:$0xff] %v5575_v29  ;;  %v5434_v54 = vmax.f32 %v5160_v25, 0.0  ;;  %v5163_v1 = vadd.f32 %v13797_v13, %v4841_v24  ;;  %v4843_v11 = vpop.f32.mrb[11].mxu0  ;;  %9297 = vmatprep.mubr.bf16.mxu1 %v5575_v29  ;;  %v5713_v60 = vshrl.u32 %v5575_v29, 16  ;;  %15884 = vst [vmem:[#allocation8_spill] sm:$0xff] %v14007_v44  ;;  %v14013_v32 = vpop.f32.mrb[41].mxu1 }
 0x495   : > { %15886 = vst [vmem:[#allocation9_spill] sm:$0xff] %v14013_v32  ;;  %v5716_v13 = vshll.u32 %v5575_v29, 16  ;;  %v14016_v18 = vpop.f32.mrb[42].mxu1  ;;  %v2600_v0 = vrot.slane %v2598_v12, 1  ;;  %v352_v32 = vadd.s32 72, %v13942_v38 }
 0x496   : > { %v5435_v61 = vmax.f32 %v5163_v1, 0.0  ;;  %5053 = vmatmul.mubr.bf16.gmra.mrb[116].mxu0 %v13717_v20  ;;  %v5715_v33 = vrot.slane %v5713_v60, 7  ;;  %15887 = vst [vmem:[#allocation10_spill] sm:$0xff] %v14016_v18  ;;  %v14018_v25 = vpop.f32.mrb[43].mxu1  ;;  %v5506_v21 = vmul.f32 %v5434_v54, %v779_v48 }
 0x497   : > { %5060 = vmatprep.mubr.bf16.mxu0 %v2593_v58  ;;  %v2606_v58 = vshll.u32 %v13739_v26, 16  ;;  %v2601_v48 = vsel %vm956_vm0, %v2596_v2, %v2600_v0 }
 0x498   : > { %v5507_v24 = vmul.f32 %v5435_v61, %v780_v62  ;;  %v5718_v11 = vor.u32 %v5716_v13, %v5715_v33  ;;  %v423_v61 = vshra.s32 %v351_v45, 5 }
 0x499   : > { %v4846_v44 = vpop.f32.mrb[12].mxu0 }
 0x49a   : > { %v5576_v1 = vpack.c.bf16 %v5507_v24, %v5506_v21  ;;  %v5168_v20 = vadd.f32 %v13791_v55, %v4846_v44  ;;  %v4848_v60 = vpop.f32.mrb[13].mxu0  ;;  %v5719_v29 = vsel %vm5683_vm2, %v5707_v47, %v5718_v11  ;;  %v424_v55 = vshra.s32 %v352_v32, 5  ;;  %v14028_v44 = vpop.f32.mrb[44].mxu1 }
 0x49b   : > { %v4849_v18 = vpop.f32.mrb[14].mxu0  ;;  %9298 = vmatmul.mubr.bf16.gmra.mrb[84].mxu1 %v5719_v29  ;;  %15888 = vst [vmem:[#allocation11_spill] sm:$0xff] %v14028_v44  ;;  %v14031_v24 = vpop.f32.mrb[45].mxu1  ;;  %v2604_v11 = vor.u32 %v2602_v14, %v2600_v0  ;;  %v14035_v29 = vld [vmem:[#allocation2 + $0x130] sm:$0xff]  ;;  %vm14039_vm7 = vcmp.lt.s32.totalorder %v423_v61, 16  ;;  %v2610_v61 = vshrl.u32 %v13739_v26, 16 }
 0x49c   : > { %5612 = vst [vmem:[#allocation4 + $0x28] sm:$0xff] %v5576_v1  ;;  %v5436_v42 = vmax.f32 %v5168_v20, 0.0  ;;  %v5171_v54 = vadd.f32 %v13795_v19, %v4849_v18  ;;  %v4851_v12 = vpop.f32.mrb[15].mxu0  ;;  %9305 = vmatprep.mubr.bf16.mxu1 %v5576_v1  ;;  %v5721_v62 = vshrl.u32 %v5576_v1, 16  ;;  %v5724_v21 = vshll.u32 %v5576_v1, 16  ;;  %v14033_v19 = vpop.f32.mrb[46].mxu1 }
 0x49d   : > { %v2608_v20 = vrot.slane %v2606_v58, 1  ;;  %15889 = vst [vmem:[#allocation12_spill] sm:$0xff] %v14033_v19  ;;  %v14037_v45 = vpop.f32.mrb[47].mxu1  ;;  %vm14043_vm8 = vcmp.lt.s32.totalorder %v424_v55, 16 }
 0x49e   : > { %v5437_v47 = vmax.f32 %v5171_v54, 0.0  ;;  %5061 = vmatmul.mubr.bf16.gmra.mrb[120].mxu0 %v13962_v4  ;;  %v5723_v13 = vrot.slane %v5721_v62, 7  ;;  %v5508_v18 = vmul.f32 0.0, %v5436_v42  ;;  %v7910_v54 = vrot.slane %v5724_v21, 1 }
 0x49f   : > { %5068 = vmatprep.mubr.bf16.mxu0 %v2601_v48  ;;  %v2609_v48 = vsel %vm956_vm0, %v2604_v11, %v2608_v20  ;;  %v783_v11 = vsel %vm14039_vm7, 1.0, %v15885_v51 }
 0x4a0   : > { %v5509_v60 = vmul.f32 0.0, %v5437_v47  ;;  %v5726_v2 = vor.u32 %v5724_v21, %v5723_v13  ;;  %v2614_v47 = vshll.u32 %v14035_v29, 16  ;;  %v12530_v21 = vld [vmem:[%s15807_s2 + $0xc0] sm:$0xff]  }
 0x4a1   : > { %v4854_v4 = vpop.f32.mrb[16].mxu0  ;;  %9579 = vmatpush1.bf16.msra.mxu1 %v12530_v21  ;;  %v356_v21 = vadd.s32 104, %v13942_v38 }
 0x4a2   : > { %v14047_v0 = vpack.c.bf16 %v5509_v60, %v5508_v18  ;;  %v5176_v14 = vadd.f32 %v13809_v36, %v4854_v4  ;;  %v4856_v58 = vpop.f32.mrb[17].mxu0  ;;  %v5727_v42 = vsel %vm5683_vm2, %v5715_v33, %v5726_v2  ;;  %v784_v2 = vsel %vm14043_vm8, 1.0, %v15885_v51  ;;  %9580 = vmatprep.subr.bf16.mxu1 %v13727_v56 }
 0x4a3   : > { %v4857_v12 = vpop.f32.mrb[18].mxu0  ;;  %9306 = vmatmul.mubr.bf16.gmra.mrb[88].mxu1 %v5727_v42  ;;  %v7911_v58 = vor.u32 %v7910_v54, %v5721_v62  ;;  %v355_v54 = vadd.s32 96, %v13942_v38 }
 0x4a4   : > { %5613 = vst [vmem:[#allocation4 + $0x30] sm:$0xff] %v14047_v0  ;;  %v5438_v55 = vmax.f32 %v5176_v14, 0.0  ;;  %v5179_v18 = vadd.f32 %v13813_v7, %v4857_v12  ;;  %v4859_v60 = vpop.f32.mrb[19].mxu0  ;;  %9313 = vmatprep.mubr.bf16.mxu1 %v14047_v0  ;;  %v5729_v36 = vshrl.u32 %v14047_v0, 16  ;;  %v5732_v33 = vshll.u32 %v14047_v0, 16  ;;  %v14068_v7 = vpop.f32.mrb[48].mxu1 }
 0x4a5   : > { %15894 = vst [vmem:[#allocation13_spill] sm:$0xff] %v14068_v7  ;;  %v14071_v42 = vpop.f32.mrb[49].mxu1  ;;  %v2612_v12 = vor.u32 %v2610_v61, %v2608_v20  ;;  %v2616_v60 = vrot.slane %v2614_v47, 1 }
 0x4a6   : > { %v5439_v4 = vmax.f32 %v5179_v18, 0.0  ;;  %5069 = vmatmul.mubr.bf16.gmra.mrb[124].mxu0 %v13972_v50  ;;  %v5731_v14 = vrot.slane %v5729_v36, 7  ;;  %v7915_v0 = vrot.slane %v5732_v33, 1  ;;  %v14074_v32 = vpop.f32.mrb[50].mxu1  ;;  %v5510_v1 = vmul.f32 %v5438_v55, %v783_v11 }
 0x4a7   : > { %5076 = vmatprep.mubr.bf16.mxu0 %v2609_v48  ;;  %15895 = vst [vmem:[#allocation14_spill] sm:$0xff] %v14074_v32  ;;  %v14079_v50 = vpop.f32.mrb[51].mxu1  ;;  %v2617_v55 = vsel %vm956_vm0, %v2612_v12, %v2616_v60  ;;  %v2622_v11 = vshll.u32 %v13753_v35, 16 }
 0x4a8   : > { %v5511_v19 = vmul.f32 %v5439_v4, %v784_v2  ;;  %v5734_v44 = vor.u32 %v5732_v33, %v5731_v14  ;;  %v14077_v18 = vsel %vm956_vm0, %v7911_v58, %v7915_v0  ;;  %15896 = vst [vmem:[#allocation15_spill] sm:$0xff] %v14079_v50  ;;  %v2618_v33 = vshrl.u32 %v14035_v29, 16 }
 0x4a9   : > { %v4862_v62 = vpop.f32.mrb[20].mxu0  ;;  %v7919_v12 = vor.u32 %v7915_v0, %v5729_v36  ;;  %v2624_v50 = vrot.slane %v2622_v11, 1 }
 0x4aa   : > { %v5578_v48 = vpack.c.bf16 %v5511_v19, %v5510_v1  ;;  %v5184_v20 = vadd.f32 %v13807_v49, %v4862_v62  ;;  %v4864_v61 = vpop.f32.mrb[21].mxu0  ;;  %v5735_v47 = vsel %vm5683_vm2, %v5723_v13, %v5734_v44  ;;  %v427_v49 = vshra.s32 %v355_v54, 5  ;;  %v2341_v54 = vld [vmem:[#allocation2 + $0x140] sm:$0x1] }
 0x4ab   : > { %v4865_v32 = vpop.f32.mrb[22].mxu0  ;;  %9314 = vmatmul.mubr.bf16.gmra.mrb[92].mxu1 %v5735_v47  ;;  %v428_v62 = vshra.s32 %v356_v21, 5  ;;  %v14089_v61 = vpop.f32.mrb[52].mxu1 }
 0x4ac   : > { %5614 = vst [vmem:[#allocation4 + $0x38] sm:$0xff] %v5578_v48  ;;  %v5440_v2 = vmax.f32 %v5184_v20, 0.0  ;;  %v5187_v4 = vadd.f32 %v13811_v8, %v4865_v32  ;;  %v4867_v58 = vpop.f32.mrb[23].mxu0  ;;  %9321 = vmatprep.mubr.bf16.mxu1 %v5578_v48  ;;  %v5737_v19 = vshrl.u32 %v5578_v48, 16  ;;  %v5740_v1 = vshll.u32 %v5578_v48, 16  ;;  %v14092_v7 = vpop.f32.mrb[53].mxu1 }
 0x4ad   : > { %v2620_v20 = vor.u32 %v2618_v33, %v2616_v60  ;;  %v14094_v8 = vpop.f32.mrb[54].mxu1  ;;  %vm14101_vm9 = vcmp.lt.s32.totalorder %v427_v49, 16  ;;  %vm14106_vm10 = vcmp.lt.s32.totalorder %v428_v62, 16  ;;  %v2626_v49 = vshrl.u32 %v13753_v35, 16 }
 0x4ae   : > { %v5441_v44 = vmax.f32 %v5187_v4, 0.0  ;;  %5077 = vmatmul.mubr.bf16.gmra.mrb[128].mxu0 %v13997_v46  ;;  %v5739_v13 = vrot.slane %v5737_v19, 7  ;;  %v7923_v47 = vrot.slane %v5740_v1, 1  ;;  %v5512_v32 = vmul.f32 0.0, %v5440_v2  ;;  %v14099_v4 = vpop.f32.mrb[55].mxu1 }
 0x4af   : > { %5084 = vmatprep.mubr.bf16.mxu0 %v2617_v55  ;;  %v788_v35 = vsel %vm14106_vm10, 1.0, %v15885_v51 }
 0x4b0   : > { %v5513_v58 = vmul.f32 0.0, %v5441_v44  ;;  %v5742_v48 = vor.u32 %v5740_v1, %v5739_v13  ;;  %v14097_v21 = vsel %vm956_vm0, %v7919_v12, %v7923_v47  ;;  %v2625_v1 = vsel %vm956_vm0, %v2620_v20, %v2624_v50  ;;  %v14123_v20 = vpop.f32.mrb[56].mxu1 }
 0x4b1   : > { %v4870_v36 = vpop.f32.mrb[24].mxu0  ;;  %v2630_v44 = vshll.u32 %v2341_v54, 16  ;;  %15901 = vst [vmem:[#allocation16_spill] sm:$0xff] %v14123_v20  ;;  %v7927_v54 = vor.u32 %v7923_v47, %v5737_v19  ;;  %v359_v47 = vadd.s32 128, %v13942_v38 }
 0x4b2   : > { %v5579_v0 = vpack.c.bf16 %v5513_v58, %v5512_v32  ;;  %v5192_v60 = vadd.f32 %v13831_v3, %v4870_v36  ;;  %v4872_v55 = vpop.f32.mrb[25].mxu0  ;;  %v5743_v11 = vsel %vm5683_vm2, %v5731_v14, %v5742_v48  ;;  %v12531_v36 = vld [vmem:[%s15807_s2 + $0xc8] sm:$0xff]   ;;  %v787_v14 = vsel %vm14101_vm9, 1.0, %v15885_v51 }
 0x4b3   : > { %v4873_v2 = vpop.f32.mrb[26].mxu0  ;;  %9322 = vmatmul.mubr.bf16.gmra.mrb[96].mxu1 %v5743_v11  ;;  %v2628_v55 = vor.u32 %v2626_v49, %v2624_v50  ;;  %v2632_v11 = vrot.slane %v2630_v44, 1 }
 0x4b4   : > { %5615 = vst [vmem:[#allocation4 + $0x40] sm:$0xff] %v5579_v0  ;;  %v5442_v12 = vmax.f32 %v5192_v60, 0.0  ;;  %v5195_v32 = vadd.f32 %v13835_v57, %v4873_v2  ;;  %v4875_v58 = vpop.f32.mrb[27].mxu0  ;;  %9329 = vmatprep.mubr.bf16.mxu1 %v5579_v0  ;;  %v5745_v3 = vshrl.u32 %v5579_v0, 16  ;;  %v5748_v62 = vshll.u32 %v5579_v0, 16  ;;  %9581 = vmatpush1.bf16.msra.mxu1 %v12531_v36  ;;  %v14126_v60 = vpop.f32.mrb[57].mxu1 }
 0x4b5   : > { %v14128_v46 = vpop.f32.mrb[58].mxu1  ;;  %9582 = vmatprep.subr.bf16.mxu1 %v13727_v56  ;;  %v360_v36 = vadd.s32 136, %v13942_v38 }
 0x4b6   : > { %v5443_v48 = vmax.f32 %v5195_v32, 0.0  ;;  %5085 = vmatmul.mubr.bf16.gmra.mrb[132].mxu0 %v13739_v26  ;;  %v5747_v57 = vrot.slane %v5745_v3, 7  ;;  %v7931_v0 = vrot.slane %v5748_v62, 1  ;;  %15902 = vst [vmem:[#allocation17_spill] sm:$0xff] %v14128_v46  ;;  %v5514_v33 = vmul.f32 %v5442_v12, %v787_v14  ;;  %v14134_v26 = vpop.f32.mrb[59].mxu1 }
 0x4b7   : > { %5092 = vmatprep.mubr.bf16.mxu0 %v2625_v1  ;;  %v2633_v12 = vsel %vm956_vm0, %v2628_v55, %v2632_v11  ;;  %v431_v46 = vshra.s32 %v359_v47, 5  ;;  %v432_v20 = vshra.s32 %v360_v36, 5 }
 0x4b8   : > { %v5515_v2 = vmul.f32 %v5443_v48, %v788_v35  ;;  %v5750_v58 = vor.u32 %v5748_v62, %v5747_v57  ;;  %v14132_v32 = vsel %vm956_vm0, %v7927_v54, %v7931_v0 }
 0x4b9   : > { %v4878_v19 = vpop.f32.mrb[28].mxu0  ;;  %vm14154_vm11 = vcmp.lt.s32.totalorder %v431_v46, 16  ;;  %vm576_vm12 = vcmp.lt.s32.totalorder %v432_v20, 16 }
 0x4ba   : > { %v5580_v1 = vpack.c.bf16 %v5515_v2, %v5514_v33  ;;  %v5200_v50 = vadd.f32 %v13829_v17, %v4878_v19  ;;  %v4880_v49 = vpop.f32.mrb[29].mxu0  ;;  %v5751_v44 = vsel %vm5683_vm2, %v5739_v13, %v5750_v58  ;;  %v14142_v33 = vpop.f32.mrb[60].mxu1  ;;  %v7935_v2 = vor.u32 %v7931_v0, %v5745_v3 }
 0x4bb   : > { %v4881_v56 = vpop.f32.mrb[30].mxu0  ;;  %9330 = vmatmul.mubr.bf16.gmra.mrb[100].mxu1 %v5751_v44  ;;  %v14145_v19 = vpop.f32.mrb[61].mxu1  ;;  %v792_v20 = vsel %vm576_vm12, 1.0, %v15885_v51 }
 0x4bc   : > { %5616 = vst [vmem:[#allocation4 + $0x48] sm:$0xff] %v5580_v1  ;;  %v5444_v62 = vmax.f32 %v5200_v50, 0.0  ;;  %v5203_v14 = vadd.f32 %v13833_v5, %v4881_v56  ;;  %v4883_v35 = vpop.f32.mrb[31].mxu0  ;;  %9337 = vmatprep.mubr.bf16.mxu1 %v5580_v1  ;;  %v5753_v48 = vshrl.u32 %v5580_v1, 16  ;;  %v5756_v54 = vshll.u32 %v5580_v1, 16  ;;  %v14147_v55 = vpop.f32.mrb[62].mxu1 }
 0x4bd   : > { %v14152_v47 = vpop.f32.mrb[63].mxu1 }
 0x4be   : > { %v5445_v17 = vmax.f32 %v5203_v14, 0.0  ;;  %5093 = vmatmul.mubr.bf16.gmra.mrb[136].mxu0 %v14035_v29  ;;  %v5755_v13 = vrot.slane %v5753_v48, 7  ;;  %v7939_v58 = vrot.slane %v5756_v54, 1  ;;  %v5516_v5 = vmul.f32 0.0, %v5444_v62 }
 0x4bf   : > { %5100 = vmatprep.mubr.bf16.mxu0 %v2633_v12 }
 0x4c0   : > { %v5517_v11 = vmul.f32 0.0, %v5445_v17  ;;  %v5758_v50 = vor.u32 %v5756_v54, %v5755_v13  ;;  %v14150_v1 = vsel %vm956_vm0, %v7935_v2, %v7939_v58  ;;  %v12532_v54 = vld [vmem:[%s15807_s2 + $0xd0] sm:$0xff]   ;;  %v12591_v2 = vld [vmem:[#allocation2 + $0x138] sm:$0xff] }
 0x4c1   : > { %v4886_v29 = vpop.f32.mrb[32].mxu0  ;;  %9583 = vmatpush1.bf16.msra.mxu1 %v12532_v54 }
 0x4c2   : > { %v5581_v3 = vpack.c.bf16 %v5517_v11, %v5516_v5  ;;  %v5208_v0 = vadd.f32 %v13863_v15, %v4886_v29  ;;  %v4888_v49 = vpop.f32.mrb[33].mxu0  ;;  %v5759_v44 = vsel %vm5683_vm2, %v5747_v57, %v5758_v50  ;;  %v791_v15 = vsel %vm14154_vm11, 1.0, %v15885_v51  ;;  %v14168_v57 = vpop.f32.mrb[64].mxu1 }
 0x4c3   : > { %v4889_v56 = vpop.f32.mrb[34].mxu0  ;;  %9338 = vmatmul.mubr.bf16.gmra.mrb[104].mxu1 %v5759_v44  ;;  %15905 = vst [vmem:[#allocation18_spill] sm:$0xff] %v14168_v57  ;;  %v7943_v5 = vor.u32 %v7939_v58, %v5753_v48  ;;  %v14170_v50 = vpop.f32.mrb[65].mxu1  ;;  %v363_v58 = vadd.s32 160, %v13942_v38 }
 0x4c4   : > { %5617 = vst [vmem:[#allocation4 + $0x50] sm:$0xff] %v5581_v3  ;;  %v5446_v12 = vmax.f32 %v5208_v0, 0.0  ;;  %v5211_v62 = vadd.f32 %v13867_v9, %v4889_v56  ;;  %v4891_v14 = vpop.f32.mrb[35].mxu0  ;;  %9345 = vmatprep.mubr.bf16.mxu1 %v5581_v3  ;;  %v5761_v46 = vshrl.u32 %v5581_v3, 16  ;;  %v5764_v35 = vshll.u32 %v5581_v3, 16  ;;  %v14173_v29 = vpop.f32.mrb[66].mxu1 }
 0x4c5   : > { %15906 = vst [vmem:[#allocation19_spill] sm:$0xff] %v14173_v29  ;;  %v14175_v3 = vld [vmem:[#allocation4] sm:$0xff]  ;;  %v14179_v56 = vpop.f32.mrb[67].mxu1 }
 0x4c6   : > { %v5447_v17 = vmax.f32 %v5211_v62, 0.0  ;;  %5101 = vmatmul.mubr.bf16.gmra.mrb[140].mxu0 %v12591_v2  ;;  %v5763_v9 = vrot.slane %v5761_v46, 7  ;;  %v7947_v11 = vrot.slane %v5764_v35, 1  ;;  %9584 = vmatprep.subr.bf16.mxu1 %v14175_v3  ;;  %v5518_v36 = vmul.f32 %v5446_v12, %v791_v15  ;;  %15907 = vst [vmem:[#allocation20_spill] sm:$0xff] %v14179_v56  ;;  %v14186_v56 = vpop.f32.mrb[68].mxu1 }
 0x4c7   : > { %11390 = vmatprep.mubr.bf16.mxu0 %v14077_v18  ;;  %v364_v62 = vadd.s32 168, %v13942_v38 }
 0x4c8   : > { %v5519_v0 = vmul.f32 %v5447_v17, %v792_v20  ;;  %v5766_v49 = vor.u32 %v5764_v35, %v5763_v9  ;;  %v7948_v44 = vsel %vm956_vm0, %v7943_v5, %v7947_v11  ;;  %v435_v5 = vshra.s32 %v363_v58, 5 }
 0x4c9   : > { %v4894_v48 = vpop.f32.mrb[36].mxu0  ;;  %v436_v57 = vshra.s32 %v364_v62, 5 }
 0x4ca   : > { %v5582_v14 = vpack.c.bf16 %v5519_v0, %v5518_v36  ;;  %v5216_v18 = vadd.f32 %v13860_v23, %v4894_v48  ;;  %v4896_v54 = vpop.f32.mrb[37].mxu0  ;;  %v5767_v2 = vsel %vm5683_vm2, %v5755_v13, %v5766_v49  ;;  %v7951_v0 = vor.u32 %v7947_v11, %v5761_v46  ;;  %v14189_v49 = vpop.f32.mrb[69].mxu1 }
 0x4cb   : > { %v4897_v29 = vpop.f32.mrb[38].mxu0  ;;  %9346 = vmatmul.mubr.bf16.gmra.mrb[108].mxu1 %v5767_v2  ;;  %v14192_v48 = vpop.f32.mrb[70].mxu1  ;;  %vm14197_vm13 = vcmp.lt.s32.totalorder %v435_v5, 16  ;;  %vm580_vm14 = vcmp.lt.s32.totalorder %v436_v57, 16 }
 0x4cc   : > { %5618 = vst [vmem:[#allocation4 + $0x58] sm:$0xff] %v5582_v14  ;;  %v5448_v12 = vmax.f32 %v5216_v18, 0.0  ;;  %v5219_v35 = vadd.f32 %v13865_v16, %v4897_v29  ;;  %v4899_v15 = vpop.f32.mrb[39].mxu0  ;;  %9353 = vmatprep.mubr.bf16.mxu1 %v5582_v14  ;;  %v5769_v20 = vshrl.u32 %v5582_v14, 16  ;;  %v5772_v17 = vshll.u32 %v5582_v14, 16  ;;  %v14195_v62 = vpop.f32.mrb[71].mxu1 }
 0x4ce   : > { %v5449_v36 = vmax.f32 %v5219_v35, 0.0  ;;  %11391 = vmatmul.mubr.bf16.vlgmr.msra.gmra.mrb[144].mxu0 %v14097_v21  ;;  %v5771_v23 = vrot.slane %v5769_v20, 7  ;;  %v7955_v13 = vrot.slane %v5772_v17, 1  ;;  %v5520_v16 = vmul.f32 0.0, %v5448_v12 }
 0x4cf   : > { %11394 = vmatprep.mubr.bf16.mxu0 %v14132_v32 }
 0x4d0   : > { %v5521_v29 = vmul.f32 0.0, %v5449_v36  ;;  %v5774_v18 = vor.u32 %v5772_v17, %v5771_v23  ;;  %v7956_v58 = vsel %vm956_vm0, %v7951_v0, %v7955_v13  ;;  %v795_v36 = vsel %vm14197_vm13, 1.0, %v15885_v51 }
 0x4d1   : > { %v4902_v21 = vpop.f32.mrb[40].mxu0  ;;  %v7959_v57 = vor.u32 %v7955_v13, %v5769_v20 }
 0x4d2   : > { %v5583_v46 = vpack.c.bf16 %v5521_v29, %v5520_v16  ;;  %v5224_v11 = vadd.f32 %v13892_v41, %v4902_v21  ;;  %v4904_v54 = vpop.f32.mrb[41].mxu0  ;;  %v5775_v32 = vsel %vm5683_vm2, %v5763_v9, %v5774_v18  ;;  %v796_v41 = vsel %vm580_vm14, 1.0, %v15885_v51 }
 0x4d3   : > { %v4905_v2 = vpop.f32.mrb[42].mxu0  ;;  %9354 = vmatmul.mubr.bf16.gmra.mrb[112].mxu1 %v5775_v32  ;;  %v368_v54 = vadd.s32 200, %v13942_v38 }
 0x4d4   : > { %5619 = vst [vmem:[#allocation4 + $0x60] sm:$0xff] %v5583_v46  ;;  %v5450_v12 = vmax.f32 %v5224_v11, 0.0  ;;  %v5227_v35 = vadd.f32 %v13896_v37, %v4905_v2  ;;  %v4907_v15 = vpop.f32.mrb[43].mxu0  ;;  %9361 = vmatprep.mubr.bf16.mxu1 %v5583_v46  ;;  %v7961_v17 = vshll.u32 %v5583_v46, 16  ;;  %v5777_v5 = vshrl.u32 %v5583_v46, 16  ;;  %v12533_v37 = vld [vmem:[%s15807_s2 + $0xd8] sm:$0xff]  }
 0x4d5   : > { %9585 = vmatpush1.bf16.msra.mxu1 %v12533_v37  ;;  %v367_v11 = vadd.s32 192, %v13942_v38 }
 0x4d6   : > { %v5451_v0 = vmax.f32 %v5227_v35, 0.0  ;;  %11395 = vmatmul.mubr.bf16.gmra.mrb[148].mxu0 %v14150_v1  ;;  %v7963_v9 = vrot.slane %v7961_v17, 1  ;;  %v5779_v16 = vrot.slane %v5777_v5, 7  ;;  %v5522_v29 = vmul.f32 %v5450_v12, %v795_v36  ;;  %9586 = vmatprep.subr.bf16.mxu1 %v14175_v3 }
 0x4d7   : > { %11398 = vmatprep.mubr.bf16.mxu0 %v7948_v44  ;;  %v439_v36 = vshra.s32 %v367_v11, 5 }
 0x4d8   : > { %v5523_v18 = vmul.f32 %v5451_v0, %v796_v41  ;;  %v7964_v21 = vsel %vm956_vm0, %v7959_v57, %v7963_v9  ;;  %v5782_v46 = vor.u32 %v7961_v17, %v5779_v16  ;;  %v440_v41 = vshra.s32 %v368_v54, 5 }
 0x4d9   : > { %v4910_v14 = vpop.f32.mrb[44].mxu0  ;;  %v7967_v57 = vor.u32 %v7963_v9, %v5777_v5  ;;  %vm14220_vm15 = vcmp.lt.s32.totalorder %v439_v36, 16 }
 0x4da   : > { %v5584_v1 = vpack.c.bf16 %v5523_v18, %v5522_v29  ;;  %v5232_v20 = vadd.f32 %v13889_v43, %v4910_v14  ;;  %v4912_v13 = vpop.f32.mrb[45].mxu0  ;;  %v5783_v32 = vsel %vm5683_vm2, %v5771_v23, %v5782_v46  ;;  %vm584_vm1 = vcmp.lt.s32.totalorder %v440_v41, 16 }
 0x4db   : > { %v4913_v44 = vpop.f32.mrb[46].mxu0  ;;  %9362 = vmatmul.mubr.bf16.gmra.mrb[116].mxu1 %v5783_v32 }
 0x4dc   : > { %5620 = vst [vmem:[#allocation4 + $0x68] sm:$0xff] %v5584_v1  ;;  %v5452_v2 = vmax.f32 %v5232_v20, 0.0  ;;  %v5235_v12 = vadd.f32 %v13894_v22, %v4913_v44  ;;  %v4915_v35 = vpop.f32.mrb[47].mxu0  ;;  %9369 = vmatprep.mubr.bf16.mxu1 %v5584_v1  ;;  %v7969_v15 = vshll.u32 %v5584_v1, 16  ;;  %v5785_v17 = vshrl.u32 %v5584_v1, 16 }
 0x4dd   : > { %v799_v44 = vsel %vm14220_vm15, 1.0, %v15885_v51 }
 0x4de   : > { %v5453_v0 = vmax.f32 %v5235_v12, 0.0  ;;  %11399 = vmatmul.mubr.bf16.gmra.mrb[152].mxu0 %v7956_v58  ;;  %v7971_v37 = vrot.slane %v7969_v15, 1  ;;  %v5787_v43 = vrot.slane %v5785_v17, 7  ;;  %v5524_v29 = vmul.f32 0.0, %v5452_v2 }
 0x4df   : > { %11402 = vmatprep.mubr.bf16.mxu0 %v7964_v21 }
 0x4e0   : > { %v5525_v23 = vmul.f32 0.0, %v5453_v0  ;;  %v7972_v18 = vsel %vm956_vm0, %v7967_v57, %v7971_v37  ;;  %v5790_v46 = vor.u32 %v7969_v15, %v5787_v43  ;;  %v7975_v12 = vor.u32 %v7971_v37, %v5785_v17 }
 0x4e1   : > { %v4918_v22 = vpop.f32.mrb[48].mxu0  ;;  %v371_v57 = vadd.s32 224, %v13942_v38 }
 0x4e2   : > { %v5585_v20 = vpack.c.bf16 %v5525_v23, %v5524_v29  ;;  %v5240_v11 = vadd.f32 %v13911_v6, %v4918_v22  ;;  %v4920_v54 = vpop.f32.mrb[49].mxu0  ;;  %v5791_v58 = vsel %vm5683_vm2, %v5779_v16, %v5790_v46  ;;  %v800_v6 = vsel %vm584_vm1, 1.0, %v15885_v51 }
 0x4e3   : > { %v4921_v5 = vpop.f32.mrb[50].mxu0  ;;  %9370 = vmatmul.mubr.bf16.gmra.mrb[120].mxu1 %v5791_v58  ;;  %v372_v29 = vadd.s32 232, %v13942_v38  ;;  %v12534_v58 = vld [vmem:[%s15807_s2 + $0xe0] sm:$0xff]  }
 0x4e4   : > { %5621 = vst [vmem:[#allocation4 + $0x70] sm:$0xff] %v5585_v20  ;;  %v5454_v9 = vmax.f32 %v5240_v11, 0.0  ;;  %v5243_v21 = vadd.f32 %v13916_v53, %v4921_v5  ;;  %v4923_v1 = vpop.f32.mrb[51].mxu0  ;;  %9377 = vmatprep.mubr.bf16.mxu1 %v5585_v20  ;;  %v7977_v13 = vshll.u32 %v5585_v20, 16  ;;  %v5793_v32 = vshrl.u32 %v5585_v20, 16  ;;  %9587 = vmatpush1.bf16.msra.mxu1 %v12534_v58 }
 0x4e5   : > { %v443_v5 = vshra.s32 %v371_v57, 5  ;;  %9588 = vmatprep.subr.bf16.mxu1 %v14175_v3  ;;  %v375_v58 = vadd.s32 256, %v13942_v38 }
 0x4e6   : > { %v5455_v2 = vmax.f32 %v5243_v21, 0.0  ;;  %11403 = vmatmul.mubr.bf16.gmra.mrb[156].mxu0 %v7972_v18  ;;  %v7979_v16 = vrot.slane %v7977_v13, 1  ;;  %v5795_v35 = vrot.slane %v5793_v32, 7  ;;  %v5526_v15 = vmul.f32 %v5454_v9, %v799_v44 }
 0x4e7   : > { %v444_v9 = vshra.s32 %v372_v29, 5  ;;  %vm14242_vm3 = vcmp.lt.s32.totalorder %v443_v5, 16  ;;  %v376_v5 = vadd.s32 264, %v13942_v38 }
 0x4e8   : > { %v5527_v36 = vmul.f32 %v5455_v2, %v800_v6  ;;  %v7980_v41 = vsel %vm956_vm0, %v7975_v12, %v7979_v16  ;;  %v5798_v53 = vor.u32 %v7977_v13, %v5795_v35  ;;  %v7983_v21 = vor.u32 %v7979_v16, %v5793_v32 }
 0x4e9   : > { %v4926_v0 = vpop.f32.mrb[52].mxu0  ;;  %11406 = vmatprep.mubr.bf16.mxu0 %v7980_v41  ;;  %vm588_vm4 = vcmp.lt.s32.totalorder %v444_v9, 16 }
 0x4ea   : > { %v5586_v23 = vpack.c.bf16 %v5527_v36, %v5526_v15  ;;  %v5248_v46 = vadd.f32 %v13908_v27, %v4926_v0  ;;  %v4928_v14 = vpop.f32.mrb[53].mxu0  ;;  %v5799_v18 = vsel %vm5683_vm2, %v5787_v43, %v5798_v53 }
 0x4eb   : > { %v4929_v17 = vpop.f32.mrb[54].mxu0  ;;  %9378 = vmatmul.mubr.bf16.gmra.mrb[124].mxu1 %v5799_v18 }
 0x4ec   : > { %5622 = vst [vmem:[#allocation4 + $0x78] sm:$0xff] %v5586_v23  ;;  %v5456_v37 = vmax.f32 %v5248_v46, 0.0  ;;  %v5251_v22 = vadd.f32 %v13913_v39, %v4929_v17  ;;  %v4931_v20 = vpop.f32.mrb[55].mxu0  ;;  %9385 = vmatprep.mubr.bf16.mxu1 %v5586_v23  ;;  %v7985_v11 = vshll.u32 %v5586_v23, 16  ;;  %v5801_v54 = vshrl.u32 %v5586_v23, 16 }
 0x4ed   : > { %v803_v46 = vsel %vm14242_vm3, 1.0, %v15885_v51 }
 0x4ee   : > { %v5457_v27 = vmax.f32 %v5251_v22, 0.0  ;;  %v7987_v1 = vrot.slane %v7985_v11, 1  ;;  %v5803_v43 = vrot.slane %v5801_v54, 7  ;;  %v5528_v13 = vmul.f32 0.0, %v5456_v37 }
 0x4f0   : > { %v5529_v44 = vmul.f32 0.0, %v5457_v27  ;;  %v7988_v39 = vsel %vm956_vm0, %v7983_v21, %v7987_v1  ;;  %v5806_v6 = vor.u32 %v7985_v11, %v5803_v43  ;;  %v7991_v18 = vor.u32 %v7987_v1, %v5801_v54 }
 0x4f1   : > { %v4934_v12 = vpop.f32.mrb[56].mxu0  ;;  %11407 = vmatmul.mubr.bf16.gmra.mrb[160].mxu0 %v7988_v39 }
 0x4f2   : > { %v5587_v15 = vpack.c.bf16 %v5529_v44, %v5528_v13  ;;  %v5256_v36 = vadd.f32 %v13931_v30, %v4934_v12  ;;  %v4936_v32 = vpop.f32.mrb[57].mxu0  ;;  %v5807_v16 = vsel %vm5683_vm2, %v5795_v35, %v5806_v6  ;;  %v804_v30 = vsel %vm588_vm4, 1.0, %v15885_v51  ;;  %v12535_v12 = vld [vmem:[%s15807_s2 + $0xe8] sm:$0xff]  }
 0x4f3   : > { %v4937_v41 = vpop.f32.mrb[58].mxu0  ;;  %9386 = vmatmul.mubr.bf16.gmra.mrb[128].mxu1 %v5807_v16 }
 0x4f4   : > { %5623 = vst [vmem:[#allocation4 + $0x80] sm:$0xff] %v5587_v15  ;;  %v5458_v53 = vmax.f32 %v5256_v36, 0.0  ;;  %v5259_v0 = vadd.f32 %v13936_v59, %v4937_v41  ;;  %v4939_v57 = vpop.f32.mrb[59].mxu0  ;;  %9393 = vmatprep.mubr.bf16.mxu1 %v5587_v15  ;;  %v7993_v29 = vshll.u32 %v5587_v15, 16  ;;  %v5809_v23 = vshrl.u32 %v5587_v15, 16  ;;  %9589 = vmatpush1.bf16.msra.mxu1 %v12535_v12 }
 0x4f5   : > { %v447_v15 = vshra.s32 %v375_v58, 5  ;;  %v448_v36 = vshra.s32 %v376_v5, 5  ;;  %9590 = vmatprep.subr.bf16.mxu1 %v14175_v3 }
 0x4f6   : > { %v5459_v14 = vmax.f32 %v5259_v0, 0.0  ;;  %v7995_v17 = vrot.slane %v7993_v29, 1  ;;  %v5811_v35 = vrot.slane %v5809_v23, 7  ;;  %v5530_v37 = vmul.f32 %v5458_v53, %v803_v46 }
 0x4f7   : > { %vm14264_vm5 = vcmp.lt.s32.totalorder %v447_v15, 16  ;;  %vm592_vm6 = vcmp.lt.s32.totalorder %v448_v36, 16 }
 0x4f8   : > { %v5531_v22 = vmul.f32 %v5459_v14, %v804_v30  ;;  %v7996_v20 = vsel %vm956_vm0, %v7991_v18, %v7995_v17  ;;  %v5814_v11 = vor.u32 %v7993_v29, %v5811_v35  ;;  %v7999_v32 = vor.u32 %v7995_v17, %v5809_v23 }
 0x4f9   : > { %v4942_v59 = vpop.f32.mrb[60].mxu0  ;;  %11410 = vmatprep.mubr.bf16.mxu0 %v7996_v20 }
 0x4fa   : > { %v5588_v9 = vpack.c.bf16 %v5531_v22, %v5530_v37  ;;  %v5264_v27 = vadd.f32 %v13928_v34, %v4942_v59  ;;  %v4944_v21 = vpop.f32.mrb[61].mxu0  ;;  %v5815_v13 = vsel %vm5683_vm2, %v5803_v43, %v5814_v11  ;;  %v807_v59 = vsel %vm14264_vm5, 1.0, %v15885_v51 }
 0x4fb   : > { %v4945_v54 = vpop.f32.mrb[62].mxu0  ;;  %9394 = vmatmul.mubr.bf16.gmra.mrb[132].mxu1 %v5815_v13 }
 0x4fc   : > { %5624 = vst [vmem:[#allocation4 + $0x88] sm:$0xff] %v5588_v9  ;;  %v5460_v1 = vmax.f32 %v5264_v27, 0.0  ;;  %v5267_v44 = vadd.f32 %v13933_v52, %v4945_v54  ;;  %v4947_v39 = vpop.f32.mrb[63].mxu0  ;;  %9401 = vmatprep.mubr.bf16.mxu1 %v5588_v9  ;;  %v8001_v6 = vshll.u32 %v5588_v9, 16  ;;  %v5817_v2 = vshrl.u32 %v5588_v9, 16 }
 0x4fe   : > { %v5461_v34 = vmax.f32 %v5267_v44, 0.0  ;;  %v8003_v16 = vrot.slane %v8001_v6, 1  ;;  %v5819_v43 = vrot.slane %v5817_v2, 7  ;;  %v5532_v41 = vmul.f32 0.0, %v5460_v1 }
 0x4ff   : > { %v379_v1 = vadd.s32 288, %v13942_v38  ;;  %v380_v44 = vadd.s32 296, %v13942_v38 }
 0x500   : > { %v5533_v53 = vmul.f32 0.0, %v5461_v34  ;;  %v8004_v52 = vsel %vm956_vm0, %v7999_v32, %v8003_v16  ;;  %v5822_v0 = vor.u32 %v8001_v6, %v5819_v43  ;;  %v8007_v5 = vor.u32 %v8003_v16, %v5817_v2 }
 0x501   : > { %v4950_v29 = vpop.f32.mrb[64].mxu0  ;;  %11411 = vmatmul.mubr.bf16.gmra.mrb[164].mxu0 %v8004_v52  ;;  %v451_v52 = vshra.s32 %v379_v1, 5 }
 0x502   : > { %v5589_v46 = vpack.c.bf16 %v5533_v53, %v5532_v41  ;;  %v5272_v30 = vadd.f32 %v13955_v40, %v4950_v29  ;;  %v4952_v23 = vpop.f32.mrb[65].mxu0  ;;  %v5823_v14 = vsel %vm5683_vm2, %v5811_v35, %v5822_v0  ;;  %v808_v40 = vsel %vm592_vm6, 1.0, %v15885_v51  ;;  %v12536_v53 = vld [vmem:[%s15807_s2 + $0xf0] sm:$0xff]  }
 0x503   : > { %v4953_v18 = vpop.f32.mrb[66].mxu0  ;;  %9402 = vmatmul.mubr.bf16.gmra.mrb[136].mxu1 %v5823_v14  ;;  %v452_v0 = vshra.s32 %v380_v44, 5  ;;  %vm14286_vm7 = vcmp.lt.s32.totalorder %v451_v52, 16 }
 0x504   : > { %5625 = vst [vmem:[#allocation4 + $0x90] sm:$0xff] %v5589_v46  ;;  %v5462_v17 = vmax.f32 %v5272_v30, 0.0  ;;  %v5275_v37 = vadd.f32 %v13960_v31, %v4953_v18  ;;  %v4955_v22 = vpop.f32.mrb[67].mxu0  ;;  %9409 = vmatprep.mubr.bf16.mxu1 %v5589_v46  ;;  %v8009_v20 = vshll.u32 %v5589_v46, 16  ;;  %v5825_v11 = vshrl.u32 %v5589_v46, 16  ;;  %9591 = vmatpush1.bf16.msra.mxu1 %v12536_v53 }
 0x505   : > { %9592 = vmatprep.subr.bf16.mxu1 %v14175_v3  ;;  %vm596_vm8 = vcmp.lt.s32.totalorder %v452_v0, 16 }
 0x506   : > { %v5463_v58 = vmax.f32 %v5275_v37, 0.0  ;;  %v8011_v9 = vrot.slane %v8009_v20, 1  ;;  %v5827_v35 = vrot.slane %v5825_v11, 7  ;;  %v5534_v27 = vmul.f32 %v5462_v17, %v807_v59 }
 0x508   : > { %v5535_v21 = vmul.f32 %v5463_v58, %v808_v40  ;;  %v8012_v13 = vsel %vm956_vm0, %v8007_v5, %v8011_v9  ;;  %v5830_v54 = vor.u32 %v8009_v20, %v5827_v35  ;;  %v8015_v57 = vor.u32 %v8011_v9, %v5825_v11  ;;  %v15918_v40 = vld [vmem:[#allocation7_spill] sm:$0xff] }
 0x509   : > { %v4958_v31 = vpop.f32.mrb[68].mxu0  ;;  %11414 = vmatprep.mubr.bf16.mxu0 %v8012_v13 }
 0x50a   : > { %v5590_v39 = vpack.c.bf16 %v5535_v21, %v5534_v27  ;;  %v5280_v6 = vadd.f32 %v13951_v28, %v4958_v31  ;;  %v4960_v12 = vpop.f32.mrb[69].mxu0  ;;  %v5831_v15 = vsel %vm5683_vm2, %v5819_v43, %v5830_v54  ;;  %v811_v21 = vsel %vm14286_vm7, 1.0, %v15885_v51 }
 0x50b   : > { %v4961_v2 = vpop.f32.mrb[70].mxu0  ;;  %9410 = vmatmul.mubr.bf16.gmra.mrb[140].mxu1 %v5831_v15  ;;  %v383_v15 = vadd.s32 320, %v13942_v38 }
 0x50c   : > { %5626 = vst [vmem:[#allocation4 + $0x98] sm:$0xff] %v5590_v39  ;;  %v5464_v36 = vmax.f32 %v5280_v6, 0.0  ;;  %v5283_v34 = vadd.f32 %v13957_v63, %v4961_v2  ;;  %v4963_v32 = vpop.f32.mrb[71].mxu0  ;;  %9417 = vmatprep.mubr.bf16.mxu1 %v5590_v39  ;;  %v8017_v16 = vshll.u32 %v5590_v39, 16  ;;  %v5833_v41 = vshrl.u32 %v5590_v39, 16 }
 0x50d   : > { %v384_v2 = vadd.s32 328, %v13942_v38 }
 0x50e   : > { %v5465_v28 = vmax.f32 %v5283_v34, 0.0  ;;  %v8019_v29 = vrot.slane %v8017_v16, 1  ;;  %v5835_v43 = vrot.slane %v5833_v41, 7  ;;  %v5536_v46 = vmul.f32 0.0, %v5464_v36  ;;  %v15919_v34 = vld [vmem:[#allocation5_spill] sm:$0xff] }
 0x510   : > { %v5537_v30 = vmul.f32 0.0, %v5465_v28  ;;  %v8020_v63 = vsel %vm956_vm0, %v8015_v57, %v8019_v29  ;;  %v5838_v23 = vor.u32 %v8017_v16, %v5835_v43  ;;  %v8023_v54 = vor.u32 %v8019_v29, %v5833_v41  ;;  %v15920_v28 = vld [vmem:[#allocation6_spill] sm:$0xff] }
 0x511   : > { %v4966_v18 = vpop.f32.mrb[72].mxu0  ;;  %11415 = vmatmul.mubr.bf16.gmra.mrb[168].mxu0 %v8020_v63  ;;  %v455_v63 = vshra.s32 %v383_v15, 5 }
 0x512   : > { %v5591_v17 = vpack.c.bf16 %v5537_v30, %v5536_v46  ;;  %v5288_v37 = vadd.f32 %v13983_v10, %v4966_v18  ;;  %v4968_v22 = vpop.f32.mrb[73].mxu0  ;;  %v5839_v20 = vsel %vm5683_vm2, %v5827_v35, %v5838_v23  ;;  %v812_v10 = vsel %vm596_vm8, 1.0, %v15885_v51 }
 0x513   : > { %v4969_v11 = vpop.f32.mrb[74].mxu0  ;;  %9418 = vmatmul.mubr.bf16.gmra.mrb[144].mxu1 %v5839_v20  ;;  %v456_v23 = vshra.s32 %v384_v2, 5  ;;  %v12537_v22 = vld [vmem:[%s15807_s2 + $0xf8] sm:$0xff]   ;;  %vm14310_vm9 = vcmp.lt.s32.totalorder %v455_v63, 16 }
 0x514   : > { %5627 = vst [vmem:[#allocation4 + $0xa0] sm:$0xff] %v5591_v17  ;;  %v5466_v59 = vmax.f32 %v5288_v37, 0.0  ;;  %v5291_v58 = vadd.f32 %v15918_v40, %v4969_v11  ;;  %v4971_v5 = vpop.f32.mrb[75].mxu0  ;;  %9425 = vmatprep.mubr.bf16.mxu1 %v5591_v17  ;;  %v8025_v9 = vshll.u32 %v5591_v17, 16  ;;  %v5841_v27 = vshrl.u32 %v5591_v17, 16  ;;  %9593 = vmatpush1.bf16.msra.mxu1 %v12537_v22 }
 0x515   : > { %9883 = vmatprep.subr.bf16.mxu1 %v14175_v3  ;;  %vm600_vm10 = vcmp.lt.s32.totalorder %v456_v23, 16  ;;  %v387_v23 = vadd.s32 352, %v13942_v38 }
 0x516   : > { %v5467_v13 = vmax.f32 %v5291_v58, 0.0  ;;  %v8027_v31 = vrot.slane %v8025_v9, 1  ;;  %v5843_v35 = vrot.slane %v5841_v27, 7  ;;  %v5538_v1 = vmul.f32 %v5466_v59, %v811_v21 }
 0x518   : > { %v5539_v44 = vmul.f32 %v5467_v13, %v812_v10  ;;  %v8028_v39 = vsel %vm956_vm0, %v8023_v54, %v8027_v31  ;;  %v5846_v6 = vor.u32 %v8025_v9, %v5843_v35  ;;  %v8031_v17 = vor.u32 %v8027_v31, %v5841_v27  ;;  %v15923_v10 = vld [vmem:[#allocation9_spill] sm:$0xff] }
 0x519   : > { %v4974_v12 = vpop.f32.mrb[76].mxu0  ;;  %11418 = vmatprep.mubr.bf16.mxu0 %v8028_v39 }
 0x51a   : > { %v5592_v36 = vpack.c.bf16 %v5539_v44, %v5538_v1  ;;  %v5296_v32 = vadd.f32 %v15919_v34, %v4974_v12  ;;  %v4976_v16 = vpop.f32.mrb[77].mxu0  ;;  %v5847_v53 = vsel %vm5683_vm2, %v5835_v43, %v5846_v6 }
 0x51b   : > { %v4977_v41 = vpop.f32.mrb[78].mxu0  ;;  %9426 = vmatmul.mubr.bf16.gmra.mrb[148].mxu1 %v5847_v53  ;;  %v14302_v52 = vld [vmem:[#allocation4 + $0xa0] sm:$0xff] }
 0x51c   : > { %5628 = vst [vmem:[#allocation4 + $0xa8] sm:$0xff] %v5592_v36  ;;  %v5468_v0 = vmax.f32 %v5296_v32, 0.0  ;;  %v5299_v57 = vadd.f32 %v15920_v28, %v4977_v41  ;;  %v4979_v29 = vpop.f32.mrb[79].mxu0  ;;  %9433 = vmatprep.mubr.bf16.mxu1 %v5592_v36  ;;  %v8033_v46 = vshll.u32 %v5592_v36, 16  ;;  %v5849_v30 = vshrl.u32 %v5592_v36, 16 }
 0x51d   : > { %v15838_v14 = vshll.u32 %v14302_v52, 16  ;;  %v7171_v27 = vshrl.u32 %v14302_v52, 16  ;;  %v815_v36 = vsel %vm14310_vm9, 1.0, %v15885_v51 }
 0x51e   : > { %v5469_v18 = vmax.f32 %v5299_v57, 0.0  ;;  %v8035_v37 = vrot.slane %v8033_v46, 1  ;;  %v5851_v43 = vrot.slane %v5849_v30, 7  ;;  %v5540_v20 = vmul.f32 0.0, %v5468_v0 }
 0x51f   : > { %v14317_v9 = vrot.slane %v15838_v14, 1 }
 0x520   : > { %v5541_v11 = vmul.f32 0.0, %v5469_v18  ;;  %v8036_v59 = vsel %vm956_vm0, %v8031_v17, %v8035_v37  ;;  %v5854_v40 = vor.u32 %v8033_v46, %v5851_v43  ;;  %v8039_v16 = vor.u32 %v8035_v37, %v5849_v30  ;;  %v15925_v37 = vld [vmem:[#allocation8_spill] sm:$0xff] }
 0x521   : > { %v4982_v5 = vpop.f32.mrb[80].mxu0  ;;  %11419 = vmatmul.mubr.bf16.gmra.mrb[172].mxu0 %v8036_v59  ;;  %v7173_v39 = vor.u32 %v7171_v27, %v14317_v9  ;;  %v388_v18 = vadd.s32 360, %v13942_v38  ;;  %v15926_v27 = vld [vmem:[#allocation10_spill] sm:$0xff] }
 0x522   : > { %v5593_v21 = vpack.c.bf16 %v5541_v11, %v5540_v20  ;;  %v5304_v13 = vadd.f32 %v15923_v10, %v4982_v5  ;;  %v4984_v54 = vpop.f32.mrb[81].mxu0  ;;  %v5855_v31 = vsel %vm5683_vm2, %v5843_v35, %v5854_v40  ;;  %v816_v35 = vsel %vm600_vm10, 1.0, %v15885_v51 }
 0x523   : > { %v4985_v1 = vpop.f32.mrb[82].mxu0  ;;  %9434 = vmatmul.mubr.bf16.gmra.mrb[152].mxu1 %v5855_v31  ;;  %v14322_v44 = vld [vmem:[#allocation4 + $0xa8] sm:$0xff]  ;;  %v459_v31 = vshra.s32 %v387_v23, 5 }
 0x524   : > { %5629 = vst [vmem:[#allocation4 + $0xb0] sm:$0xff] %v5593_v21  ;;  %v5470_v3 = vmax.f32 %v5304_v13, 0.0  ;;  %v5307_v6 = vadd.f32 %v14018_v25, %v4985_v1  ;;  %v4987_v12 = vpop.f32.mrb[83].mxu0  ;;  %9441 = vmatprep.mubr.bf16.mxu1 %v5593_v21  ;;  %v8041_v15 = vshll.u32 %v5593_v21, 16  ;;  %v5857_v2 = vshrl.u32 %v5593_v21, 16 }
 0x525   : > { %v15837_v34 = vshll.u32 %v14322_v44, 16  ;;  %v7179_v25 = vshrl.u32 %v14322_v44, 16  ;;  %v460_v1 = vshra.s32 %v388_v18, 5  ;;  %vm14356_vm11 = vcmp.lt.s32.totalorder %v459_v31, 16 }
 0x526   : > { %v5471_v32 = vmax.f32 %v5307_v6, 0.0  ;;  %v8043_v53 = vrot.slane %v8041_v15, 1  ;;  %v5859_v41 = vrot.slane %v5857_v2, 7  ;;  %v5542_v28 = vmul.f32 %v5470_v3, %v815_v36 }
 0x527   : > { %v14333_v0 = vrot.slane %v15837_v34, 1  ;;  %vm14360_vm12 = vcmp.lt.s32.totalorder %v460_v1, 16 }
 0x528   : > { %v5543_v57 = vmul.f32 %v5471_v32, %v816_v35  ;;  %v8044_v29 = vsel %vm956_vm0, %v8039_v16, %v8043_v53  ;;  %v5862_v46 = vor.u32 %v8041_v15, %v5859_v41 }
 0x529   : > { %v4990_v63 = vpop.f32.mrb[84].mxu0  ;;  %11422 = vmatprep.mubr.bf16.mxu0 %v8044_v29  ;;  %v14341_v30 = vsel %vm956_vm0, %v7173_v39, %v14333_v0  ;;  %v7181_v59 = vor.u32 %v7179_v25, %v14333_v0 }
 0x52a   : > { %15924 = vst [vmem:[#allocation7_spill] sm:$0xff] %v14341_v30  ;;  %v5594_v17 = vpack.c.bf16 %v5543_v57, %v5542_v28  ;;  %v5312_v22 = vadd.f32 %v15925_v37, %v4990_v63  ;;  %v4992_v20 = vpop.f32.mrb[85].mxu0  ;;  %v5863_v11 = vsel %vm5683_vm2, %v5851_v43, %v5862_v46  ;;  %v8047_v43 = vor.u32 %v8043_v53, %v5857_v2  ;;  %v15932_v28 = vld [vmem:[#allocation11_spill] sm:$0xff] }
 0x52b   : > { %v4993_v40 = vpop.f32.mrb[86].mxu0  ;;  %9442 = vmatmul.mubr.bf16.gmra.mrb[156].mxu1 %v5863_v11  ;;  %v14346_v58 = vld [vmem:[#allocation4 + $0xb0] sm:$0xff] }
 0x52c   : > { %5630 = vst [vmem:[#allocation4 + $0xb8] sm:$0xff] %v5594_v17  ;;  %v5472_v5 = vmax.f32 %v5312_v22, 0.0  ;;  %v5315_v21 = vadd.f32 %v15926_v27, %v4993_v40  ;;  %v4995_v10 = vpop.f32.mrb[87].mxu0  ;;  %9449 = vmatprep.mubr.bf16.mxu1 %v5594_v17  ;;  %v8049_v13 = vshll.u32 %v5594_v17, 16  ;;  %v5865_v54 = vshrl.u32 %v5594_v17, 16 }
 0x52d   : > { %v15831_v39 = vshll.u32 %v14346_v58, 16  ;;  %v15834_v15 = vshrl.u32 %v14346_v58, 16 }
 0x52e   : > { %v5473_v3 = vmax.f32 %v5315_v21, 0.0  ;;  %v8051_v6 = vrot.slane %v8049_v13, 1  ;;  %v5867_v12 = vrot.slane %v5865_v54, 7  ;;  %v5544_v35 = vmul.f32 0.0, %v5472_v5 }
 0x52f   : > { %v14353_v36 = vrot.slane %v15831_v39, 1 }
 0x530   : > { %v5545_v32 = vmul.f32 0.0, %v5473_v3  ;;  %v8052_v16 = vsel %vm956_vm0, %v8047_v43, %v8051_v6  ;;  %v5870_v25 = vor.u32 %v8049_v13, %v5867_v12  ;;  %v8055_v21 = vor.u32 %v8051_v6, %v5865_v54 }
 0x531   : > { %v4998_v57 = vpop.f32.mrb[88].mxu0  ;;  %11423 = vmatmul.mubr.bf16.gmra.mrb[176].mxu0 %v8052_v16  ;;  %v14366_v53 = vsel %vm956_vm0, %v7181_v59, %v14353_v36  ;;  %v7189_v18 = vor.u32 %v14353_v36, %v15834_v15  ;;  %v391_v16 = vadd.s32 384, %v13942_v38 }
 0x532   : > { %15931 = vst [vmem:[#allocation5_spill] sm:$0xff] %v14366_v53  ;;  %v5595_v29 = vpack.c.bf16 %v5545_v32, %v5544_v35  ;;  %v5320_v46 = vadd.f32 %v14031_v24, %v4998_v57  ;;  %v5000_v63 = vpop.f32.mrb[89].mxu0  ;;  %v5871_v23 = vsel %vm5683_vm2, %v5859_v41, %v5870_v25  ;;  %v819_v24 = vsel %vm14356_vm11, 1.0, %v15885_v51 }
 0x533   : > { %v5001_v17 = vpop.f32.mrb[90].mxu0  ;;  %9450 = vmatmul.mubr.bf16.gmra.mrb[160].mxu1 %v5871_v23  ;;  %v14373_v37 = vld [vmem:[#allocation4 + $0xb8] sm:$0xff]  ;;  %v820_v41 = vsel %vm14360_vm12, 1.0, %v15885_v51  ;;  %v392_v25 = vadd.s32 392, %v13942_v38 }
 0x534   : > { %5631 = vst [vmem:[#allocation4 + $0xc0] sm:$0xff] %v5595_v29  ;;  %v5474_v22 = vmax.f32 %v5320_v46, 0.0  ;;  %v5323_v20 = vadd.f32 %v14037_v45, %v5001_v17  ;;  %v5003_v11 = vpop.f32.mrb[91].mxu0  ;;  %9457 = vmatprep.mubr.bf16.mxu1 %v5595_v29  ;;  %v8057_v59 = vshll.u32 %v5595_v29, 16  ;;  %v5873_v40 = vshrl.u32 %v5595_v29, 16 }
 0x535   : > { %v15823_v5 = vshll.u32 %v14373_v37, 16  ;;  %v15830_v45 = vshrl.u32 %v14373_v37, 16 }
 0x536   : > { %v5475_v27 = vmax.f32 %v5323_v20, 0.0  ;;  %v8059_v10 = vrot.slane %v8057_v59, 1  ;;  %v5875_v13 = vrot.slane %v5873_v40, 7  ;;  %v5546_v1 = vmul.f32 %v5474_v22, %v819_v24  ;;  %v15933_v22 = vld [vmem:[#allocation12_spill] sm:$0xff] }
 0x537   : > { %v7193_v31 = vrot.slane %v15823_v5, 1  ;;  %v463_v24 = vshra.s32 %v391_v16, 5 }
 0x538   : > { %v5547_v3 = vmul.f32 %v5475_v27, %v820_v41  ;;  %v8060_v43 = vsel %vm956_vm0, %v8055_v21, %v8059_v10  ;;  %v5878_v35 = vor.u32 %v8057_v59, %v5875_v13  ;;  %v464_v41 = vshra.s32 %v392_v25, 5 }
 0x539   : > { %v5006_v32 = vpop.f32.mrb[92].mxu0  ;;  %11426 = vmatprep.mubr.bf16.mxu0 %v8060_v43  ;;  %v14390_v54 = vsel %vm956_vm0, %v7189_v18, %v7193_v31  ;;  %v7197_v46 = vor.u32 %v7193_v31, %v15830_v45  ;;  %v8063_v21 = vor.u32 %v8059_v10, %v5873_v40  ;;  %vm14404_vm13 = vcmp.lt.s32.totalorder %v463_v24, 16 }
 0x53a   : > { %v5596_v6 = vpack.c.bf16 %v5547_v3, %v5546_v1  ;;  %v5328_v57 = vadd.f32 %v15932_v28, %v5006_v32  ;;  %v5008_v2 = vpop.f32.mrb[93].mxu0  ;;  %v5879_v29 = vsel %vm5683_vm2, %v5867_v12, %v5878_v35  ;;  %vm14408_vm14 = vcmp.lt.s32.totalorder %v464_v41, 16 }
 0x53b   : > { %v5009_v63 = vpop.f32.mrb[94].mxu0  ;;  %9458 = vmatmul.mubr.bf16.gmra.mrb[164].mxu1 %v5879_v29  ;;  %v14396_v23 = vld [vmem:[#allocation4 + $0xc0] sm:$0xff]  ;;  %v395_v25 = vadd.s32 416, %v13942_v38 }
 0x53c   : > { %5632 = vst [vmem:[#allocation4 + $0xc8] sm:$0xff] %v5596_v6  ;;  %v5476_v17 = vmax.f32 %v5328_v57, 0.0  ;;  %v5331_v20 = vadd.f32 %v15933_v22, %v5009_v63  ;;  %v5011_v11 = vpop.f32.mrb[95].mxu0  ;;  %9465 = vmatprep.mubr.bf16.mxu1 %v5596_v6  ;;  %v8065_v18 = vshll.u32 %v5596_v6, 16  ;;  %v5881_v59 = vshrl.u32 %v5596_v6, 16 }
 0x53d   : > { %v15813_v27 = vshll.u32 %v14396_v23, 16  ;;  %v15820_v3 = vshrl.u32 %v14396_v23, 16 }
 0x53e   : > { %v5477_v12 = vmax.f32 %v5331_v20, 0.0  ;;  %v8067_v1 = vrot.slane %v8065_v18, 1  ;;  %v5883_v31 = vrot.slane %v5881_v59, 7  ;;  %v5548_v35 = vmul.f32 0.0, %v5476_v17 }
 0x53f   : > { %v7201_v43 = vrot.slane %v15813_v27, 1 }
 0x540   : > { %v5549_v32 = vmul.f32 0.0, %v5477_v12  ;;  %v8068_v28 = vsel %vm956_vm0, %v8063_v21, %v8067_v1  ;;  %v5886_v57 = vor.u32 %v8065_v18, %v5883_v31  ;;  %v15938_v18 = vld [vmem:[#allocation15_spill] sm:$0xff] }
 0x541   : > { %v5014_v16 = vpop.f32.mrb[96].mxu0  ;;  %11427 = vmatmul.mubr.bf16.gmra.mrb[180].mxu0 %v8068_v28  ;;  %v14413_v40 = vsel %vm956_vm0, %v7197_v46, %v7201_v43  ;;  %v7205_v17 = vor.u32 %v7201_v43, %v15820_v3 }
 0x542   : > { %v5597_v10 = vpack.c.bf16 %v5549_v32, %v5548_v35  ;;  %v5336_v2 = vadd.f32 %v14071_v42, %v5014_v16  ;;  %v5016_v29 = vpop.f32.mrb[97].mxu0  ;;  %v5887_v63 = vsel %vm5683_vm2, %v5875_v13, %v5886_v57  ;;  %v823_v42 = vsel %vm14404_vm13, 1.0, %v15885_v51 }
 0x543   : > { %v5017_v22 = vpop.f32.mrb[98].mxu0  ;;  %9466 = vmatmul.mubr.bf16.gmra.mrb[168].mxu1 %v5887_v63  ;;  %v14419_v20 = vld [vmem:[#allocation4 + $0xc8] sm:$0xff]  ;;  %v824_v13 = vsel %vm14408_vm14, 1.0, %v15885_v51  ;;  %v8071_v35 = vor.u32 %v8067_v1, %v5881_v59 }
 0x544   : > { %5633 = vst [vmem:[#allocation4 + $0xd0] sm:$0xff] %v5597_v10  ;;  %v5478_v11 = vmax.f32 %v5336_v2, 0.0  ;;  %v5339_v24 = vadd.f32 %v15938_v18, %v5017_v22  ;;  %v5019_v41 = vpop.f32.mrb[99].mxu0  ;;  %9473 = vmatprep.mubr.bf16.mxu1 %v5597_v10  ;;  %v8073_v46 = vshll.u32 %v5597_v10, 16  ;;  %v5889_v12 = vshrl.u32 %v5597_v10, 16  ;;  %v15939_v18 = vld [vmem:[#allocation13_spill] sm:$0xff] }
 0x545   : > { %v15811_v21 = vshll.u32 %v14419_v20, 16  ;;  %v15812_v57 = vshrl.u32 %v14419_v20, 16  ;;  %v396_v22 = vadd.s32 424, %v13942_v38 }
 0x546   : > { %v5479_v43 = vmax.f32 %v5339_v24, 0.0  ;;  %v8075_v32 = vrot.slane %v8073_v46, 1  ;;  %v5891_v28 = vrot.slane %v5889_v12, 7  ;;  %v5550_v10 = vmul.f32 %v5478_v11, %v823_v42 }
 0x547   : > { %v7209_v16 = vrot.slane %v15811_v21, 1 }
 0x548   : > { %v5551_v2 = vmul.f32 %v5479_v43, %v824_v13  ;;  %v8076_v6 = vsel %vm956_vm0, %v8071_v35, %v8075_v32  ;;  %v5894_v29 = vor.u32 %v8073_v46, %v5891_v28  ;;  %v15940_v43 = vld [vmem:[#allocation14_spill] sm:$0xff] }
 0x549   : > { %v5022_v63 = vpop.f32.mrb[100].mxu0  ;;  %11430 = vmatprep.mubr.bf16.mxu0 %v8076_v6  ;;  %v14436_v59 = vsel %vm956_vm0, %v7205_v17, %v7209_v16  ;;  %v7213_v11 = vor.u32 %v7209_v16, %v15812_v57 }
 0x54a   : > { %v5598_v1 = vpack.c.bf16 %v5551_v2, %v5550_v10  ;;  %v5344_v24 = vadd.f32 %v15939_v18, %v5022_v63  ;;  %v5024_v41 = vpop.f32.mrb[101].mxu0  ;;  %v5895_v21 = vsel %vm5683_vm2, %v5883_v31, %v5894_v29  ;;  %v467_v2 = vshra.s32 %v395_v25, 5 }
 0x54b   : > { %v5025_v42 = vpop.f32.mrb[102].mxu0  ;;  %9474 = vmatmul.mubr.bf16.gmra.mrb[172].mxu1 %v5895_v21  ;;  %v14442_v46 = vld [vmem:[#allocation4 + $0xd0] sm:$0xff]  ;;  %v468_v63 = vshra.s32 %v396_v22, 5  ;;  %v8079_v29 = vor.u32 %v8075_v32, %v5889_v12  ;;  %v399_v22 = vadd.s32 448, %v13942_v38 }
 0x54c   : > { %5634 = vst [vmem:[#allocation4 + $0xd8] sm:$0xff] %v5598_v1  ;;  %v5480_v13 = vmax.f32 %v5344_v24, 0.0  ;;  %v5347_v35 = vadd.f32 %v15940_v43, %v5025_v42  ;;  %v5027_v6 = vpop.f32.mrb[103].mxu0  ;;  %9481 = vmatprep.mubr.bf16.mxu1 %v5598_v1  ;;  %v8081_v17 = vshll.u32 %v5598_v1, 16  ;;  %v5897_v10 = vshrl.u32 %v5598_v1, 16 }
 0x54d   : > { %v15814_v18 = vshll.u32 %v14442_v46, 16  ;;  %v15815_v21 = vshrl.u32 %v14442_v46, 16  ;;  %vm14450_vm15 = vcmp.lt.s32.totalorder %v467_v2, 16  ;;  %vm14454_vm1 = vcmp.lt.s32.totalorder %v468_v63, 16 }
 0x54e   : > { %v5481_v31 = vmax.f32 %v5347_v35, 0.0  ;;  %v8083_v41 = vrot.slane %v8081_v17, 1  ;;  %v5899_v16 = vrot.slane %v5897_v10, 7  ;;  %v5552_v24 = vmul.f32 0.0, %v5480_v13 }
 0x54f   : > { %v7217_v57 = vrot.slane %v15814_v18, 1  ;;  %v400_v18 = vadd.s32 456, %v13942_v38 }
 0x550   : > { %v5553_v27 = vmul.f32 0.0, %v5481_v31  ;;  %v8084_v42 = vsel %vm956_vm0, %v8079_v29, %v8083_v41  ;;  %v5902_v43 = vor.u32 %v8081_v17, %v5899_v16 }
 0x551   : > { %v5030_v25 = vpop.f32.mrb[104].mxu0  ;;  %11431 = vmatmul.mubr.bf16.gmra.mrb[184].mxu0 %v8084_v42  ;;  %v14459_v12 = vsel %vm956_vm0, %v7213_v11, %v7217_v57  ;;  %v7221_v17 = vor.u32 %v7217_v57, %v15815_v21 }
 0x552   : > { %v5599_v32 = vpack.c.bf16 %v5553_v27, %v5552_v24  ;;  %v5352_v13 = vadd.f32 %v14092_v7, %v5030_v25  ;;  %v5032_v35 = vpop.f32.mrb[105].mxu0  ;;  %v5903_v6 = vsel %vm5683_vm2, %v5891_v28, %v5902_v43  ;;  %v827_v7 = vsel %vm14450_vm15, 1.0, %v15885_v51 }
 0x553   : > { %v5033_v2 = vpop.f32.mrb[106].mxu0  ;;  %9482 = vmatmul.mubr.bf16.gmra.mrb[176].mxu1 %v5903_v6  ;;  %v14465_v31 = vld [vmem:[#allocation4 + $0xd8] sm:$0xff]  ;;  %v828_v28 = vsel %vm14454_vm1, 1.0, %v15885_v51  ;;  %v8087_v43 = vor.u32 %v8083_v41, %v5897_v10 }
 0x554   : > { %5635 = vst [vmem:[#allocation4 + $0xe0] sm:$0xff] %v5599_v32  ;;  %v5482_v63 = vmax.f32 %v5352_v13, 0.0  ;;  %v5355_v29 = vadd.f32 %v14099_v4, %v5033_v2  ;;  %v5035_v42 = vpop.f32.mrb[107].mxu0  ;;  %9489 = vmatprep.mubr.bf16.mxu1 %v5599_v32  ;;  %v8089_v11 = vshll.u32 %v5599_v32, 16  ;;  %v5905_v27 = vshrl.u32 %v5599_v32, 16 }
 0x555   : > { %v15816_v57 = vshll.u32 %v14465_v31, 16  ;;  %v15817_v4 = vshrl.u32 %v14465_v31, 16 }
 0x556   : > { %v5483_v24 = vmax.f32 %v5355_v29, 0.0  ;;  %v8091_v25 = vrot.slane %v8089_v11, 1  ;;  %v5907_v13 = vrot.slane %v5905_v27, 7  ;;  %v5554_v32 = vmul.f32 %v5482_v63, %v827_v7 }
 0x557   : > { %v7225_v35 = vrot.slane %v15816_v57, 1 }
 0x558   : > { %v5555_v6 = vmul.f32 %v5483_v24, %v828_v28  ;;  %v8092_v1 = vsel %vm956_vm0, %v8087_v43, %v8091_v25  ;;  %v5910_v2 = vor.u32 %v8089_v11, %v5907_v13 }
 0x559   : > { %v5038_v42 = vpop.f32.mrb[108].mxu0  ;;  %11434 = vmatprep.mubr.bf16.mxu0 %v8092_v1  ;;  %v14482_v10 = vsel %vm956_vm0, %v7221_v17, %v7225_v35  ;;  %v7229_v63 = vor.u32 %v7225_v35, %v15817_v4  ;;  %v8095_v1 = vor.u32 %v8091_v25, %v5905_v27 }
 0x55a   : > { %v5600_v41 = vpack.c.bf16 %v5555_v6, %v5554_v32  ;;  %v5360_v29 = vadd.f32 %v14089_v61, %v5038_v42  ;;  %v5040_v21 = vpop.f32.mrb[109].mxu0  ;;  %v5911_v57 = vsel %vm5683_vm2, %v5899_v16, %v5910_v2  ;;  %v471_v6 = vshra.s32 %v399_v22, 5 }
 0x55b   : > { %v5041_v7 = vpop.f32.mrb[110].mxu0  ;;  %9490 = vmatmul.mubr.bf16.gmra.mrb[180].mxu1 %v5911_v57  ;;  %v14488_v11 = vld [vmem:[#allocation4 + $0xe0] sm:$0xff]  ;;  %v472_v61 = vshra.s32 %v400_v18, 5  ;;  %v403_v22 = vadd.s32 480, %v13942_v38 }
 0x55c   : > { %5636 = vst [vmem:[#allocation4 + $0xe8] sm:$0xff] %v5600_v41  ;;  %v5484_v28 = vmax.f32 %v5360_v29, 0.0  ;;  %v5363_v24 = vadd.f32 %v14094_v8, %v5041_v7  ;;  %v5043_v43 = vpop.f32.mrb[111].mxu0  ;;  %9497 = vmatprep.mubr.bf16.mxu1 %v5600_v41  ;;  %v8097_v17 = vshll.u32 %v5600_v41, 16  ;;  %v5913_v32 = vshrl.u32 %v5600_v41, 16 }
 0x55d   : > { %v15818_v21 = vshll.u32 %v14488_v11, 16  ;;  %v15819_v57 = vshrl.u32 %v14488_v11, 16  ;;  %vm14496_vm3 = vcmp.lt.s32.totalorder %v471_v6, 16  ;;  %vm14500_vm4 = vcmp.lt.s32.totalorder %v472_v61, 16 }
 0x55e   : > { %v5485_v16 = vmax.f32 %v5363_v24, 0.0  ;;  %v8099_v2 = vrot.slane %v8097_v17, 1  ;;  %v5915_v35 = vrot.slane %v5913_v32, 7  ;;  %v5556_v29 = vmul.f32 0.0, %v5484_v28 }
 0x55f   : > { %v7233_v42 = vrot.slane %v15818_v21, 1  ;;  %v404_v21 = vadd.s32 488, %v13942_v38 }
 0x560   : > { %v5557_v4 = vmul.f32 0.0, %v5485_v16  ;;  %v8100_v8 = vsel %vm956_vm0, %v8095_v1, %v8099_v2  ;;  %v5918_v7 = vor.u32 %v8097_v17, %v5915_v35 }
 0x561   : > { %v5046_v18 = vpop.f32.mrb[112].mxu0  ;;  %11435 = vmatmul.mubr.bf16.gmra.mrb[188].mxu0 %v8100_v8  ;;  %v14505_v27 = vsel %vm956_vm0, %v7229_v63, %v7233_v42  ;;  %v7237_v17 = vor.u32 %v7233_v42, %v15819_v57 }
 0x562   : > { %v5601_v25 = vpack.c.bf16 %v5557_v4, %v5556_v29  ;;  %v5368_v28 = vadd.f32 %v14126_v60, %v5046_v18  ;;  %v5048_v24 = vpop.f32.mrb[113].mxu0  ;;  %v5919_v43 = vsel %vm5683_vm2, %v5907_v13, %v5918_v7  ;;  %v831_v60 = vsel %vm14496_vm3, 1.0, %v15885_v51 }
 0x563   : > { %v5049_v6 = vpop.f32.mrb[114].mxu0  ;;  %9498 = vmatmul.mubr.bf16.gmra.mrb[184].mxu1 %v5919_v43  ;;  %v14511_v16 = vld [vmem:[#allocation4 + $0xe8] sm:$0xff]  ;;  %v832_v13 = vsel %vm14500_vm4, 1.0, %v15885_v51  ;;  %v8103_v7 = vor.u32 %v8099_v2, %v5913_v32 }
 0x564   : > { %5637 = vst [vmem:[#allocation4 + $0xf0] sm:$0xff] %v5601_v25  ;;  %v5486_v61 = vmax.f32 %v5368_v28, 0.0  ;;  %v5371_v1 = vadd.f32 %v14134_v26, %v5049_v6  ;;  %v5051_v8 = vpop.f32.mrb[115].mxu0  ;;  %9505 = vmatprep.mubr.bf16.mxu1 %v5601_v25  ;;  %v8105_v63 = vshll.u32 %v5601_v25, 16  ;;  %v5921_v4 = vshrl.u32 %v5601_v25, 16 }
 0x565   : > { %v15821_v42 = vshll.u32 %v14511_v16, 16  ;;  %v15822_v26 = vshrl.u32 %v14511_v16, 16 }
 0x566   : > { %v5487_v29 = vmax.f32 %v5371_v1, 0.0  ;;  %v8107_v18 = vrot.slane %v8105_v63, 1  ;;  %v5923_v28 = vrot.slane %v5921_v4, 7  ;;  %v5558_v25 = vmul.f32 %v5486_v61, %v831_v60  ;;  %v15949_v1 = vld [vmem:[#allocation16_spill] sm:$0xff] }
 0x567   : > { %v7241_v24 = vrot.slane %v15821_v42, 1 }
 0x568   : > { %v5559_v43 = vmul.f32 %v5487_v29, %v832_v13  ;;  %v8108_v41 = vsel %vm956_vm0, %v8103_v7, %v8107_v18  ;;  %v5926_v6 = vor.u32 %v8105_v63, %v5923_v28  ;;  %v15950_v29 = vld [vmem:[#allocation17_spill] sm:$0xff] }
 0x569   : > { %v5054_v8 = vpop.f32.mrb[116].mxu0  ;;  %11438 = vmatprep.mubr.bf16.mxu0 %v8108_v41  ;;  %v14528_v32 = vsel %vm956_vm0, %v7237_v17, %v7241_v24  ;;  %v7245_v61 = vor.u32 %v7241_v24, %v15822_v26 }
 0x56a   : > { %v5602_v2 = vpack.c.bf16 %v5559_v43, %v5558_v25  ;;  %v5376_v57 = vadd.f32 %v15949_v1, %v5054_v8  ;;  %v5056_v3 = vpop.f32.mrb[117].mxu0  ;;  %v5927_v42 = vsel %vm5683_vm2, %v5915_v35, %v5926_v6  ;;  %v475_v43 = vshra.s32 %v403_v22, 5 }
 0x56b   : > { %v5057_v60 = vpop.f32.mrb[118].mxu0  ;;  %9506 = vmatmul.mubr.bf16.gmra.mrb[188].mxu1 %v5927_v42  ;;  %v14534_v63 = vld [vmem:[#allocation4 + $0xf0] sm:$0xff]  ;;  %v476_v8 = vshra.s32 %v404_v21, 5  ;;  %v8111_v6 = vor.u32 %v8107_v18, %v5921_v4  ;;  %v407_v22 = vadd.s32 512, %v13942_v38 }
 0x56c   : > { %5638 = vst [vmem:[#allocation4 + $0xf8] sm:$0xff] %v5602_v2  ;;  %v5488_v13 = vmax.f32 %v5376_v57, 0.0  ;;  %v5379_v7 = vadd.f32 %v15950_v29, %v5057_v60  ;;  %v5059_v41 = vpop.f32.mrb[119].mxu0  ;;  %9513 = vmatprep.mubr.bf16.mxu1 %v5602_v2  ;;  %v8113_v17 = vshll.u32 %v5602_v2, 16  ;;  %v5929_v25 = vshrl.u32 %v5602_v2, 16 }
 0x56d   : > { %v15824_v3 = vshll.u32 %v14534_v63, 16  ;;  %v15825_v42 = vshrl.u32 %v14534_v63, 16  ;;  %vm14542_vm5 = vcmp.lt.s32.totalorder %v475_v43, 16  ;;  %vm14546_vm6 = vcmp.lt.s32.totalorder %v476_v8, 16 }
 0x56e   : > { %v5489_v35 = vmax.f32 %v5379_v7, 0.0  ;;  %v8115_v1 = vrot.slane %v8113_v17, 1  ;;  %v5931_v24 = vrot.slane %v5929_v25, 7  ;;  %v5560_v57 = vmul.f32 0.0, %v5488_v13 }
 0x56f   : > { %v7249_v26 = vrot.slane %v15824_v3, 1  ;;  %v408_v3 = vadd.s32 520, %v13942_v38 }
 0x570   : > { %v5561_v5 = vmul.f32 0.0, %v5489_v35  ;;  %v8116_v60 = vsel %vm956_vm0, %v8111_v6, %v8115_v1  ;;  %v5934_v29 = vor.u32 %v8113_v17, %v5931_v24 }
 0x571   : > { %v5062_v21 = vpop.f32.mrb[120].mxu0  ;;  %11439 = vmatmul.mubr.bf16.gmra.mrb[192].mxu0 %v8116_v60  ;;  %v14551_v4 = vsel %vm956_vm0, %v7245_v61, %v7249_v26  ;;  %v7253_v17 = vor.u32 %v7249_v26, %v15825_v42 }
 0x572   : > { %v5603_v18 = vpack.c.bf16 %v5561_v5, %v5560_v57  ;;  %v5384_v13 = vadd.f32 %v14145_v19, %v5062_v21  ;;  %v5064_v7 = vpop.f32.mrb[121].mxu0  ;;  %v5935_v41 = vsel %vm5683_vm2, %v5923_v28, %v5934_v29  ;;  %v835_v19 = vsel %vm14542_vm5, 1.0, %v15885_v51 }
 0x573   : > { %v5065_v43 = vpop.f32.mrb[122].mxu0  ;;  %9514 = vmatmul.mubr.bf16.gmra.mrb[192].mxu1 %v5935_v41  ;;  %v14557_v35 = vld [vmem:[#allocation4 + $0xf8] sm:$0xff]  ;;  %v836_v28 = vsel %vm14546_vm6, 1.0, %v15885_v51  ;;  %v8119_v29 = vor.u32 %v8115_v1, %v5929_v25 }
 0x574   : > { %5639 = vst [vmem:[#allocation4 + $0x100] sm:$0xff] %v5603_v18  ;;  %v5490_v8 = vmax.f32 %v5384_v13, 0.0  ;;  %v5387_v6 = vadd.f32 %v14152_v47, %v5065_v43  ;;  %v5067_v60 = vpop.f32.mrb[123].mxu0  ;;  %9521 = vmatprep.mubr.bf16.mxu1 %v5603_v18  ;;  %v8121_v61 = vshll.u32 %v5603_v18, 16  ;;  %v5937_v5 = vshrl.u32 %v5603_v18, 16 }
 0x575   : > { %v15826_v26 = vshll.u32 %v14557_v35, 16  ;;  %v15827_v47 = vshrl.u32 %v14557_v35, 16 }
 0x576   : > { %v5491_v57 = vmax.f32 %v5387_v6, 0.0  ;;  %v8123_v21 = vrot.slane %v8121_v61, 1  ;;  %v5939_v13 = vrot.slane %v5937_v5, 7  ;;  %v5562_v18 = vmul.f32 %v5490_v8, %v835_v19 }
 0x577   : > { %v7257_v7 = vrot.slane %v15826_v26, 1 }
 0x578   : > { %v5563_v41 = vmul.f32 %v5491_v57, %v836_v28  ;;  %v8124_v2 = vsel %vm956_vm0, %v8119_v29, %v8123_v21  ;;  %v5942_v43 = vor.u32 %v8121_v61, %v5939_v13 }
 0x579   : > { %v5070_v60 = vpop.f32.mrb[124].mxu0  ;;  %11442 = vmatprep.mubr.bf16.mxu0 %v8124_v2  ;;  %v14574_v25 = vsel %vm956_vm0, %v7253_v17, %v7257_v7  ;;  %v7261_v8 = vor.u32 %v7257_v7, %v15827_v47  ;;  %v8127_v2 = vor.u32 %v8123_v21, %v5937_v5 }
 0x57a   : > { %v5604_v1 = vpack.c.bf16 %v5563_v41, %v5562_v18  ;;  %v5392_v6 = vadd.f32 %v14142_v33, %v5070_v60  ;;  %v5072_v42 = vpop.f32.mrb[125].mxu0  ;;  %v5943_v26 = vsel %vm5683_vm2, %v5931_v24, %v5942_v43  ;;  %v479_v41 = vshra.s32 %v407_v22, 5 }
 0x57b   : > { %v5073_v19 = vpop.f32.mrb[126].mxu0  ;;  %9522 = vmatmul.mubr.bf16.gmra.mrb[196].mxu1 %v5943_v26  ;;  %v14580_v61 = vld [vmem:[#allocation4 + $0x100] sm:$0xff]  ;;  %v480_v33 = vshra.s32 %v408_v3, 5  ;;  %v411_v22 = vadd.s32 544, %v13942_v38 }
 0x57c   : > { %5640 = vst [vmem:[#allocation4 + $0x108] sm:$0xff] %v5604_v1  ;;  %v5492_v28 = vmax.f32 %v5392_v6, 0.0  ;;  %v5395_v57 = vadd.f32 %v14147_v55, %v5073_v19  ;;  %v5075_v29 = vpop.f32.mrb[127].mxu0  ;;  %9529 = vmatprep.mubr.bf16.mxu1 %v5604_v1  ;;  %v8129_v17 = vshll.u32 %v5604_v1, 16  ;;  %v5945_v18 = vshrl.u32 %v5604_v1, 16 }
 0x57d   : > { %v15828_v42 = vshll.u32 %v14580_v61, 16  ;;  %v15829_v26 = vshrl.u32 %v14580_v61, 16  ;;  %vm14588_vm7 = vcmp.lt.s32.totalorder %v479_v41, 16  ;;  %vm14592_vm8 = vcmp.lt.s32.totalorder %v480_v33, 16 }
 0x57e   : > { %v5493_v24 = vmax.f32 %v5395_v57, 0.0  ;;  %v8131_v43 = vrot.slane %v8129_v17, 1  ;;  %v5947_v7 = vrot.slane %v5945_v18, 7  ;;  %v5564_v6 = vmul.f32 0.0, %v5492_v28 }
 0x57f   : > { %v7265_v60 = vrot.slane %v15828_v42, 1 }
 0x580   : > { %v5565_v47 = vmul.f32 0.0, %v5493_v24  ;;  %v8132_v55 = vsel %vm956_vm0, %v8127_v2, %v8131_v43  ;;  %v5950_v19 = vor.u32 %v8129_v17, %v5947_v7  ;;  %v15959_v2 = vld [vmem:[#allocation20_spill] sm:$0xff] }
 0x581   : > { %v5078_v3 = vpop.f32.mrb[128].mxu0  ;;  %11443 = vmatmul.mubr.bf16.gmra.mrb[196].mxu0 %v8132_v55  ;;  %v14597_v5 = vsel %vm956_vm0, %v7261_v8, %v7265_v60  ;;  %v7269_v17 = vor.u32 %v7265_v60, %v15829_v26  ;;  %v412_v26 = vadd.s32 552, %v13942_v38 }
 0x582   : > { %v5605_v21 = vpack.c.bf16 %v5565_v47, %v5564_v6  ;;  %v5400_v28 = vadd.f32 %v14170_v50, %v5078_v3  ;;  %v5080_v57 = vpop.f32.mrb[129].mxu0  ;;  %v5951_v29 = vsel %vm5683_vm2, %v5939_v13, %v5950_v19  ;;  %v839_v50 = vsel %vm14588_vm7, 1.0, %v15885_v51 }
 0x583   : > { %v5081_v41 = vpop.f32.mrb[130].mxu0  ;;  %9530 = vmatmul.mubr.bf16.gmra.mrb[200].mxu1 %v5951_v29  ;;  %v14603_v24 = vld [vmem:[#allocation4 + $0x108] sm:$0xff]  ;;  %v840_v13 = vsel %vm14592_vm8, 1.0, %v15885_v51  ;;  %v8135_v19 = vor.u32 %v8131_v43, %v5945_v18 }
 0x584   : > { %5641 = vst [vmem:[#allocation4 + $0x110] sm:$0xff] %v5605_v21  ;;  %v5494_v33 = vmax.f32 %v5400_v28, 0.0  ;;  %v5403_v55 = vadd.f32 %v15959_v2, %v5081_v41  ;;  %v5083_v42 = vpop.f32.mrb[131].mxu0  ;;  %9537 = vmatprep.mubr.bf16.mxu1 %v5605_v21  ;;  %v8137_v8 = vshll.u32 %v5605_v21, 16  ;;  %v5953_v47 = vshrl.u32 %v5605_v21, 16 }
 0x585   : > { %v15832_v60 = vshll.u32 %v14603_v24, 16  ;;  %v15833_v57 = vshrl.u32 %v14603_v24, 16 }
 0x586   : > { %v5495_v6 = vmax.f32 %v5403_v55, 0.0  ;;  %v8139_v3 = vrot.slane %v8137_v8, 1  ;;  %v5955_v28 = vrot.slane %v5953_v47, 7  ;;  %v5566_v21 = vmul.f32 %v5494_v33, %v839_v50  ;;  %v15960_v55 = vld [vmem:[#allocation18_spill] sm:$0xff] }
 0x587   : > { %v7273_v42 = vrot.slane %v15832_v60, 1 }
 0x588   : > { %v5567_v29 = vmul.f32 %v5495_v6, %v840_v13  ;;  %v8140_v1 = vsel %vm956_vm0, %v8135_v19, %v8139_v3  ;;  %v5958_v41 = vor.u32 %v8137_v8, %v5955_v28  ;;  %v6521_v13 = vld [vmem:[#allocation4 + $0x10] sm:$0x80] }
 0x589   : > { %v5086_v2 = vpop.f32.mrb[132].mxu0  ;;  %11446 = vmatprep.mubr.bf16.mxu0 %v8140_v1  ;;  %v14620_v18 = vsel %vm956_vm0, %v7269_v17, %v7273_v42  ;;  %v7277_v50 = vor.u32 %v7273_v42, %v15833_v57  ;;  %v15961_v17 = vld [vmem:[#allocation19_spill] sm:$0xff]  ;;  %v483_v42 = vshra.s32 %v411_v22, 5  ;;  %v484_v1 = vshra.s32 %v412_v26, 5 }
 0x58a   : > { %v14622_v43 = vpack.c.bf16 %v5567_v29, %v5566_v21  ;;  %v5408_v45 = vadd.f32 %v15960_v55, %v5086_v2  ;;  %v5088_v39 = vpop.f32.mrb[133].mxu0  ;;  %v5959_v33 = vsel %vm5683_vm2, %v5947_v7, %v5958_v41  ;;  %v14635_v29 = vld [vmem:[#allocation4 + $0x18] sm:$0xff]  ;;  %v8143_v55 = vor.u32 %v8139_v3, %v5953_v47 }
 0x58b   : > { %v5089_v8 = vpop.f32.mrb[134].mxu0  ;;  %9538 = vmatmul.mubr.bf16.gmra.mrb[204].mxu1 %v5959_v33  ;;  %v14628_v6 = vld [vmem:[#allocation4 + $0x110] sm:$0xff]  ;;  %vm14643_vm9 = vcmp.lt.s32.totalorder %v483_v42, 16  ;;  %vm14647_vm10 = vcmp.lt.s32.totalorder %v484_v1, 16 }
 0x58c   : > { %5642 = vst [vmem:[#allocation4 + $0x118] sm:$0xff] %v14622_v43  ;;  %v5496_v38 = vmax.f32 %v5408_v45, 0.0  ;;  %v5411_v19 = vadd.f32 %v15961_v17, %v5089_v8  ;;  %v5091_v21 = vpop.f32.mrb[135].mxu0  ;;  %9545 = vmatprep.mubr.bf16.mxu1 %v14622_v43  ;;  %v8145_v39 = vshll.u32 %v14622_v43, 16  ;;  %v5961_v7 = vshrl.u32 %v14622_v43, 16 }
 0x58d   : > { %v15835_v41 = vshll.u32 %v14628_v6, 16  ;;  %v6559_v45 = vshrl.u32 %v6521_v13, 16  ;;  %v15839_v8 = vshrl.u32 %v14635_v29, 16  ;;  %v15836_v17 = vshrl.u32 %v14628_v6, 16 }
 0x58e   : > { %v5497_v2 = vmax.f32 %v5411_v19, 0.0  ;;  %v8147_v33 = vrot.slane %v8145_v39, 1  ;;  %v5963_v60 = vrot.slane %v5961_v7, 7  ;;  %v5568_v57 = vmul.f32 0.0, %v5496_v38 }
 0x58f   : > { %v7281_v21 = vrot.slane %v15835_v41, 1  ;;  %v6561_v1 = vrot.slane %v6559_v45, 7  ;;  %v14662_v41 = vrot.slane %v15839_v8, 7 }
 0x590   : > { %v5569_v43 = vmul.f32 0.0, %v5497_v2  ;;  %v8148_v15 = vsel %vm956_vm0, %v8143_v55, %v8147_v33  ;;  %v5966_v22 = vor.u32 %v8145_v39, %v5963_v60 }
 0x591   : > { %v5094_v47 = vpop.f32.mrb[136].mxu0  ;;  %11447 = vmatmul.mubr.bf16.gmra.mrb[200].mxu0 %v8148_v15  ;;  %v14652_v13 = vsel %vm956_vm0, %v7277_v50, %v7281_v21  ;;  %v7285_v42 = vor.u32 %v7281_v21, %v15836_v17  ;;  %v14664_v15 = vld [vmem:[#allocation4] sm:$0xff] }
 0x592   : > { %v14654_v19 = vpack.c.bf16 %v5569_v43, %v5568_v57  ;;  %v5416_v38 = vadd.f32 %v14189_v49, %v5094_v47  ;;  %v5096_v2 = vpop.f32.mrb[137].mxu0  ;;  %v5967_v39 = vsel %vm5683_vm2, %v5955_v28, %v5966_v22  ;;  %v6160_v57 = vshll.u32 %v14664_v15, 16  ;;  %v14674_v22 = vld [vmem:[#allocation4 + $0x20] sm:$0xff] }
 0x593   : > { %v5097_v55 = vpop.f32.mrb[138].mxu0  ;;  %9546 = vmatmul.mubr.bf16.gmra.mrb[208].mxu1 %v5967_v39  ;;  %v14667_v50 = vld [vmem:[#allocation4 + $0x118] sm:$0xff]  ;;  %v843_v47 = vsel %vm14643_vm9, 1.0, %v15885_v51  ;;  %v844_v2 = vsel %vm14647_vm10, 1.0, %v15885_v51 }
 0x594   : > { %5643 = vst [vmem:[#allocation4 + $0x120] sm:$0xff] %v14654_v19  ;;  %v5498_v49 = vmax.f32 %v5416_v38, 0.0  ;;  %v5419_v28 = vadd.f32 %v14195_v62, %v5097_v55  ;;  %v5099_v43 = vpop.f32.mrb[139].mxu0  ;;  %9553 = vmatprep.mubr.bf16.mxu1 %v14654_v19  ;;  %v8153_v45 = vshll.u32 %v14654_v19, 16  ;;  %v5969_v21 = vshrl.u32 %v14654_v19, 16 }
 0x595   : > { %v15840_v38 = vshll.u32 %v14635_v29, 16  ;;  %v15841_v62 = vshll.u32 %v14667_v50, 16  ;;  %v8151_v55 = vor.u32 %v8147_v33, %v5961_v7  ;;  %v6158_v7 = vshrl.u32 %v14664_v15, 16 }
 0x596   : > { %v5499_v39 = vmax.f32 %v5419_v28, 0.0  ;;  %v8155_v43 = vrot.slane %v8153_v45, 1  ;;  %v5971_v17 = vrot.slane %v5969_v21, 7  ;;  %v5570_v51 = vmul.f32 %v5498_v49, %v843_v47 }
 0x597   : > { %v6568_v19 = vor.u32 %v15840_v38, %v14662_v41  ;;  %v7289_v3 = vrot.slane %v15841_v62, 1  ;;  %v6162_v33 = vrot.slane %v6160_v57, 1  ;;  %v15966_v49 = vshrl.u32 %v14667_v50, 16 }
 0x598   : > { %v5571_v14 = vmul.f32 %v5499_v39, %v844_v2  ;;  %v8156_v8 = vsel %vm956_vm0, %v8151_v55, %v8155_v43  ;;  %v5974_v53 = vor.u32 %v8153_v45, %v5971_v17  ;;  %v15967_v17 = vshrl.u32 %v14674_v22, 16  ;;  %v14710_v39 = vld [vmem:[#allocation4 + $0x28] sm:$0xff] }
 0x599   : > { %v5102_v28 = vpop.f32.mrb[140].mxu0  ;;  %11450 = vmatprep.mubr.bf16.mxu0 %v8156_v8  ;;  %v14694_v30 = vsel %vm956_vm0, %v7285_v42, %v7289_v3  ;;  %v7293_v47 = vor.u32 %v7289_v3, %v15966_v49  ;;  %v6569_v8 = vsel %vm5683_vm2, %v6561_v1, %v6568_v19  ;;  %v8159_v19 = vor.u32 %v8155_v43, %v5969_v21  ;;  %v12538_v21 = vld [vmem:[%s15807_s2 + $0x100] sm:$0xff]  }
 0x59a   : > { %v14696_v38 = vpack.c.bf16 %v5571_v14, %v5570_v51  ;;  %v5424_v34 = vadd.f32 %v14186_v56, %v5102_v28  ;;  %v5104_v26 = vpop.f32.mrb[141].mxu0  ;;  %v5975_v62 = vsel %vm5683_vm2, %v5963_v60, %v5974_v53  ;;  %v6573_v57 = vrot.slane %v15967_v17, 7 }
 0x59b   : > { %v5105_v2 = vpop.f32.mrb[142].mxu0  ;;  %9554 = vmatmul.mubr.bf16.gmra.mrb[212].mxu1 %v5975_v62  ;;  %v14705_v45 = vld [vmem:[#allocation4 + $0x120] sm:$0xff]  ;;  %v6163_v60 = vor.u32 %v6162_v33, %v6158_v7  ;;  %v6574_v62 = vshll.u32 %v14674_v22, 16 }
 0x59c   : > { %5644 = vst [vmem:[#allocation4 + $0x128] sm:$0xff] %v14696_v38  ;;  %v5500_v14 = vmax.f32 %v5424_v34, 0.0  ;;  %v5427_v56 = vadd.f32 %v14192_v48, %v5105_v2  ;;  %v5107_v42 = vpop.f32.mrb[143].mxu0  ;;  %9594 = vmatprep.mubr.bf16.mxu1 %v6569_v8  ;;  %v8161_v53 = vshll.u32 %v14696_v38, 16  ;;  %v15842_v1 = vshll.u32 %v14705_v45, 16 }
 0x59d   : > { %v6576_v3 = vor.u32 %v6574_v62, %v6573_v57  ;;  %v15845_v34 = vshrl.u32 %v14710_v39, 16  ;;  %v15843_v48 = vshrl.u32 %v14705_v45, 16  ;;  %v6168_v2 = vsel %vm956_vm0, %v6163_v60, %v6162_v33 }
 0x59e   : > { %v5501_v55 = vmax.f32 %v5427_v56, 0.0  ;;  %v14714_v26 = vrot.slane %v8161_v53, 1  ;;  %v7297_v51 = vrot.slane %v15842_v1, 1  ;;  %v5572_v28 = vmul.f32 0.0, %v5500_v14 }
 0x59f   : > { %v6577_v33 = vsel %vm5683_vm2, %v14662_v41, %v6576_v3  ;;  %v6581_v53 = vrot.slane %v15845_v34, 7  ;;  %v6582_v41 = vshll.u32 %v14710_v39, 16  ;;  %v15972_v3 = vshll.u32 %v14635_v29, 16 }
 0x5a0   : > { %v5573_v7 = vmul.f32 0.0, %v5501_v55  ;;  %v8164_v49 = vsel %vm956_vm0, %v8159_v19, %v14714_v26  ;;  %v14729_v8 = vsel %vm956_vm0, %v7293_v47, %v7297_v51  ;;  %v14733_v17 = vor.u32 %v7297_v51, %v15843_v48  ;;  %v14747_v19 = vld [vmem:[#allocation4 + $0x30] sm:$0xff]  ;;  %v12539_v51 = vld [vmem:[%s15807_s2 + $0x108] sm:$0xff]  }
 0x5a1   : > { %v14726_v43 = vpop.f32.mrb[144].mxu0  ;;  %11451 = vmatmul.mubr.bf16.gmra.mrb[204].mxu0 %v8164_v49 }
 0x5a2   : > { %15968 = vst [vmem:[#allocation6_spill] sm:$0xff] %v14726_v43  ;;  %v5609_v14 = vpack.c.bf16 %v5573_v7, %v5572_v28  ;;  %v14735_v56 = vpop.f32.mrb[145].mxu0  ;;  %v6175_v7 = vrot.slane %v15972_v3, 1 }
 0x5a3   : > { %15969 = vst [vmem:[#allocation9_spill] sm:$0xff] %v14735_v56  ;;  %v14737_v42 = vpop.f32.mrb[146].mxu0  ;;  %9595 = vmatmul.mubr.bf16.vlgmr.msra.gmra.mrb[72].mxu1 %v6168_v2  ;;  %v14743_v55 = vld [vmem:[#allocation4 + $0x128] sm:$0xff] }
 0x5a4   : > { %15970 = vst [vmem:[#allocation8_spill] sm:$0xff] %v14737_v42  ;;  %5645 = vst [vmem:[#allocation4 + $0x130] sm:$0xff] %v5609_v14  ;;  %v14745_v47 = vpop.f32.mrb[147].mxu0  ;;  %9602 = vmatprep.mubr.bf16.mxu1 %v6577_v33  ;;  %9884 = vmatpush1.bf16.msra.mxu1 %v12538_v21  ;;  %v15844_v28 = vshll.u32 %v14743_v55, 16  ;;  %v15846_v49 = vshrl.u32 %v14743_v55, 16  ;;  %v6584_v21 = vor.u32 %v6582_v41, %v6581_v53  ;;  %v12540_v33 = vld [vmem:[%s15807_s2 + $0x110] sm:$0xff]  }
 0x5a5   : > { %15971 = vst [vmem:[#allocation10_spill] sm:$0xff] %v14745_v47  ;;  %9885 = vmatprep.subr.bf16.mxu1 %v14664_v15  ;;  %v6176_v34 = vsel %vm956_vm0, %v6163_v60, %v6175_v7  ;;  %v15977_v42 = vshrl.u32 %v14747_v19, 16  ;;  %v12541_v60 = vld [vmem:[%s15807_s2 + $0x118] sm:$0xff]  }
 0x5a6   : > { %v7305_v2 = vrot.slane %v15844_v28, 1  ;;  %v6585_v14 = vsel %vm5683_vm2, %v6573_v57, %v6584_v21  ;;  %v6183_v57 = vrot.slane %v6574_v62, 1 }
 0x5a7   : > { %v6589_v43 = vrot.slane %v15977_v42, 7 }
 0x5a8   : > { %9886 = vmatpush1.bf16.msra.mxu1 %v12539_v51  ;;  %v14766_v1 = vsel %vm956_vm0, %v14733_v17, %v7305_v2  ;;  %v7309_v3 = vor.u32 %v7305_v2, %v15846_v49  ;;  %v14785_v2 = vld [vmem:[#allocation4 + $0x38] sm:$0xff] }
 0x5a9   : > { %15973 = vst [vmem:[#allocation11_spill] sm:$0xff] %v14766_v1  ;;  %v14770_v48 = vpop.f32.mrb[148].mxu0  ;;  %9887 = vmatprep.subr.bf16.mxu1 %v14664_v15 }
 0x5aa   : > { %15974 = vst [vmem:[#allocation12_spill] sm:$0xff] %v14770_v48  ;;  %v14773_v28 = vpop.f32.mrb[149].mxu0 }
 0x5ab   : > { %15975 = vst [vmem:[#allocation15_spill] sm:$0xff] %v14773_v28  ;;  %v14776_v51 = vpop.f32.mrb[150].mxu0  ;;  %9603 = vmatmul.mubr.bf16.gmra.mrb[76].mxu1 %v6176_v34  ;;  %v14781_v47 = vld [vmem:[#allocation4 + $0x130] sm:$0xff]  ;;  %v6590_v34 = vshll.u32 %v14747_v19, 16 }
 0x5ac   : > { %15976 = vst [vmem:[#allocation13_spill] sm:$0xff] %v14776_v51  ;;  %v14783_v56 = vpop.f32.mrb[151].mxu0  ;;  %9610 = vmatprep.mubr.bf16.mxu1 %v6585_v14  ;;  %9888 = vmatpush1.bf16.msra.mxu1 %v12540_v33  ;;  %v15847_v49 = vshll.u32 %v14781_v47, 16  ;;  %v15848_v42 = vshrl.u32 %v14781_v47, 16  ;;  %v15849_v51 = vshrl.u32 %v14785_v2, 16  ;;  %v15979_v33 = vshrl.u32 %v14635_v29, 16 }
 0x5ad   : > { %15978 = vst [vmem:[#allocation14_spill] sm:$0xff] %v14783_v56  ;;  %9889 = vmatprep.subr.bf16.mxu1 %v14664_v15  ;;  %v6592_v14 = vor.u32 %v6590_v34, %v6589_v43  ;;  %v12542_v56 = vld [vmem:[%s15807_s2 + $0x120] sm:$0xff]  }
 0x5ae   : > { %v7313_v21 = vrot.slane %v15847_v49, 1  ;;  %v6179_v48 = vor.u32 %v15979_v33, %v6175_v7  ;;  %v8165_v33 = vshrl.u32 %v14696_v38, 16 }
 0x5b0   : > { %9890 = vmatpush1.bf16.msra.mxu1 %v12541_v60  ;;  %v14803_v28 = vsel %vm956_vm0, %v7309_v3, %v7313_v21  ;;  %v14807_v62 = vor.u32 %v7313_v21, %v15848_v42  ;;  %v6184_v29 = vsel %vm956_vm0, %v6179_v48, %v6183_v57  ;;  %v6593_v60 = vsel %vm5683_vm2, %v6581_v53, %v6592_v14  ;;  %v14823_v42 = vld [vmem:[#allocation4 + $0x40] sm:$0xff] }
 0x5b1   : > { %v14809_v1 = vpop.f32.mrb[152].mxu0  ;;  %9891 = vmatprep.subr.bf16.mxu1 %v14664_v15  ;;  %v6597_v3 = vrot.slane %v15849_v51, 7  ;;  %v12543_v48 = vld [vmem:[%s15807_s2 + $0x128] sm:$0xff]   ;;  %v14831_v53 = vor.u32 %v8165_v33, %v14714_v26  ;;  %v6191_v14 = vrot.slane %v6582_v41, 1  ;;  %v15850_v38 = vshrl.u32 %v14823_v42, 16 }
 0x5b2   : > { %15980 = vst [vmem:[#allocation16_spill] sm:$0xff] %v14807_v62  ;;  %15981 = vst [vmem:[#allocation17_spill] sm:$0xff] %v14809_v1  ;;  %v14812_v49 = vpop.f32.mrb[153].mxu0  ;;  %v12594_v62 = vld [vmem:[#allocation4 + $0xa0] sm:$0xff] }
 0x5b3   : > { %15982 = vst [vmem:[#allocation20_spill] sm:$0xff] %v14812_v49  ;;  %v14815_v7 = vpop.f32.mrb[154].mxu0  ;;  %9611 = vmatmul.mubr.bf16.gmra.mrb[80].mxu1 %v6184_v29  ;;  %15985 = vst [vmem:[#allocation21_spill] sm:$0xff] %v14831_v53 }
 0x5b4   : > { %15983 = vst [vmem:[#allocation18_spill] sm:$0xff] %v14815_v7  ;;  %v14821_v21 = vpop.f32.mrb[155].mxu0  ;;  %9618 = vmatprep.mubr.bf16.mxu1 %v6593_v60  ;;  %9892 = vmatpush1.bf16.msra.mxu1 %v12542_v56  ;;  %v6598_v7 = vshll.u32 %v14785_v2, 16  ;;  %v15986_v60 = vshrl.u32 %v14674_v22, 16  ;;  %v12544_v56 = vld [vmem:[%s15807_s2 + $0x130] sm:$0xff]   ;;  %v6605_v22 = vrot.slane %v15850_v38, 7 }
 0x5b5   : > { %15984 = vst [vmem:[#allocation19_spill] sm:$0xff] %v14821_v21  ;;  %9893 = vmatprep.subr.bf16.mxu1 %v14664_v15 }
 0x5b6   : > { %v6600_v29 = vor.u32 %v6598_v7, %v6597_v3  ;;  %v6187_v51 = vor.u32 %v15986_v60, %v6183_v57  ;;  %v12545_v60 = vld [vmem:[%s15807_s2 + $0x138] sm:$0xff]  }
 0x5b8   : > { %9894 = vmatpush1.bf16.msra.mxu1 %v12543_v48  ;;  %v6192_v26 = vsel %vm956_vm0, %v6187_v51, %v6191_v14  ;;  %v6601_v33 = vsel %vm5683_vm2, %v6589_v43, %v6600_v29  ;;  %v14852_v48 = vld [vmem:[#allocation4 + $0x48] sm:$0xff]  ;;  %v6606_v51 = vshll.u32 %v14823_v42, 16  ;;  %v15991_v29 = vshrl.u32 %v14710_v39, 16  ;;  %v14872_v39 = vld [vmem:[#allocation4 + $0x50] sm:$0xff] }
 0x5b9   : > { %v14839_v1 = vpop.f32.mrb[156].mxu0  ;;  %9895 = vmatprep.subr.bf16.mxu1 %v14664_v15  ;;  %v15851_v43 = vshrl.u32 %v14852_v48, 16 }
 0x5ba   : > { %15987 = vst [vmem:[#allocation22_spill] sm:$0xff] %v14839_v1  ;;  %v14842_v21 = vpop.f32.mrb[157].mxu0  ;;  %v6608_v53 = vor.u32 %v6606_v51, %v6605_v22  ;;  %v6195_v38 = vor.u32 %v15991_v29, %v6191_v14 }
 0x5bb   : > { %15988 = vst [vmem:[#allocation23_spill] sm:$0xff] %v14842_v21  ;;  %v14845_v41 = vpop.f32.mrb[158].mxu0  ;;  %9619 = vmatmul.mubr.bf16.gmra.mrb[84].mxu1 %v6192_v26  ;;  %v6199_v26 = vrot.slane %v6590_v34, 1  ;;  %v6613_v34 = vrot.slane %v15851_v43, 7 }
 0x5bc   : > { %15989 = vst [vmem:[#allocation24_spill] sm:$0xff] %v14845_v41  ;;  %v14850_v57 = vpop.f32.mrb[159].mxu0  ;;  %9626 = vmatprep.mubr.bf16.mxu1 %v6601_v33  ;;  %9896 = vmatpush1.bf16.msra.mxu1 %v12544_v56  ;;  %v12546_v56 = vld [vmem:[%s15807_s2 + $0x140] sm:$0xff]   ;;  %v6609_v41 = vsel %vm5683_vm2, %v6597_v3, %v6608_v53  ;;  %v6207_v53 = vrot.slane %v6598_v7, 1  ;;  %v6622_v7 = vshll.u32 %v14872_v39, 16 }
 0x5bd   : > { %15990 = vst [vmem:[#allocation25_spill] sm:$0xff] %v14850_v57  ;;  %9897 = vmatprep.subr.bf16.mxu1 %v14664_v15  ;;  %v6200_v33 = vsel %vm956_vm0, %v6195_v38, %v6199_v26  ;;  %v12547_v38 = vld [vmem:[%s15807_s2 + $0x148] sm:$0xff]  }
 0x5c0   : > { %9898 = vmatpush1.bf16.msra.mxu1 %v12545_v60  ;;  %v6614_v60 = vshll.u32 %v14852_v48, 16 }
 0x5c1   : > { %9899 = vmatprep.subr.bf16.mxu1 %v14664_v15 }
 0x5c3   : > { %9627 = vmatmul.mubr.bf16.gmra.mrb[88].mxu1 %v6200_v33  ;;  %v6619_v33 = vshrl.u32 %v14872_v39, 16 }
 0x5c4   : > { %9634 = vmatprep.mubr.bf16.mxu1 %v6609_v41  ;;  %v14870_v1 = vpop.f32.mrb[160].mxu0  ;;  %9900 = vmatpush1.bf16.msra.mxu1 %v12546_v56  ;;  %v6616_v41 = vor.u32 %v6614_v60, %v6613_v34  ;;  %v15996_v56 = vshrl.u32 %v14747_v19, 16  ;;  %v15997_v19 = vshrl.u32 %v14785_v2, 16 }
 0x5c5   : > { %15992 = vst [vmem:[#allocation26_spill] sm:$0xff] %v14870_v1  ;;  %v14874_v14 = vpop.f32.mrb[161].mxu0  ;;  %9901 = vmatprep.subr.bf16.mxu1 %v14664_v15  ;;  %v6621_v57 = vrot.slane %v6619_v33, 7 }
 0x5c6   : > { %15993 = vst [vmem:[#allocation27_spill] sm:$0xff] %v14874_v14  ;;  %v14881_v3 = vpop.f32.mrb[162].mxu0  ;;  %v6203_v43 = vor.u32 %v15996_v56, %v6199_v26  ;;  %v6617_v14 = vsel %vm5683_vm2, %v6605_v22, %v6616_v41  ;;  %v6211_v26 = vor.u32 %v15997_v19, %v6207_v53  ;;  %v6223_v56 = vrot.slane %v6614_v60, 1 }
 0x5c7   : > { %15994 = vst [vmem:[#allocation28_spill] sm:$0xff] %v14881_v3  ;;  %v14883_v29 = vpop.f32.mrb[163].mxu0  ;;  %v14891_v3 = vld [vmem:[#allocation4 + $0x58] sm:$0xff]  ;;  %v6624_v21 = vor.u32 %v6622_v7, %v6621_v57 }
 0x5c8   : > { %15995 = vst [vmem:[#allocation29_spill] sm:$0xff] %v14883_v29  ;;  %9902 = vmatpush1.bf16.msra.mxu1 %v12547_v38  ;;  %v6208_v1 = vsel %vm956_vm0, %v6203_v43, %v6207_v53  ;;  %v6215_v29 = vrot.slane %v6606_v51, 1  ;;  %v6627_v49 = vshrl.u32 %v14891_v3, 16  ;;  %v6630_v51 = vshll.u32 %v14891_v3, 16 }
 0x5c9   : > { %9903 = vmatprep.subr.bf16.mxu1 %v14664_v15 }
 0x5ca   : > { %v6216_v38 = vsel %vm956_vm0, %v6211_v26, %v6215_v29  ;;  %v6629_v43 = vrot.slane %v6627_v49, 7 }
 0x5cb   : > { %9635 = vmatmul.mubr.bf16.gmra.mrb[92].mxu1 %v6208_v1  ;;  %v6625_v1 = vsel %vm5683_vm2, %v6613_v34, %v6624_v21  ;;  %v12548_v21 = vld [vmem:[%s15807_s2 + $0x150] sm:$0xff]   ;;  %v16002_v34 = vshrl.u32 %v14823_v42, 16  ;;  %v16003_v42 = vshrl.u32 %v14852_v48, 16 }
 0x5cc   : > { %9642 = vmatprep.mubr.bf16.mxu1 %v6617_v14  ;;  %v14901_v14 = vld [vmem:[#allocation4 + $0x60] sm:$0xff]  ;;  %v6632_v53 = vor.u32 %v6630_v51, %v6629_v43  ;;  %9904 = vmatpush1.bf16.msra.mxu1 %v12548_v21 }
 0x5cd   : > { %v6635_v19 = vshrl.u32 %v14901_v14, 16  ;;  %v6219_v26 = vor.u32 %v16002_v34, %v6215_v29  ;;  %9905 = vmatprep.subr.bf16.mxu1 %v14664_v15  ;;  %v6227_v29 = vor.u32 %v16003_v42, %v6223_v56 }
 0x5ce   : > { %v6633_v60 = vsel %vm5683_vm2, %v6621_v57, %v6632_v53  ;;  %v14929_v53 = vld [vmem:[#allocation4 + $0x70] sm:$0xff] }
 0x5cf   : > { %v6637_v3 = vrot.slane %v6635_v19, 7  ;;  %v6651_v42 = vshrl.u32 %v14929_v53, 16 }
 0x5d3   : > { %9643 = vmatmul.mubr.bf16.gmra.mrb[96].mxu1 %v6216_v38  ;;  %v6224_v38 = vsel %vm956_vm0, %v6219_v26, %v6223_v56 }
 0x5d4   : > { %9650 = vmatprep.mubr.bf16.mxu1 %v6625_v1  ;;  %v14899_v22 = vpop.f32.mrb[164].mxu0  ;;  %v14919_v1 = vld [vmem:[#allocation4 + $0x68] sm:$0xff] }
 0x5d5   : > { %15998 = vst [vmem:[#allocation30_spill] sm:$0xff] %v14899_v22  ;;  %v14903_v41 = vpop.f32.mrb[165].mxu0  ;;  %v6231_v22 = vrot.slane %v6622_v7, 1  ;;  %v6646_v7 = vshll.u32 %v14919_v1, 16 }
 0x5d6   : > { %15999 = vst [vmem:[#allocation31_spill] sm:$0xff] %v14903_v41  ;;  %v14906_v39 = vpop.f32.mrb[166].mxu0  ;;  %v6643_v41 = vshrl.u32 %v14919_v1, 16 }
 0x5d7   : > { %16000 = vst [vmem:[#allocation32_spill] sm:$0xff] %v14906_v39  ;;  %v14908_v2 = vpop.f32.mrb[167].mxu0  ;;  %v6638_v39 = vshll.u32 %v14901_v14, 16  ;;  %v6232_v21 = vsel %vm956_vm0, %v6227_v29, %v6231_v22 }
 0x5d8   : > { %16001 = vst [vmem:[#allocation33_spill] sm:$0xff] %v14908_v2  ;;  %v6645_v26 = vrot.slane %v6643_v41, 7 }
 0x5d9   : > { %v6640_v2 = vor.u32 %v6638_v39, %v6637_v3 }
 0x5da   : > { %v6648_v56 = vor.u32 %v6646_v7, %v6645_v26 }
 0x5db   : > { %9651 = vmatmul.mubr.bf16.gmra.mrb[100].mxu1 %v6224_v38  ;;  %v6641_v34 = vsel %vm5683_vm2, %v6629_v43, %v6640_v2  ;;  %v12549_v43 = vld [vmem:[%s15807_s2 + $0x158] sm:$0xff]   ;;  %v6235_v2 = vor.u32 %v6619_v33, %v6231_v22 }
 0x5dc   : > { %9658 = vmatprep.mubr.bf16.mxu1 %v6633_v60  ;;  %v6239_v60 = vrot.slane %v6630_v51, 1  ;;  %9906 = vmatpush1.bf16.msra.mxu1 %v12549_v43  ;;  %v6649_v1 = vsel %vm5683_vm2, %v6637_v3, %v6648_v56  ;;  %v14945_v51 = vld [vmem:[#allocation4 + $0x78] sm:$0xff]  ;;  %v14953_v3 = vld [vmem:[#allocation4 + $0x80] sm:$0xff] }
 0x5dd   : > { %9907 = vmatprep.subr.bf16.mxu1 %v14664_v15 }
 0x5de   : > { %v6240_v29 = vsel %vm956_vm0, %v6235_v2, %v6239_v60 }
 0x5e3   : > { %9659 = vmatmul.mubr.bf16.gmra.mrb[104].mxu1 %v6232_v21  ;;  %v6653_v21 = vrot.slane %v6651_v42, 7 }
 0x5e4   : > { %9666 = vmatprep.mubr.bf16.mxu1 %v6641_v34  ;;  %v14927_v57 = vpop.f32.mrb[168].mxu0  ;;  %v6654_v34 = vshll.u32 %v14929_v53, 16  ;;  %v6662_v53 = vshll.u32 %v14945_v51, 16 }
 0x5e5   : > { %16004 = vst [vmem:[#allocation34_spill] sm:$0xff] %v14927_v57  ;;  %v14931_v38 = vpop.f32.mrb[169].mxu0 }
 0x5e6   : > { %16005 = vst [vmem:[#allocation35_spill] sm:$0xff] %v14931_v38  ;;  %v14934_v14 = vpop.f32.mrb[170].mxu0  ;;  %v6656_v57 = vor.u32 %v6654_v34, %v6653_v21  ;;  %v6243_v38 = vor.u32 %v6627_v49, %v6239_v60 }
 0x5e7   : > { %16006 = vst [vmem:[#allocation36_spill] sm:$0xff] %v14934_v14  ;;  %v14936_v48 = vpop.f32.mrb[171].mxu0  ;;  %v6247_v14 = vrot.slane %v6638_v39, 1 }
 0x5e8   : > { %16007 = vst [vmem:[#allocation37_spill] sm:$0xff] %v14936_v48  ;;  %v6659_v48 = vshrl.u32 %v14945_v51, 16  ;;  %v6657_v22 = vsel %vm5683_vm2, %v6645_v26, %v6656_v57  ;;  %v12550_v51 = vld [vmem:[%s15807_s2 + $0x160] sm:$0xff]  }
 0x5e9   : > { %v6248_v33 = vsel %vm956_vm0, %v6243_v38, %v6247_v14  ;;  %v6667_v38 = vshrl.u32 %v14953_v3, 16  ;;  %v6251_v60 = vor.u32 %v6635_v19, %v6247_v14  ;;  %9908 = vmatpush1.bf16.msra.mxu1 %v12550_v51 }
 0x5ea   : > { %v6661_v43 = vrot.slane %v6659_v48, 7  ;;  %9909 = vmatprep.subr.bf16.mxu1 %v14664_v15 }
 0x5eb   : > { %9667 = vmatmul.mubr.bf16.gmra.mrb[108].mxu1 %v6240_v29  ;;  %v6255_v29 = vrot.slane %v6646_v7, 1  ;;  %v6670_v7 = vshll.u32 %v14953_v3, 16 }
 0x5ec   : > { %9674 = vmatprep.mubr.bf16.mxu1 %v6649_v1  ;;  %v6664_v49 = vor.u32 %v6662_v53, %v6661_v43 }
 0x5ed   : > { %v6256_v26 = vsel %vm956_vm0, %v6251_v60, %v6255_v29  ;;  %v6259_v14 = vor.u32 %v6643_v41, %v6255_v29 }
 0x5ee   : > { %v6665_v57 = vsel %vm5683_vm2, %v6653_v21, %v6664_v49 }
 0x5f3   : > { %9675 = vmatmul.mubr.bf16.gmra.mrb[112].mxu1 %v6248_v33  ;;  %v6669_v33 = vrot.slane %v6667_v38, 7 }
 0x5f4   : > { %9682 = vmatprep.mubr.bf16.mxu1 %v6657_v22  ;;  %v14951_v2 = vpop.f32.mrb[172].mxu0  ;;  %v14965_v22 = vld [vmem:[#allocation4 + $0x88] sm:$0xff] }
 0x5f5   : > { %16008 = vst [vmem:[#allocation38_spill] sm:$0xff] %v14951_v2  ;;  %v14955_v56 = vpop.f32.mrb[173].mxu0  ;;  %v6672_v2 = vor.u32 %v6670_v7, %v6669_v33  ;;  %v6675_v19 = vshrl.u32 %v14965_v22, 16 }
 0x5f6   : > { %16009 = vst [vmem:[#allocation39_spill] sm:$0xff] %v14955_v56  ;;  %v14958_v39 = vpop.f32.mrb[174].mxu0 }
 0x5f7   : > { %16010 = vst [vmem:[#allocation40_spill] sm:$0xff] %v14958_v39  ;;  %v14960_v1 = vpop.f32.mrb[175].mxu0  ;;  %v6263_v39 = vrot.slane %v6654_v34, 1  ;;  %v6673_v49 = vsel %vm5683_vm2, %v6661_v43, %v6672_v2  ;;  %v6677_v60 = vrot.slane %v6675_v19, 7  ;;  %v6678_v34 = vshll.u32 %v14965_v22, 16  ;;  %v12551_v22 = vld [vmem:[%s15807_s2 + $0x168] sm:$0xff]  }
 0x5f8   : > { %16011 = vst [vmem:[#allocation41_spill] sm:$0xff] %v14960_v1  ;;  %v6271_v1 = vrot.slane %v6662_v53, 1  ;;  %9910 = vmatpush1.bf16.msra.mxu1 %v12551_v22 }
 0x5f9   : > { %v6264_v21 = vsel %vm956_vm0, %v6259_v14, %v6263_v39  ;;  %v6680_v41 = vor.u32 %v6678_v34, %v6677_v60  ;;  %v6267_v14 = vor.u32 %v6651_v42, %v6263_v39  ;;  %9911 = vmatprep.subr.bf16.mxu1 %v14664_v15 }
 0x5fa   : > { %v6275_v42 = vor.u32 %v6659_v48, %v6271_v1  ;;  %v6699_v48 = vshrl.u32 %v12594_v62, 16 }
 0x5fb   : > { %9683 = vmatmul.mubr.bf16.gmra.mrb[116].mxu1 %v6256_v26  ;;  %v6272_v43 = vsel %vm956_vm0, %v6267_v14, %v6271_v1  ;;  %v6681_v2 = vsel %vm5683_vm2, %v6669_v33, %v6680_v41 }
 0x5fc   : > { %9690 = vmatprep.mubr.bf16.mxu1 %v6665_v57  ;;  %v14977_v57 = vld [vmem:[#allocation4 + $0x90] sm:$0xff] }
 0x5fd   : > { %v6683_v29 = vshrl.u32 %v14977_v57, 16  ;;  %v6686_v53 = vshll.u32 %v14977_v57, 16 }
 0x603   : > { %9691 = vmatmul.mubr.bf16.gmra.mrb[120].mxu1 %v6264_v21  ;;  %v6685_v21 = vrot.slane %v6683_v29, 7 }
 0x604   : > { %9698 = vmatprep.mubr.bf16.mxu1 %v6673_v49  ;;  %v14975_v26 = vpop.f32.mrb[176].mxu0  ;;  %v6538_v49 = vld [vmem:[#allocation4 + $0x98] sm:$0xff] }
 0x605   : > { %16012 = vst [vmem:[#allocation42_spill] sm:$0xff] %v14975_v26  ;;  %v14979_v3 = vpop.f32.mrb[177].mxu0  ;;  %v6688_v26 = vor.u32 %v6686_v53, %v6685_v21 }
 0x606   : > { %16013 = vst [vmem:[#allocation43_spill] sm:$0xff] %v14979_v3  ;;  %v14982_v51 = vpop.f32.mrb[178].mxu0 }
 0x607   : > { %16014 = vst [vmem:[#allocation44_spill] sm:$0xff] %v14982_v51  ;;  %v14984_v56 = vpop.f32.mrb[179].mxu0  ;;  %v6279_v51 = vrot.slane %v6670_v7, 1  ;;  %v6689_v33 = vsel %vm5683_vm2, %v6677_v60, %v6688_v26  ;;  %v6287_v7 = vrot.slane %v6678_v34, 1  ;;  %v6701_v26 = vrot.slane %v6699_v48, 7 }
 0x608   : > { %16015 = vst [vmem:[#allocation45_spill] sm:$0xff] %v14984_v56  ;;  %v6691_v56 = vshrl.u32 %v6538_v49, 16  ;;  %v16018_v34 = vshll.u32 %v14302_v52, 16 }
 0x609   : > { %v6280_v39 = vsel %vm956_vm0, %v6275_v42, %v6279_v51  ;;  %v6283_v1 = vor.u32 %v6667_v38, %v6279_v51  ;;  %v6291_v62 = vor.u32 %v6675_v19, %v6287_v7 }
 0x60a   : > { %v6693_v41 = vrot.slane %v6691_v56, 7 }
 0x60b   : > { %9699 = vmatmul.mubr.bf16.gmra.mrb[124].mxu1 %v6272_v43  ;;  %v6288_v42 = vsel %vm956_vm0, %v6283_v1, %v6287_v7 }
 0x60c   : > { %9706 = vmatprep.mubr.bf16.mxu1 %v6681_v2  ;;  %v6694_v2 = vshll.u32 %v6538_v49, 16  ;;  %v12552_v49 = vld [vmem:[%s15807_s2 + $0x170] sm:$0xff]  }
 0x60d   : > { %9912 = vmatpush1.bf16.msra.mxu1 %v12552_v49  ;;  %v16020_v49 = vshrl.u32 %v14346_v58, 16 }
 0x60e   : > { %v6696_v3 = vor.u32 %v6694_v2, %v6693_v41  ;;  %9913 = vmatprep.subr.bf16.mxu1 %v14664_v15  ;;  %v6303_v52 = vrot.slane %v6694_v2, 1  ;;  %v16021_v2 = vshll.u32 %v14346_v58, 16 }
 0x610   : > { %v6697_v60 = vsel %vm5683_vm2, %v6685_v21, %v6696_v3 }
 0x613   : > { %9707 = vmatmul.mubr.bf16.gmra.mrb[128].mxu1 %v6280_v39  ;;  %v6295_v39 = vrot.slane %v6686_v53, 1 }
 0x614   : > { %9714 = vmatprep.mubr.bf16.mxu1 %v6689_v33  ;;  %v14996_v14 = vpop.f32.mrb[180].mxu0  ;;  %v6704_v33 = vor.u32 %v16018_v34, %v6701_v26  ;;  %v6717_v34 = vrot.slane %v16020_v49, 7  ;;  %v16025_v49 = vshll.u32 %v14396_v23, 16 }
 0x615   : > { %16016 = vst [vmem:[#allocation46_spill] sm:$0xff] %v14996_v14  ;;  %v14998_v43 = vpop.f32.mrb[181].mxu0  ;;  %v6296_v38 = vsel %vm956_vm0, %v6291_v62, %v6295_v39  ;;  %v6299_v19 = vor.u32 %v6683_v29, %v6295_v39  ;;  %v16022_v39 = vshrl.u32 %v14373_v37, 16 }
 0x616   : > { %v15000_v57 = vpop.f32.mrb[182].mxu0  ;;  %v6705_v3 = vsel %vm5683_vm2, %v6693_v41, %v6704_v33  ;;  %v12553_v33 = vld [vmem:[%s15807_s2 + $0x178] sm:$0xff]   ;;  %v6720_v62 = vor.u32 %v16021_v2, %v6717_v34 }
 0x617   : > { %16017 = vst [vmem:[#allocation47_spill] sm:$0xff] %v15000_v57  ;;  %v15002_v22 = vpop.f32.mrb[183].mxu0  ;;  %v12595_v57 = vld [vmem:[#allocation4 + $0xa8] sm:$0xff]  ;;  %v6304_v7 = vsel %vm956_vm0, %v6299_v19, %v6303_v52  ;;  %9914 = vmatpush1.bf16.msra.mxu1 %v12553_v33 }
 0x618   : > { %v6707_v14 = vshrl.u32 %v12595_v57, 16  ;;  %v16019_v57 = vshll.u32 %v14322_v44, 16  ;;  %10204 = vmatprep.subr.bf16.mxu1 %v14664_v15  ;;  %v6307_v44 = vor.u32 %v6691_v56, %v6303_v52  ;;  %v16023_v15 = vshll.u32 %v14373_v37, 16 }
 0x619   : > { %v6315_v52 = vor.u32 %v14317_v9, %v6699_v48 }
 0x61a   : > { %v6709_v51 = vrot.slane %v6707_v14, 7  ;;  %v6312_v29 = vsel %vm956_vm0, %v6307_v44, %v14317_v9  ;;  %v6323_v2 = vor.u32 %v14333_v0, %v6707_v14 }
 0x61b   : > { %9715 = vmatmul.mubr.bf16.gmra.mrb[132].mxu1 %v6288_v42 }
 0x61c   : > { %9722 = vmatprep.mubr.bf16.mxu1 %v6697_v60  ;;  %v6712_v60 = vor.u32 %v16019_v57, %v6709_v51  ;;  %v6328_v37 = vsel %vm956_vm0, %v6323_v2, %v14353_v36 }
 0x61e   : > { %v6713_v41 = vsel %vm5683_vm2, %v6701_v26, %v6712_v60  ;;  %v6721_v26 = vsel %vm5683_vm2, %v6709_v51, %v6720_v62  ;;  %v6320_v51 = vsel %vm956_vm0, %v6315_v52, %v14333_v0  ;;  %v16026_v62 = vshrl.u32 %v14419_v20, 16 }
 0x61f   : > { %v16027_v0 = vshll.u32 %v14419_v20, 16 }
 0x620   : > { %v6741_v44 = vrot.slane %v16026_v62, 7  ;;  %v16033_v62 = vshll.u32 %v14488_v11, 16 }
 0x622   : > { %v6744_v14 = vor.u32 %v16027_v0, %v6741_v44 }
 0x623   : > { %9723 = vmatmul.mubr.bf16.gmra.mrb[136].mxu1 %v6296_v38  ;;  %v6725_v38 = vrot.slane %v16022_v39, 7  ;;  %v16028_v39 = vshrl.u32 %v14442_v46, 16 }
 0x624   : > { %9730 = vmatprep.mubr.bf16.mxu1 %v6705_v3  ;;  %v15014_v21 = vpop.f32.mrb[184].mxu0 }
 0x625   : > { %v15016_v1 = vpop.f32.mrb[185].mxu0  ;;  %v6728_v56 = vor.u32 %v16023_v15, %v6725_v38  ;;  %v16029_v15 = vshll.u32 %v14442_v46, 16 }
 0x626   : > { %v15018_v53 = vpop.f32.mrb[186].mxu0 }
 0x627   : > { %v15020_v42 = vpop.f32.mrb[187].mxu0  ;;  %v6729_v19 = vsel %vm5683_vm2, %v6717_v34, %v6728_v56 }
 0x62b   : > { %9731 = vmatmul.mubr.bf16.gmra.mrb[140].mxu1 %v6304_v7  ;;  %v16024_v7 = vshrl.u32 %v14396_v23, 16 }
 0x62c   : > { %9738 = vmatprep.mubr.bf16.mxu1 %v6713_v41 }
 0x62d   : > { %v6733_v41 = vrot.slane %v16024_v7, 7 }
 0x62f   : > { %v6736_v33 = vor.u32 %v16025_v49, %v6733_v41  ;;  %v6745_v36 = vsel %vm5683_vm2, %v6733_v41, %v6744_v14  ;;  %v16034_v14 = vshrl.u32 %v14511_v16, 16 }
 0x631   : > { %v6737_v48 = vsel %vm5683_vm2, %v6725_v38, %v6736_v33  ;;  %v6749_v38 = vrot.slane %v16028_v39, 7  ;;  %v16031_v33 = vshll.u32 %v14465_v31, 16 }
 0x633   : > { %9739 = vmatmul.mubr.bf16.gmra.mrb[144].mxu1 %v6312_v29  ;;  %v6752_v56 = vor.u32 %v16029_v15, %v6749_v38 }
 0x634   : > { %9746 = vmatprep.mubr.bf16.mxu1 %v6721_v26  ;;  %v15039_v3 = vpop.f32.mrb[188].mxu0 }
 0x635   : > { %v15041_v57 = vpop.f32.mrb[189].mxu0  ;;  %v6753_v52 = vsel %vm5683_vm2, %v6741_v44, %v6752_v56  ;;  %v16035_v56 = vshll.u32 %v14511_v16, 16 }
 0x636   : > { %v15043_v60 = vpop.f32.mrb[190].mxu0 }
 0x637   : > { %v15045_v58 = vpop.f32.mrb[191].mxu0 }
 0x63b   : > { %9747 = vmatmul.mubr.bf16.gmra.mrb[148].mxu1 %v6320_v51  ;;  %v16030_v51 = vshrl.u32 %v14465_v31, 16 }
 0x63c   : > { %9754 = vmatprep.mubr.bf16.mxu1 %v6729_v19 }
 0x63d   : > { %v6757_v19 = vrot.slane %v16030_v51, 7  ;;  %v16036_v51 = vshrl.u32 %v14534_v63, 16 }
 0x63f   : > { %v6760_v46 = vor.u32 %v16031_v33, %v6757_v19  ;;  %v16037_v33 = vshll.u32 %v14534_v63, 16 }
 0x641   : > { %v6761_v2 = vsel %vm5683_vm2, %v6749_v38, %v6760_v46 }
 0x643   : > { %9755 = vmatmul.mubr.bf16.gmra.mrb[152].mxu1 %v6328_v37  ;;  %v16032_v37 = vshrl.u32 %v14488_v11, 16 }
 0x644   : > { %9762 = vmatprep.mubr.bf16.mxu1 %v6737_v48  ;;  %v15063_v34 = vpop.f32.mrb[192].mxu0 }
 0x645   : > { %v15065_v29 = vpop.f32.mrb[193].mxu0  ;;  %v6765_v48 = vrot.slane %v16032_v37, 7  ;;  %v16038_v37 = vshrl.u32 %v14557_v35, 16 }
 0x646   : > { %v15067_v26 = vpop.f32.mrb[194].mxu0 }
 0x647   : > { %v15069_v23 = vpop.f32.mrb[195].mxu0  ;;  %v6768_v44 = vor.u32 %v16033_v62, %v6765_v48  ;;  %v6789_v62 = vrot.slane %v16038_v37, 7 }
 0x649   : > { %v6769_v0 = vsel %vm5683_vm2, %v6757_v19, %v6768_v44  ;;  %v6781_v19 = vrot.slane %v16036_v51, 7 }
 0x64b   : > { %9763 = vmatmul.mubr.bf16.gmra.mrb[156].mxu1 %v14390_v54  ;;  %v6784_v46 = vor.u32 %v16037_v33, %v6781_v19 }
 0x64c   : > { %9770 = vmatprep.mubr.bf16.mxu1 %v6745_v36  ;;  %v6773_v36 = vrot.slane %v16034_v14, 7  ;;  %v16042_v14 = vshll.u32 %v14557_v35, 16  ;;  %v16046_v35 = vshll.u32 %v14603_v24, 16 }
 0x64e   : > { %v6776_v11 = vor.u32 %v16035_v56, %v6773_v36  ;;  %v6792_v63 = vor.u32 %v16042_v14, %v6789_v62  ;;  %v16047_v14 = vshrl.u32 %v14628_v6, 16 }
 0x650   : > { %v6793_v56 = vsel %vm5683_vm2, %v6781_v19, %v6792_v63  ;;  %v6813_v63 = vrot.slane %v16047_v14, 7 }
 0x653   : > { %9771 = vmatmul.mubr.bf16.gmra.mrb[160].mxu1 %v14413_v40 }
 0x654   : > { %9778 = vmatprep.mubr.bf16.mxu1 %v6753_v52  ;;  %v15083_v20 = vpop.f32.mrb[196].mxu0  ;;  %v6777_v52 = vsel %vm5683_vm2, %v6765_v48, %v6776_v11 }
 0x655   : > { %v15085_v7 = vpop.f32.mrb[197].mxu0 }
 0x656   : > { %v15087_v41 = vpop.f32.mrb[198].mxu0 }
 0x657   : > { %v15089_v49 = vpop.f32.mrb[199].mxu0 }
 0x65b   : > { %9779 = vmatmul.mubr.bf16.gmra.mrb[164].mxu1 %v14436_v59 }
 0x65c   : > { %9786 = vmatprep.mubr.bf16.mxu1 %v6761_v2  ;;  %v6785_v2 = vsel %vm5683_vm2, %v6773_v36, %v6784_v46  ;;  %v16043_v36 = vshrl.u32 %v14580_v61, 16  ;;  %v16045_v46 = vshrl.u32 %v14603_v24, 16  ;;  %v16050_v24 = vshll.u32 %v14667_v50, 16 }
 0x65e   : > { %v6797_v11 = vrot.slane %v16043_v36, 7  ;;  %v16049_v36 = vshrl.u32 %v14667_v50, 16  ;;  %v16054_v50 = vshll.u32 %v14743_v55, 16 }
 0x663   : > { %9787 = vmatmul.mubr.bf16.gmra.mrb[168].mxu1 %v14459_v12 }
 0x664   : > { %9794 = vmatprep.mubr.bf16.mxu1 %v6769_v0  ;;  %v15103_v31 = vpop.f32.mrb[200].mxu0 }
 0x665   : > { %v15105_v39 = vpop.f32.mrb[201].mxu0 }
 0x666   : > { %v15107_v38 = vpop.f32.mrb[202].mxu0 }
 0x667   : > { %v15109_v15 = vpop.f32.mrb[203].mxu0 }
 0x66b   : > { %9795 = vmatmul.mubr.bf16.gmra.mrb[172].mxu1 %v14482_v10 }
 0x66c   : > { %9802 = vmatprep.mubr.bf16.mxu1 %v6777_v52  ;;  %v16044_v52 = vshll.u32 %v14580_v61, 16  ;;  %v16048_v61 = vshll.u32 %v14628_v6, 16  ;;  %v16052_v6 = vshll.u32 %v14705_v45, 16 }
 0x66e   : > { %v6800_v51 = vor.u32 %v16044_v52, %v6797_v11  ;;  %v6821_v52 = vrot.slane %v16049_v36, 7 }
 0x670   : > { %v6801_v33 = vsel %vm5683_vm2, %v6789_v62, %v6800_v51  ;;  %v6824_v51 = vor.u32 %v16050_v24, %v6821_v52  ;;  %v6995_v24 = vld [vmem:[#allocation4 + $0x20] sm:$0xff] }
 0x673   : > { %9803 = vmatmul.mubr.bf16.gmra.mrb[176].mxu1 %v14505_v27 }
 0x674   : > { %9810 = vmatprep.mubr.bf16.mxu1 %v6785_v2  ;;  %v15123_v16 = vpop.f32.mrb[204].mxu0  ;;  %v6805_v2 = vrot.slane %v16045_v46, 7 }
 0x675   : > { %16039 = vst [vmem:[#allocation48_spill] sm:$0xff] %v15123_v16  ;;  %v15125_v44 = vpop.f32.mrb[205].mxu0 }
 0x676   : > { %v15127_v48 = vpop.f32.mrb[206].mxu0  ;;  %v6808_v37 = vor.u32 %v16046_v35, %v6805_v2 }
 0x677   : > { %16040 = vst [vmem:[#allocation49_spill] sm:$0xff] %v15127_v48  ;;  %v15129_v0 = vpop.f32.mrb[207].mxu0  ;;  %v15341_v48 = vld [vmem:[#allocation4 + $0x88] sm:$0xff] }
 0x678   : > { %16041 = vst [vmem:[#allocation50_spill] sm:$0xff] %v15129_v0  ;;  %v6809_v19 = vsel %vm5683_vm2, %v6797_v11, %v6808_v37  ;;  %v6825_v11 = vsel %vm5683_vm2, %v6813_v63, %v6824_v51  ;;  %v16053_v37 = vshrl.u32 %v14743_v55, 16 }
 0x67b   : > { %9811 = vmatmul.mubr.bf16.gmra.mrb[180].mxu1 %v14528_v32 }
 0x67c   : > { %9818 = vmatprep.mubr.bf16.mxu1 %v6793_v56  ;;  %v6816_v56 = vor.u32 %v16048_v61, %v6813_v63  ;;  %v16055_v61 = vshrl.u32 %v14781_v47, 16 }
 0x67e   : > { %v6817_v62 = vsel %vm5683_vm2, %v6805_v2, %v6816_v56  ;;  %v6845_v56 = vrot.slane %v16055_v61, 7  ;;  %v7043_v61 = vshrl.u32 %v6995_v24, 16 }
 0x683   : > { %9819 = vmatmul.mubr.bf16.gmra.mrb[184].mxu1 %v14551_v4 }
 0x684   : > { %9826 = vmatprep.mubr.bf16.mxu1 %v6801_v33  ;;  %v16051_v33 = vshrl.u32 %v14705_v45, 16  ;;  %v6994_v45 = vld [vmem:[#allocation4 + $0x18] sm:$0xff] }
 0x685   : > { %v7034_v51 = vshll.u32 %v6994_v45, 16 }
 0x686   : > { %v6829_v46 = vrot.slane %v16051_v33, 7  ;;  %v7039_v33 = vshll.u32 %v6995_v24, 16 }
 0x688   : > { %v6832_v35 = vor.u32 %v16052_v6, %v6829_v46  ;;  %v7036_v6 = vrot.slane %v7034_v51, 1  ;;  %v12555_v51 = vld [vmem:[%s15807_s2 + $0x188] sm:$0xff]  }
 0x68a   : > { %v6833_v2 = vsel %vm5683_vm2, %v6821_v52, %v6832_v35  ;;  %v6156_v52 = vld [vmem:[#allocation4 + $0x128] sm:$0x1]  ;;  %v7032_v35 = vshrl.u32 %v6994_v45, 16 }
 0x68b   : > { %9827 = vmatmul.mubr.bf16.gmra.mrb[188].mxu1 %v14574_v25 }
 0x68c   : > { %9834 = vmatprep.mubr.bf16.mxu1 %v6809_v19  ;;  %v6837_v19 = vrot.slane %v16053_v37, 7  ;;  %v15177_v37 = vld [vmem:[#allocation4 + $0x28] sm:$0xff] }
 0x68e   : > { %v6840_v14 = vor.u32 %v16054_v50, %v6837_v19  ;;  %v7037_v50 = vor.u32 %v7036_v6, %v7032_v35  ;;  %v12556_v6 = vld [vmem:[%s15807_s2 + $0x190] sm:$0xff]  }
 0x690   : > { %v6841_v63 = vsel %vm5683_vm2, %v6829_v46, %v6840_v14 }
 0x693   : > { %9835 = vmatmul.mubr.bf16.gmra.mrb[192].mxu1 %v14597_v5 }
 0x694   : > { %9842 = vmatprep.mubr.bf16.mxu1 %v6817_v62  ;;  %v16056_v62 = vshll.u32 %v14781_v47, 16 }
 0x696   : > { %v6848_v36 = vor.u32 %v16056_v62, %v6845_v56  ;;  %v12554_v56 = vld [vmem:[%s15807_s2 + $0x180] sm:$0xff]   ;;  %v15188_v62 = vld [vmem:[#allocation4 + $0x30] sm:$0xff] }
 0x698   : > { %v6849_v55 = vsel %vm5683_vm2, %v6837_v19, %v6848_v36 }
 0x69b   : > { %9843 = vmatmul.mubr.bf16.gmra.mrb[196].mxu1 %v14620_v18 }
 0x69c   : > { %9850 = vmatprep.mubr.bf16.mxu1 %v6825_v11  ;;  %v6445_v11 = vshll.u32 %v6156_v52, 16  ;;  %v15861_v52 = vshll.u32 %v15188_v62, 16 }
 0x69e   : > { %v6447_v46 = vrot.slane %v6445_v11, 1  ;;  %v15195_v11 = vld [vmem:[#allocation4] sm:$0xff] }
 0x6a0   : > { %v6448_v47 = vsel %vm956_vm0, %v14733_v17, %v6447_v46 }
 0x6a3   : > { %9851 = vmatmul.mubr.bf16.gmra.mrb[200].mxu1 %v14652_v13 }
 0x6a4   : > { %9858 = vmatprep.mubr.bf16.mxu1 %v6833_v2  ;;  %v7041_v2 = vrot.slane %v7039_v33, 1  ;;  %v7057_v33 = vrot.slane %v15861_v52, 1 }
 0x6a6   : > { %v7042_v14 = vsel %vm956_vm0, %v7037_v50, %v7041_v2  ;;  %v7045_v36 = vor.u32 %v7043_v61, %v7041_v2  ;;  %v12557_v50 = vld [vmem:[%s15807_s2 + $0x198] sm:$0xff]   ;;  %v15218_v61 = vld [vmem:[#allocation4 + $0x40] sm:$0xff] }
 0x6ab   : > { %9859 = vmatmul.mubr.bf16.gmra.mrb[204].mxu1 %v14694_v30 }
 0x6ac   : > { %9866 = vmatprep.mubr.bf16.mxu1 %v6841_v63  ;;  %v15867_v63 = vshll.u32 %v15177_v37, 16 }
 0x6ae   : > { %v7049_v19 = vrot.slane %v15867_v63, 1 }
 0x6b0   : > { %v7050_v17 = vsel %vm956_vm0, %v7045_v36, %v7049_v19  ;;  %v15852_v36 = vshll.u32 %v15218_v61, 16 }
 0x6b3   : > { %9867 = vmatmul.mubr.bf16.gmra.mrb[208].mxu1 %v14729_v8 }
 0x6b4   : > { %9874 = vmatprep.mubr.bf16.mxu1 %v6849_v55  ;;  %v15869_v55 = vshrl.u32 %v15177_v37, 16 }
 0x6b6   : > { %v7053_v46 = vor.u32 %v15869_v55, %v7049_v19 }
 0x6b8   : > { %v7058_v35 = vsel %vm956_vm0, %v7053_v46, %v7057_v33  ;;  %v12560_v46 = vld [vmem:[%s15807_s2 + $0x1b0] sm:$0xff]  }
 0x6bb   : > { %9875 = vmatmul.mubr.bf16.gmra.mrb[212].mxu1 %v6448_v47  ;;  %v15863_v47 = vshrl.u32 %v15188_v62, 16 }
 0x6bc   : > { %9915 = vmatprep.mubr.bf16.mxu1 %v7042_v14 }
 0x6bd   : > { %v7061_v19 = vor.u32 %v15863_v47, %v7057_v33  ;;  %v7073_v33 = vrot.slane %v15852_v36, 1 }
 0x6c3   : > { %9916 = vmatmul.mubr.bf16.vlgmr.msra.gmra.mrb[72].mxu1 %v6994_v45  ;;  %v15201_v45 = vld [vmem:[#allocation4 + $0x38] sm:$0xff] }
 0x6c4   : > { %9923 = vmatprep.mubr.bf16.mxu1 %v7050_v17  ;;  %10205 = vmatpush1.bf16.msra.mxu1 %v12554_v56  ;;  %v15855_v2 = vshll.u32 %v15201_v45, 16  ;;  %v12559_v17 = vld [vmem:[%s15807_s2 + $0x1a8] sm:$0xff]  }
 0x6c5   : > { %10206 = vmatprep.subr.bf16.mxu1 %v15195_v11 }
 0x6c6   : > { %v7065_v14 = vrot.slane %v15855_v2, 1 }
 0x6c8   : > { %10207 = vmatpush1.bf16.msra.mxu1 %v12555_v51  ;;  %v7066_v56 = vsel %vm956_vm0, %v7061_v19, %v7065_v14  ;;  %v15857_v51 = vshrl.u32 %v15201_v45, 16  ;;  %v12561_v19 = vld [vmem:[%s15807_s2 + $0x1b8] sm:$0xff]  }
 0x6c9   : > { %10208 = vmatprep.subr.bf16.mxu1 %v15195_v11 }
 0x6cb   : > { %9924 = vmatmul.mubr.bf16.gmra.mrb[76].mxu1 %v6995_v24  ;;  %v12558_v24 = vld [vmem:[%s15807_s2 + $0x1a0] sm:$0xff]  }
 0x6cc   : > { %9931 = vmatprep.mubr.bf16.mxu1 %v7058_v35  ;;  %10209 = vmatpush1.bf16.msra.mxu1 %v12556_v6  ;;  %v15236_v6 = vld [vmem:[#allocation4 + $0x48] sm:$0xff]  ;;  %v7069_v35 = vor.u32 %v15857_v51, %v7065_v14  ;;  %v15283_v51 = vld [vmem:[#allocation4 + $0x60] sm:$0xff] }
 0x6cd   : > { %10210 = vmatprep.subr.bf16.mxu1 %v15195_v11 }
 0x6d0   : > { %10211 = vmatpush1.bf16.msra.mxu1 %v12557_v50  ;;  %v7074_v50 = vsel %vm956_vm0, %v7069_v35, %v7073_v33  ;;  %v12562_v35 = vld [vmem:[%s15807_s2 + $0x1c0] sm:$0xff]  }
 0x6d1   : > { %10212 = vmatprep.subr.bf16.mxu1 %v15195_v11 }
 0x6d3   : > { %9932 = vmatmul.mubr.bf16.gmra.mrb[80].mxu1 %v15177_v37 }
 0x6d4   : > { %9939 = vmatprep.mubr.bf16.mxu1 %v7066_v56  ;;  %10213 = vmatpush1.bf16.msra.mxu1 %v12558_v24  ;;  %v15853_v24 = vshll.u32 %v15236_v6, 16  ;;  %v15854_v56 = vshrl.u32 %v15218_v61, 16 }
 0x6d5   : > { %10214 = vmatprep.subr.bf16.mxu1 %v15195_v11 }
 0x6d6   : > { %v7081_v14 = vrot.slane %v15853_v24, 1  ;;  %v15858_v24 = vshrl.u32 %v15236_v6, 16 }
 0x6d8   : > { %10215 = vmatpush1.bf16.msra.mxu1 %v12559_v17  ;;  %v15254_v17 = vld [vmem:[#allocation4 + $0x50] sm:$0xff] }
 0x6d9   : > { %10216 = vmatprep.subr.bf16.mxu1 %v15195_v11  ;;  %v15856_v36 = vshll.u32 %v15254_v17, 16  ;;  %v15860_v2 = vshrl.u32 %v15254_v17, 16 }
 0x6db   : > { %9940 = vmatmul.mubr.bf16.gmra.mrb[84].mxu1 %v15188_v62 }
 0x6dc   : > { %9947 = vmatprep.mubr.bf16.mxu1 %v7074_v50  ;;  %10217 = vmatpush1.bf16.msra.mxu1 %v12560_v46  ;;  %v7077_v46 = vor.u32 %v15854_v56, %v7073_v33  ;;  %v7089_v33 = vrot.slane %v15856_v36, 1  ;;  %v15272_v56 = vld [vmem:[#allocation4 + $0x58] sm:$0xff] }
 0x6dd   : > { %10218 = vmatprep.subr.bf16.mxu1 %v15195_v11 }
 0x6de   : > { %v7082_v50 = vsel %vm956_vm0, %v7077_v46, %v7081_v14  ;;  %v7085_v46 = vor.u32 %v15858_v24, %v7081_v14  ;;  %v15862_v24 = vshll.u32 %v15283_v51, 16 }
 0x6e0   : > { %10219 = vmatpush1.bf16.msra.mxu1 %v12561_v19  ;;  %v12563_v19 = vld [vmem:[%s15807_s2 + $0x1c8] sm:$0xff]  }
 0x6e1   : > { %10220 = vmatprep.subr.bf16.mxu1 %v15195_v11 }
 0x6e3   : > { %9948 = vmatmul.mubr.bf16.gmra.mrb[88].mxu1 %v15201_v45 }
 0x6e4   : > { %9955 = vmatprep.mubr.bf16.mxu1 %v7082_v50  ;;  %10221 = vmatpush1.bf16.msra.mxu1 %v12562_v35  ;;  %v7090_v35 = vsel %vm956_vm0, %v7085_v46, %v7089_v33  ;;  %v15859_v50 = vshll.u32 %v15272_v56, 16  ;;  %v12564_v46 = vld [vmem:[%s15807_s2 + $0x1d0] sm:$0xff]  }
 0x6e5   : > { %10222 = vmatprep.subr.bf16.mxu1 %v15195_v11 }
 0x6e6   : > { %v7097_v36 = vrot.slane %v15859_v50, 1  ;;  %v7105_v50 = vrot.slane %v15862_v24, 1  ;;  %v15307_v24 = vld [vmem:[#allocation4 + $0x70] sm:$0xff] }
 0x6e8   : > { %10223 = vmatpush1.bf16.msra.mxu1 %v12563_v19  ;;  %v7093_v19 = vor.u32 %v15860_v2, %v7089_v33  ;;  %v15297_v33 = vld [vmem:[#allocation4 + $0x68] sm:$0xff] }
 0x6e9   : > { %10224 = vmatprep.subr.bf16.mxu1 %v15195_v11  ;;  %v15865_v2 = vshll.u32 %v15297_v33, 16 }
 0x6ea   : > { %v7098_v14 = vsel %vm956_vm0, %v7093_v19, %v7097_v36 }
 0x6eb   : > { %9956 = vmatmul.mubr.bf16.gmra.mrb[92].mxu1 %v15218_v61  ;;  %v7113_v52 = vrot.slane %v15865_v2, 1 }
 0x6ec   : > { %9963 = vmatprep.mubr.bf16.mxu1 %v7090_v35  ;;  %10225 = vmatpush1.bf16.msra.mxu1 %v12564_v46  ;;  %v15864_v35 = vshrl.u32 %v15272_v56, 16  ;;  %v15866_v46 = vshrl.u32 %v15283_v51, 16 }
 0x6ed   : > { %10226 = vmatprep.subr.bf16.mxu1 %v15195_v11 }
 0x6ee   : > { %v7101_v19 = vor.u32 %v15864_v35, %v7097_v36  ;;  %v7109_v47 = vor.u32 %v15866_v46, %v7105_v50  ;;  %v15868_v35 = vshll.u32 %v15307_v24, 16 }
 0x6f0   : > { %v7114_v36 = vsel %vm956_vm0, %v7109_v47, %v7113_v52  ;;  %v7121_v2 = vrot.slane %v15868_v35, 1  ;;  %v15331_v35 = vld [vmem:[#allocation4 + $0x80] sm:$0xff] }
 0x6f3   : > { %9964 = vmatmul.mubr.bf16.gmra.mrb[96].mxu1 %v15236_v6 }
 0x6f4   : > { %9971 = vmatprep.mubr.bf16.mxu1 %v7098_v14  ;;  %v7106_v14 = vsel %vm956_vm0, %v7101_v19, %v7105_v50  ;;  %v12565_v19 = vld [vmem:[%s15807_s2 + $0x1d8] sm:$0xff]   ;;  %v15321_v50 = vld [vmem:[#allocation4 + $0x78] sm:$0xff] }
 0x6f5   : > { %10227 = vmatpush1.bf16.msra.mxu1 %v12565_v19  ;;  %v15871_v46 = vshll.u32 %v15321_v50, 16  ;;  %v15872_v19 = vshrl.u32 %v15307_v24, 16 }
 0x6f6   : > { %10228 = vmatprep.subr.bf16.mxu1 %v15195_v11 }
 0x6f7   : > { %v7129_v63 = vrot.slane %v15871_v46, 1  ;;  %v7125_v55 = vor.u32 %v15872_v19, %v7121_v2  ;;  %v15875_v19 = vshll.u32 %v15341_v48, 16 }
 0x6fb   : > { %9972 = vmatmul.mubr.bf16.gmra.mrb[100].mxu1 %v15254_v17 }
 0x6fc   : > { %9979 = vmatprep.mubr.bf16.mxu1 %v7106_v14  ;;  %v15870_v14 = vshrl.u32 %v15297_v33, 16 }
 0x6fe   : > { %v7117_v47 = vor.u32 %v15870_v14, %v7113_v52  ;;  %v7130_v52 = vsel %vm956_vm0, %v7125_v55, %v7129_v63  ;;  %v15873_v14 = vshll.u32 %v15331_v35, 16  ;;  %v12566_v55 = vld [vmem:[%s15807_s2 + $0x1e0] sm:$0xff]  }
 0x6ff   : > { %10229 = vmatpush1.bf16.msra.mxu1 %v12566_v55  ;;  %v7147_v55 = vshrl.u32 %v15341_v48, 16 }
 0x700   : > { %10230 = vmatprep.subr.bf16.mxu1 %v15195_v11 }
 0x703   : > { %9980 = vmatmul.mubr.bf16.gmra.mrb[104].mxu1 %v15272_v56 }
 0x704   : > { %9987 = vmatprep.mubr.bf16.mxu1 %v7114_v36  ;;  %v7122_v36 = vsel %vm956_vm0, %v7117_v47, %v7121_v2  ;;  %v15874_v47 = vshrl.u32 %v15321_v50, 16 }
 0x706   : > { %v7133_v46 = vor.u32 %v15874_v47, %v7129_v63  ;;  %v15355_v63 = vld [vmem:[#allocation4 + $0x90] sm:$0xff] }
 0x707   : > { %v15877_v47 = vshll.u32 %v15355_v63, 16 }
 0x709   : > { %v7153_v16 = vrot.slane %v15877_v47, 1 }
 0x70b   : > { %9988 = vmatmul.mubr.bf16.gmra.mrb[108].mxu1 %v15283_v51 }
 0x70c   : > { %9995 = vmatprep.mubr.bf16.mxu1 %v7122_v36  ;;  %v7137_v36 = vrot.slane %v15873_v14, 1  ;;  %v7145_v14 = vrot.slane %v15875_v19, 1  ;;  %v15365_v19 = vld [vmem:[#allocation4 + $0x98] sm:$0xff] }
 0x70e   : > { %v7138_v2 = vsel %vm956_vm0, %v7133_v46, %v7137_v36  ;;  %v7149_v0 = vor.u32 %v7147_v55, %v7145_v14 }
 0x713   : > { %9996 = vmatmul.mubr.bf16.gmra.mrb[112].mxu1 %v15297_v33 }
 0x714   : > { %10003 = vmatprep.mubr.bf16.mxu1 %v7130_v52  ;;  %v15876_v52 = vshrl.u32 %v15331_v35, 16 }
 0x716   : > { %v7141_v46 = vor.u32 %v15876_v52, %v7137_v36  ;;  %v7154_v36 = vsel %vm956_vm0, %v7149_v0, %v7153_v16  ;;  %v15878_v52 = vshll.u32 %v15365_v19, 16 }
 0x718   : > { %v7161_v47 = vrot.slane %v15878_v52, 1 }
 0x71b   : > { %10004 = vmatmul.mubr.bf16.gmra.mrb[116].mxu1 %v15307_v24 }
 0x71c   : > { %10011 = vmatprep.mubr.bf16.mxu1 %v7138_v2  ;;  %v7146_v2 = vsel %vm956_vm0, %v7141_v46, %v7145_v14  ;;  %v12567_v46 = vld [vmem:[%s15807_s2 + $0x1e8] sm:$0xff]  }
 0x71d   : > { %10231 = vmatpush1.bf16.msra.mxu1 %v12567_v46 }
 0x71e   : > { %10232 = vmatprep.subr.bf16.mxu1 %v15195_v11 }
 0x723   : > { %10012 = vmatmul.mubr.bf16.gmra.mrb[120].mxu1 %v15321_v50 }
 0x724   : > { %10019 = vmatprep.mubr.bf16.mxu1 %v7146_v2  ;;  %v7155_v2 = vshrl.u32 %v15355_v63, 16 }
 0x726   : > { %v7157_v14 = vor.u32 %v7155_v2, %v7153_v16  ;;  %v12568_v16 = vld [vmem:[%s15807_s2 + $0x1f0] sm:$0xff]  }
 0x727   : > { %10233 = vmatpush1.bf16.msra.mxu1 %v12568_v16  ;;  %v12598_v16 = vld [vmem:[#allocation4 + $0xb8] sm:$0xff] }
 0x728   : > { %v7162_v0 = vsel %vm956_vm0, %v7157_v14, %v7161_v47  ;;  %10234 = vmatprep.subr.bf16.mxu1 %v15195_v11  ;;  %v16057_v14 = vld [vmem:[#allocation7_spill] sm:$0xff]  ;;  %v15408_v11 = vld [vmem:[#allocation4 + $0xa8] sm:$0xff] }
 0x72b   : > { %10020 = vmatmul.mubr.bf16.gmra.mrb[124].mxu1 %v15331_v35 }
 0x72c   : > { %10027 = vmatprep.mubr.bf16.mxu1 %v7154_v36  ;;  %v7163_v36 = vshrl.u32 %v15365_v19, 16 }
 0x72e   : > { %v7165_v46 = vor.u32 %v7163_v36, %v7161_v47  ;;  %v16058_v47 = vld [vmem:[#allocation5_spill] sm:$0xff] }
 0x730   : > { %v7170_v52 = vsel %vm956_vm0, %v7165_v46, %v14317_v9  ;;  %v12569_v9 = vld [vmem:[%s15807_s2 + $0x1f8] sm:$0xff]  }
 0x731   : > { %10235 = vmatpush1.bf16.msra.mxu1 %v12569_v9  ;;  %v15412_v46 = vld [vmem:[#allocation4 + $0xb0] sm:$0xff] }
 0x732   : > { %v12601_v9 = vld [vmem:[#allocation4 + $0xd0] sm:$0xff] }
 0x733   : > { %10028 = vmatmul.mubr.bf16.gmra.mrb[128].mxu1 %v15341_v48 }
 0x734   : > { %10035 = vmatprep.mubr.bf16.mxu1 %v7162_v0  ;;  %v15395_v0 = vld [vmem:[#allocation4 + $0xa0] sm:$0xff] }
 0x73b   : > { %10036 = vmatmul.mubr.bf16.gmra.mrb[132].mxu1 %v15355_v63 }
 0x73c   : > { %10043 = vmatprep.mubr.bf16.mxu1 %v7170_v52  ;;  %v15405_v52 = vld [vmem:[%s15807_s2 + $0x200] sm:$0xff]  }
 0x73d   : > { %11462 = vmatprep.subr.bf16.mxu1 %v15405_v52 }
 0x743   : > { %10044 = vmatmul.mubr.bf16.gmra.mrb[136].mxu1 %v15365_v19 }
 0x744   : > { %10051 = vmatprep.mubr.bf16.mxu1 %v16057_v14  ;;  %v12599_v14 = vld [vmem:[#allocation4 + $0xc0] sm:$0xff] }
 0x74b   : > { %10052 = vmatmul.mubr.bf16.gmra.mrb[140].mxu1 %v15395_v0 }
 0x74c   : > { %10059 = vmatprep.mubr.bf16.mxu1 %v16058_v47  ;;  %v12600_v47 = vld [vmem:[#allocation4 + $0xc8] sm:$0xff] }
 0x753   : > { %10060 = vmatmul.mubr.bf16.gmra.mrb[144].mxu1 %v15408_v11 }
 0x754   : > { %10067 = vmatprep.mubr.bf16.mxu1 %v14390_v54  ;;  %v12602_v54 = vld [vmem:[#allocation4 + $0xd8] sm:$0xff] }
 0x75b   : > { %10068 = vmatmul.mubr.bf16.gmra.mrb[148].mxu1 %v15412_v46 }
 0x75c   : > { %10075 = vmatprep.mubr.bf16.mxu1 %v14413_v40  ;;  %v12603_v40 = vld [vmem:[#allocation4 + $0xe0] sm:$0xff] }
 0x763   : > { %10076 = vmatmul.mubr.bf16.gmra.mrb[152].mxu1 %v12598_v16  ;;  %v16059_v16 = vld [vmem:[#allocation11_spill] sm:$0xff] }
 0x764   : > { %10083 = vmatprep.mubr.bf16.mxu1 %v14436_v59  ;;  %v12604_v59 = vld [vmem:[#allocation4 + $0xe8] sm:$0xff] }
 0x76b   : > { %10084 = vmatmul.mubr.bf16.gmra.mrb[156].mxu1 %v12599_v14  ;;  %v12611_v14 = vld [vmem:[#allocation4 + $0x120] sm:$0xff] }
 0x76c   : > { %10091 = vmatprep.mubr.bf16.mxu1 %v14459_v12  ;;  %v12605_v12 = vld [vmem:[#allocation4 + $0xf0] sm:$0xff] }
 0x773   : > { %10092 = vmatmul.mubr.bf16.gmra.mrb[160].mxu1 %v12600_v47 }
 0x774   : > { %10099 = vmatprep.mubr.bf16.mxu1 %v14482_v10  ;;  %v12606_v10 = vld [vmem:[#allocation4 + $0xf8] sm:$0xff] }
 0x77b   : > { %10100 = vmatmul.mubr.bf16.gmra.mrb[164].mxu1 %v12601_v9  ;;  %v16060_v9 = vld [vmem:[#allocation16_spill] sm:$0xff] }
 0x77c   : > { %10107 = vmatprep.mubr.bf16.mxu1 %v14505_v27  ;;  %v12607_v27 = vld [vmem:[#allocation4 + $0x100] sm:$0xff] }
 0x783   : > { %10108 = vmatmul.mubr.bf16.gmra.mrb[168].mxu1 %v12602_v54  ;;  %v7395_v54 = vld [vmem:[#allocation4 + $0x20] sm:$0x80] }
 0x784   : > { %10115 = vmatprep.mubr.bf16.mxu1 %v14528_v32  ;;  %v12608_v32 = vld [vmem:[#allocation4 + $0x108] sm:$0xff] }
 0x78b   : > { %10116 = vmatmul.mubr.bf16.gmra.mrb[172].mxu1 %v12603_v40 }
 0x78c   : > { %10123 = vmatprep.mubr.bf16.mxu1 %v14551_v4  ;;  %v12609_v4 = vld [vmem:[#allocation4 + $0x110] sm:$0xff] }
 0x793   : > { %10124 = vmatmul.mubr.bf16.gmra.mrb[176].mxu1 %v12604_v59  ;;  %v12613_v59 = vld [vmem:[#allocation4 + $0x130] sm:$0xff] }
 0x794   : > { %10131 = vmatprep.mubr.bf16.mxu1 %v14574_v25  ;;  %v12610_v25 = vld [vmem:[#allocation4 + $0x118] sm:$0xff] }
 0x79b   : > { %10132 = vmatmul.mubr.bf16.gmra.mrb[180].mxu1 %v12605_v12  ;;  %v7433_v12 = vshrl.u32 %v7395_v54, 16 }
 0x79c   : > { %10139 = vmatprep.mubr.bf16.mxu1 %v14597_v5  ;;  %v7030_v5 = vld [vmem:[#allocation4 + $0x138] sm:$0x1] }
 0x7a3   : > { %10140 = vmatmul.mubr.bf16.gmra.mrb[184].mxu1 %v12606_v10  ;;  %v16062_v10 = vshll.u32 %v15177_v37, 16 }
 0x7a4   : > { %10147 = vmatprep.mubr.bf16.mxu1 %v14620_v18  ;;  %v7319_v18 = vshll.u32 %v7030_v5, 16  ;;  %v16064_v5 = vshll.u32 %v15188_v62, 16 }
 0x7a6   : > { %v7321_v47 = vrot.slane %v7319_v18, 1 }
 0x7ab   : > { %10148 = vmatmul.mubr.bf16.gmra.mrb[188].mxu1 %v12607_v27 }
 0x7ac   : > { %10155 = vmatprep.mubr.bf16.mxu1 %v14652_v13  ;;  %v12612_v13 = vld [vmem:[#allocation4 + $0x128] sm:$0xff] }
 0x7b3   : > { %10156 = vmatmul.mubr.bf16.gmra.mrb[192].mxu1 %v12608_v32 }
 0x7b4   : > { %10163 = vmatprep.mubr.bf16.mxu1 %v14694_v30  ;;  %v7322_v30 = vsel %vm956_vm0, %v16060_v9, %v7321_v47  ;;  %v16065_v47 = vshrl.u32 %v15201_v45, 16 }
 0x7bb   : > { %10164 = vmatmul.mubr.bf16.gmra.mrb[196].mxu1 %v12609_v4  ;;  %v16063_v4 = vshrl.u32 %v15188_v62, 16 }
 0x7bc   : > { %10171 = vmatprep.mubr.bf16.mxu1 %v14729_v8  ;;  %v16061_v8 = vshrl.u32 %v15177_v37, 16 }
 0x7be   : > { %v7439_v40 = vrot.slane %v16061_v8, 7  ;;  %v16067_v8 = vshrl.u32 %v15218_v61, 16 }
 0x7c0   : > { %v7442_v27 = vor.u32 %v7439_v40, %v16062_v10  ;;  %v12619_v10 = vld [vmem:[%s15807_s2 + $0x230] sm:$0xff]  }
 0x7c3   : > { %10172 = vmatmul.mubr.bf16.gmra.mrb[200].mxu1 %v12610_v25  ;;  %v7447_v25 = vrot.slane %v16063_v4, 7  ;;  %v16070_v4 = vshll.u32 %v15236_v6, 16 }
 0x7c4   : > { %10179 = vmatprep.mubr.bf16.mxu1 %v16059_v16  ;;  %v12614_v16 = vld [vmem:[%s15807_s2 + $0x208] sm:$0xff]  }
 0x7cb   : > { %10180 = vmatmul.mubr.bf16.gmra.mrb[204].mxu1 %v12611_v14  ;;  %v12615_v14 = vld [vmem:[%s15807_s2 + $0x210] sm:$0xff]  }
 0x7cc   : > { %10187 = vmatprep.mubr.bf16.mxu1 %v14803_v28  ;;  %v7435_v28 = vrot.slane %v7433_v12, 7 }
 0x7ce   : > { %v7443_v32 = vsel %vm5683_vm2, %v7435_v28, %v7442_v27  ;;  %v16069_v28 = vshrl.u32 %v15236_v6, 16 }
 0x7d3   : > { %10188 = vmatmul.mubr.bf16.gmra.mrb[208].mxu1 %v12612_v13  ;;  %v7455_v13 = vrot.slane %v16065_v47, 7 }
 0x7d4   : > { %10195 = vmatprep.mubr.bf16.mxu1 %v7322_v30  ;;  %v12617_v30 = vld [vmem:[%s15807_s2 + $0x220] sm:$0xff]  }
 0x7db   : > { %10196 = vmatmul.mubr.bf16.gmra.mrb[212].mxu1 %v12613_v59  ;;  %v16068_v59 = vshll.u32 %v15218_v61, 16 }
 0x7dc   : > { %10236 = vmatprep.mubr.bf16.mxu1 %v15177_v37  ;;  %v7450_v37 = vor.u32 %v7447_v25, %v16064_v5  ;;  %v16071_v5 = vshrl.u32 %v15254_v17, 16 }
 0x7de   : > { %v7451_v18 = vsel %vm5683_vm2, %v7439_v40, %v7450_v37  ;;  %v7463_v40 = vrot.slane %v16067_v8, 7  ;;  %v7479_v37 = vrot.slane %v16071_v5, 7 }
 0x7e0   : > { %v7466_v12 = vor.u32 %v7463_v40, %v16068_v59 }
 0x7e2   : > { %v7467_v27 = vsel %vm5683_vm2, %v7455_v13, %v7466_v12 }
 0x7e3   : > { %10237 = vmatmul.mubr.bf16.vlgmr.msra.gmra.mrb[72].mxu1 %v7443_v32  ;;  %v7471_v32 = vrot.slane %v16069_v28, 7 }
 0x7e4   : > { %10244 = vmatprep.mubr.bf16.mxu1 %v15188_v62  ;;  %11470 = vmatpush3.bf16.msra.mxu1 %v15405_v52  ;;  %v12616_v62 = vld [vmem:[%s15807_s2 + $0x218] sm:$0xff]   ;;  %v16066_v52 = vshll.u32 %v15201_v45, 16 }
 0x7e5   : > { %11463 = vmatprep.subr.bf16.mxu1 %v12614_v16 }
 0x7e6   : > { %v7458_v9 = vor.u32 %v7455_v13, %v16066_v52  ;;  %v16073_v13 = vshrl.u32 %v15272_v56, 16 }
 0x7e8   : > { %11471 = vmatpush3.bf16.msra.mxu1 %v12614_v16  ;;  %v7459_v54 = vsel %vm5683_vm2, %v7447_v25, %v7458_v9  ;;  %v7474_v25 = vor.u32 %v7471_v32, %v16070_v4  ;;  %v16081_v4 = vshrl.u32 %v15321_v50, 16 }
 0x7e9   : > { %11464 = vmatprep.subr.bf16.mxu1 %v12615_v14 }
 0x7ea   : > { %v7475_v16 = vsel %vm5683_vm2, %v7463_v40, %v7474_v25  ;;  %v7519_v25 = vrot.slane %v16081_v4, 7 }
 0x7eb   : > { %10245 = vmatmul.mubr.bf16.gmra.mrb[76].mxu1 %v7451_v18 }
 0x7ec   : > { %10252 = vmatprep.mubr.bf16.mxu1 %v15201_v45  ;;  %11472 = vmatpush3.bf16.msra.mxu1 %v12615_v14  ;;  %v12618_v45 = vld [vmem:[%s15807_s2 + $0x228] sm:$0xff]   ;;  %v16072_v14 = vshll.u32 %v15254_v17, 16 }
 0x7ed   : > { %11465 = vmatprep.subr.bf16.mxu1 %v12616_v62 }
 0x7ee   : > { %v7482_v18 = vor.u32 %v7479_v37, %v16072_v14 }
 0x7f0   : > { %11473 = vmatpush3.bf16.msra.mxu1 %v12616_v62  ;;  %v7483_v47 = vsel %vm5683_vm2, %v7471_v32, %v7482_v18  ;;  %v7487_v62 = vrot.slane %v16073_v13, 7  ;;  %v7535_v13 = vrot.slane %v7147_v55, 7  ;;  %v7551_v55 = vrot.slane %v7163_v36, 7 }
 0x7f1   : > { %11466 = vmatprep.subr.bf16.mxu1 %v12617_v30 }
 0x7f3   : > { %10253 = vmatmul.mubr.bf16.gmra.mrb[80].mxu1 %v7459_v54 }
 0x7f4   : > { %10260 = vmatprep.mubr.bf16.mxu1 %v15218_v61  ;;  %11474 = vmatpush3.bf16.msra.mxu1 %v12617_v30  ;;  %v12620_v61 = vld [vmem:[%s15807_s2 + $0x238] sm:$0xff]   ;;  %v16075_v30 = vshrl.u32 %v15283_v51, 16 }
 0x7f5   : > { %11467 = vmatprep.subr.bf16.mxu1 %v12618_v45 }
 0x7f6   : > { %v7495_v54 = vrot.slane %v16075_v30, 7 }
 0x7f8   : > { %11475 = vmatpush3.bf16.msra.mxu1 %v12618_v45  ;;  %v16077_v45 = vshrl.u32 %v15297_v33, 16 }
 0x7f9   : > { %11468 = vmatprep.subr.bf16.mxu1 %v12619_v10 }
 0x7fa   : > { %v7503_v59 = vrot.slane %v16077_v45, 7  ;;  %v7565_v45 = vshrl.u32 %v15408_v11, 16 }
 0x7fb   : > { %10261 = vmatmul.mubr.bf16.gmra.mrb[84].mxu1 %v7467_v27  ;;  %v16079_v27 = vshrl.u32 %v15307_v24, 16 }
 0x7fc   : > { %10268 = vmatprep.mubr.bf16.mxu1 %v15236_v6  ;;  %11476 = vmatpush3.bf16.msra.mxu1 %v12619_v10  ;;  %v16074_v6 = vshll.u32 %v15272_v56, 16 }
 0x7fd   : > { %11469 = vmatprep.subr.bf16.mxu1 %v12620_v61  ;;  %v7511_v28 = vrot.slane %v16079_v27, 7 }
 0x7fe   : > { %v7490_v52 = vor.u32 %v7487_v62, %v16074_v6 }
 0x800   : > { %11477 = vmatpush3.bf16.msra.mxu1 %v12620_v61  ;;  %v7491_v9 = vsel %vm5683_vm2, %v7479_v37, %v7490_v52  ;;  %v16083_v37 = vshrl.u32 %v15331_v35, 16  ;;  %v7543_v52 = vrot.slane %v7155_v2, 7 }
 0x802   : > { %v7527_v14 = vrot.slane %v16083_v37, 7 }
 0x803   : > { %10269 = vmatmul.mubr.bf16.gmra.mrb[88].mxu1 %v7475_v16 }
 0x804   : > { %10276 = vmatprep.mubr.bf16.mxu1 %v15254_v17  ;;  %v16076_v17 = vshll.u32 %v15283_v51, 16 }
 0x806   : > { %v7498_v8 = vor.u32 %v7495_v54, %v16076_v17  ;;  %v7557_v17 = vshrl.u32 %v15395_v0, 16 }
 0x808   : > { %v7499_v40 = vsel %vm5683_vm2, %v7487_v62, %v7498_v8  ;;  %v7559_v8 = vrot.slane %v7557_v17, 7 }
 0x80b   : > { %10277 = vmatmul.mubr.bf16.gmra.mrb[92].mxu1 %v7483_v47 }
 0x80c   : > { %10284 = vmatprep.mubr.bf16.mxu1 %v15272_v56  ;;  %v16078_v56 = vshll.u32 %v15297_v33, 16 }
 0x80e   : > { %v7506_v12 = vor.u32 %v7503_v59, %v16078_v56 }
 0x810   : > { %v7507_v10 = vsel %vm5683_vm2, %v7495_v54, %v7506_v12  ;;  %v7573_v12 = vshrl.u32 %v15412_v46, 16 }
 0x812   : > { %v7575_v27 = vrot.slane %v7573_v12, 7 }
 0x813   : > { %10285 = vmatmul.mubr.bf16.gmra.mrb[96].mxu1 %v7491_v9 }
 0x814   : > { %10292 = vmatprep.mubr.bf16.mxu1 %v15283_v51  ;;  %v16080_v51 = vshll.u32 %v15307_v24, 16 }
 0x816   : > { %v7514_v32 = vor.u32 %v7511_v28, %v16080_v51 }
 0x818   : > { %v7515_v61 = vsel %vm5683_vm2, %v7503_v59, %v7514_v32  ;;  %v7567_v59 = vrot.slane %v7565_v45, 7 }
 0x81b   : > { %10293 = vmatmul.mubr.bf16.gmra.mrb[100].mxu1 %v7499_v40 }
 0x81c   : > { %10300 = vmatprep.mubr.bf16.mxu1 %v15297_v33  ;;  %v16082_v33 = vshll.u32 %v15321_v50, 16 }
 0x81e   : > { %v7522_v16 = vor.u32 %v7519_v25, %v16082_v33 }
 0x820   : > { %v7523_v5 = vsel %vm5683_vm2, %v7511_v28, %v7522_v16  ;;  %v7814_v28 = vld [vmem:[#allocation4 + $0xb8] sm:$0xff] }
 0x821   : > { %v7581_v32 = vshrl.u32 %v7814_v28, 16 }
 0x823   : > { %10301 = vmatmul.mubr.bf16.gmra.mrb[104].mxu1 %v7507_v10  ;;  %v7583_v4 = vrot.slane %v7581_v32, 7 }
 0x824   : > { %10308 = vmatprep.mubr.bf16.mxu1 %v15307_v24  ;;  %v16084_v24 = vshll.u32 %v15331_v35, 16 }
 0x826   : > { %v7530_v18 = vor.u32 %v7527_v14, %v16084_v24 }
 0x828   : > { %v7531_v47 = vsel %vm5683_vm2, %v7519_v25, %v7530_v18  ;;  %v7815_v25 = vld [vmem:[#allocation4 + $0xc0] sm:$0xff] }
 0x829   : > { %v7589_v16 = vshrl.u32 %v7815_v25, 16  ;;  %v7592_v24 = vshll.u32 %v7815_v25, 16 }
 0x82b   : > { %10309 = vmatmul.mubr.bf16.gmra.mrb[108].mxu1 %v7515_v61  ;;  %v7591_v37 = vrot.slane %v7589_v16, 7 }
 0x82c   : > { %10316 = vmatprep.mubr.bf16.mxu1 %v15321_v50  ;;  %v16085_v50 = vshll.u32 %v15341_v48, 16 }
 0x82d   : > { %v7594_v18 = vor.u32 %v7592_v24, %v7591_v37  ;;  %v7823_v24 = vld [vmem:[#allocation4 + $0x100] sm:$0xff] }
 0x82e   : > { %v7538_v62 = vor.u32 %v7535_v13, %v16085_v50  ;;  %v7817_v50 = vld [vmem:[#allocation4 + $0xd0] sm:$0xff] }
 0x830   : > { %v7539_v6 = vsel %vm5683_vm2, %v7527_v14, %v7538_v62  ;;  %v7816_v14 = vld [vmem:[#allocation4 + $0xc8] sm:$0xff] }
 0x831   : > { %v7600_v62 = vshll.u32 %v7816_v14, 16 }
 0x833   : > { %10317 = vmatmul.mubr.bf16.gmra.mrb[112].mxu1 %v7523_v5 }
 0x834   : > { %10324 = vmatprep.mubr.bf16.mxu1 %v15331_v35  ;;  %v16086_v35 = vshll.u32 %v15355_v63, 16 }
 0x836   : > { %v7546_v9 = vor.u32 %v7543_v52, %v16086_v35 }
 0x838   : > { %v7547_v30 = vsel %vm5683_vm2, %v7535_v13, %v7546_v9 }
 0x83b   : > { %10325 = vmatmul.mubr.bf16.gmra.mrb[116].mxu1 %v7531_v47  ;;  %v7595_v47 = vsel %vm5683_vm2, %v7583_v4, %v7594_v18 }
 0x83c   : > { %10332 = vmatprep.mubr.bf16.mxu1 %v15341_v48  ;;  %v16087_v48 = vshll.u32 %v15365_v19, 16 }
 0x83e   : > { %v7554_v54 = vor.u32 %v7551_v55, %v16087_v48 }
 0x840   : > { %v7555_v2 = vsel %vm5683_vm2, %v7543_v52, %v7554_v54  ;;  %v7605_v52 = vshrl.u32 %v7817_v50, 16 }
 0x842   : > { %v7607_v9 = vrot.slane %v7605_v52, 7  ;;  %v7656_v52 = vshll.u32 %v7823_v24, 16 }
 0x843   : > { %10333 = vmatmul.mubr.bf16.gmra.mrb[120].mxu1 %v7539_v6 }
 0x844   : > { %10340 = vmatprep.mubr.bf16.mxu1 %v15355_v63  ;;  %v7560_v63 = vshll.u32 %v15395_v0, 16 }
 0x846   : > { %v7562_v40 = vor.u32 %v7560_v63, %v7559_v8 }
 0x848   : > { %v7563_v36 = vsel %vm5683_vm2, %v7551_v55, %v7562_v40  ;;  %v7608_v55 = vshll.u32 %v7817_v50, 16 }
 0x84a   : > { %v7610_v48 = vor.u32 %v7608_v55, %v7607_v9 }
 0x84b   : > { %10341 = vmatmul.mubr.bf16.gmra.mrb[124].mxu1 %v7547_v30  ;;  %v7818_v30 = vld [vmem:[#allocation4 + $0xd8] sm:$0xff] }
 0x84c   : > { %10348 = vmatprep.mubr.bf16.mxu1 %v15365_v19  ;;  %v7568_v19 = vshll.u32 %v15408_v11, 16  ;;  %v7613_v54 = vshrl.u32 %v7818_v30, 16  ;;  %v7616_v63 = vshll.u32 %v7818_v30, 16 }
 0x84e   : > { %v7570_v56 = vor.u32 %v7568_v19, %v7567_v59  ;;  %v7820_v19 = vld [vmem:[#allocation4 + $0xe8] sm:$0xff] }
 0x850   : > { %v7571_v10 = vsel %vm5683_vm2, %v7559_v8, %v7570_v56  ;;  %v7819_v8 = vld [vmem:[#allocation4 + $0xe0] sm:$0xff] }
 0x851   : > { %v7621_v45 = vshrl.u32 %v7819_v8, 16  ;;  %v7624_v56 = vshll.u32 %v7819_v8, 16 }
 0x853   : > { %10349 = vmatmul.mubr.bf16.gmra.mrb[128].mxu1 %v7555_v2  ;;  %v7615_v2 = vrot.slane %v7613_v54, 7 }
 0x854   : > { %10356 = vmatprep.mubr.bf16.mxu1 %v15395_v0  ;;  %v7576_v0 = vshll.u32 %v15412_v46, 16 }
 0x855   : > { %v7618_v40 = vor.u32 %v7616_v63, %v7615_v2 }
 0x856   : > { %v7578_v51 = vor.u32 %v7576_v0, %v7575_v27  ;;  %v7821_v0 = vld [vmem:[#allocation4 + $0xf0] sm:$0xff] }
 0x858   : > { %v7579_v61 = vsel %vm5683_vm2, %v7567_v59, %v7578_v51  ;;  %v7623_v59 = vrot.slane %v7621_v45, 7  ;;  %v7632_v51 = vshll.u32 %v7820_v19, 16 }
 0x85a   : > { %v7626_v12 = vor.u32 %v7624_v56, %v7623_v59 }
 0x85b   : > { %10357 = vmatmul.mubr.bf16.gmra.mrb[132].mxu1 %v7563_v36  ;;  %v7619_v36 = vsel %vm5683_vm2, %v7607_v9, %v7618_v40  ;;  %v8738_v9 = vld [vmem:[%s12686_s25 + $0x29] sm:$0xff] }
 0x85c   : > { %10364 = vmatprep.mubr.bf16.mxu1 %v15408_v11  ;;  %v7584_v11 = vshll.u32 %v7814_v28, 16 }
 0x85e   : > { %v7586_v33 = vor.u32 %v7584_v11, %v7583_v4  ;;  %v7822_v11 = vld [vmem:[#allocation4 + $0xf8] sm:$0xff] }
 0x85f   : > { %v7648_v18 = vshll.u32 %v7822_v11, 16 }
 0x860   : > { %v7587_v5 = vsel %vm5683_vm2, %v7575_v27, %v7586_v33  ;;  %v7627_v27 = vsel %vm5683_vm2, %v7615_v2, %v7626_v12  ;;  %v7640_v33 = vshll.u32 %v7821_v0, 16  ;;  %v16088_v2 = vld [vmem:[#allocation9_spill] sm:$0xff] }
 0x861   : > { %v7825_v12 = vld [vmem:[#allocation4 + $0x110] sm:$0xff] }
 0x863   : > { %10365 = vmatmul.mubr.bf16.gmra.mrb[136].mxu1 %v7571_v10  ;;  %v7629_v10 = vshrl.u32 %v7820_v19, 16 }
 0x864   : > { %10372 = vmatprep.mubr.bf16.mxu1 %v15412_v46  ;;  %v7597_v46 = vshrl.u32 %v7816_v14, 16 }
 0x866   : > { %v7599_v13 = vrot.slane %v7597_v46, 7 }
 0x868   : > { %v7602_v6 = vor.u32 %v7600_v62, %v7599_v13  ;;  %v7611_v17 = vsel %vm5683_vm2, %v7599_v13, %v7610_v48  ;;  %v7824_v62 = vld [vmem:[#allocation4 + $0x108] sm:$0xff] }
 0x869   : > { %v7661_v55 = vshrl.u32 %v7824_v62, 16 }
 0x86a   : > { %v7603_v35 = vsel %vm5683_vm2, %v7591_v37, %v7602_v6  ;;  %v8737_v6 = vld [vmem:[%s12686_s25 + $0x21] sm:$0xff] }
 0x86b   : > { %10373 = vmatmul.mubr.bf16.gmra.mrb[140].mxu1 %v7579_v61  ;;  %v7637_v61 = vshrl.u32 %v7821_v0, 16 }
 0x86c   : > { %10380 = vmatprep.mubr.bf16.mxu1 %v7814_v28  ;;  %v7631_v28 = vrot.slane %v7629_v10, 7  ;;  %v8739_v10 = vld [vmem:[%s12686_s25 + $0x31] sm:$0xff] }
 0x86e   : > { %v7634_v32 = vor.u32 %v7632_v51, %v7631_v28  ;;  %v8740_v51 = vld [vmem:[%s12686_s25 + $0x39] sm:$0xff] }
 0x870   : > { %v7635_v4 = vsel %vm5683_vm2, %v7623_v59, %v7634_v32 }
 0x873   : > { %10381 = vmatmul.mubr.bf16.gmra.mrb[144].mxu1 %v7587_v5  ;;  %v7645_v5 = vshrl.u32 %v7822_v11, 16 }
 0x874   : > { %10388 = vmatprep.mubr.bf16.mxu1 %v7815_v25  ;;  %v7639_v25 = vrot.slane %v7637_v61, 7  ;;  %v7669_v61 = vshrl.u32 %v7825_v12, 16 }
 0x876   : > { %v7642_v16 = vor.u32 %v7640_v33, %v7639_v25  ;;  %v16090_v33 = vld [vmem:[#allocation6_spill] sm:$0xff] }
 0x878   : > { %v7643_v37 = vsel %vm5683_vm2, %v7631_v28, %v7642_v16 }
 0x87b   : > { %10389 = vmatmul.mubr.bf16.gmra.mrb[148].mxu1 %v7595_v47  ;;  %v7653_v47 = vshrl.u32 %v7823_v24, 16 }
 0x87c   : > { %10396 = vmatprep.mubr.bf16.mxu1 %v7816_v14  ;;  %v7647_v14 = vrot.slane %v7645_v5, 7 }
 0x87e   : > { %v7650_v46 = vor.u32 %v7648_v18, %v7647_v14 }
 0x880   : > { %v7651_v13 = vsel %vm5683_vm2, %v7639_v25, %v7650_v46  ;;  %v16091_v46 = vld [vmem:[#allocation8_spill] sm:$0xff] }
 0x883   : > { %10397 = vmatmul.mubr.bf16.gmra.mrb[152].mxu1 %v7603_v35 }
 0x884   : > { %10404 = vmatprep.mubr.bf16.mxu1 %v7817_v50  ;;  %v7655_v50 = vrot.slane %v7653_v47, 7 }
 0x88b   : > { %10405 = vmatmul.mubr.bf16.gmra.mrb[156].mxu1 %v7611_v17 }
 0x88c   : > { %10412 = vmatprep.mubr.bf16.mxu1 %v7818_v30  ;;  %v7658_v30 = vor.u32 %v7656_v52, %v7655_v50 }
 0x88e   : > { %v7659_v45 = vsel %vm5683_vm2, %v7647_v14, %v7658_v30 }
 0x893   : > { %10413 = vmatmul.mubr.bf16.gmra.mrb[160].mxu1 %v7619_v36  ;;  %v7663_v36 = vrot.slane %v7661_v55, 7 }
 0x894   : > { %10420 = vmatprep.mubr.bf16.mxu1 %v7819_v8 }
 0x89b   : > { %10421 = vmatmul.mubr.bf16.gmra.mrb[164].mxu1 %v7627_v27  ;;  %v7664_v27 = vshll.u32 %v7824_v62, 16 }
 0x89c   : > { %10428 = vmatprep.mubr.bf16.mxu1 %v7820_v19  ;;  %v16089_v19 = vld [vmem:[#allocation10_spill] sm:$0xff] }
 0x89d   : > { %v7666_v32 = vor.u32 %v7664_v27, %v7663_v36 }
 0x89f   : > { %v7667_v14 = vsel %vm5683_vm2, %v7655_v50, %v7666_v32 }
 0x8a3   : > { %10429 = vmatmul.mubr.bf16.gmra.mrb[168].mxu1 %v7635_v4 }
 0x8a4   : > { %10436 = vmatprep.mubr.bf16.mxu1 %v7821_v0 }
 0x8ab   : > { %10437 = vmatmul.mubr.bf16.gmra.mrb[172].mxu1 %v7643_v37 }
 0x8ac   : > { %10444 = vmatprep.mubr.bf16.mxu1 %v7822_v11 }
 0x8b3   : > { %10445 = vmatmul.mubr.bf16.gmra.mrb[176].mxu1 %v7651_v13  ;;  %v7826_v13 = vld [vmem:[#allocation4 + $0x118] sm:$0xff] }
 0x8b4   : > { %10452 = vmatprep.mubr.bf16.mxu1 %v7823_v24  ;;  %v7671_v24 = vrot.slane %v7669_v61, 7  ;;  %v7677_v55 = vshrl.u32 %v7826_v13, 16  ;;  %v7680_v27 = vshll.u32 %v7826_v13, 16 }
 0x8b6   : > { %v10238_v35 = vpop.f32.mrb[72].mxu1 }
 0x8b7   : > { %v11478_v48 = vadd.f32 %v10238_v35, %v8737_v6  ;;  %v10240_v54 = vpop.f32.mrb[73].mxu1  ;;  %v7672_v6 = vshll.u32 %v7825_v12, 16 }
 0x8b8   : > { %v10241_v17 = vpop.f32.mrb[74].mxu1 }
 0x8b9   : > { %v10560_v8 = vadd.f32 %v11478_v48, %v16088_v2  ;;  %v11479_v63 = vadd.f32 %v10241_v17, %v8738_v9  ;;  %v10243_v40 = vpop.f32.mrb[75].mxu1  ;;  %v8742_v9 = vld [vmem:[%s12686_s25 + $0x49] sm:$0xff]  ;;  %v7674_v30 = vor.u32 %v7672_v6, %v7671_v24 }
 0x8ba   : > { %v16092_v17 = vld [vmem:[#allocation15_spill] sm:$0xff] }
 0x8bb   : > { %v10846_v59 = vmax.f32 %v10560_v8, 0.0  ;;  %v10563_v56 = vadd.f32 %v11479_v63, %v16089_v19  ;;  %10453 = vmatmul.mubr.bf16.gmra.mrb[180].mxu1 %v7659_v45  ;;  %v7675_v40 = vsel %vm5683_vm2, %v7663_v36, %v7674_v30  ;;  %v7679_v45 = vrot.slane %v7677_v55, 7  ;;  %v16093_v19 = vld [vmem:[#allocation14_spill] sm:$0xff] }
 0x8bc   : > { %10460 = vmatprep.mubr.bf16.mxu1 %v7824_v62  ;;  %v8741_v62 = vld [vmem:[%s12686_s25 + $0x41] sm:$0xff] }
 0x8bd   : > { %10918 = vst [vmem:[%s15572_s10] sm:$0xff] %v10846_v59  ;;  %v10847_v28 = vmax.f32 %v10563_v56, 0.0  ;;  %v7682_v32 = vor.u32 %v7680_v27, %v7679_v45 }
 0x8be   : > { %v10246_v0 = vpop.f32.mrb[76].mxu1 }
 0x8bf   : > { %10919 = vst [vmem:[%s15572_s10 + $0x8] sm:$0xff] %v10847_v28  ;;  %v11480_v4 = vadd.f32 %v10246_v0, %v8739_v10  ;;  %v10248_v25 = vpop.f32.mrb[77].mxu1  ;;  %v8743_v10 = vld [vmem:[%s12686_s25 + $0x51] sm:$0xff] }
 0x8c0   : > { %v10249_v11 = vpop.f32.mrb[78].mxu1 }
 0x8c1   : > { %v10568_v16 = vadd.f32 %v11480_v4, %v16090_v33  ;;  %v11481_v5 = vadd.f32 %v10249_v11, %v8740_v51  ;;  %v10251_v37 = vpop.f32.mrb[79].mxu1  ;;  %v8744_v51 = vld [vmem:[%s12686_s25 + $0x59] sm:$0xff]  ;;  %v16094_v11 = vld [vmem:[#allocation12_spill] sm:$0xff] }
 0x8c2   : > { %v7683_v37 = vsel %vm5683_vm2, %v7671_v24, %v7682_v32 }
 0x8c3   : > { %v10848_v18 = vmax.f32 %v10568_v16, 0.0  ;;  %v10571_v47 = vadd.f32 %v11481_v5, %v16091_v46  ;;  %10461 = vmatmul.mubr.bf16.gmra.mrb[184].mxu1 %v7667_v14  ;;  %v16095_v46 = vld [vmem:[#allocation13_spill] sm:$0xff] }
 0x8c4   : > { %10468 = vmatprep.mubr.bf16.mxu1 %v7825_v12  ;;  %v7827_v12 = vld [vmem:[#allocation4 + $0x120] sm:$0xff] }
 0x8c5   : > { %10920 = vst [vmem:[%s15572_s10 + $0x10] sm:$0xff] %v10848_v18  ;;  %v10849_v52 = vmax.f32 %v10571_v47, 0.0  ;;  %v7685_v61 = vshrl.u32 %v7827_v12, 16  ;;  %v7688_v6 = vshll.u32 %v7827_v12, 16 }
 0x8c6   : > { %v10254_v35 = vpop.f32.mrb[80].mxu1 }
 0x8c7   : > { %10921 = vst [vmem:[%s15572_s10 + $0x18] sm:$0xff] %v10849_v52  ;;  %v11482_v48 = vadd.f32 %v10254_v35, %v8741_v62  ;;  %v10256_v50 = vpop.f32.mrb[81].mxu1  ;;  %v7687_v14 = vrot.slane %v7685_v61, 7  ;;  %v8745_v62 = vld [vmem:[%s12686_s25 + $0x61] sm:$0xff] }
 0x8c8   : > { %v10257_v54 = vpop.f32.mrb[82].mxu1 }
 0x8c9   : > { %v10576_v2 = vadd.f32 %v11482_v48, %v16092_v17  ;;  %v11483_v8 = vadd.f32 %v10257_v54, %v8742_v9  ;;  %v10259_v63 = vpop.f32.mrb[83].mxu1  ;;  %v8746_v9 = vld [vmem:[%s12686_s25 + $0x69] sm:$0xff]  ;;  %v7690_v30 = vor.u32 %v7688_v6, %v7687_v14 }
 0x8ca   : > { %v16096_v54 = vld [vmem:[#allocation20_spill] sm:$0xff] }
 0x8cb   : > { %v10850_v59 = vmax.f32 %v10576_v2, 0.0  ;;  %v10579_v56 = vadd.f32 %v11483_v8, %v16093_v19  ;;  %10469 = vmatmul.mubr.bf16.gmra.mrb[188].mxu1 %v7675_v40  ;;  %v7691_v63 = vsel %vm5683_vm2, %v7679_v45, %v7690_v30  ;;  %v16097_v19 = vld [vmem:[#allocation19_spill] sm:$0xff] }
 0x8cc   : > { %10476 = vmatprep.mubr.bf16.mxu1 %v7826_v13  ;;  %v7828_v13 = vld [vmem:[#allocation4 + $0x128] sm:$0xff]  ;;  %v12621_v30 = vld [vmem:[#allocation4] sm:$0xff] }
 0x8cd   : > { %10922 = vst [vmem:[%s15572_s10 + $0x20] sm:$0xff] %v10850_v59  ;;  %v10851_v28 = vmax.f32 %v10579_v56, 0.0  ;;  %v7693_v55 = vshrl.u32 %v7828_v13, 16  ;;  %v7696_v27 = vshll.u32 %v7828_v13, 16 }
 0x8ce   : > { %v10262_v0 = vpop.f32.mrb[84].mxu1 }
 0x8cf   : > { %10923 = vst [vmem:[%s15572_s10 + $0x28] sm:$0xff] %v10851_v28  ;;  %v11484_v4 = vadd.f32 %v10262_v0, %v8743_v10  ;;  %v10264_v36 = vpop.f32.mrb[85].mxu1  ;;  %v7695_v40 = vrot.slane %v7693_v55, 7  ;;  %v8747_v10 = vld [vmem:[%s12686_s25 + $0x71] sm:$0xff] }
 0x8d0   : > { %v10265_v25 = vpop.f32.mrb[86].mxu1 }
 0x8d1   : > { %v10584_v33 = vadd.f32 %v11484_v4, %v16094_v11  ;;  %v11485_v16 = vadd.f32 %v10265_v25, %v8744_v51  ;;  %v10267_v5 = vpop.f32.mrb[87].mxu1  ;;  %v8748_v51 = vld [vmem:[%s12686_s25 + $0x79] sm:$0xff]  ;;  %v7698_v32 = vor.u32 %v7696_v27, %v7695_v40  ;;  %v8751_v27 = vld [vmem:[%s12686_s25 + $0x91] sm:$0xff] }
 0x8d2   : > { %v16098_v25 = vld [vmem:[#allocation17_spill] sm:$0xff] }
 0x8d3   : > { %v10852_v18 = vmax.f32 %v10584_v33, 0.0  ;;  %v10587_v47 = vadd.f32 %v11485_v16, %v16095_v46  ;;  %10477 = vmatmul.mubr.bf16.gmra.mrb[192].mxu1 %v7683_v37  ;;  %v7699_v5 = vsel %vm5683_vm2, %v7687_v14, %v7698_v32  ;;  %v16099_v46 = vld [vmem:[#allocation18_spill] sm:$0xff]  ;;  %v7709_v14 = vshrl.u32 %v12621_v30, 16 }
 0x8d4   : > { %10484 = vmatprep.mubr.bf16.mxu1 %v7827_v12  ;;  %v15604_v12 = vld [vmem:[#allocation4 + $0x130] sm:$0xff] }
 0x8d5   : > { %10924 = vst [vmem:[%s15572_s10 + $0x30] sm:$0xff] %v10852_v18  ;;  %v10853_v52 = vmax.f32 %v10587_v47, 0.0  ;;  %v7701_v61 = vshrl.u32 %v15604_v12, 16 }
 0x8d6   : > { %v10270_v35 = vpop.f32.mrb[88].mxu1 }
 0x8d7   : > { %10925 = vst [vmem:[%s15572_s10 + $0x38] sm:$0xff] %v10853_v52  ;;  %v11486_v48 = vadd.f32 %v10270_v35, %v8745_v62  ;;  %v10272_v24 = vpop.f32.mrb[89].mxu1  ;;  %v7703_v37 = vrot.slane %v7701_v61, 7  ;;  %v7704_v62 = vshll.u32 %v15604_v12, 16  ;;  %v8750_v35 = vld [vmem:[%s12686_s25 + $0x89] sm:$0xff] }
 0x8d8   : > { %v10273_v50 = vpop.f32.mrb[90].mxu1 }
 0x8d9   : > { %v10592_v17 = vadd.f32 %v11486_v48, %v16096_v54  ;;  %v11487_v2 = vadd.f32 %v10273_v50, %v8746_v9  ;;  %v10275_v8 = vpop.f32.mrb[91].mxu1  ;;  %v7706_v9 = vor.u32 %v7704_v62, %v7703_v37  ;;  %v16100_v50 = vld [vmem:[#allocation23_spill] sm:$0xff] }
 0x8db   : > { %v10854_v59 = vmax.f32 %v10592_v17, 0.0  ;;  %v10595_v56 = vadd.f32 %v11487_v2, %v16097_v19  ;;  %10485 = vmatmul.mubr.bf16.gmra.mrb[196].mxu1 %v7691_v63  ;;  %v7707_v8 = vsel %vm5683_vm2, %v7695_v40, %v7706_v9  ;;  %v7711_v63 = vrot.slane %v7709_v14, 7 }
 0x8dc   : > { %10492 = vmatprep.mubr.bf16.mxu1 %v7828_v13  ;;  %v8749_v13 = vld [vmem:[%s12686_s25 + $0x81] sm:$0xff] }
 0x8dd   : > { %10926 = vst [vmem:[%s15572_s10 + $0x40] sm:$0xff] %v10854_v59  ;;  %v10855_v28 = vmax.f32 %v10595_v56, 0.0  ;;  %v7712_v59 = vshll.u32 %v12621_v30, 16  ;;  %v16101_v56 = vld [vmem:[#allocation25_spill] sm:$0xff] }
 0x8de   : > { %v10278_v0 = vpop.f32.mrb[92].mxu1 }
 0x8df   : > { %10927 = vst [vmem:[%s15572_s10 + $0x48] sm:$0xff] %v10855_v28  ;;  %v11488_v45 = vadd.f32 %v10278_v0, %v8747_v10  ;;  %v10280_v4 = vpop.f32.mrb[93].mxu1  ;;  %v7714_v32 = vor.u32 %v7712_v59, %v7711_v63 }
 0x8e0   : > { %v10281_v36 = vpop.f32.mrb[94].mxu1 }
 0x8e1   : > { %v10600_v11 = vadd.f32 %v11488_v45, %v16098_v25  ;;  %v11489_v33 = vadd.f32 %v10281_v36, %v8748_v51  ;;  %v10283_v16 = vpop.f32.mrb[95].mxu1  ;;  %v8752_v51 = vld [vmem:[%s12686_s25 + $0x99] sm:$0xff] }
 0x8e2   : > { %v16102_v36 = vld [vmem:[#allocation22_spill] sm:$0xff]  ;;  %v7715_v16 = vsel %vm5683_vm2, %v7703_v37, %v7714_v32  ;;  %v16104_v37 = vld [vmem:[#allocation27_spill] sm:$0xff] }
 0x8e3   : > { %v10856_v18 = vmax.f32 %v10600_v11, 0.0  ;;  %v10603_v47 = vadd.f32 %v11489_v33, %v16099_v46  ;;  %10493 = vmatmul.mubr.bf16.gmra.mrb[200].mxu1 %v7699_v5 }
 0x8e4   : > { %10500 = vmatprep.mubr.bf16.mxu1 %v15604_v12 }
 0x8e5   : > { %10928 = vst [vmem:[%s15572_s10 + $0x50] sm:$0xff] %v10856_v18  ;;  %v10857_v6 = vmax.f32 %v10603_v47, 0.0  ;;  %v16103_v18 = vld [vmem:[#allocation24_spill] sm:$0xff]  ;;  %v8753_v47 = vld [vmem:[%s12686_s25 + $0xa1] sm:$0xff] }
 0x8e6   : > { %v10286_v52 = vpop.f32.mrb[96].mxu1 }
 0x8e7   : > { %10929 = vst [vmem:[%s15572_s10 + $0x58] sm:$0xff] %v10857_v6  ;;  %v11490_v55 = vadd.f32 %v10286_v52, %v8749_v13  ;;  %v10288_v48 = vpop.f32.mrb[97].mxu1  ;;  %v8754_v52 = vld [vmem:[%s12686_s25 + $0xa9] sm:$0xff] }
 0x8e8   : > { %v10289_v24 = vpop.f32.mrb[98].mxu1 }
 0x8e9   : > { %v10608_v54 = vadd.f32 %v11490_v55, %v16100_v50  ;;  %v11491_v17 = vadd.f32 %v10289_v24, %v8750_v35  ;;  %v10291_v2 = vpop.f32.mrb[99].mxu1  ;;  %v8171_v55 = vrot.slane %v7704_v62, 1  ;;  %v7723_v24 = vsel %vm5683_vm2, %v7711_v63, %v7714_v32  ;;  %v7904_v63 = vld [vmem:[#allocation4 + $0x148] sm:$0x1]  ;;  %v8756_v32 = vld [vmem:[%s12686_s25 + $0xb9] sm:$0xff] }
 0x8ea   : > { %v16105_v2 = vld [vmem:[#allocation29_spill] sm:$0xff] }
 0x8eb   : > { %v10858_v19 = vmax.f32 %v10608_v54, 0.0  ;;  %v10611_v10 = vadd.f32 %v11491_v17, %v16101_v56  ;;  %10501 = vmatmul.mubr.bf16.gmra.mrb[204].mxu1 %v7707_v8 }
 0x8ec   : > { %10508 = vmatprep.mubr.bf16.mxu1 %v12621_v30 }
 0x8ed   : > { %10930 = vst [vmem:[%s15572_s10 + $0x60] sm:$0xff] %v10858_v19  ;;  %v10859_v28 = vmax.f32 %v10611_v10, 0.0  ;;  %v16106_v19 = vld [vmem:[#allocation21_spill] sm:$0xff]  ;;  %v8179_v10 = vrot.slane %v7712_v59, 1  ;;  %v16107_v59 = vld [vmem:[#allocation26_spill] sm:$0xff] }
 0x8ee   : > { %v10294_v0 = vpop.f32.mrb[100].mxu1  ;;  %v8172_v56 = vsel %vm956_vm0, %v16106_v19, %v8171_v55 }
 0x8ef   : > { %10931 = vst [vmem:[%s15572_s10 + $0x68] sm:$0xff] %v10859_v28  ;;  %v11492_v45 = vadd.f32 %v10294_v0, %v8751_v27  ;;  %v10296_v40 = vpop.f32.mrb[101].mxu1  ;;  %v8755_v27 = vld [vmem:[%s12686_s25 + $0xb1] sm:$0xff]  ;;  %v8183_v28 = vor.u32 %v8179_v10, %v7709_v14  ;;  %v8175_v0 = vor.u32 %v8171_v55, %v7701_v61 }
 0x8f0   : > { %v10297_v4 = vpop.f32.mrb[102].mxu1 }
 0x8f1   : > { %v10616_v25 = vadd.f32 %v11492_v45, %v16102_v36  ;;  %v11493_v11 = vadd.f32 %v10297_v4, %v8752_v51  ;;  %v10299_v33 = vpop.f32.mrb[103].mxu1  ;;  %v8193_v36 = vshll.u32 %v7904_v63, 16  ;;  %v8188_v14 = vsel %vm956_vm0, %v8183_v28, %v8179_v10 }
 0x8f2   : > { %v8180_v12 = vsel %vm956_vm0, %v8175_v0, %v8179_v10 }
 0x8f3   : > { %v10860_v5 = vmax.f32 %v10616_v25, 0.0  ;;  %v10619_v46 = vadd.f32 %v11493_v11, %v16103_v18  ;;  %10509 = vmatmul.mubr.bf16.gmra.mrb[208].mxu1 %v7715_v16  ;;  %v16108_v16 = vld [vmem:[#allocation28_spill] sm:$0xff]  ;;  %v8757_v18 = vld [vmem:[%s12686_s25 + $0xc1] sm:$0xff] }
 0x8f4   : > { %10516 = vmatprep.mubr.bf16.mxu1 %v12621_v30 }
 0x8f5   : > { %10932 = vst [vmem:[%s15572_s10 + $0x70] sm:$0xff] %v10860_v5  ;;  %v10861_v13 = vmax.f32 %v10619_v46, 0.0  ;;  %v8195_v46 = vrot.slane %v8193_v36, 1 }
 0x8f6   : > { %v10302_v6 = vpop.f32.mrb[104].mxu1 }
 0x8f7   : > { %10933 = vst [vmem:[%s15572_s10 + $0x78] sm:$0xff] %v10861_v13  ;;  %v11494_v35 = vadd.f32 %v10302_v6, %v8753_v47  ;;  %v10304_v9 = vpop.f32.mrb[105].mxu1  ;;  %v8758_v6 = vld [vmem:[%s12686_s25 + $0xc9] sm:$0xff]  ;;  %v8196_v55 = vsel %vm956_vm0, %v8183_v28, %v8195_v46  ;;  %v16111_v28 = vld [vmem:[#allocation30_spill] sm:$0xff]  ;;  %v16114_v46 = vld [vmem:[#allocation37_spill] sm:$0xff] }
 0x8f8   : > { %v10305_v48 = vpop.f32.mrb[106].mxu1 }
 0x8f9   : > { %v10624_v50 = vadd.f32 %v11494_v35, %v16104_v37  ;;  %v11495_v54 = vadd.f32 %v10305_v48, %v8754_v52  ;;  %v10307_v17 = vpop.f32.mrb[107].mxu1  ;;  %v16109_v48 = vld [vmem:[#allocation31_spill] sm:$0xff] }
 0x8fa   : > { %v16110_v17 = vld [vmem:[#allocation33_spill] sm:$0xff] }
 0x8fb   : > { %v10862_v30 = vmax.f32 %v10624_v50, 0.0  ;;  %v10627_v8 = vadd.f32 %v11495_v54, %v16105_v2  ;;  %10517 = vmatmul.mubr.bf16.gmra.mrb[212].mxu1 %v7723_v24  ;;  %v8759_v2 = vld [vmem:[%s12686_s25 + $0xd1] sm:$0xff] }
 0x8fc   : > { %11454 = vmatprep.mubr.bf16.mxu1 %v8172_v56  ;;  %v8760_v56 = vld [vmem:[%s12686_s25 + $0xd9] sm:$0xff] }
 0x8fd   : > { %10934 = vst [vmem:[%s15572_s10 + $0x80] sm:$0xff] %v10862_v30  ;;  %v10863_v62 = vmax.f32 %v10627_v8, 0.0 }
 0x8fe   : > { %v10310_v51 = vpop.f32.mrb[108].mxu1 }
 0x8ff   : > { %10935 = vst [vmem:[%s15572_s10 + $0x88] sm:$0xff] %v10863_v62  ;;  %v11496_v45 = vadd.f32 %v10310_v51, %v8755_v27  ;;  %v10312_v40 = vpop.f32.mrb[109].mxu1 }
 0x900   : > { %v10313_v4 = vpop.f32.mrb[110].mxu1 }
 0x901   : > { %v10632_v25 = vadd.f32 %v11496_v45, %v16107_v59  ;;  %v11497_v11 = vadd.f32 %v10313_v4, %v8756_v32  ;;  %v10315_v33 = vpop.f32.mrb[111].mxu1  ;;  %v16112_v45 = vld [vmem:[#allocation32_spill] sm:$0xff]  ;;  %v8761_v4 = vld [vmem:[%s12686_s25 + $0xe1] sm:$0xff] }
 0x903   : > { %v10864_v61 = vmax.f32 %v10632_v25, 0.0  ;;  %v10635_v5 = vadd.f32 %v11497_v11, %v16108_v16  ;;  %11455 = vmatmul.mubr.bf16.vlgmr.msra.gmra.mrb[216].mxu1 %v8180_v12  ;;  %v8762_v25 = vld [vmem:[%s12686_s25 + $0xe9] sm:$0xff] }
 0x904   : > { %11458 = vmatprep.mubr.bf16.mxu1 %v8188_v14  ;;  %v16113_v12 = vld [vmem:[#allocation35_spill] sm:$0xff] }
 0x905   : > { %10936 = vst [vmem:[%s15572_s10 + $0x90] sm:$0xff] %v10864_v61  ;;  %v10865_v47 = vmax.f32 %v10635_v5, 0.0 }
 0x906   : > { %v10318_v13 = vpop.f32.mrb[112].mxu1 }
 0x907   : > { %10937 = vst [vmem:[%s15572_s10 + $0x98] sm:$0xff] %v10865_v47  ;;  %v11498_v52 = vadd.f32 %v10318_v13, %v8757_v18  ;;  %v10320_v35 = vpop.f32.mrb[113].mxu1  ;;  %v8763_v13 = vld [vmem:[%s12686_s25 + $0xf1] sm:$0xff] }
 0x908   : > { %v10321_v9 = vpop.f32.mrb[114].mxu1  ;;  %v8764_v35 = vld [vmem:[%s12686_s25 + $0xf9] sm:$0xff] }
 0x909   : > { %v10640_v24 = vadd.f32 %v11498_v52, %v16109_v48  ;;  %v11499_v37 = vadd.f32 %v10321_v9, %v8758_v6  ;;  %v10323_v50 = vpop.f32.mrb[115].mxu1 }
 0x90b   : > { %v10866_v54 = vmax.f32 %v10640_v24, 0.0  ;;  %v10643_v30 = vadd.f32 %v11499_v37, %v16110_v17  ;;  %11459 = vmatmul.mubr.bf16.gmra.mrb[220].mxu1 %v8196_v55  ;;  %v16115_v24 = vld [vmem:[#allocation34_spill] sm:$0xff] }
 0x90d   : > { %10938 = vst [vmem:[%s15572_s10 + $0xa0] sm:$0xff] %v10866_v54  ;;  %v10867_v8 = vmax.f32 %v10643_v30, 0.0  ;;  %v16116_v30 = vld [vmem:[#allocation36_spill] sm:$0xff] }
 0x90e   : > { %v10326_v19 = vpop.f32.mrb[116].mxu1 }
 0x90f   : > { %10939 = vst [vmem:[%s15572_s10 + $0xa8] sm:$0xff] %v10867_v8  ;;  %v11500_v10 = vadd.f32 %v10326_v19, %v8759_v2  ;;  %v10328_v27 = vpop.f32.mrb[117].mxu1  ;;  %v8765_v8 = vld [vmem:[%s12686_s25 + $0x101] sm:$0xff] }
 0x910   : > { %v10329_v62 = vpop.f32.mrb[118].mxu1 }
 0x911   : > { %v10648_v63 = vadd.f32 %v11500_v10, %v16111_v28  ;;  %v11501_v0 = vadd.f32 %v10329_v62, %v8760_v56  ;;  %v10331_v51 = vpop.f32.mrb[119].mxu1  ;;  %v8766_v10 = vld [vmem:[%s12686_s25 + $0x109] sm:$0xff] }
 0x913   : > { %v10868_v32 = vmax.f32 %v10648_v63, 0.0  ;;  %v10651_v40 = vadd.f32 %v11501_v0, %v16112_v45  ;;  %v16117_v63 = vld [vmem:[#allocation39_spill] sm:$0xff] }
 0x915   : > { %10940 = vst [vmem:[%s15572_s10 + $0xb0] sm:$0xff] %v10868_v32  ;;  %v10869_v36 = vmax.f32 %v10651_v40, 0.0  ;;  %v16118_v40 = vld [vmem:[#allocation41_spill] sm:$0xff] }
 0x916   : > { %v10334_v59 = vpop.f32.mrb[120].mxu1 }
 0x917   : > { %10941 = vst [vmem:[%s15572_s10 + $0xb8] sm:$0xff] %v10869_v36  ;;  %v11502_v11 = vadd.f32 %v10334_v59, %v8761_v4  ;;  %v10336_v33 = vpop.f32.mrb[121].mxu1  ;;  %v8767_v36 = vld [vmem:[%s12686_s25 + $0x111] sm:$0xff] }
 0x918   : > { %v10337_v14 = vpop.f32.mrb[122].mxu1 }
 0x919   : > { %v10656_v61 = vadd.f32 %v11502_v11, %v16113_v12  ;;  %v11503_v16 = vadd.f32 %v10337_v14, %v8762_v25  ;;  %v10339_v5 = vpop.f32.mrb[123].mxu1  ;;  %v8768_v11 = vld [vmem:[%s12686_s25 + $0x119] sm:$0xff] }
 0x91b   : > { %v10870_v18 = vmax.f32 %v10656_v61, 0.0  ;;  %v10659_v47 = vadd.f32 %v11503_v16, %v16114_v46  ;;  %v16119_v61 = vld [vmem:[#allocation38_spill] sm:$0xff] }
 0x91d   : > { %10942 = vst [vmem:[%s15572_s10 + $0xc0] sm:$0xff] %v10870_v18  ;;  %v10871_v6 = vmax.f32 %v10659_v47, 0.0  ;;  %v16120_v47 = vld [vmem:[#allocation40_spill] sm:$0xff] }
 0x91e   : > { %v10342_v52 = vpop.f32.mrb[124].mxu1 }
 0x91f   : > { %10943 = vst [vmem:[%s15572_s10 + $0xc8] sm:$0xff] %v10871_v6  ;;  %v11504_v9 = vadd.f32 %v10342_v52, %v8763_v13  ;;  %v10344_v55 = vpop.f32.mrb[125].mxu1  ;;  %v8769_v6 = vld [vmem:[%s12686_s25 + $0x121] sm:$0xff] }
 0x920   : > { %v10345_v48 = vpop.f32.mrb[126].mxu1 }
 0x921   : > { %v10664_v37 = vadd.f32 %v11504_v9, %v16115_v24  ;;  %v11505_v50 = vadd.f32 %v10345_v48, %v8764_v35  ;;  %v10347_v54 = vpop.f32.mrb[127].mxu1  ;;  %v8770_v9 = vld [vmem:[%s12686_s25 + $0x129] sm:$0xff] }
 0x923   : > { %v10872_v17 = vmax.f32 %v10664_v37, 0.0  ;;  %v10667_v2 = vadd.f32 %v11505_v50, %v16116_v30  ;;  %v16121_v37 = vld [vmem:[#allocation43_spill] sm:$0xff] }
 0x925   : > { %10944 = vst [vmem:[%s15572_s10 + $0xd0] sm:$0xff] %v10872_v17  ;;  %v10873_v19 = vmax.f32 %v10667_v2, 0.0  ;;  %v16122_v2 = vld [vmem:[#allocation45_spill] sm:$0xff] }
 0x926   : > { %v10350_v56 = vpop.f32.mrb[128].mxu1 }
 0x927   : > { %10945 = vst [vmem:[%s15572_s10 + $0xd8] sm:$0xff] %v10873_v19  ;;  %v11506_v27 = vadd.f32 %v10350_v56, %v8765_v8  ;;  %v10352_v62 = vpop.f32.mrb[129].mxu1  ;;  %v8771_v19 = vld [vmem:[%s12686_s25 + $0x131] sm:$0xff] }
 0x928   : > { %v10353_v28 = vpop.f32.mrb[130].mxu1 }
 0x929   : > { %v10672_v0 = vadd.f32 %v11506_v27, %v16117_v63  ;;  %v11507_v51 = vadd.f32 %v10353_v28, %v8766_v10  ;;  %v10355_v32 = vpop.f32.mrb[131].mxu1  ;;  %v8772_v27 = vld [vmem:[%s12686_s25 + $0x139] sm:$0xff] }
 0x92b   : > { %v10874_v45 = vmax.f32 %v10672_v0, 0.0  ;;  %v10675_v4 = vadd.f32 %v11507_v51, %v16118_v40  ;;  %v16123_v0 = vld [vmem:[#allocation42_spill] sm:$0xff] }
 0x92d   : > { %10946 = vst [vmem:[%s15572_s10 + $0xe0] sm:$0xff] %v10874_v45  ;;  %v10875_v59 = vmax.f32 %v10675_v4, 0.0  ;;  %v16124_v4 = vld [vmem:[#allocation44_spill] sm:$0xff] }
 0x92e   : > { %v10358_v25 = vpop.f32.mrb[132].mxu1 }
 0x92f   : > { %10947 = vst [vmem:[%s15572_s10 + $0xe8] sm:$0xff] %v10875_v59  ;;  %v11508_v33 = vadd.f32 %v10358_v25, %v8767_v36  ;;  %v10360_v14 = vpop.f32.mrb[133].mxu1  ;;  %v8773_v59 = vld [vmem:[%s12686_s25 + $0x141] sm:$0xff] }
 0x930   : > { %v10361_v12 = vpop.f32.mrb[134].mxu1 }
 0x931   : > { %v10680_v16 = vadd.f32 %v11508_v33, %v16119_v61  ;;  %v11509_v5 = vadd.f32 %v10361_v12, %v8768_v11  ;;  %v10363_v18 = vpop.f32.mrb[135].mxu1  ;;  %v8774_v33 = vld [vmem:[%s12686_s25 + $0x149] sm:$0xff] }
 0x933   : > { %v10876_v46 = vmax.f32 %v10680_v16, 0.0  ;;  %v10683_v13 = vadd.f32 %v11509_v5, %v16120_v47 }
 0x935   : > { %10948 = vst [vmem:[%s15572_s10 + $0xf0] sm:$0xff] %v10876_v46  ;;  %v10877_v52 = vmax.f32 %v10683_v13, 0.0  ;;  %v8775_v13 = vld [vmem:[%s12686_s25 + $0x151] sm:$0xff] }
 0x936   : > { %v10366_v35 = vpop.f32.mrb[136].mxu1 }
 0x937   : > { %10949 = vst [vmem:[%s15572_s10 + $0xf8] sm:$0xff] %v10877_v52  ;;  %v11510_v55 = vadd.f32 %v10366_v35, %v8769_v6  ;;  %v10368_v48 = vpop.f32.mrb[137].mxu1  ;;  %v8776_v35 = vld [vmem:[%s12686_s25 + $0x159] sm:$0xff] }
 0x938   : > { %v10369_v24 = vpop.f32.mrb[138].mxu1 }
 0x939   : > { %v10688_v50 = vadd.f32 %v11510_v55, %v16121_v37  ;;  %v11511_v54 = vadd.f32 %v10369_v24, %v8770_v9  ;;  %v10371_v17 = vpop.f32.mrb[139].mxu1  ;;  %v16125_v24 = vld [vmem:[#allocation46_spill] sm:$0xff] }
 0x93a   : > { %v16126_v17 = vld [vmem:[#allocation47_spill] sm:$0xff] }
 0x93b   : > { %v10878_v30 = vmax.f32 %v10688_v50, 0.0  ;;  %v10691_v8 = vadd.f32 %v11511_v54, %v16122_v2 }
 0x93d   : > { %10950 = vst [vmem:[%s15572_s10 + $0x100] sm:$0xff] %v10878_v30  ;;  %v10879_v56 = vmax.f32 %v10691_v8, 0.0  ;;  %v8777_v30 = vld [vmem:[%s12686_s25 + $0x161] sm:$0xff] }
 0x93e   : > { %v10374_v10 = vpop.f32.mrb[140].mxu1 }
 0x93f   : > { %10951 = vst [vmem:[%s15572_s10 + $0x108] sm:$0xff] %v10879_v56  ;;  %v11512_v62 = vadd.f32 %v10374_v10, %v8771_v19  ;;  %v10376_v28 = vpop.f32.mrb[141].mxu1  ;;  %v8778_v19 = vld [vmem:[%s12686_s25 + $0x169] sm:$0xff] }
 0x940   : > { %v10377_v63 = vpop.f32.mrb[142].mxu1 }
 0x941   : > { %v10696_v51 = vadd.f32 %v11512_v62, %v16123_v0  ;;  %v11513_v32 = vadd.f32 %v10377_v63, %v8772_v27  ;;  %v10379_v45 = vpop.f32.mrb[143].mxu1 }
 0x943   : > { %v10880_v40 = vmax.f32 %v10696_v51, 0.0  ;;  %v10699_v36 = vadd.f32 %v11513_v32, %v16124_v4  ;;  %v8779_v32 = vld [vmem:[%s12686_s25 + $0x171] sm:$0xff]  ;;  %v8780_v4 = vld [vmem:[%s12686_s25 + $0x179] sm:$0xff] }
 0x945   : > { %10952 = vst [vmem:[%s15572_s10 + $0x110] sm:$0xff] %v10880_v40  ;;  %v10881_v25 = vmax.f32 %v10699_v36, 0.0 }
 0x946   : > { %v10382_v11 = vpop.f32.mrb[144].mxu1 }
 0x947   : > { %10953 = vst [vmem:[%s15572_s10 + $0x118] sm:$0xff] %v10881_v25  ;;  %v11514_v14 = vadd.f32 %v10382_v11, %v8773_v59  ;;  %v10384_v12 = vpop.f32.mrb[145].mxu1 }
 0x948   : > { %v10385_v61 = vpop.f32.mrb[146].mxu1  ;;  %v8781_v12 = vld [vmem:[%s12686_s25 + $0x181] sm:$0xff] }
 0x949   : > { %v10704_v16 = vadd.f32 %v11514_v14, %v14998_v43  ;;  %v11515_v5 = vadd.f32 %v10385_v61, %v8774_v33  ;;  %v10387_v18 = vpop.f32.mrb[147].mxu1 }
 0x94b   : > { %v10882_v46 = vmax.f32 %v10704_v16, 0.0  ;;  %v10707_v47 = vadd.f32 %v11515_v5, %v15002_v22  ;;  %v8782_v5 = vld [vmem:[%s12686_s25 + $0x189] sm:$0xff] }
 0x94d   : > { %10954 = vst [vmem:[%s15572_s10 + $0x120] sm:$0xff] %v10882_v46  ;;  %v10883_v6 = vmax.f32 %v10707_v47, 0.0 }
 0x94e   : > { %v10390_v52 = vpop.f32.mrb[148].mxu1 }
 0x94f   : > { %10955 = vst [vmem:[%s15572_s10 + $0x128] sm:$0xff] %v10883_v6  ;;  %v11516_v9 = vadd.f32 %v10390_v52, %v8775_v13  ;;  %v10392_v55 = vpop.f32.mrb[149].mxu1 }
 0x950   : > { %v10393_v48 = vpop.f32.mrb[150].mxu1 }
 0x951   : > { %v10712_v43 = vadd.f32 %v11516_v9, %v16125_v24  ;;  %v11517_v37 = vadd.f32 %v10393_v48, %v8776_v35  ;;  %v10395_v50 = vpop.f32.mrb[151].mxu1  ;;  %v8783_v35 = vld [vmem:[%s12686_s25 + $0x191] sm:$0xff]  ;;  %v8784_v48 = vld [vmem:[%s12686_s25 + $0x199] sm:$0xff] }
 0x953   : > { %v10884_v54 = vmax.f32 %v10712_v43, 0.0  ;;  %v10715_v22 = vadd.f32 %v11517_v37, %v16126_v17 }
 0x955   : > { %10956 = vst [vmem:[%s15572_s10 + $0x130] sm:$0xff] %v10884_v54  ;;  %v10885_v2 = vmax.f32 %v10715_v22, 0.0  ;;  %v8785_v22 = vld [vmem:[%s12686_s25 + $0x1a1] sm:$0xff] }
 0x956   : > { %v10398_v8 = vpop.f32.mrb[152].mxu1 }
 0x957   : > { %10957 = vst [vmem:[%s15572_s10 + $0x138] sm:$0xff] %v10885_v2  ;;  %v11518_v56 = vadd.f32 %v10398_v8, %v8777_v30  ;;  %v10400_v10 = vpop.f32.mrb[153].mxu1  ;;  %v8786_v8 = vld [vmem:[%s12686_s25 + $0x1a9] sm:$0xff] }
 0x958   : > { %v10401_v27 = vpop.f32.mrb[154].mxu1 }
 0x959   : > { %v10720_v62 = vadd.f32 %v11518_v56, %v15016_v1  ;;  %v11519_v28 = vadd.f32 %v10401_v27, %v8778_v19  ;;  %v10403_v63 = vpop.f32.mrb[155].mxu1 }
 0x95a   : > { %v8787_v63 = vld [vmem:[%s12686_s25 + $0x1b1] sm:$0xff] }
 0x95b   : > { %v10886_v0 = vmax.f32 %v10720_v62, 0.0  ;;  %v10723_v51 = vadd.f32 %v11519_v28, %v15020_v42 }
 0x95d   : > { %10958 = vst [vmem:[%s15572_s10 + $0x140] sm:$0xff] %v10886_v0  ;;  %v10887_v45 = vmax.f32 %v10723_v51, 0.0 }
 0x95e   : > { %v10406_v40 = vpop.f32.mrb[156].mxu1 }
 0x95f   : > { %10959 = vst [vmem:[%s15572_s10 + $0x148] sm:$0xff] %v10887_v45  ;;  %v11520_v36 = vadd.f32 %v10406_v40, %v8779_v32  ;;  %v10408_v59 = vpop.f32.mrb[157].mxu1  ;;  %v8788_v32 = vld [vmem:[%s12686_s25 + $0x1b9] sm:$0xff] }
 0x960   : > { %v10409_v25 = vpop.f32.mrb[158].mxu1 }
 0x961   : > { %v10728_v1 = vadd.f32 %v11520_v36, %v15014_v21  ;;  %v11521_v11 = vadd.f32 %v10409_v25, %v8780_v4  ;;  %v10411_v33 = vpop.f32.mrb[159].mxu1 }
 0x963   : > { %v10888_v14 = vmax.f32 %v10728_v1, 0.0  ;;  %v10731_v42 = vadd.f32 %v11521_v11, %v15018_v53  ;;  %v8789_v1 = vld [vmem:[%s12686_s25 + $0x1c1] sm:$0xff] }
 0x965   : > { %10960 = vst [vmem:[%s15572_s10 + $0x150] sm:$0xff] %v10888_v14  ;;  %v10889_v61 = vmax.f32 %v10731_v42, 0.0  ;;  %v8790_v14 = vld [vmem:[%s12686_s25 + $0x1c9] sm:$0xff] }
 0x966   : > { %v10414_v16 = vpop.f32.mrb[160].mxu1 }
 0x967   : > { %10961 = vst [vmem:[%s15572_s10 + $0x158] sm:$0xff] %v10889_v61  ;;  %v11522_v18 = vadd.f32 %v10414_v16, %v8781_v12  ;;  %v10416_v46 = vpop.f32.mrb[161].mxu1 }
 0x968   : > { %v10417_v47 = vpop.f32.mrb[162].mxu1  ;;  %v8791_v46 = vld [vmem:[%s12686_s25 + $0x1d1] sm:$0xff] }
 0x969   : > { %v10736_v21 = vadd.f32 %v11522_v18, %v15041_v57  ;;  %v11523_v13 = vadd.f32 %v10417_v47, %v8782_v5  ;;  %v10419_v6 = vpop.f32.mrb[163].mxu1 }
 0x96b   : > { %v10890_v52 = vmax.f32 %v10736_v21, 0.0  ;;  %v10739_v53 = vadd.f32 %v11523_v13, %v15045_v58  ;;  %v8792_v13 = vld [vmem:[%s12686_s25 + $0x1d9] sm:$0xff] }
 0x96d   : > { %10962 = vst [vmem:[%s15572_s10 + $0x160] sm:$0xff] %v10890_v52  ;;  %v10891_v9 = vmax.f32 %v10739_v53, 0.0 }
 0x96e   : > { %v10422_v55 = vpop.f32.mrb[164].mxu1 }
 0x96f   : > { %10963 = vst [vmem:[%s15572_s10 + $0x168] sm:$0xff] %v10891_v9  ;;  %v11524_v24 = vadd.f32 %v10422_v55, %v8783_v35  ;;  %v10424_v43 = vpop.f32.mrb[165].mxu1 }
 0x970   : > { %v10425_v37 = vpop.f32.mrb[166].mxu1 }
 0x971   : > { %v10744_v57 = vadd.f32 %v11524_v24, %v15039_v3  ;;  %v11525_v50 = vadd.f32 %v10425_v37, %v8784_v48  ;;  %v10427_v54 = vpop.f32.mrb[167].mxu1  ;;  %v8793_v48 = vld [vmem:[%s12686_s25 + $0x1e1] sm:$0xff]  ;;  %v8794_v37 = vld [vmem:[%s12686_s25 + $0x1e9] sm:$0xff] }
 0x973   : > { %v10892_v17 = vmax.f32 %v10744_v57, 0.0  ;;  %v10747_v58 = vadd.f32 %v11525_v50, %v15043_v60 }
 0x975   : > { %10964 = vst [vmem:[%s15572_s10 + $0x170] sm:$0xff] %v10892_v17  ;;  %v10893_v30 = vmax.f32 %v10747_v58, 0.0 }
 0x976   : > { %v10430_v2 = vpop.f32.mrb[168].mxu1 }
 0x977   : > { %10965 = vst [vmem:[%s15572_s10 + $0x178] sm:$0xff] %v10893_v30  ;;  %v11526_v19 = vadd.f32 %v10430_v2, %v8785_v22  ;;  %v10432_v56 = vpop.f32.mrb[169].mxu1  ;;  %v8795_v30 = vld [vmem:[%s12686_s25 + $0x1f1] sm:$0xff] }
 0x978   : > { %v10433_v10 = vpop.f32.mrb[170].mxu1 }
 0x979   : > { %v10752_v3 = vadd.f32 %v11526_v19, %v15065_v29  ;;  %v11527_v27 = vadd.f32 %v10433_v10, %v8786_v8  ;;  %v10435_v62 = vpop.f32.mrb[171].mxu1  ;;  %v8796_v19 = vld [vmem:[%s12686_s25 + $0x1f9] sm:$0xff] }
 0x97b   : > { %v10894_v28 = vmax.f32 %v10752_v3, 0.0  ;;  %v10755_v60 = vadd.f32 %v11527_v27, %v15069_v23 }
 0x97d   : > { %10966 = vst [vmem:[%s15572_s10 + $0x180] sm:$0xff] %v10894_v28  ;;  %v10895_v0 = vmax.f32 %v10755_v60, 0.0  ;;  %v8797_v60 = vld [vmem:[%s12686_s25 + $0x201] sm:$0xff] }
 0x97e   : > { %v10438_v51 = vpop.f32.mrb[172].mxu1 }
 0x97f   : > { %10967 = vst [vmem:[%s15572_s10 + $0x188] sm:$0xff] %v10895_v0  ;;  %v11528_v45 = vadd.f32 %v10438_v51, %v8787_v63  ;;  %v10440_v40 = vpop.f32.mrb[173].mxu1  ;;  %v8798_v51 = vld [vmem:[%s12686_s25 + $0x209] sm:$0xff] }
 0x980   : > { %v10441_v4 = vpop.f32.mrb[174].mxu1 }
 0x981   : > { %v10760_v29 = vadd.f32 %v11528_v45, %v15063_v34  ;;  %v11529_v36 = vadd.f32 %v10441_v4, %v8788_v32  ;;  %v10443_v59 = vpop.f32.mrb[175].mxu1 }
 0x982   : > { %v16127_v59 = vld [vmem:[#allocation50_spill] sm:$0xff] }
 0x983   : > { %v10896_v25 = vmax.f32 %v10760_v29, 0.0  ;;  %v10763_v23 = vadd.f32 %v11529_v36, %v15067_v26 }
 0x985   : > { %10968 = vst [vmem:[%s15572_s10 + $0x190] sm:$0xff] %v10896_v25  ;;  %v10897_v11 = vmax.f32 %v10763_v23, 0.0  ;;  %v8799_v25 = vld [vmem:[%s12686_s25 + $0x211] sm:$0xff] }
 0x986   : > { %v10446_v33 = vpop.f32.mrb[176].mxu1 }
 0x987   : > { %10969 = vst [vmem:[%s15572_s10 + $0x198] sm:$0xff] %v10897_v11  ;;  %v11530_v42 = vadd.f32 %v10446_v33, %v8789_v1  ;;  %v10448_v12 = vpop.f32.mrb[177].mxu1  ;;  %v8800_v11 = vld [vmem:[%s12686_s25 + $0x219] sm:$0xff] }
 0x988   : > { %v10449_v61 = vpop.f32.mrb[178].mxu1  ;;  %v16128_v12 = vld [vmem:[#allocation48_spill] sm:$0xff] }
 0x989   : > { %v10768_v34 = vadd.f32 %v11530_v42, %v15085_v7  ;;  %v11531_v16 = vadd.f32 %v10449_v61, %v8790_v14  ;;  %v10451_v5 = vpop.f32.mrb[179].mxu1 }
 0x98a   : > { %v16129_v5 = vld [vmem:[#allocation49_spill] sm:$0xff] }
 0x98b   : > { %v10898_v18 = vmax.f32 %v10768_v34, 0.0  ;;  %v10771_v26 = vadd.f32 %v11531_v16, %v15089_v49 }
 0x98d   : > { %10970 = vst [vmem:[%s15572_s10 + $0x1a0] sm:$0xff] %v10898_v18  ;;  %v10899_v47 = vmax.f32 %v10771_v26, 0.0 }
 0x98e   : > { %v10454_v21 = vpop.f32.mrb[180].mxu1 }
 0x98f   : > { %10971 = vst [vmem:[%s15572_s10 + $0x1a8] sm:$0xff] %v10899_v47  ;;  %v11532_v6 = vadd.f32 %v10454_v21, %v8791_v46  ;;  %v10456_v52 = vpop.f32.mrb[181].mxu1 }
 0x990   : > { %v10457_v53 = vpop.f32.mrb[182].mxu1 }
 0x991   : > { %v10776_v7 = vadd.f32 %v11532_v6, %v15083_v20  ;;  %v11533_v35 = vadd.f32 %v10457_v53, %v8792_v13  ;;  %v10459_v9 = vpop.f32.mrb[183].mxu1 }
 0x993   : > { %v10900_v55 = vmax.f32 %v10776_v7, 0.0  ;;  %v10779_v49 = vadd.f32 %v11533_v35, %v15087_v41 }
 0x995   : > { %10972 = vst [vmem:[%s15572_s10 + $0x1b0] sm:$0xff] %v10900_v55  ;;  %v10901_v24 = vmax.f32 %v10779_v49, 0.0 }
 0x996   : > { %v10462_v43 = vpop.f32.mrb[184].mxu1 }
 0x997   : > { %10973 = vst [vmem:[%s15572_s10 + $0x1b8] sm:$0xff] %v10901_v24  ;;  %v11534_v57 = vadd.f32 %v10462_v43, %v8793_v48  ;;  %v10464_v50 = vpop.f32.mrb[185].mxu1 }
 0x998   : > { %v10465_v54 = vpop.f32.mrb[186].mxu1  ;;  %v8801_v50 = vld [vmem:[%s12686_s25 + $0x221] sm:$0xff] }
 0x999   : > { %v10784_v20 = vadd.f32 %v11534_v57, %v15105_v39  ;;  %v11535_v17 = vadd.f32 %v10465_v54, %v8794_v37  ;;  %v10467_v58 = vpop.f32.mrb[187].mxu1  ;;  %v8803_v57 = vld [vmem:[%s12686_s25 + $0x231] sm:$0xff]  ;;  %v8804_v54 = vld [vmem:[%s12686_s25 + $0x239] sm:$0xff] }
 0x99b   : > { %v10902_v22 = vmax.f32 %v10784_v20, 0.0  ;;  %v10787_v41 = vadd.f32 %v11535_v17, %v15109_v15  ;;  %v8802_v20 = vld [vmem:[%s12686_s25 + $0x229] sm:$0xff] }
 0x99d   : > { %10974 = vst [vmem:[%s15572_s10 + $0x1c0] sm:$0xff] %v10902_v22  ;;  %v10903_v2 = vmax.f32 %v10787_v41, 0.0 }
 0x99e   : > { %v10470_v8 = vpop.f32.mrb[188].mxu1 }
 0x99f   : > { %10975 = vst [vmem:[%s15572_s10 + $0x1c8] sm:$0xff] %v10903_v2  ;;  %v11536_v56 = vadd.f32 %v10470_v8, %v8795_v30  ;;  %v10472_v10 = vpop.f32.mrb[189].mxu1 }
 0x9a0   : > { %v10473_v3 = vpop.f32.mrb[190].mxu1 }
 0x9a1   : > { %v10792_v39 = vadd.f32 %v11536_v56, %v15103_v31  ;;  %v11537_v27 = vadd.f32 %v10473_v3, %v8796_v19  ;;  %v10475_v62 = vpop.f32.mrb[191].mxu1 }
 0x9a3   : > { %v10904_v28 = vmax.f32 %v10792_v39, 0.0  ;;  %v10795_v15 = vadd.f32 %v11537_v27, %v15107_v38  ;;  %v8807_v27 = vld [vmem:[%s12686_s25 + $0x251] sm:$0xff] }
 0x9a5   : > { %10976 = vst [vmem:[%s15572_s10 + $0x1d0] sm:$0xff] %v10904_v28  ;;  %v10905_v63 = vmax.f32 %v10795_v15, 0.0  ;;  %v8805_v15 = vld [vmem:[%s12686_s25 + $0x241] sm:$0xff] }
 0x9a6   : > { %v10478_v0 = vpop.f32.mrb[192].mxu1 }
 0x9a7   : > { %10977 = vst [vmem:[%s15572_s10 + $0x1d8] sm:$0xff] %v10905_v63  ;;  %v11538_v32 = vadd.f32 %v10478_v0, %v8797_v60  ;;  %v10480_v45 = vpop.f32.mrb[193].mxu1  ;;  %v8808_v63 = vld [vmem:[%s12686_s25 + $0x259] sm:$0xff] }
 0x9a8   : > { %v10481_v40 = vpop.f32.mrb[194].mxu1 }
 0x9a9   : > { %v10800_v31 = vadd.f32 %v11538_v32, %v15125_v44  ;;  %v11539_v4 = vadd.f32 %v10481_v40, %v8798_v51  ;;  %v10483_v29 = vpop.f32.mrb[195].mxu1  ;;  %v8806_v51 = vld [vmem:[%s12686_s25 + $0x249] sm:$0xff] }
 0x9ab   : > { %v10906_v36 = vmax.f32 %v10800_v31, 0.0  ;;  %v10803_v38 = vadd.f32 %v11539_v4, %v16127_v59 }
 0x9ad   : > { %10978 = vst [vmem:[%s15572_s10 + $0x1e0] sm:$0xff] %v10906_v36  ;;  %v10907_v23 = vmax.f32 %v10803_v38, 0.0 }
 0x9ae   : > { %v10486_v1 = vpop.f32.mrb[196].mxu1 }
 0x9af   : > { %10979 = vst [vmem:[%s15572_s10 + $0x1e8] sm:$0xff] %v10907_v23  ;;  %v11540_v33 = vadd.f32 %v10486_v1, %v8799_v25  ;;  %v10488_v14 = vpop.f32.mrb[197].mxu1 }
 0x9b0   : > { %v10489_v42 = vpop.f32.mrb[198].mxu1 }
 0x9b1   : > { %v10808_v61 = vadd.f32 %v11540_v33, %v16128_v12  ;;  %v11541_v34 = vadd.f32 %v10489_v42, %v8800_v11  ;;  %v10491_v44 = vpop.f32.mrb[199].mxu1 }
 0x9b3   : > { %v10908_v16 = vmax.f32 %v10808_v61, 0.0  ;;  %v10811_v18 = vadd.f32 %v11541_v34, %v16129_v5 }
 0x9b5   : > { %10980 = vst [vmem:[%s15572_s10 + $0x1f0] sm:$0xff] %v10908_v16  ;;  %v10909_v26 = vmax.f32 %v10811_v18, 0.0 }
 0x9b6   : > { %v10494_v46 = vpop.f32.mrb[200].mxu1 }
 0x9b7   : > { %10981 = vst [vmem:[%s15572_s10 + $0x1f8] sm:$0xff] %v10909_v26  ;;  %v10496_v47 = vpop.f32.mrb[201].mxu1  ;;  %v11542_v58 = vadd.f32 %v10494_v46, %v8801_v50 }
 0x9b8   : > { %v10497_v21 = vpop.f32.mrb[202].mxu1 }
 0x9b9   : > { %v10499_v13 = vpop.f32.mrb[203].mxu1  ;;  %v11543_v8 = vadd.f32 %v10497_v21, %v8802_v20 }
 0x9be   : > { %v10502_v6 = vpop.f32.mrb[204].mxu1 }
 0x9bf   : > { %v10504_v52 = vpop.f32.mrb[205].mxu1  ;;  %v11544_v17 = vadd.f32 %v10502_v6, %v8803_v57 }
 0x9c0   : > { %v10505_v53 = vpop.f32.mrb[206].mxu1 }
 0x9c1   : > { %v10507_v7 = vpop.f32.mrb[207].mxu1  ;;  %v11545_v41 = vadd.f32 %v10505_v53, %v8804_v54 }
 0x9c6   : > { %v10510_v35 = vpop.f32.mrb[208].mxu1 }
 0x9c7   : > { %v10512_v9 = vpop.f32.mrb[209].mxu1  ;;  %v11546_v45 = vadd.f32 %v10510_v35, %v8805_v15 }
 0x9c8   : > { %v10513_v55 = vpop.f32.mrb[210].mxu1 }
 0x9c9   : > { %v10515_v49 = vpop.f32.mrb[211].mxu1  ;;  %v11547_v36 = vadd.f32 %v10513_v55, %v8806_v51 }
 0x9ce   : > { %v10518_v48 = vpop.f32.mrb[212].mxu1 }
 0x9cf   : > { %v10520_v24 = vpop.f32.mrb[213].mxu1  ;;  %v11548_v32 = vadd.f32 %v10518_v48, %v8807_v27 }
 0x9d0   : > { %v10521_v43 = vpop.f32.mrb[214].mxu1 }
 0x9d1   : > { %v10523_v37 = vpop.f32.mrb[215].mxu1  ;;  %v11549_v31 = vadd.f32 %v10521_v43, %v8808_v63 }
 0x9d6   : > { %v11456_v22 = vpop.f32.mrb[216].mxu1 }
 0x9d7   : > { %v10824_v30 = vadd.f32 %v11544_v17, %v11456_v22  ;;  %v10815_v2 = vpop.f32.mrb[217].mxu1 }
 0x9d8   : > { %v10816_v19 = vadd.f32 %v11542_v58, %v10815_v2  ;;  %v11457_v56 = vpop.f32.mrb[218].mxu1 }
 0x9d9   : > { %v10912_v10 = vmax.f32 %v10824_v30, 0.0  ;;  %v10827_v3 = vadd.f32 %v11545_v41, %v11457_v56  ;;  %v10818_v39 = vpop.f32.mrb[219].mxu1 }
 0x9da   : > { %v10910_v62 = vmax.f32 %v10816_v19, 0.0  ;;  %v10819_v28 = vadd.f32 %v11543_v8, %v10818_v39 }
 0x9db   : > { %10984 = vst [vmem:[%s15572_s10 + $0x210] sm:$0xff] %v10912_v10  ;;  %v10913_v60 = vmax.f32 %v10827_v3, 0.0 }
 0x9dc   : > { %10982 = vst [vmem:[%s15572_s10 + $0x200] sm:$0xff] %v10910_v62  ;;  %v10911_v0 = vmax.f32 %v10819_v28, 0.0 }
 0x9dd   : > { %10985 = vst [vmem:[%s15572_s10 + $0x218] sm:$0xff] %v10913_v60 }
 0x9de   : > { %10983 = vst [vmem:[%s15572_s10 + $0x208] sm:$0xff] %v10911_v0  ;;  %v11460_v40 = vpop.f32.mrb[220].mxu1 }
 0x9df   : > { %v10840_v4 = vadd.f32 %v11548_v32, %v11460_v40  ;;  %v10831_v29 = vpop.f32.mrb[221].mxu1 }
 0x9e0   : > { %v10832_v59 = vadd.f32 %v11546_v45, %v10831_v29  ;;  %v11461_v38 = vpop.f32.mrb[222].mxu1 }
 0x9e1   : > { %v10916_v25 = vmax.f32 %v10840_v4, 0.0  ;;  %v10843_v23 = vadd.f32 %v11549_v31, %v11461_v38  ;;  %v10834_v1 = vpop.f32.mrb[223].mxu1 }
 0x9e2   : > { %v10914_v11 = vmax.f32 %v10832_v59, 0.0  ;;  %v10835_v33 = vadd.f32 %v11547_v36, %v10834_v1 }
 0x9e3   : > { %10988 = vst [vmem:[%s15572_s10 + $0x230] sm:$0xff] %v10916_v25  ;;  %v10917_v14 = vmax.f32 %v10843_v23, 0.0 }
 0x9e4   : > { %10986 = vst [vmem:[%s15572_s10 + $0x220] sm:$0xff] %v10914_v11  ;;  %v10915_v42 = vmax.f32 %v10835_v33, 0.0 }
 0x9e5   : > { %10989 = vst [vmem:[%s15572_s10 + $0x238] sm:$0xff] %v10917_v14 }
 0x9e6   : > { %10987 = vst [vmem:[%s15572_s10 + $0x228] sm:$0xff] %v10915_v42 }
 0x9e7 PF: > { %s13_s12 = sadd.s32 1, %s12628_s12  }
 0x9e8   : > { %p10_p4 = scmp.ge.s32.totalorder %s13_s12, 4  }
 0x9ea   :  { %12 = sbr.rel (!%p10_p4) target bundleno = 1 (0x1), region = 62 }

</bundles_post_ra>
